<compile_context>
chip_gen: v7x
topology: tpu7x:2x2x1
jax: 0.10.0
libtpu: 0.0.40
codegen_flags: <defaults>
</compile_context>

<pallas_src>
import functools

import jax
import jax.numpy as jnp
from jax import lax
from jax.experimental import pallas as pl
from jax.experimental.pallas import tpu as pltpu


# ----------------------------------------------------------------------------
# Fused kernel
# ----------------------------------------------------------------------------
def _make_kernel(C, B_t):
    """C = input channels, B_t = batch tile (lanes of every activation are
    (spatial-block, batch-in-tile), so all patch slices are contiguous)."""

    def kernel(x_ref, w1_ref, b1_ref, w2_ref, b2_ref, w3_ref, b3_ref,
               wfc_ref, bfc_ref, wh_ref, bh_ref, o_ref, out1_s, out2_s):
        # x_ref block: (1, 84, 8*C, 11*B_t) with
        #   x_ref[0, h, rx*C + c, wb*B_t + b] = x[b, c, h, 8*wb + rx]   (W padded 84->88)
        #
        # ---- conv1: 8x8 stride 4 + ReLU ------------------------------------
        # Output is produced already phase-split along W (phase rx2 = ox1 % 2)
        # so conv2's stride-2 patches become contiguous slices:
        #   out1_s[rx2, oy1, c, oxb*B_t + b] = relu(conv1)[b, c, oy1, 2*oxb + rx2]
        for rx2 in range(2):
            def c1_body(oy1, carry, rx2=rx2):
                pieces = []
                for ki in range(8):
                    h = 4 * oy1 + ki
                    if rx2 == 0:
                        # kj = 0..7  ->  W-phase r'x = kj, W-block offset 0
                        pieces.append(x_ref[0, h, :, 0:10 * B_t])
                    else:
                        # kj = 0..3  ->  r'x = kj + 4, W-block offset 0
                        pieces.append(x_ref[0, h, 4 * C:8 * C, 0:10 * B_t])
                        # kj = 4..7  ->  r'x = kj - 4, W-block offset 1
                        pieces.append(x_ref[0, h, 0:4 * C, B_t:11 * B_t])
                patch = jnp.concatenate(pieces, axis=0)         # (64*C, 10*B_t)
                acc = jnp.dot(w1_ref[...], patch,
                              preferred_element_type=jnp.float32)
                acc = jnp.maximum(acc + b1_ref[...], 0.0)
                out1_s[rx2, oy1, :, :] = acc.astype(out1_s.dtype)
                return carry
            lax.fori_loop(0, 20, c1_body, 0)

        # ---- conv2: 4x4 stride 2 + ReLU ------------------------------------
        def c2_body(oy2, carry):
            pieces = []
            for i2 in range(4):
                r = 2 * oy2 + i2
                for j2 in range(4):
                    rj, pj = j2 % 2, j2 // 2
                    pieces.append(out1_s[rj, r, :, pj * B_t:(pj + 9) * B_t])
            patch = jnp.concatenate(pieces, axis=0)             # (512, 9*B_t)
            acc = jnp.dot(w2_ref[...], patch,
                          preferred_element_type=jnp.float32)
            acc = jnp.maximum(acc + b2_ref[...], 0.0)
            out2_s[oy2, :, :] = acc.astype(out2_s.dtype)
            return carry
        lax.fori_loop(0, 9, c2_body, 0)

        # ---- conv3: 3x3 stride 1 + ReLU (unrolled, rows kept as values) ----
        rows3 = []
        for oy3 in range(7):
            pieces = []
            for i3 in range(3):
                for j3 in range(3):
                    pieces.append(out2_s[oy3 + i3, :, j3 * B_t:(j3 + 7) * B_t])
            patch = jnp.concatenate(pieces, axis=0)             # (576, 7*B_t)
            acc = jnp.dot(w3_ref[...], patch,
                          preferred_element_type=jnp.float32)
            acc = jnp.maximum(acc + b3_ref[...], 0.0)
            rows3.append(acc.astype(jnp.bfloat16))              # (64, 7*B_t)

        # ---- flatten + fc + LeakyReLU + head (all in VMEM) ------------------
        # X rows are ordered (oy3, ox3, c3); Wfc columns were permuted to match
        # torch's x.view(B, -1) = (c, h, w) order in prepare_params.
        xcols = []
        for oy3 in range(7):
            for ox3 in range(7):
                xcols.append(rows3[oy3][:, ox3 * B_t:(ox3 + 1) * B_t])
        xcol = jnp.concatenate(xcols, axis=0)                   # (3136, B_t)

        hT = jnp.dot(wfc_ref[...], xcol, preferred_element_type=jnp.float32)
        hT = hT + bfc_ref[...]
        hT = jnp.where(hT >= 0.0, hT, 0.01 * hT)                # LeakyReLU(0.01)
        qT = jnp.dot(wh_ref[...], hT.astype(jnp.bfloat16),
                     preferred_element_type=jnp.float32)
        qT = qT + bh_ref[...]
        o_ref[0] = qT                                           # (A_pad, B_t) f32

    return kernel


# ----------------------------------------------------------------------------
# Forward pass wrapper
# ----------------------------------------------------------------------------
def dqn_forward(params, x, num_actions):
    """x: (B, C, 84, 84) f32 NCHW (84x84 is required by the 3136-wide fc)."""
    B, C, H, W = x.shape
    if (H, W) != (84, 84):
        raise ValueError("DQN expects 84x84 inputs (fc layer is 3136 wide).")
    A_pad = params["wh"].shape[0]

    # Batch tiling: keep per-step working set small and give the grid >=2
    # parallel steps whenever possible (v7x has two TensorCores per chip).
    B_t = 8 if B >= 16 else max(1, B // 2)
    n_tiles = -(-B // B_t)
    B_pad = n_tiles * B_t

    # Input relayout (same #bytes as the input): pad W 84->88, phase-split W by
    # 8 (w = 8*wb + rx) and put (phase, channel) on sublanes, (W-block, batch)
    # on lanes:  x_pre[t, h, rx*C + c, wb*B_t + b] = x[t*B_t + b, c, h, 8*wb + rx]
    xp = jnp.pad(x, ((0, B_pad - B), (0, 0), (0, 0), (0, 4)))
    xp = xp.reshape(n_tiles, B_t, C, 84, 11, 8)
    xp = xp.transpose(0, 3, 5, 2, 4, 1).reshape(n_tiles, 84, 8 * C, 11 * B_t)
    xp = xp.astype(jnp.bfloat16)

    kernel = _make_kernel(C, B_t)

    out = pl.pallas_call(
        kernel,
        out_shape=jax.ShapeDtypeStruct((n_tiles, A_pad, B_t), jnp.float32),
        grid=(n_tiles,),
        in_specs=[
            pl.BlockSpec((1, 84, 8 * C, 11 * B_t), lambda t: (t, 0, 0, 0)),
            pl.BlockSpec((32, 64 * C), lambda t: (0, 0)),   # conv1 weights (resident)
            pl.BlockSpec((32, 1), lambda t: (0, 0)),
            pl.BlockSpec((64, 512), lambda t: (0, 0)),      # conv2 weights
            pl.BlockSpec((64, 1), lambda t: (0, 0)),
            pl.BlockSpec((64, 576), lambda t: (0, 0)),      # conv3 weights
            pl.BlockSpec((64, 1), lambda t: (0, 0)),
            pl.BlockSpec((512, 3136), lambda t: (0, 0)),    # fc weights
            pl.BlockSpec((512, 1), lambda t: (0, 0)),
            pl.BlockSpec((A_pad, 512), lambda t: (0, 0)),   # head weights (padded)
            pl.BlockSpec((A_pad, 1), lambda t: (0, 0)),
        ],
        out_specs=pl.BlockSpec((1, A_pad, B_t), lambda t: (t, 0, 0)),
        scratch_shapes=[
            pltpu.VMEM((2, 20, 32, 10 * B_t), jnp.bfloat16),  # conv1 out (W phase-split)
            pltpu.VMEM((9, 64, 9 * B_t), jnp.bfloat16),       # conv2 out
        ],
        compiler_params=pltpu.CompilerParams(
            dimension_semantics=("parallel",),
            vmem_limit_bytes=32 * 1024 * 1024,
        ),
    )(xp, params["w1"], params["b1"], params["w2"], params["b2"],
      params["w3"], params["b3"], params["wfc"], params["bfc"],
      params["wh"], params["bh"])

    q = out.transpose(0, 2, 1).reshape(B_pad, A_pad)
    return q[:B, :num_actions]


# ----------------------------------------------------------------------------
# Parameters (deterministic init, PyTorch-default-like uniform bounds)
# ----------------------------------------------------------------------------
def init_params(key, channels, num_actions):
    ks = jax.random.split(key, 10)

    def u(k, shape, fan_in):
        bound = 1.0 / (fan_in ** 0.5)
        return jax.random.uniform(k, shape, jnp.float32, -bound, bound)

    return {
        "w1": u(ks[0], (32, channels, 8, 8), channels * 64),
        "b1": u(ks[1], (32,), channels * 64),
        "w2": u(ks[2], (64, 32, 4, 4), 32 * 16),
        "b2": u(ks[3], (64,), 32 * 16),
        "w3": u(ks[4], (64, 64, 3, 3), 64 * 9),
        "b3": u(ks[5], (64,), 64 * 9),
        "wfc": u(ks[6], (512, 3136), 3136),
        "bfc": u(ks[7], (512,), 3136),
        "wh": u(ks[8], (num_actions, 512), 512),
        "bh": u(ks[9], (num_actions,), 512),
    }


def prepare_params(p):
    """One-time conversion to kernel layouts: bf16 matmul operands, f32 biases,
    conv kernels flattened with columns ordered (kh, kw, c_in) to match the
    in-kernel patch row order, fc columns permuted to the kernel's flatten
    order (oy, ox, c), and the head zero-padded to 128 output rows."""
    C = p["w1"].shape[1]
    A = p["wh"].shape[0]
    A_pad = ((A + 127) // 128) * 128
    return {
        "w1": p["w1"].transpose(0, 2, 3, 1).reshape(32, 64 * C).astype(jnp.bfloat16),
        "b1": p["b1"].reshape(32, 1).astype(jnp.float32),
        "w2": p["w2"].transpose(0, 2, 3, 1).reshape(64, 512).astype(jnp.bfloat16),
        "b2": p["b2"].reshape(64, 1).astype(jnp.float32),
        "w3": p["w3"].transpose(0, 2, 3, 1).reshape(64, 576).astype(jnp.bfloat16),
        "b3": p["b3"].reshape(64, 1).astype(jnp.float32),
        "wfc": p["wfc"].reshape(512, 64, 7, 7).transpose(0, 2, 3, 1)
                        .reshape(512, 3136).astype(jnp.bfloat16),
        "bfc": p["bfc"].reshape(512, 1).astype(jnp.float32),
        "wh": jnp.pad(p["wh"], ((0, A_pad - A), (0, 0))).astype(jnp.bfloat16),
        "bh": jnp.pad(p["bh"], (0, A_pad - A)).reshape(A_pad, 1).astype(jnp.float32),
    }


# ----------------------------------------------------------------------------
# Pure-JAX f32 reference (matches the PyTorch module)
# ----------------------------------------------------------------------------
def dqn_reference(raw, x):
    dn = ("NCHW", "OIHW", "NCHW")
    y = lax.conv_general_dilated(x, raw["w1"], (4, 4), "VALID", dimension_numbers=dn)
    y = jnp.maximum(y + raw["b1"][None, :, None, None], 0.0)
    y = lax.conv_general_dilated(y, raw["w2"], (2, 2), "VALID", dimension_numbers=dn)
    y = jnp.maximum(y + raw["b2"][None, :, None, None], 0.0)
    y = lax.conv_general_dilated(y, raw["w3"], (1, 1), "VALID", dimension_numbers=dn)
    y = jnp.maximum(y + raw["b3"][None, :, None, None], 0.0)
    y = y.reshape(y.shape[0], -1)
    h = y @ raw["wfc"].T + raw["bfc"]
    h = jnp.where(h >= 0.0, h, 0.01 * h)
    return h @ raw["wh"].T + raw["bh"]


if __name__ == "__main__":
    batch, channels, num_actions = 2, 4, 4
    key = jax.random.PRNGKey(0)
    k_params, k_x = jax.random.split(key)

    raw_params = init_params(k_params, channels, num_actions)
    params = prepare_params(raw_params)
    x = jax.random.uniform(k_x, (batch, channels, 84, 84), jnp.float32)

    fwd = jax.jit(functools.partial(dqn_forward, num_actions=num_actions))
    q = jax.block_until_ready(fwd(params, x))

    assert q.shape == (batch, num_actions), q.shape
    assert q.dtype == jnp.float32

    q_ref = jax.block_until_ready(jax.jit(dqn_reference)(raw_params, x))
    max_err = float(jnp.max(jnp.abs(q - q_ref)))
    if not bool(jnp.allclose(q, q_ref, atol=3e-2, rtol=3e-2)):
        raise AssertionError(
            f"Pallas kernel mismatch vs f32 reference (max abs err {max_err:.4f})")
    print("KERNEL_OK")
</pallas_src>

<mosaic_0001>
module attributes {stable_mosaic.version = 11 : i64} {
  func.func @kernel(%arg0: i32, %arg1: memref<1x84x32x11xbf16, #tpu.memory_space<vmem>>, %arg2: memref<32x256xbf16, #tpu.memory_space<vmem>>, %arg3: memref<32x1xf32, #tpu.memory_space<vmem>>, %arg4: memref<64x512xbf16, #tpu.memory_space<vmem>>, %arg5: memref<64x1xf32, #tpu.memory_space<vmem>>, %arg6: memref<64x576xbf16, #tpu.memory_space<vmem>>, %arg7: memref<64x1xf32, #tpu.memory_space<vmem>>, %arg8: memref<512x3136xbf16, #tpu.memory_space<vmem>>, %arg9: memref<512x1xf32, #tpu.memory_space<vmem>>, %arg10: memref<128x512xbf16, #tpu.memory_space<vmem>>, %arg11: memref<128x1xf32, #tpu.memory_space<vmem>>, %arg12: memref<1x128x1xf32, #tpu.memory_space<vmem>>, %arg13: memref<2x20x32x10xbf16, #tpu.memory_space<vmem>>, %arg14: memref<9x64x9xbf16, #tpu.memory_space<vmem>>) attributes {dimension_semantics = [#tpu.dimension_semantics<parallel>], iteration_bounds = array<i64: 2>, scalar_prefetch = 0 : i64, scratch_operands = 2 : i64, tpu.core_type = #tpu.core_type<tc>, window_params = [{transform_indices = @transform_0, window_bounds = array<i64: 1, 84, 32, 11>}, {pipeline_mode = #tpu.pipeline_mode<synchronous>, transform_indices = @transform_1, window_bounds = array<i64: 32, 256>}, {pipeline_mode = #tpu.pipeline_mode<synchronous>, transform_indices = @transform_2, window_bounds = array<i64: 32, 1>}, {pipeline_mode = #tpu.pipeline_mode<synchronous>, transform_indices = @transform_3, window_bounds = array<i64: 64, 512>}, {pipeline_mode = #tpu.pipeline_mode<synchronous>, transform_indices = @transform_4, window_bounds = array<i64: 64, 1>}, {pipeline_mode = #tpu.pipeline_mode<synchronous>, transform_indices = @transform_5, window_bounds = array<i64: 64, 576>}, {pipeline_mode = #tpu.pipeline_mode<synchronous>, transform_indices = @transform_6, window_bounds = array<i64: 64, 1>}, {pipeline_mode = #tpu.pipeline_mode<synchronous>, transform_indices = @transform_7, window_bounds = array<i64: 512, 3136>}, {pipeline_mode = #tpu.pipeline_mode<synchronous>, transform_indices = @transform_8, window_bounds = array<i64: 512, 1>}, {pipeline_mode = #tpu.pipeline_mode<synchronous>, transform_indices = @transform_9, window_bounds = array<i64: 128, 512>}, {pipeline_mode = #tpu.pipeline_mode<synchronous>, transform_indices = @transform_10, window_bounds = array<i64: 128, 1>}, {transform_indices = @transform_11, window_bounds = array<i64: 1, 128, 1>}]} {
    %c0_i32 = arith.constant 0 : i32
    %c20_i32 = arith.constant 20 : i32
    %0 = arith.addi %c0_i32, %c20_i32 : i32
    %c1_i32 = arith.constant 1 : i32
    scf.for %arg15 = %c0_i32 to %0 step %c1_i32  : i32 {
      %c4_i32 = arith.constant 4 : i32
      %262 = arith.muli %c4_i32, %arg15 : i32
      %c0_i32_244 = arith.constant 0 : i32
      %263 = arith.addi %262, %c0_i32_244 : i32
      %c0_245 = arith.constant 0 : index
      %264 = arith.index_cast %263 : i32 to index
      %c0_246 = arith.constant 0 : index
      %c0_247 = arith.constant 0 : index
      %265 = vector.load %arg1[%c0_245, %264, %c0_246, %c0_247] : memref<1x84x32x11xbf16, #tpu.memory_space<vmem>>, vector<1x1x32x10xbf16>
      %266 = vector.shape_cast %265 : vector<1x1x32x10xbf16> to vector<32x10xbf16>
      %c4_i32_248 = arith.constant 4 : i32
      %267 = arith.muli %c4_i32_248, %arg15 : i32
      %c1_i32_249 = arith.constant 1 : i32
      %268 = arith.addi %267, %c1_i32_249 : i32
      %c0_250 = arith.constant 0 : index
      %269 = arith.index_cast %268 : i32 to index
      %c0_251 = arith.constant 0 : index
      %c0_252 = arith.constant 0 : index
      %270 = vector.load %arg1[%c0_250, %269, %c0_251, %c0_252] : memref<1x84x32x11xbf16, #tpu.memory_space<vmem>>, vector<1x1x32x10xbf16>
      %271 = vector.shape_cast %270 : vector<1x1x32x10xbf16> to vector<32x10xbf16>
      %c4_i32_253 = arith.constant 4 : i32
      %272 = arith.muli %c4_i32_253, %arg15 : i32
      %c2_i32 = arith.constant 2 : i32
      %273 = arith.addi %272, %c2_i32 : i32
      %c0_254 = arith.constant 0 : index
      %274 = arith.index_cast %273 : i32 to index
      %c0_255 = arith.constant 0 : index
      %c0_256 = arith.constant 0 : index
      %275 = vector.load %arg1[%c0_254, %274, %c0_255, %c0_256] : memref<1x84x32x11xbf16, #tpu.memory_space<vmem>>, vector<1x1x32x10xbf16>
      %276 = vector.shape_cast %275 : vector<1x1x32x10xbf16> to vector<32x10xbf16>
      %c4_i32_257 = arith.constant 4 : i32
      %277 = arith.muli %c4_i32_257, %arg15 : i32
      %c3_i32 = arith.constant 3 : i32
      %278 = arith.addi %277, %c3_i32 : i32
      %c0_258 = arith.constant 0 : index
      %279 = arith.index_cast %278 : i32 to index
      %c0_259 = arith.constant 0 : index
      %c0_260 = arith.constant 0 : index
      %280 = vector.load %arg1[%c0_258, %279, %c0_259, %c0_260] : memref<1x84x32x11xbf16, #tpu.memory_space<vmem>>, vector<1x1x32x10xbf16>
      %281 = vector.shape_cast %280 : vector<1x1x32x10xbf16> to vector<32x10xbf16>
      %c4_i32_261 = arith.constant 4 : i32
      %282 = arith.muli %c4_i32_261, %arg15 : i32
      %c4_i32_262 = arith.constant 4 : i32
      %283 = arith.addi %282, %c4_i32_262 : i32
      %c0_263 = arith.constant 0 : index
      %284 = arith.index_cast %283 : i32 to index
      %c0_264 = arith.constant 0 : index
      %c0_265 = arith.constant 0 : index
      %285 = vector.load %arg1[%c0_263, %284, %c0_264, %c0_265] : memref<1x84x32x11xbf16, #tpu.memory_space<vmem>>, vector<1x1x32x10xbf16>
      %286 = vector.shape_cast %285 : vector<1x1x32x10xbf16> to vector<32x10xbf16>
      %c4_i32_266 = arith.constant 4 : i32
      %287 = arith.muli %c4_i32_266, %arg15 : i32
      %c5_i32 = arith.constant 5 : i32
      %288 = arith.addi %287, %c5_i32 : i32
      %c0_267 = arith.constant 0 : index
      %289 = arith.index_cast %288 : i32 to index
      %c0_268 = arith.constant 0 : index
      %c0_269 = arith.constant 0 : index
      %290 = vector.load %arg1[%c0_267, %289, %c0_268, %c0_269] : memref<1x84x32x11xbf16, #tpu.memory_space<vmem>>, vector<1x1x32x10xbf16>
      %291 = vector.shape_cast %290 : vector<1x1x32x10xbf16> to vector<32x10xbf16>
      %c4_i32_270 = arith.constant 4 : i32
      %292 = arith.muli %c4_i32_270, %arg15 : i32
      %c6_i32 = arith.constant 6 : i32
      %293 = arith.addi %292, %c6_i32 : i32
      %c0_271 = arith.constant 0 : index
      %294 = arith.index_cast %293 : i32 to index
      %c0_272 = arith.constant 0 : index
      %c0_273 = arith.constant 0 : index
      %295 = vector.load %arg1[%c0_271, %294, %c0_272, %c0_273] : memref<1x84x32x11xbf16, #tpu.memory_space<vmem>>, vector<1x1x32x10xbf16>
      %296 = vector.shape_cast %295 : vector<1x1x32x10xbf16> to vector<32x10xbf16>
      %c4_i32_274 = arith.constant 4 : i32
      %297 = arith.muli %c4_i32_274, %arg15 : i32
      %c7_i32 = arith.constant 7 : i32
      %298 = arith.addi %297, %c7_i32 : i32
      %c0_275 = arith.constant 0 : index
      %299 = arith.index_cast %298 : i32 to index
      %c0_276 = arith.constant 0 : index
      %c0_277 = arith.constant 0 : index
      %300 = vector.load %arg1[%c0_275, %299, %c0_276, %c0_277] : memref<1x84x32x11xbf16, #tpu.memory_space<vmem>>, vector<1x1x32x10xbf16>
      %301 = vector.shape_cast %300 : vector<1x1x32x10xbf16> to vector<32x10xbf16>
      %302 = tpu.concatenate %266, %271, %276, %281, %286, %291, %296, %301 in 0 : vector<32x10xbf16>, vector<32x10xbf16>, vector<32x10xbf16>, vector<32x10xbf16>, vector<32x10xbf16>, vector<32x10xbf16>, vector<32x10xbf16>, vector<32x10xbf16> -> vector<256x10xbf16>
      %c0_278 = arith.constant 0 : index
      %c0_279 = arith.constant 0 : index
      %303 = vector.load %arg2[%c0_278, %c0_279] : memref<32x256xbf16, #tpu.memory_space<vmem>>, vector<32x256xbf16>
      %cst_280 = arith.constant dense<0.000000e+00> : vector<32x10xf32>
      %304 = tpu.matmul %303, %302, %cst_280 {dimension_numbers = #tpu.dot_dimension_numbers<[1], [0], [0], [1], [0, 0, 1, 1], [], []>} : vector<32x256xbf16>, vector<256x10xbf16>, vector<32x10xf32> -> vector<32x10xf32>
      %c0_281 = arith.constant 0 : index
      %c0_282 = arith.constant 0 : index
      %305 = vector.load %arg3[%c0_281, %c0_282] : memref<32x1xf32, #tpu.memory_space<vmem>>, vector<32x1xf32>
      %306 = vector.broadcast %305 : vector<32x1xf32> to vector<32x10xf32>
      %307 = arith.addf %304, %306 : vector<32x10xf32>
      %cst_283 = arith.constant 0.000000e+00 : f32
      %308 = vector.broadcast %cst_283 : f32 to vector<32x10xf32>
      %309 = arith.maximumf %307, %308 : vector<32x10xf32>
      %310 = arith.truncf %309 : vector<32x10xf32> to vector<32x10xbf16>
      %c0_284 = arith.constant 0 : index
      %311 = arith.index_cast %arg15 : i32 to index
      %c0_285 = arith.constant 0 : index
      %c0_286 = arith.constant 0 : index
      %312 = vector.load %arg13[%c0_284, %311, %c0_285, %c0_286] : memref<2x20x32x10xbf16, #tpu.memory_space<vmem>>, vector<1x1x32x10xbf16>
      %313 = vector.shape_cast %312 : vector<1x1x32x10xbf16> to vector<32x10xbf16>
      %314 = vector.shape_cast %310 : vector<32x10xbf16> to vector<1x1x32x10xbf16>
      tpu.vector_store %arg13[%c0_284, %311, %c0_285, %c0_286], %314 {strides = array<i32>} : memref<2x20x32x10xbf16, #tpu.memory_space<vmem>>, vector<1x1x32x10xbf16>,
    }
    %c20_i32_0 = arith.constant 20 : i32
    %c0_i32_1 = arith.constant 0 : i32
    %c20_i32_2 = arith.constant 20 : i32
    %1 = arith.addi %c0_i32_1, %c20_i32_2 : i32
    %c1_i32_3 = arith.constant 1 : i32
    scf.for %arg15 = %c0_i32_1 to %1 step %c1_i32_3  : i32 {
      %c4_i32 = arith.constant 4 : i32
      %262 = arith.muli %c4_i32, %arg15 : i32
      %c0_i32_244 = arith.constant 0 : i32
      %263 = arith.addi %262, %c0_i32_244 : i32
      %c0_245 = arith.constant 0 : index
      %264 = arith.index_cast %263 : i32 to index
      %c16 = arith.constant 16 : index
      %c0_246 = arith.constant 0 : index
      %265 = vector.load %arg1[%c0_245, %264, %c16, %c0_246] : memref<1x84x32x11xbf16, #tpu.memory_space<vmem>>, vector<1x1x16x10xbf16>
      %266 = vector.shape_cast %265 : vector<1x1x16x10xbf16> to vector<16x10xbf16>
      %c0_247 = arith.constant 0 : index
      %267 = arith.index_cast %263 : i32 to index
      %c0_248 = arith.constant 0 : index
      %c1_249 = arith.constant 1 : index
      %268 = vector.load %arg1[%c0_247, %267, %c0_248, %c1_249] : memref<1x84x32x11xbf16, #tpu.memory_space<vmem>>, vector<1x1x16x10xbf16>
      %269 = vector.shape_cast %268 : vector<1x1x16x10xbf16> to vector<16x10xbf16>
      %c4_i32_250 = arith.constant 4 : i32
      %270 = arith.muli %c4_i32_250, %arg15 : i32
      %c1_i32_251 = arith.constant 1 : i32
      %271 = arith.addi %270, %c1_i32_251 : i32
      %c0_252 = arith.constant 0 : index
      %272 = arith.index_cast %271 : i32 to index
      %c16_253 = arith.constant 16 : index
      %c0_254 = arith.constant 0 : index
      %273 = vector.load %arg1[%c0_252, %272, %c16_253, %c0_254] : memref<1x84x32x11xbf16, #tpu.memory_space<vmem>>, vector<1x1x16x10xbf16>
      %274 = vector.shape_cast %273 : vector<1x1x16x10xbf16> to vector<16x10xbf16>
      %c0_255 = arith.constant 0 : index
      %275 = arith.index_cast %271 : i32 to index
      %c0_256 = arith.constant 0 : index
      %c1_257 = arith.constant 1 : index
      %276 = vector.load %arg1[%c0_255, %275, %c0_256, %c1_257] : memref<1x84x32x11xbf16, #tpu.memory_space<vmem>>, vector<1x1x16x10xbf16>
      %277 = vector.shape_cast %276 : vector<1x1x16x10xbf16> to vector<16x10xbf16>
      %c4_i32_258 = arith.constant 4 : i32
      %278 = arith.muli %c4_i32_258, %arg15 : i32
      %c2_i32 = arith.constant 2 : i32
      %279 = arith.addi %278, %c2_i32 : i32
      %c0_259 = arith.constant 0 : index
      %280 = arith.index_cast %279 : i32 to index
      %c16_260 = arith.constant 16 : index
      %c0_261 = arith.constant 0 : index
      %281 = vector.load %arg1[%c0_259, %280, %c16_260, %c0_261] : memref<1x84x32x11xbf16, #tpu.memory_space<vmem>>, vector<1x1x16x10xbf16>
      %282 = vector.shape_cast %281 : vector<1x1x16x10xbf16> to vector<16x10xbf16>
      %c0_262 = arith.constant 0 : index
      %283 = arith.index_cast %279 : i32 to index
      %c0_263 = arith.constant 0 : index
      %c1_264 = arith.constant 1 : index
      %284 = vector.load %arg1[%c0_262, %283, %c0_263, %c1_264] : memref<1x84x32x11xbf16, #tpu.memory_space<vmem>>, vector<1x1x16x10xbf16>
      %285 = vector.shape_cast %284 : vector<1x1x16x10xbf16> to vector<16x10xbf16>
      %c4_i32_265 = arith.constant 4 : i32
      %286 = arith.muli %c4_i32_265, %arg15 : i32
      %c3_i32 = arith.constant 3 : i32
      %287 = arith.addi %286, %c3_i32 : i32
      %c0_266 = arith.constant 0 : index
      %288 = arith.index_cast %287 : i32 to index
      %c16_267 = arith.constant 16 : index
      %c0_268 = arith.constant 0 : index
      %289 = vector.load %arg1[%c0_266, %288, %c16_267, %c0_268] : memref<1x84x32x11xbf16, #tpu.memory_space<vmem>>, vector<1x1x16x10xbf16>
      %290 = vector.shape_cast %289 : vector<1x1x16x10xbf16> to vector<16x10xbf16>
      %c0_269 = arith.constant 0 : index
      %291 = arith.index_cast %287 : i32 to index
      %c0_270 = arith.constant 0 : index
      %c1_271 = arith.constant 1 : index
      %292 = vector.load %arg1[%c0_269, %291, %c0_270, %c1_271] : memref<1x84x32x11xbf16, #tpu.memory_space<vmem>>, vector<1x1x16x10xbf16>
      %293 = vector.shape_cast %292 : vector<1x1x16x10xbf16> to vector<16x10xbf16>
      %c4_i32_272 = arith.constant 4 : i32
      %294 = arith.muli %c4_i32_272, %arg15 : i32
      %c4_i32_273 = arith.constant 4 : i32
      %295 = arith.addi %294, %c4_i32_273 : i32
      %c0_274 = arith.constant 0 : index
      %296 = arith.index_cast %295 : i32 to index
      %c16_275 = arith.constant 16 : index
      %c0_276 = arith.constant 0 : index
      %297 = vector.load %arg1[%c0_274, %296, %c16_275, %c0_276] : memref<1x84x32x11xbf16, #tpu.memory_space<vmem>>, vector<1x1x16x10xbf16>
      %298 = vector.shape_cast %297 : vector<1x1x16x10xbf16> to vector<16x10xbf16>
      %c0_277 = arith.constant 0 : index
      %299 = arith.index_cast %295 : i32 to index
      %c0_278 = arith.constant 0 : index
      %c1_279 = arith.constant 1 : index
      %300 = vector.load %arg1[%c0_277, %299, %c0_278, %c1_279] : memref<1x84x32x11xbf16, #tpu.memory_space<vmem>>, vector<1x1x16x10xbf16>
      %301 = vector.shape_cast %300 : vector<1x1x16x10xbf16> to vector<16x10xbf16>
      %c4_i32_280 = arith.constant 4 : i32
      %302 = arith.muli %c4_i32_280, %arg15 : i32
      %c5_i32 = arith.constant 5 : i32
      %303 = arith.addi %302, %c5_i32 : i32
      %c0_281 = arith.constant 0 : index
      %304 = arith.index_cast %303 : i32 to index
      %c16_282 = arith.constant 16 : index
      %c0_283 = arith.constant 0 : index
      %305 = vector.load %arg1[%c0_281, %304, %c16_282, %c0_283] : memref<1x84x32x11xbf16, #tpu.memory_space<vmem>>, vector<1x1x16x10xbf16>
      %306 = vector.shape_cast %305 : vector<1x1x16x10xbf16> to vector<16x10xbf16>
      %c0_284 = arith.constant 0 : index
      %307 = arith.index_cast %303 : i32 to index
      %c0_285 = arith.constant 0 : index
      %c1_286 = arith.constant 1 : index
      %308 = vector.load %arg1[%c0_284, %307, %c0_285, %c1_286] : memref<1x84x32x11xbf16, #tpu.memory_space<vmem>>, vector<1x1x16x10xbf16>
      %309 = vector.shape_cast %308 : vector<1x1x16x10xbf16> to vector<16x10xbf16>
      %c4_i32_287 = arith.constant 4 : i32
      %310 = arith.muli %c4_i32_287, %arg15 : i32
      %c6_i32 = arith.constant 6 : i32
      %311 = arith.addi %310, %c6_i32 : i32
      %c0_288 = arith.constant 0 : index
      %312 = arith.index_cast %311 : i32 to index
      %c16_289 = arith.constant 16 : index
      %c0_290 = arith.constant 0 : index
      %313 = vector.load %arg1[%c0_288, %312, %c16_289, %c0_290] : memref<1x84x32x11xbf16, #tpu.memory_space<vmem>>, vector<1x1x16x10xbf16>
      %314 = vector.shape_cast %313 : vector<1x1x16x10xbf16> to vector<16x10xbf16>
      %c0_291 = arith.constant 0 : index
      %315 = arith.index_cast %311 : i32 to index
      %c0_292 = arith.constant 0 : index
      %c1_293 = arith.constant 1 : index
      %316 = vector.load %arg1[%c0_291, %315, %c0_292, %c1_293] : memref<1x84x32x11xbf16, #tpu.memory_space<vmem>>, vector<1x1x16x10xbf16>
      %317 = vector.shape_cast %316 : vector<1x1x16x10xbf16> to vector<16x10xbf16>
      %c4_i32_294 = arith.constant 4 : i32
      %318 = arith.muli %c4_i32_294, %arg15 : i32
      %c7_i32 = arith.constant 7 : i32
      %319 = arith.addi %318, %c7_i32 : i32
      %c0_295 = arith.constant 0 : index
      %320 = arith.index_cast %319 : i32 to index
      %c16_296 = arith.constant 16 : index
      %c0_297 = arith.constant 0 : index
      %321 = vector.load %arg1[%c0_295, %320, %c16_296, %c0_297] : memref<1x84x32x11xbf16, #tpu.memory_space<vmem>>, vector<1x1x16x10xbf16>
      %322 = vector.shape_cast %321 : vector<1x1x16x10xbf16> to vector<16x10xbf16>
      %c0_298 = arith.constant 0 : index
      %323 = arith.index_cast %319 : i32 to index
      %c0_299 = arith.constant 0 : index
      %c1_300 = arith.constant 1 : index
      %324 = vector.load %arg1[%c0_298, %323, %c0_299, %c1_300] : memref<1x84x32x11xbf16, #tpu.memory_space<vmem>>, vector<1x1x16x10xbf16>
      %325 = vector.shape_cast %324 : vector<1x1x16x10xbf16> to vector<16x10xbf16>
      %326 = tpu.concatenate %266, %269, %274, %277, %282, %285, %290, %293, %298, %301, %306, %309, %314, %317, %322, %325 in 0 : vector<16x10xbf16>, vector<16x10xbf16>, vector<16x10xbf16>, vector<16x10xbf16>, vector<16x10xbf16>, vector<16x10xbf16>, vector<16x10xbf16>, vector<16x10xbf16>, vector<16x10xbf16>, vector<16x10xbf16>, vector<16x10xbf16>, vector<16x10xbf16>, vector<16x10xbf16>, vector<16x10xbf16>, vector<16x10xbf16>, vector<16x10xbf16> -> vector<256x10xbf16>
      %c0_301 = arith.constant 0 : index
      %c0_302 = arith.constant 0 : index
      %327 = vector.load %arg2[%c0_301, %c0_302] : memref<32x256xbf16, #tpu.memory_space<vmem>>, vector<32x256xbf16>
      %cst_303 = arith.constant dense<0.000000e+00> : vector<32x10xf32>
      %328 = tpu.matmul %327, %326, %cst_303 {dimension_numbers = #tpu.dot_dimension_numbers<[1], [0], [0], [1], [0, 0, 1, 1], [], []>} : vector<32x256xbf16>, vector<256x10xbf16>, vector<32x10xf32> -> vector<32x10xf32>
      %c0_304 = arith.constant 0 : index
      %c0_305 = arith.constant 0 : index
      %329 = vector.load %arg3[%c0_304, %c0_305] : memref<32x1xf32, #tpu.memory_space<vmem>>, vector<32x1xf32>
      %330 = vector.broadcast %329 : vector<32x1xf32> to vector<32x10xf32>
      %331 = arith.addf %328, %330 : vector<32x10xf32>
      %cst_306 = arith.constant 0.000000e+00 : f32
      %332 = vector.broadcast %cst_306 : f32 to vector<32x10xf32>
      %333 = arith.maximumf %331, %332 : vector<32x10xf32>
      %334 = arith.truncf %333 : vector<32x10xf32> to vector<32x10xbf16>
      %c1_307 = arith.constant 1 : index
      %335 = arith.index_cast %arg15 : i32 to index
      %c0_308 = arith.constant 0 : index
      %c0_309 = arith.constant 0 : index
      %336 = vector.load %arg13[%c1_307, %335, %c0_308, %c0_309] : memref<2x20x32x10xbf16, #tpu.memory_space<vmem>>, vector<1x1x32x10xbf16>
      %337 = vector.shape_cast %336 : vector<1x1x32x10xbf16> to vector<32x10xbf16>
      %338 = vector.shape_cast %334 : vector<32x10xbf16> to vector<1x1x32x10xbf16>
      tpu.vector_store %arg13[%c1_307, %335, %c0_308, %c0_309], %338 {strides = array<i32>} : memref<2x20x32x10xbf16, #tpu.memory_space<vmem>>, vector<1x1x32x10xbf16>,
    }
    %c20_i32_4 = arith.constant 20 : i32
    %c0_i32_5 = arith.constant 0 : i32
    %c9_i32 = arith.constant 9 : i32
    %2 = arith.addi %c0_i32_5, %c9_i32 : i32
    %c1_i32_6 = arith.constant 1 : i32
    scf.for %arg15 = %c0_i32_5 to %2 step %c1_i32_6  : i32 {
      %c2_i32 = arith.constant 2 : i32
      %262 = arith.muli %c2_i32, %arg15 : i32
      %c0_i32_244 = arith.constant 0 : i32
      %263 = arith.addi %262, %c0_i32_244 : i32
      %c0_245 = arith.constant 0 : index
      %264 = arith.index_cast %263 : i32 to index
      %c0_246 = arith.constant 0 : index
      %c0_247 = arith.constant 0 : index
      %265 = vector.load %arg13[%c0_245, %264, %c0_246, %c0_247] : memref<2x20x32x10xbf16, #tpu.memory_space<vmem>>, vector<1x1x32x9xbf16>
      %266 = vector.shape_cast %265 : vector<1x1x32x9xbf16> to vector<32x9xbf16>
      %c1_248 = arith.constant 1 : index
      %267 = arith.index_cast %263 : i32 to index
      %c0_249 = arith.constant 0 : index
      %c0_250 = arith.constant 0 : index
      %268 = vector.load %arg13[%c1_248, %267, %c0_249, %c0_250] : memref<2x20x32x10xbf16, #tpu.memory_space<vmem>>, vector<1x1x32x9xbf16>
      %269 = vector.shape_cast %268 : vector<1x1x32x9xbf16> to vector<32x9xbf16>
      %c0_251 = arith.constant 0 : index
      %270 = arith.index_cast %263 : i32 to index
      %c0_252 = arith.constant 0 : index
      %c1_253 = arith.constant 1 : index
      %271 = vector.load %arg13[%c0_251, %270, %c0_252, %c1_253] : memref<2x20x32x10xbf16, #tpu.memory_space<vmem>>, vector<1x1x32x9xbf16>
      %272 = vector.shape_cast %271 : vector<1x1x32x9xbf16> to vector<32x9xbf16>
      %c1_254 = arith.constant 1 : index
      %273 = arith.index_cast %263 : i32 to index
      %c0_255 = arith.constant 0 : index
      %c1_256 = arith.constant 1 : index
      %274 = vector.load %arg13[%c1_254, %273, %c0_255, %c1_256] : memref<2x20x32x10xbf16, #tpu.memory_space<vmem>>, vector<1x1x32x9xbf16>
      %275 = vector.shape_cast %274 : vector<1x1x32x9xbf16> to vector<32x9xbf16>
      %c2_i32_257 = arith.constant 2 : i32
      %276 = arith.muli %c2_i32_257, %arg15 : i32
      %c1_i32_258 = arith.constant 1 : i32
      %277 = arith.addi %276, %c1_i32_258 : i32
      %c0_259 = arith.constant 0 : index
      %278 = arith.index_cast %277 : i32 to index
      %c0_260 = arith.constant 0 : index
      %c0_261 = arith.constant 0 : index
      %279 = vector.load %arg13[%c0_259, %278, %c0_260, %c0_261] : memref<2x20x32x10xbf16, #tpu.memory_space<vmem>>, vector<1x1x32x9xbf16>
      %280 = vector.shape_cast %279 : vector<1x1x32x9xbf16> to vector<32x9xbf16>
      %c1_262 = arith.constant 1 : index
      %281 = arith.index_cast %277 : i32 to index
      %c0_263 = arith.constant 0 : index
      %c0_264 = arith.constant 0 : index
      %282 = vector.load %arg13[%c1_262, %281, %c0_263, %c0_264] : memref<2x20x32x10xbf16, #tpu.memory_space<vmem>>, vector<1x1x32x9xbf16>
      %283 = vector.shape_cast %282 : vector<1x1x32x9xbf16> to vector<32x9xbf16>
      %c0_265 = arith.constant 0 : index
      %284 = arith.index_cast %277 : i32 to index
      %c0_266 = arith.constant 0 : index
      %c1_267 = arith.constant 1 : index
      %285 = vector.load %arg13[%c0_265, %284, %c0_266, %c1_267] : memref<2x20x32x10xbf16, #tpu.memory_space<vmem>>, vector<1x1x32x9xbf16>
      %286 = vector.shape_cast %285 : vector<1x1x32x9xbf16> to vector<32x9xbf16>
      %c1_268 = arith.constant 1 : index
      %287 = arith.index_cast %277 : i32 to index
      %c0_269 = arith.constant 0 : index
      %c1_270 = arith.constant 1 : index
      %288 = vector.load %arg13[%c1_268, %287, %c0_269, %c1_270] : memref<2x20x32x10xbf16, #tpu.memory_space<vmem>>, vector<1x1x32x9xbf16>
      %289 = vector.shape_cast %288 : vector<1x1x32x9xbf16> to vector<32x9xbf16>
      %c2_i32_271 = arith.constant 2 : i32
      %290 = arith.muli %c2_i32_271, %arg15 : i32
      %c2_i32_272 = arith.constant 2 : i32
      %291 = arith.addi %290, %c2_i32_272 : i32
      %c0_273 = arith.constant 0 : index
      %292 = arith.index_cast %291 : i32 to index
      %c0_274 = arith.constant 0 : index
      %c0_275 = arith.constant 0 : index
      %293 = vector.load %arg13[%c0_273, %292, %c0_274, %c0_275] : memref<2x20x32x10xbf16, #tpu.memory_space<vmem>>, vector<1x1x32x9xbf16>
      %294 = vector.shape_cast %293 : vector<1x1x32x9xbf16> to vector<32x9xbf16>
      %c1_276 = arith.constant 1 : index
      %295 = arith.index_cast %291 : i32 to index
      %c0_277 = arith.constant 0 : index
      %c0_278 = arith.constant 0 : index
      %296 = vector.load %arg13[%c1_276, %295, %c0_277, %c0_278] : memref<2x20x32x10xbf16, #tpu.memory_space<vmem>>, vector<1x1x32x9xbf16>
      %297 = vector.shape_cast %296 : vector<1x1x32x9xbf16> to vector<32x9xbf16>
      %c0_279 = arith.constant 0 : index
      %298 = arith.index_cast %291 : i32 to index
      %c0_280 = arith.constant 0 : index
      %c1_281 = arith.constant 1 : index
      %299 = vector.load %arg13[%c0_279, %298, %c0_280, %c1_281] : memref<2x20x32x10xbf16, #tpu.memory_space<vmem>>, vector<1x1x32x9xbf16>
      %300 = vector.shape_cast %299 : vector<1x1x32x9xbf16> to vector<32x9xbf16>
      %c1_282 = arith.constant 1 : index
      %301 = arith.index_cast %291 : i32 to index
      %c0_283 = arith.constant 0 : index
      %c1_284 = arith.constant 1 : index
      %302 = vector.load %arg13[%c1_282, %301, %c0_283, %c1_284] : memref<2x20x32x10xbf16, #tpu.memory_space<vmem>>, vector<1x1x32x9xbf16>
      %303 = vector.shape_cast %302 : vector<1x1x32x9xbf16> to vector<32x9xbf16>
      %c2_i32_285 = arith.constant 2 : i32
      %304 = arith.muli %c2_i32_285, %arg15 : i32
      %c3_i32 = arith.constant 3 : i32
      %305 = arith.addi %304, %c3_i32 : i32
      %c0_286 = arith.constant 0 : index
      %306 = arith.index_cast %305 : i32 to index
      %c0_287 = arith.constant 0 : index
      %c0_288 = arith.constant 0 : index
      %307 = vector.load %arg13[%c0_286, %306, %c0_287, %c0_288] : memref<2x20x32x10xbf16, #tpu.memory_space<vmem>>, vector<1x1x32x9xbf16>
      %308 = vector.shape_cast %307 : vector<1x1x32x9xbf16> to vector<32x9xbf16>
      %c1_289 = arith.constant 1 : index
      %309 = arith.index_cast %305 : i32 to index
      %c0_290 = arith.constant 0 : index
      %c0_291 = arith.constant 0 : index
      %310 = vector.load %arg13[%c1_289, %309, %c0_290, %c0_291] : memref<2x20x32x10xbf16, #tpu.memory_space<vmem>>, vector<1x1x32x9xbf16>
      %311 = vector.shape_cast %310 : vector<1x1x32x9xbf16> to vector<32x9xbf16>
      %c0_292 = arith.constant 0 : index
      %312 = arith.index_cast %305 : i32 to index
      %c0_293 = arith.constant 0 : index
      %c1_294 = arith.constant 1 : index
      %313 = vector.load %arg13[%c0_292, %312, %c0_293, %c1_294] : memref<2x20x32x10xbf16, #tpu.memory_space<vmem>>, vector<1x1x32x9xbf16>
      %314 = vector.shape_cast %313 : vector<1x1x32x9xbf16> to vector<32x9xbf16>
      %c1_295 = arith.constant 1 : index
      %315 = arith.index_cast %305 : i32 to index
      %c0_296 = arith.constant 0 : index
      %c1_297 = arith.constant 1 : index
      %316 = vector.load %arg13[%c1_295, %315, %c0_296, %c1_297] : memref<2x20x32x10xbf16, #tpu.memory_space<vmem>>, vector<1x1x32x9xbf16>
      %317 = vector.shape_cast %316 : vector<1x1x32x9xbf16> to vector<32x9xbf16>
      %318 = tpu.concatenate %266, %269, %272, %275, %280, %283, %286, %289, %294, %297, %300, %303, %308, %311, %314, %317 in 0 : vector<32x9xbf16>, vector<32x9xbf16>, vector<32x9xbf16>, vector<32x9xbf16>, vector<32x9xbf16>, vector<32x9xbf16>, vector<32x9xbf16>, vector<32x9xbf16>, vector<32x9xbf16>, vector<32x9xbf16>, vector<32x9xbf16>, vector<32x9xbf16>, vector<32x9xbf16>, vector<32x9xbf16>, vector<32x9xbf16>, vector<32x9xbf16> -> vector<512x9xbf16>
      %c0_298 = arith.constant 0 : index
      %c0_299 = arith.constant 0 : index
      %319 = vector.load %arg4[%c0_298, %c0_299] : memref<64x512xbf16, #tpu.memory_space<vmem>>, vector<64x512xbf16>
      %cst_300 = arith.constant dense<0.000000e+00> : vector<64x9xf32>
      %320 = tpu.matmul %319, %318, %cst_300 {dimension_numbers = #tpu.dot_dimension_numbers<[1], [0], [0], [1], [0, 0, 1, 1], [], []>} : vector<64x512xbf16>, vector<512x9xbf16>, vector<64x9xf32> -> vector<64x9xf32>
      %c0_301 = arith.constant 0 : index
      %c0_302 = arith.constant 0 : index
      %321 = vector.load %arg5[%c0_301, %c0_302] : memref<64x1xf32, #tpu.memory_space<vmem>>, vector<64x1xf32>
      %322 = vector.broadcast %321 : vector<64x1xf32> to vector<64x9xf32>
      %323 = arith.addf %320, %322 : vector<64x9xf32>
      %cst_303 = arith.constant 0.000000e+00 : f32
      %324 = vector.broadcast %cst_303 : f32 to vector<64x9xf32>
      %325 = arith.maximumf %323, %324 : vector<64x9xf32>
      %326 = arith.truncf %325 : vector<64x9xf32> to vector<64x9xbf16>
      %327 = arith.index_cast %arg15 : i32 to index
      %c0_304 = arith.constant 0 : index
      %c0_305 = arith.constant 0 : index
      %328 = vector.load %arg14[%327, %c0_304, %c0_305] : memref<9x64x9xbf16, #tpu.memory_space<vmem>>, vector<1x64x9xbf16>
      %329 = vector.shape_cast %328 : vector<1x64x9xbf16> to vector<64x9xbf16>
      %330 = vector.shape_cast %326 : vector<64x9xbf16> to vector<1x64x9xbf16>
      tpu.vector_store %arg14[%327, %c0_304, %c0_305], %330 {strides = array<i32>} : memref<9x64x9xbf16, #tpu.memory_space<vmem>>, vector<1x64x9xbf16>,
    }
    %c9_i32_7 = arith.constant 9 : i32
    %c0 = arith.constant 0 : index
    %c0_8 = arith.constant 0 : index
    %c0_9 = arith.constant 0 : index
    %3 = vector.load %arg14[%c0, %c0_8, %c0_9] : memref<9x64x9xbf16, #tpu.memory_space<vmem>>, vector<1x64x7xbf16>
    %4 = vector.shape_cast %3 : vector<1x64x7xbf16> to vector<64x7xbf16>
    %c0_10 = arith.constant 0 : index
    %c0_11 = arith.constant 0 : index
    %c1 = arith.constant 1 : index
    %5 = vector.load %arg14[%c0_10, %c0_11, %c1] : memref<9x64x9xbf16, #tpu.memory_space<vmem>>, vector<1x64x7xbf16>
    %6 = vector.shape_cast %5 : vector<1x64x7xbf16> to vector<64x7xbf16>
    %c0_12 = arith.constant 0 : index
    %c0_13 = arith.constant 0 : index
    %c2 = arith.constant 2 : index
    %7 = vector.load %arg14[%c0_12, %c0_13, %c2] : memref<9x64x9xbf16, #tpu.memory_space<vmem>>, vector<1x64x7xbf16>
    %8 = vector.shape_cast %7 : vector<1x64x7xbf16> to vector<64x7xbf16>
    %c1_14 = arith.constant 1 : index
    %c0_15 = arith.constant 0 : index
    %c0_16 = arith.constant 0 : index
    %9 = vector.load %arg14[%c1_14, %c0_15, %c0_16] : memref<9x64x9xbf16, #tpu.memory_space<vmem>>, vector<1x64x7xbf16>
    %10 = vector.shape_cast %9 : vector<1x64x7xbf16> to vector<64x7xbf16>
    %c1_17 = arith.constant 1 : index
    %c0_18 = arith.constant 0 : index
    %c1_19 = arith.constant 1 : index
    %11 = vector.load %arg14[%c1_17, %c0_18, %c1_19] : memref<9x64x9xbf16, #tpu.memory_space<vmem>>, vector<1x64x7xbf16>
    %12 = vector.shape_cast %11 : vector<1x64x7xbf16> to vector<64x7xbf16>
    %c1_20 = arith.constant 1 : index
    %c0_21 = arith.constant 0 : index
    %c2_22 = arith.constant 2 : index
    %13 = vector.load %arg14[%c1_20, %c0_21, %c2_22] : memref<9x64x9xbf16, #tpu.memory_space<vmem>>, vector<1x64x7xbf16>
    %14 = vector.shape_cast %13 : vector<1x64x7xbf16> to vector<64x7xbf16>
    %c2_23 = arith.constant 2 : index
    %c0_24 = arith.constant 0 : index
    %c0_25 = arith.constant 0 : index
    %15 = vector.load %arg14[%c2_23, %c0_24, %c0_25] : memref<9x64x9xbf16, #tpu.memory_space<vmem>>, vector<1x64x7xbf16>
    %16 = vector.shape_cast %15 : vector<1x64x7xbf16> to vector<64x7xbf16>
    %c2_26 = arith.constant 2 : index
    %c0_27 = arith.constant 0 : index
    %c1_28 = arith.constant 1 : index
    %17 = vector.load %arg14[%c2_26, %c0_27, %c1_28] : memref<9x64x9xbf16, #tpu.memory_space<vmem>>, vector<1x64x7xbf16>
    %18 = vector.shape_cast %17 : vector<1x64x7xbf16> to vector<64x7xbf16>
    %c2_29 = arith.constant 2 : index
    %c0_30 = arith.constant 0 : index
    %c2_31 = arith.constant 2 : index
    %19 = vector.load %arg14[%c2_29, %c0_30, %c2_31] : memref<9x64x9xbf16, #tpu.memory_space<vmem>>, vector<1x64x7xbf16>
    %20 = vector.shape_cast %19 : vector<1x64x7xbf16> to vector<64x7xbf16>
    %21 = tpu.concatenate %4, %6, %8, %10, %12, %14, %16, %18, %20 in 0 : vector<64x7xbf16>, vector<64x7xbf16>, vector<64x7xbf16>, vector<64x7xbf16>, vector<64x7xbf16>, vector<64x7xbf16>, vector<64x7xbf16>, vector<64x7xbf16>, vector<64x7xbf16> -> vector<576x7xbf16>
    %c0_32 = arith.constant 0 : index
    %c0_33 = arith.constant 0 : index
    %22 = vector.load %arg6[%c0_32, %c0_33] : memref<64x576xbf16, #tpu.memory_space<vmem>>, vector<64x576xbf16>
    %cst = arith.constant dense<0.000000e+00> : vector<64x7xf32>
    %23 = tpu.matmul %22, %21, %cst {dimension_numbers = #tpu.dot_dimension_numbers<[1], [0], [0], [1], [0, 0, 1, 1], [], []>} : vector<64x576xbf16>, vector<576x7xbf16>, vector<64x7xf32> -> vector<64x7xf32>
    %c0_34 = arith.constant 0 : index
    %c0_35 = arith.constant 0 : index
    %24 = vector.load %arg7[%c0_34, %c0_35] : memref<64x1xf32, #tpu.memory_space<vmem>>, vector<64x1xf32>
    %25 = vector.broadcast %24 : vector<64x1xf32> to vector<64x7xf32>
    %26 = arith.addf %23, %25 : vector<64x7xf32>
    %cst_36 = arith.constant 0.000000e+00 : f32
    %27 = vector.broadcast %cst_36 : f32 to vector<64x7xf32>
    %28 = arith.maximumf %26, %27 : vector<64x7xf32>
    %29 = arith.truncf %28 : vector<64x7xf32> to vector<64x7xbf16>
    %c1_37 = arith.constant 1 : index
    %c0_38 = arith.constant 0 : index
    %c0_39 = arith.constant 0 : index
    %30 = vector.load %arg14[%c1_37, %c0_38, %c0_39] : memref<9x64x9xbf16, #tpu.memory_space<vmem>>, vector<1x64x7xbf16>
    %31 = vector.shape_cast %30 : vector<1x64x7xbf16> to vector<64x7xbf16>
    %c1_40 = arith.constant 1 : index
    %c0_41 = arith.constant 0 : index
    %c1_42 = arith.constant 1 : index
    %32 = vector.load %arg14[%c1_40, %c0_41, %c1_42] : memref<9x64x9xbf16, #tpu.memory_space<vmem>>, vector<1x64x7xbf16>
    %33 = vector.shape_cast %32 : vector<1x64x7xbf16> to vector<64x7xbf16>
    %c1_43 = arith.constant 1 : index
    %c0_44 = arith.constant 0 : index
    %c2_45 = arith.constant 2 : index
    %34 = vector.load %arg14[%c1_43, %c0_44, %c2_45] : memref<9x64x9xbf16, #tpu.memory_space<vmem>>, vector<1x64x7xbf16>
    %35 = vector.shape_cast %34 : vector<1x64x7xbf16> to vector<64x7xbf16>
    %c2_46 = arith.constant 2 : index
    %c0_47 = arith.constant 0 : index
    %c0_48 = arith.constant 0 : index
    %36 = vector.load %arg14[%c2_46, %c0_47, %c0_48] : memref<9x64x9xbf16, #tpu.memory_space<vmem>>, vector<1x64x7xbf16>
    %37 = vector.shape_cast %36 : vector<1x64x7xbf16> to vector<64x7xbf16>
    %c2_49 = arith.constant 2 : index
    %c0_50 = arith.constant 0 : index
    %c1_51 = arith.constant 1 : index
    %38 = vector.load %arg14[%c2_49, %c0_50, %c1_51] : memref<9x64x9xbf16, #tpu.memory_space<vmem>>, vector<1x64x7xbf16>
    %39 = vector.shape_cast %38 : vector<1x64x7xbf16> to vector<64x7xbf16>
    %c2_52 = arith.constant 2 : index
    %c0_53 = arith.constant 0 : index
    %c2_54 = arith.constant 2 : index
    %40 = vector.load %arg14[%c2_52, %c0_53, %c2_54] : memref<9x64x9xbf16, #tpu.memory_space<vmem>>, vector<1x64x7xbf16>
    %41 = vector.shape_cast %40 : vector<1x64x7xbf16> to vector<64x7xbf16>
    %c3 = arith.constant 3 : index
    %c0_55 = arith.constant 0 : index
    %c0_56 = arith.constant 0 : index
    %42 = vector.load %arg14[%c3, %c0_55, %c0_56] : memref<9x64x9xbf16, #tpu.memory_space<vmem>>, vector<1x64x7xbf16>
    %43 = vector.shape_cast %42 : vector<1x64x7xbf16> to vector<64x7xbf16>
    %c3_57 = arith.constant 3 : index
    %c0_58 = arith.constant 0 : index
    %c1_59 = arith.constant 1 : index
    %44 = vector.load %arg14[%c3_57, %c0_58, %c1_59] : memref<9x64x9xbf16, #tpu.memory_space<vmem>>, vector<1x64x7xbf16>
    %45 = vector.shape_cast %44 : vector<1x64x7xbf16> to vector<64x7xbf16>
    %c3_60 = arith.constant 3 : index
    %c0_61 = arith.constant 0 : index
    %c2_62 = arith.constant 2 : index
    %46 = vector.load %arg14[%c3_60, %c0_61, %c2_62] : memref<9x64x9xbf16, #tpu.memory_space<vmem>>, vector<1x64x7xbf16>
    %47 = vector.shape_cast %46 : vector<1x64x7xbf16> to vector<64x7xbf16>
    %48 = tpu.concatenate %31, %33, %35, %37, %39, %41, %43, %45, %47 in 0 : vector<64x7xbf16>, vector<64x7xbf16>, vector<64x7xbf16>, vector<64x7xbf16>, vector<64x7xbf16>, vector<64x7xbf16>, vector<64x7xbf16>, vector<64x7xbf16>, vector<64x7xbf16> -> vector<576x7xbf16>
    %c0_63 = arith.constant 0 : index
    %c0_64 = arith.constant 0 : index
    %49 = vector.load %arg6[%c0_63, %c0_64] : memref<64x576xbf16, #tpu.memory_space<vmem>>, vector<64x576xbf16>
    %cst_65 = arith.constant dense<0.000000e+00> : vector<64x7xf32>
    %50 = tpu.matmul %49, %48, %cst_65 {dimension_numbers = #tpu.dot_dimension_numbers<[1], [0], [0], [1], [0, 0, 1, 1], [], []>} : vector<64x576xbf16>, vector<576x7xbf16>, vector<64x7xf32> -> vector<64x7xf32>
    %c0_66 = arith.constant 0 : index
    %c0_67 = arith.constant 0 : index
    %51 = vector.load %arg7[%c0_66, %c0_67] : memref<64x1xf32, #tpu.memory_space<vmem>>, vector<64x1xf32>
    %52 = vector.broadcast %51 : vector<64x1xf32> to vector<64x7xf32>
    %53 = arith.addf %50, %52 : vector<64x7xf32>
    %cst_68 = arith.constant 0.000000e+00 : f32
    %54 = vector.broadcast %cst_68 : f32 to vector<64x7xf32>
    %55 = arith.maximumf %53, %54 : vector<64x7xf32>
    %56 = arith.truncf %55 : vector<64x7xf32> to vector<64x7xbf16>
    %c2_69 = arith.constant 2 : index
    %c0_70 = arith.constant 0 : index
    %c0_71 = arith.constant 0 : index
    %57 = vector.load %arg14[%c2_69, %c0_70, %c0_71] : memref<9x64x9xbf16, #tpu.memory_space<vmem>>, vector<1x64x7xbf16>
    %58 = vector.shape_cast %57 : vector<1x64x7xbf16> to vector<64x7xbf16>
    %c2_72 = arith.constant 2 : index
    %c0_73 = arith.constant 0 : index
    %c1_74 = arith.constant 1 : index
    %59 = vector.load %arg14[%c2_72, %c0_73, %c1_74] : memref<9x64x9xbf16, #tpu.memory_space<vmem>>, vector<1x64x7xbf16>
    %60 = vector.shape_cast %59 : vector<1x64x7xbf16> to vector<64x7xbf16>
    %c2_75 = arith.constant 2 : index
    %c0_76 = arith.constant 0 : index
    %c2_77 = arith.constant 2 : index
    %61 = vector.load %arg14[%c2_75, %c0_76, %c2_77] : memref<9x64x9xbf16, #tpu.memory_space<vmem>>, vector<1x64x7xbf16>
    %62 = vector.shape_cast %61 : vector<1x64x7xbf16> to vector<64x7xbf16>
    %c3_78 = arith.constant 3 : index
    %c0_79 = arith.constant 0 : index
    %c0_80 = arith.constant 0 : index
    %63 = vector.load %arg14[%c3_78, %c0_79, %c0_80] : memref<9x64x9xbf16, #tpu.memory_space<vmem>>, vector<1x64x7xbf16>
    %64 = vector.shape_cast %63 : vector<1x64x7xbf16> to vector<64x7xbf16>
    %c3_81 = arith.constant 3 : index
    %c0_82 = arith.constant 0 : index
    %c1_83 = arith.constant 1 : index
    %65 = vector.load %arg14[%c3_81, %c0_82, %c1_83] : memref<9x64x9xbf16, #tpu.memory_space<vmem>>, vector<1x64x7xbf16>
    %66 = vector.shape_cast %65 : vector<1x64x7xbf16> to vector<64x7xbf16>
    %c3_84 = arith.constant 3 : index
    %c0_85 = arith.constant 0 : index
    %c2_86 = arith.constant 2 : index
    %67 = vector.load %arg14[%c3_84, %c0_85, %c2_86] : memref<9x64x9xbf16, #tpu.memory_space<vmem>>, vector<1x64x7xbf16>
    %68 = vector.shape_cast %67 : vector<1x64x7xbf16> to vector<64x7xbf16>
    %c4 = arith.constant 4 : index
    %c0_87 = arith.constant 0 : index
    %c0_88 = arith.constant 0 : index
    %69 = vector.load %arg14[%c4, %c0_87, %c0_88] : memref<9x64x9xbf16, #tpu.memory_space<vmem>>, vector<1x64x7xbf16>
    %70 = vector.shape_cast %69 : vector<1x64x7xbf16> to vector<64x7xbf16>
    %c4_89 = arith.constant 4 : index
    %c0_90 = arith.constant 0 : index
    %c1_91 = arith.constant 1 : index
    %71 = vector.load %arg14[%c4_89, %c0_90, %c1_91] : memref<9x64x9xbf16, #tpu.memory_space<vmem>>, vector<1x64x7xbf16>
    %72 = vector.shape_cast %71 : vector<1x64x7xbf16> to vector<64x7xbf16>
    %c4_92 = arith.constant 4 : index
    %c0_93 = arith.constant 0 : index
    %c2_94 = arith.constant 2 : index
    %73 = vector.load %arg14[%c4_92, %c0_93, %c2_94] : memref<9x64x9xbf16, #tpu.memory_space<vmem>>, vector<1x64x7xbf16>
    %74 = vector.shape_cast %73 : vector<1x64x7xbf16> to vector<64x7xbf16>
    %75 = tpu.concatenate %58, %60, %62, %64, %66, %68, %70, %72, %74 in 0 : vector<64x7xbf16>, vector<64x7xbf16>, vector<64x7xbf16>, vector<64x7xbf16>, vector<64x7xbf16>, vector<64x7xbf16>, vector<64x7xbf16>, vector<64x7xbf16>, vector<64x7xbf16> -> vector<576x7xbf16>
    %c0_95 = arith.constant 0 : index
    %c0_96 = arith.constant 0 : index
    %76 = vector.load %arg6[%c0_95, %c0_96] : memref<64x576xbf16, #tpu.memory_space<vmem>>, vector<64x576xbf16>
    %cst_97 = arith.constant dense<0.000000e+00> : vector<64x7xf32>
    %77 = tpu.matmul %76, %75, %cst_97 {dimension_numbers = #tpu.dot_dimension_numbers<[1], [0], [0], [1], [0, 0, 1, 1], [], []>} : vector<64x576xbf16>, vector<576x7xbf16>, vector<64x7xf32> -> vector<64x7xf32>
    %c0_98 = arith.constant 0 : index
    %c0_99 = arith.constant 0 : index
    %78 = vector.load %arg7[%c0_98, %c0_99] : memref<64x1xf32, #tpu.memory_space<vmem>>, vector<64x1xf32>
    %79 = vector.broadcast %78 : vector<64x1xf32> to vector<64x7xf32>
    %80 = arith.addf %77, %79 : vector<64x7xf32>
    %cst_100 = arith.constant 0.000000e+00 : f32
    %81 = vector.broadcast %cst_100 : f32 to vector<64x7xf32>
    %82 = arith.maximumf %80, %81 : vector<64x7xf32>
    %83 = arith.truncf %82 : vector<64x7xf32> to vector<64x7xbf16>
    %c3_101 = arith.constant 3 : index
    %c0_102 = arith.constant 0 : index
    %c0_103 = arith.constant 0 : index
    %84 = vector.load %arg14[%c3_101, %c0_102, %c0_103] : memref<9x64x9xbf16, #tpu.memory_space<vmem>>, vector<1x64x7xbf16>
    %85 = vector.shape_cast %84 : vector<1x64x7xbf16> to vector<64x7xbf16>
    %c3_104 = arith.constant 3 : index
    %c0_105 = arith.constant 0 : index
    %c1_106 = arith.constant 1 : index
    %86 = vector.load %arg14[%c3_104, %c0_105, %c1_106] : memref<9x64x9xbf16, #tpu.memory_space<vmem>>, vector<1x64x7xbf16>
    %87 = vector.shape_cast %86 : vector<1x64x7xbf16> to vector<64x7xbf16>
    %c3_107 = arith.constant 3 : index
    %c0_108 = arith.constant 0 : index
    %c2_109 = arith.constant 2 : index
    %88 = vector.load %arg14[%c3_107, %c0_108, %c2_109] : memref<9x64x9xbf16, #tpu.memory_space<vmem>>, vector<1x64x7xbf16>
    %89 = vector.shape_cast %88 : vector<1x64x7xbf16> to vector<64x7xbf16>
    %c4_110 = arith.constant 4 : index
    %c0_111 = arith.constant 0 : index
    %c0_112 = arith.constant 0 : index
    %90 = vector.load %arg14[%c4_110, %c0_111, %c0_112] : memref<9x64x9xbf16, #tpu.memory_space<vmem>>, vector<1x64x7xbf16>
    %91 = vector.shape_cast %90 : vector<1x64x7xbf16> to vector<64x7xbf16>
    %c4_113 = arith.constant 4 : index
    %c0_114 = arith.constant 0 : index
    %c1_115 = arith.constant 1 : index
    %92 = vector.load %arg14[%c4_113, %c0_114, %c1_115] : memref<9x64x9xbf16, #tpu.memory_space<vmem>>, vector<1x64x7xbf16>
    %93 = vector.shape_cast %92 : vector<1x64x7xbf16> to vector<64x7xbf16>
    %c4_116 = arith.constant 4 : index
    %c0_117 = arith.constant 0 : index
    %c2_118 = arith.constant 2 : index
    %94 = vector.load %arg14[%c4_116, %c0_117, %c2_118] : memref<9x64x9xbf16, #tpu.memory_space<vmem>>, vector<1x64x7xbf16>
    %95 = vector.shape_cast %94 : vector<1x64x7xbf16> to vector<64x7xbf16>
    %c5 = arith.constant 5 : index
    %c0_119 = arith.constant 0 : index
    %c0_120 = arith.constant 0 : index
    %96 = vector.load %arg14[%c5, %c0_119, %c0_120] : memref<9x64x9xbf16, #tpu.memory_space<vmem>>, vector<1x64x7xbf16>
    %97 = vector.shape_cast %96 : vector<1x64x7xbf16> to vector<64x7xbf16>
    %c5_121 = arith.constant 5 : index
    %c0_122 = arith.constant 0 : index
    %c1_123 = arith.constant 1 : index
    %98 = vector.load %arg14[%c5_121, %c0_122, %c1_123] : memref<9x64x9xbf16, #tpu.memory_space<vmem>>, vector<1x64x7xbf16>
    %99 = vector.shape_cast %98 : vector<1x64x7xbf16> to vector<64x7xbf16>
    %c5_124 = arith.constant 5 : index
    %c0_125 = arith.constant 0 : index
    %c2_126 = arith.constant 2 : index
    %100 = vector.load %arg14[%c5_124, %c0_125, %c2_126] : memref<9x64x9xbf16, #tpu.memory_space<vmem>>, vector<1x64x7xbf16>
    %101 = vector.shape_cast %100 : vector<1x64x7xbf16> to vector<64x7xbf16>
    %102 = tpu.concatenate %85, %87, %89, %91, %93, %95, %97, %99, %101 in 0 : vector<64x7xbf16>, vector<64x7xbf16>, vector<64x7xbf16>, vector<64x7xbf16>, vector<64x7xbf16>, vector<64x7xbf16>, vector<64x7xbf16>, vector<64x7xbf16>, vector<64x7xbf16> -> vector<576x7xbf16>
    %c0_127 = arith.constant 0 : index
    %c0_128 = arith.constant 0 : index
    %103 = vector.load %arg6[%c0_127, %c0_128] : memref<64x576xbf16, #tpu.memory_space<vmem>>, vector<64x576xbf16>
    %cst_129 = arith.constant dense<0.000000e+00> : vector<64x7xf32>
    %104 = tpu.matmul %103, %102, %cst_129 {dimension_numbers = #tpu.dot_dimension_numbers<[1], [0], [0], [1], [0, 0, 1, 1], [], []>} : vector<64x576xbf16>, vector<576x7xbf16>, vector<64x7xf32> -> vector<64x7xf32>
    %c0_130 = arith.constant 0 : index
    %c0_131 = arith.constant 0 : index
    %105 = vector.load %arg7[%c0_130, %c0_131] : memref<64x1xf32, #tpu.memory_space<vmem>>, vector<64x1xf32>
    %106 = vector.broadcast %105 : vector<64x1xf32> to vector<64x7xf32>
    %107 = arith.addf %104, %106 : vector<64x7xf32>
    %cst_132 = arith.constant 0.000000e+00 : f32
    %108 = vector.broadcast %cst_132 : f32 to vector<64x7xf32>
    %109 = arith.maximumf %107, %108 : vector<64x7xf32>
    %110 = arith.truncf %109 : vector<64x7xf32> to vector<64x7xbf16>
    %c4_133 = arith.constant 4 : index
    %c0_134 = arith.constant 0 : index
    %c0_135 = arith.constant 0 : index
    %111 = vector.load %arg14[%c4_133, %c0_134, %c0_135] : memref<9x64x9xbf16, #tpu.memory_space<vmem>>, vector<1x64x7xbf16>
    %112 = vector.shape_cast %111 : vector<1x64x7xbf16> to vector<64x7xbf16>
    %c4_136 = arith.constant 4 : index
    %c0_137 = arith.constant 0 : index
    %c1_138 = arith.constant 1 : index
    %113 = vector.load %arg14[%c4_136, %c0_137, %c1_138] : memref<9x64x9xbf16, #tpu.memory_space<vmem>>, vector<1x64x7xbf16>
    %114 = vector.shape_cast %113 : vector<1x64x7xbf16> to vector<64x7xbf16>
    %c4_139 = arith.constant 4 : index
    %c0_140 = arith.constant 0 : index
    %c2_141 = arith.constant 2 : index
    %115 = vector.load %arg14[%c4_139, %c0_140, %c2_141] : memref<9x64x9xbf16, #tpu.memory_space<vmem>>, vector<1x64x7xbf16>
    %116 = vector.shape_cast %115 : vector<1x64x7xbf16> to vector<64x7xbf16>
    %c5_142 = arith.constant 5 : index
    %c0_143 = arith.constant 0 : index
    %c0_144 = arith.constant 0 : index
    %117 = vector.load %arg14[%c5_142, %c0_143, %c0_144] : memref<9x64x9xbf16, #tpu.memory_space<vmem>>, vector<1x64x7xbf16>
    %118 = vector.shape_cast %117 : vector<1x64x7xbf16> to vector<64x7xbf16>
    %c5_145 = arith.constant 5 : index
    %c0_146 = arith.constant 0 : index
    %c1_147 = arith.constant 1 : index
    %119 = vector.load %arg14[%c5_145, %c0_146, %c1_147] : memref<9x64x9xbf16, #tpu.memory_space<vmem>>, vector<1x64x7xbf16>
    %120 = vector.shape_cast %119 : vector<1x64x7xbf16> to vector<64x7xbf16>
    %c5_148 = arith.constant 5 : index
    %c0_149 = arith.constant 0 : index
    %c2_150 = arith.constant 2 : index
    %121 = vector.load %arg14[%c5_148, %c0_149, %c2_150] : memref<9x64x9xbf16, #tpu.memory_space<vmem>>, vector<1x64x7xbf16>
    %122 = vector.shape_cast %121 : vector<1x64x7xbf16> to vector<64x7xbf16>
    %c6 = arith.constant 6 : index
    %c0_151 = arith.constant 0 : index
    %c0_152 = arith.constant 0 : index
    %123 = vector.load %arg14[%c6, %c0_151, %c0_152] : memref<9x64x9xbf16, #tpu.memory_space<vmem>>, vector<1x64x7xbf16>
    %124 = vector.shape_cast %123 : vector<1x64x7xbf16> to vector<64x7xbf16>
    %c6_153 = arith.constant 6 : index
    %c0_154 = arith.constant 0 : index
    %c1_155 = arith.constant 1 : index
    %125 = vector.load %arg14[%c6_153, %c0_154, %c1_155] : memref<9x64x9xbf16, #tpu.memory_space<vmem>>, vector<1x64x7xbf16>
    %126 = vector.shape_cast %125 : vector<1x64x7xbf16> to vector<64x7xbf16>
    %c6_156 = arith.constant 6 : index
    %c0_157 = arith.constant 0 : index
    %c2_158 = arith.constant 2 : index
    %127 = vector.load %arg14[%c6_156, %c0_157, %c2_158] : memref<9x64x9xbf16, #tpu.memory_space<vmem>>, vector<1x64x7xbf16>
    %128 = vector.shape_cast %127 : vector<1x64x7xbf16> to vector<64x7xbf16>
    %129 = tpu.concatenate %112, %114, %116, %118, %120, %122, %124, %126, %128 in 0 : vector<64x7xbf16>, vector<64x7xbf16>, vector<64x7xbf16>, vector<64x7xbf16>, vector<64x7xbf16>, vector<64x7xbf16>, vector<64x7xbf16>, vector<64x7xbf16>, vector<64x7xbf16> -> vector<576x7xbf16>
    %c0_159 = arith.constant 0 : index
    %c0_160 = arith.constant 0 : index
    %130 = vector.load %arg6[%c0_159, %c0_160] : memref<64x576xbf16, #tpu.memory_space<vmem>>, vector<64x576xbf16>
    %cst_161 = arith.constant dense<0.000000e+00> : vector<64x7xf32>
    %131 = tpu.matmul %130, %129, %cst_161 {dimension_numbers = #tpu.dot_dimension_numbers<[1], [0], [0], [1], [0, 0, 1, 1], [], []>} : vector<64x576xbf16>, vector<576x7xbf16>, vector<64x7xf32> -> vector<64x7xf32>
    %c0_162 = arith.constant 0 : index
    %c0_163 = arith.constant 0 : index
    %132 = vector.load %arg7[%c0_162, %c0_163] : memref<64x1xf32, #tpu.memory_space<vmem>>, vector<64x1xf32>
    %133 = vector.broadcast %132 : vector<64x1xf32> to vector<64x7xf32>
    %134 = arith.addf %131, %133 : vector<64x7xf32>
    %cst_164 = arith.constant 0.000000e+00 : f32
    %135 = vector.broadcast %cst_164 : f32 to vector<64x7xf32>
    %136 = arith.maximumf %134, %135 : vector<64x7xf32>
    %137 = arith.truncf %136 : vector<64x7xf32> to vector<64x7xbf16>
    %c5_165 = arith.constant 5 : index
    %c0_166 = arith.constant 0 : index
    %c0_167 = arith.constant 0 : index
    %138 = vector.load %arg14[%c5_165, %c0_166, %c0_167] : memref<9x64x9xbf16, #tpu.memory_space<vmem>>, vector<1x64x7xbf16>
    %139 = vector.shape_cast %138 : vector<1x64x7xbf16> to vector<64x7xbf16>
    %c5_168 = arith.constant 5 : index
    %c0_169 = arith.constant 0 : index
    %c1_170 = arith.constant 1 : index
    %140 = vector.load %arg14[%c5_168, %c0_169, %c1_170] : memref<9x64x9xbf16, #tpu.memory_space<vmem>>, vector<1x64x7xbf16>
    %141 = vector.shape_cast %140 : vector<1x64x7xbf16> to vector<64x7xbf16>
    %c5_171 = arith.constant 5 : index
    %c0_172 = arith.constant 0 : index
    %c2_173 = arith.constant 2 : index
    %142 = vector.load %arg14[%c5_171, %c0_172, %c2_173] : memref<9x64x9xbf16, #tpu.memory_space<vmem>>, vector<1x64x7xbf16>
    %143 = vector.shape_cast %142 : vector<1x64x7xbf16> to vector<64x7xbf16>
    %c6_174 = arith.constant 6 : index
    %c0_175 = arith.constant 0 : index
    %c0_176 = arith.constant 0 : index
    %144 = vector.load %arg14[%c6_174, %c0_175, %c0_176] : memref<9x64x9xbf16, #tpu.memory_space<vmem>>, vector<1x64x7xbf16>
    %145 = vector.shape_cast %144 : vector<1x64x7xbf16> to vector<64x7xbf16>
    %c6_177 = arith.constant 6 : index
    %c0_178 = arith.constant 0 : index
    %c1_179 = arith.constant 1 : index
    %146 = vector.load %arg14[%c6_177, %c0_178, %c1_179] : memref<9x64x9xbf16, #tpu.memory_space<vmem>>, vector<1x64x7xbf16>
    %147 = vector.shape_cast %146 : vector<1x64x7xbf16> to vector<64x7xbf16>
    %c6_180 = arith.constant 6 : index
    %c0_181 = arith.constant 0 : index
    %c2_182 = arith.constant 2 : index
    %148 = vector.load %arg14[%c6_180, %c0_181, %c2_182] : memref<9x64x9xbf16, #tpu.memory_space<vmem>>, vector<1x64x7xbf16>
    %149 = vector.shape_cast %148 : vector<1x64x7xbf16> to vector<64x7xbf16>
    %c7 = arith.constant 7 : index
    %c0_183 = arith.constant 0 : index
    %c0_184 = arith.constant 0 : index
    %150 = vector.load %arg14[%c7, %c0_183, %c0_184] : memref<9x64x9xbf16, #tpu.memory_space<vmem>>, vector<1x64x7xbf16>
    %151 = vector.shape_cast %150 : vector<1x64x7xbf16> to vector<64x7xbf16>
    %c7_185 = arith.constant 7 : index
    %c0_186 = arith.constant 0 : index
    %c1_187 = arith.constant 1 : index
    %152 = vector.load %arg14[%c7_185, %c0_186, %c1_187] : memref<9x64x9xbf16, #tpu.memory_space<vmem>>, vector<1x64x7xbf16>
    %153 = vector.shape_cast %152 : vector<1x64x7xbf16> to vector<64x7xbf16>
    %c7_188 = arith.constant 7 : index
    %c0_189 = arith.constant 0 : index
    %c2_190 = arith.constant 2 : index
    %154 = vector.load %arg14[%c7_188, %c0_189, %c2_190] : memref<9x64x9xbf16, #tpu.memory_space<vmem>>, vector<1x64x7xbf16>
    %155 = vector.shape_cast %154 : vector<1x64x7xbf16> to vector<64x7xbf16>
    %156 = tpu.concatenate %139, %141, %143, %145, %147, %149, %151, %153, %155 in 0 : vector<64x7xbf16>, vector<64x7xbf16>, vector<64x7xbf16>, vector<64x7xbf16>, vector<64x7xbf16>, vector<64x7xbf16>, vector<64x7xbf16>, vector<64x7xbf16>, vector<64x7xbf16> -> vector<576x7xbf16>
    %c0_191 = arith.constant 0 : index
    %c0_192 = arith.constant 0 : index
    %157 = vector.load %arg6[%c0_191, %c0_192] : memref<64x576xbf16, #tpu.memory_space<vmem>>, vector<64x576xbf16>
    %cst_193 = arith.constant dense<0.000000e+00> : vector<64x7xf32>
    %158 = tpu.matmul %157, %156, %cst_193 {dimension_numbers = #tpu.dot_dimension_numbers<[1], [0], [0], [1], [0, 0, 1, 1], [], []>} : vector<64x576xbf16>, vector<576x7xbf16>, vector<64x7xf32> -> vector<64x7xf32>
    %c0_194 = arith.constant 0 : index
    %c0_195 = arith.constant 0 : index
    %159 = vector.load %arg7[%c0_194, %c0_195] : memref<64x1xf32, #tpu.memory_space<vmem>>, vector<64x1xf32>
    %160 = vector.broadcast %159 : vector<64x1xf32> to vector<64x7xf32>
    %161 = arith.addf %158, %160 : vector<64x7xf32>
    %cst_196 = arith.constant 0.000000e+00 : f32
    %162 = vector.broadcast %cst_196 : f32 to vector<64x7xf32>
    %163 = arith.maximumf %161, %162 : vector<64x7xf32>
    %164 = arith.truncf %163 : vector<64x7xf32> to vector<64x7xbf16>
    %c6_197 = arith.constant 6 : index
    %c0_198 = arith.constant 0 : index
    %c0_199 = arith.constant 0 : index
    %165 = vector.load %arg14[%c6_197, %c0_198, %c0_199] : memref<9x64x9xbf16, #tpu.memory_space<vmem>>, vector<1x64x7xbf16>
    %166 = vector.shape_cast %165 : vector<1x64x7xbf16> to vector<64x7xbf16>
    %c6_200 = arith.constant 6 : index
    %c0_201 = arith.constant 0 : index
    %c1_202 = arith.constant 1 : index
    %167 = vector.load %arg14[%c6_200, %c0_201, %c1_202] : memref<9x64x9xbf16, #tpu.memory_space<vmem>>, vector<1x64x7xbf16>
    %168 = vector.shape_cast %167 : vector<1x64x7xbf16> to vector<64x7xbf16>
    %c6_203 = arith.constant 6 : index
    %c0_204 = arith.constant 0 : index
    %c2_205 = arith.constant 2 : index
    %169 = vector.load %arg14[%c6_203, %c0_204, %c2_205] : memref<9x64x9xbf16, #tpu.memory_space<vmem>>, vector<1x64x7xbf16>
    %170 = vector.shape_cast %169 : vector<1x64x7xbf16> to vector<64x7xbf16>
    %c7_206 = arith.constant 7 : index
    %c0_207 = arith.constant 0 : index
    %c0_208 = arith.constant 0 : index
    %171 = vector.load %arg14[%c7_206, %c0_207, %c0_208] : memref<9x64x9xbf16, #tpu.memory_space<vmem>>, vector<1x64x7xbf16>
    %172 = vector.shape_cast %171 : vector<1x64x7xbf16> to vector<64x7xbf16>
    %c7_209 = arith.constant 7 : index
    %c0_210 = arith.constant 0 : index
    %c1_211 = arith.constant 1 : index
    %173 = vector.load %arg14[%c7_209, %c0_210, %c1_211] : memref<9x64x9xbf16, #tpu.memory_space<vmem>>, vector<1x64x7xbf16>
    %174 = vector.shape_cast %173 : vector<1x64x7xbf16> to vector<64x7xbf16>
    %c7_212 = arith.constant 7 : index
    %c0_213 = arith.constant 0 : index
    %c2_214 = arith.constant 2 : index
    %175 = vector.load %arg14[%c7_212, %c0_213, %c2_214] : memref<9x64x9xbf16, #tpu.memory_space<vmem>>, vector<1x64x7xbf16>
    %176 = vector.shape_cast %175 : vector<1x64x7xbf16> to vector<64x7xbf16>
    %c8 = arith.constant 8 : index
    %c0_215 = arith.constant 0 : index
    %c0_216 = arith.constant 0 : index
    %177 = vector.load %arg14[%c8, %c0_215, %c0_216] : memref<9x64x9xbf16, #tpu.memory_space<vmem>>, vector<1x64x7xbf16>
    %178 = vector.shape_cast %177 : vector<1x64x7xbf16> to vector<64x7xbf16>
    %c8_217 = arith.constant 8 : index
    %c0_218 = arith.constant 0 : index
    %c1_219 = arith.constant 1 : index
    %179 = vector.load %arg14[%c8_217, %c0_218, %c1_219] : memref<9x64x9xbf16, #tpu.memory_space<vmem>>, vector<1x64x7xbf16>
    %180 = vector.shape_cast %179 : vector<1x64x7xbf16> to vector<64x7xbf16>
    %c8_220 = arith.constant 8 : index
    %c0_221 = arith.constant 0 : index
    %c2_222 = arith.constant 2 : index
    %181 = vector.load %arg14[%c8_220, %c0_221, %c2_222] : memref<9x64x9xbf16, #tpu.memory_space<vmem>>, vector<1x64x7xbf16>
    %182 = vector.shape_cast %181 : vector<1x64x7xbf16> to vector<64x7xbf16>
    %183 = tpu.concatenate %166, %168, %170, %172, %174, %176, %178, %180, %182 in 0 : vector<64x7xbf16>, vector<64x7xbf16>, vector<64x7xbf16>, vector<64x7xbf16>, vector<64x7xbf16>, vector<64x7xbf16>, vector<64x7xbf16>, vector<64x7xbf16>, vector<64x7xbf16> -> vector<576x7xbf16>
    %c0_223 = arith.constant 0 : index
    %c0_224 = arith.constant 0 : index
    %184 = vector.load %arg6[%c0_223, %c0_224] : memref<64x576xbf16, #tpu.memory_space<vmem>>, vector<64x576xbf16>
    %cst_225 = arith.constant dense<0.000000e+00> : vector<64x7xf32>
    %185 = tpu.matmul %184, %183, %cst_225 {dimension_numbers = #tpu.dot_dimension_numbers<[1], [0], [0], [1], [0, 0, 1, 1], [], []>} : vector<64x576xbf16>, vector<576x7xbf16>, vector<64x7xf32> -> vector<64x7xf32>
    %c0_226 = arith.constant 0 : index
    %c0_227 = arith.constant 0 : index
    %186 = vector.load %arg7[%c0_226, %c0_227] : memref<64x1xf32, #tpu.memory_space<vmem>>, vector<64x1xf32>
    %187 = vector.broadcast %186 : vector<64x1xf32> to vector<64x7xf32>
    %188 = arith.addf %185, %187 : vector<64x7xf32>
    %cst_228 = arith.constant 0.000000e+00 : f32
    %189 = vector.broadcast %cst_228 : f32 to vector<64x7xf32>
    %190 = arith.maximumf %188, %189 : vector<64x7xf32>
    %191 = arith.truncf %190 : vector<64x7xf32> to vector<64x7xbf16>
    %192 = vector.extract_strided_slice %29 {offsets = [0, 0], sizes = [64, 1], strides = [1, 1]} : vector<64x7xbf16> to vector<64x1xbf16>
    %193 = vector.extract_strided_slice %29 {offsets = [0, 1], sizes = [64, 1], strides = [1, 1]} : vector<64x7xbf16> to vector<64x1xbf16>
    %194 = vector.extract_strided_slice %29 {offsets = [0, 2], sizes = [64, 1], strides = [1, 1]} : vector<64x7xbf16> to vector<64x1xbf16>
    %195 = vector.extract_strided_slice %29 {offsets = [0, 3], sizes = [64, 1], strides = [1, 1]} : vector<64x7xbf16> to vector<64x1xbf16>
    %196 = vector.extract_strided_slice %29 {offsets = [0, 4], sizes = [64, 1], strides = [1, 1]} : vector<64x7xbf16> to vector<64x1xbf16>
    %197 = vector.extract_strided_slice %29 {offsets = [0, 5], sizes = [64, 1], strides = [1, 1]} : vector<64x7xbf16> to vector<64x1xbf16>
    %198 = vector.extract_strided_slice %29 {offsets = [0, 6], sizes = [64, 1], strides = [1, 1]} : vector<64x7xbf16> to vector<64x1xbf16>
    %199 = vector.extract_strided_slice %56 {offsets = [0, 0], sizes = [64, 1], strides = [1, 1]} : vector<64x7xbf16> to vector<64x1xbf16>
    %200 = vector.extract_strided_slice %56 {offsets = [0, 1], sizes = [64, 1], strides = [1, 1]} : vector<64x7xbf16> to vector<64x1xbf16>
    %201 = vector.extract_strided_slice %56 {offsets = [0, 2], sizes = [64, 1], strides = [1, 1]} : vector<64x7xbf16> to vector<64x1xbf16>
    %202 = vector.extract_strided_slice %56 {offsets = [0, 3], sizes = [64, 1], strides = [1, 1]} : vector<64x7xbf16> to vector<64x1xbf16>
    %203 = vector.extract_strided_slice %56 {offsets = [0, 4], sizes = [64, 1], strides = [1, 1]} : vector<64x7xbf16> to vector<64x1xbf16>
    %204 = vector.extract_strided_slice %56 {offsets = [0, 5], sizes = [64, 1], strides = [1, 1]} : vector<64x7xbf16> to vector<64x1xbf16>
    %205 = vector.extract_strided_slice %56 {offsets = [0, 6], sizes = [64, 1], strides = [1, 1]} : vector<64x7xbf16> to vector<64x1xbf16>
    %206 = vector.extract_strided_slice %83 {offsets = [0, 0], sizes = [64, 1], strides = [1, 1]} : vector<64x7xbf16> to vector<64x1xbf16>
    %207 = vector.extract_strided_slice %83 {offsets = [0, 1], sizes = [64, 1], strides = [1, 1]} : vector<64x7xbf16> to vector<64x1xbf16>
    %208 = vector.extract_strided_slice %83 {offsets = [0, 2], sizes = [64, 1], strides = [1, 1]} : vector<64x7xbf16> to vector<64x1xbf16>
    %209 = vector.extract_strided_slice %83 {offsets = [0, 3], sizes = [64, 1], strides = [1, 1]} : vector<64x7xbf16> to vector<64x1xbf16>
    %210 = vector.extract_strided_slice %83 {offsets = [0, 4], sizes = [64, 1], strides = [1, 1]} : vector<64x7xbf16> to vector<64x1xbf16>
    %211 = vector.extract_strided_slice %83 {offsets = [0, 5], sizes = [64, 1], strides = [1, 1]} : vector<64x7xbf16> to vector<64x1xbf16>
    %212 = vector.extract_strided_slice %83 {offsets = [0, 6], sizes = [64, 1], strides = [1, 1]} : vector<64x7xbf16> to vector<64x1xbf16>
    %213 = vector.extract_strided_slice %110 {offsets = [0, 0], sizes = [64, 1], strides = [1, 1]} : vector<64x7xbf16> to vector<64x1xbf16>
    %214 = vector.extract_strided_slice %110 {offsets = [0, 1], sizes = [64, 1], strides = [1, 1]} : vector<64x7xbf16> to vector<64x1xbf16>
    %215 = vector.extract_strided_slice %110 {offsets = [0, 2], sizes = [64, 1], strides = [1, 1]} : vector<64x7xbf16> to vector<64x1xbf16>
    %216 = vector.extract_strided_slice %110 {offsets = [0, 3], sizes = [64, 1], strides = [1, 1]} : vector<64x7xbf16> to vector<64x1xbf16>
    %217 = vector.extract_strided_slice %110 {offsets = [0, 4], sizes = [64, 1], strides = [1, 1]} : vector<64x7xbf16> to vector<64x1xbf16>
    %218 = vector.extract_strided_slice %110 {offsets = [0, 5], sizes = [64, 1], strides = [1, 1]} : vector<64x7xbf16> to vector<64x1xbf16>
    %219 = vector.extract_strided_slice %110 {offsets = [0, 6], sizes = [64, 1], strides = [1, 1]} : vector<64x7xbf16> to vector<64x1xbf16>
    %220 = vector.extract_strided_slice %137 {offsets = [0, 0], sizes = [64, 1], strides = [1, 1]} : vector<64x7xbf16> to vector<64x1xbf16>
    %221 = vector.extract_strided_slice %137 {offsets = [0, 1], sizes = [64, 1], strides = [1, 1]} : vector<64x7xbf16> to vector<64x1xbf16>
    %222 = vector.extract_strided_slice %137 {offsets = [0, 2], sizes = [64, 1], strides = [1, 1]} : vector<64x7xbf16> to vector<64x1xbf16>
    %223 = vector.extract_strided_slice %137 {offsets = [0, 3], sizes = [64, 1], strides = [1, 1]} : vector<64x7xbf16> to vector<64x1xbf16>
    %224 = vector.extract_strided_slice %137 {offsets = [0, 4], sizes = [64, 1], strides = [1, 1]} : vector<64x7xbf16> to vector<64x1xbf16>
    %225 = vector.extract_strided_slice %137 {offsets = [0, 5], sizes = [64, 1], strides = [1, 1]} : vector<64x7xbf16> to vector<64x1xbf16>
    %226 = vector.extract_strided_slice %137 {offsets = [0, 6], sizes = [64, 1], strides = [1, 1]} : vector<64x7xbf16> to vector<64x1xbf16>
    %227 = vector.extract_strided_slice %164 {offsets = [0, 0], sizes = [64, 1], strides = [1, 1]} : vector<64x7xbf16> to vector<64x1xbf16>
    %228 = vector.extract_strided_slice %164 {offsets = [0, 1], sizes = [64, 1], strides = [1, 1]} : vector<64x7xbf16> to vector<64x1xbf16>
    %229 = vector.extract_strided_slice %164 {offsets = [0, 2], sizes = [64, 1], strides = [1, 1]} : vector<64x7xbf16> to vector<64x1xbf16>
    %230 = vector.extract_strided_slice %164 {offsets = [0, 3], sizes = [64, 1], strides = [1, 1]} : vector<64x7xbf16> to vector<64x1xbf16>
    %231 = vector.extract_strided_slice %164 {offsets = [0, 4], sizes = [64, 1], strides = [1, 1]} : vector<64x7xbf16> to vector<64x1xbf16>
    %232 = vector.extract_strided_slice %164 {offsets = [0, 5], sizes = [64, 1], strides = [1, 1]} : vector<64x7xbf16> to vector<64x1xbf16>
    %233 = vector.extract_strided_slice %164 {offsets = [0, 6], sizes = [64, 1], strides = [1, 1]} : vector<64x7xbf16> to vector<64x1xbf16>
    %234 = vector.extract_strided_slice %191 {offsets = [0, 0], sizes = [64, 1], strides = [1, 1]} : vector<64x7xbf16> to vector<64x1xbf16>
    %235 = vector.extract_strided_slice %191 {offsets = [0, 1], sizes = [64, 1], strides = [1, 1]} : vector<64x7xbf16> to vector<64x1xbf16>
    %236 = vector.extract_strided_slice %191 {offsets = [0, 2], sizes = [64, 1], strides = [1, 1]} : vector<64x7xbf16> to vector<64x1xbf16>
    %237 = vector.extract_strided_slice %191 {offsets = [0, 3], sizes = [64, 1], strides = [1, 1]} : vector<64x7xbf16> to vector<64x1xbf16>
    %238 = vector.extract_strided_slice %191 {offsets = [0, 4], sizes = [64, 1], strides = [1, 1]} : vector<64x7xbf16> to vector<64x1xbf16>
    %239 = vector.extract_strided_slice %191 {offsets = [0, 5], sizes = [64, 1], strides = [1, 1]} : vector<64x7xbf16> to vector<64x1xbf16>
    %240 = vector.extract_strided_slice %191 {offsets = [0, 6], sizes = [64, 1], strides = [1, 1]} : vector<64x7xbf16> to vector<64x1xbf16>
    %241 = tpu.concatenate %192, %193, %194, %195, %196, %197, %198, %199, %200, %201, %202, %203, %204, %205, %206, %207 in 0 : vector<64x1xbf16>, vector<64x1xbf16>, vector<64x1xbf16>, vector<64x1xbf16>, vector<64x1xbf16>, vector<64x1xbf16>, vector<64x1xbf16>, vector<64x1xbf16>, vector<64x1xbf16>, vector<64x1xbf16>, vector<64x1xbf16>, vector<64x1xbf16>, vector<64x1xbf16>, vector<64x1xbf16>, vector<64x1xbf16>, vector<64x1xbf16> -> vector<1024x1xbf16>
    %242 = tpu.concatenate %208, %209, %210, %211, %212, %213, %214, %215, %216, %217, %218, %219, %220, %221, %222, %223 in 0 : vector<64x1xbf16>, vector<64x1xbf16>, vector<64x1xbf16>, vector<64x1xbf16>, vector<64x1xbf16>, vector<64x1xbf16>, vector<64x1xbf16>, vector<64x1xbf16>, vector<64x1xbf16>, vector<64x1xbf16>, vector<64x1xbf16>, vector<64x1xbf16>, vector<64x1xbf16>, vector<64x1xbf16>, vector<64x1xbf16>, vector<64x1xbf16> -> vector<1024x1xbf16>
    %243 = tpu.concatenate %224, %225, %226, %227, %228, %229, %230, %231, %232, %233, %234, %235, %236, %237, %238, %239 in 0 : vector<64x1xbf16>, vector<64x1xbf16>, vector<64x1xbf16>, vector<64x1xbf16>, vector<64x1xbf16>, vector<64x1xbf16>, vector<64x1xbf16>, vector<64x1xbf16>, vector<64x1xbf16>, vector<64x1xbf16>, vector<64x1xbf16>, vector<64x1xbf16>, vector<64x1xbf16>, vector<64x1xbf16>, vector<64x1xbf16>, vector<64x1xbf16> -> vector<1024x1xbf16>
    %244 = tpu.concatenate %241, %242, %243, %240 in 0 : vector<1024x1xbf16>, vector<1024x1xbf16>, vector<1024x1xbf16>, vector<64x1xbf16> -> vector<3136x1xbf16>
    %c0_229 = arith.constant 0 : index
    %c0_230 = arith.constant 0 : index
    %245 = vector.load %arg8[%c0_229, %c0_230] : memref<512x3136xbf16, #tpu.memory_space<vmem>>, vector<512x3136xbf16>
    %cst_231 = arith.constant dense<0.000000e+00> : vector<512x1xf32>
    %246 = tpu.matmul %245, %244, %cst_231 {dimension_numbers = #tpu.dot_dimension_numbers<[1], [0], [0], [1], [0, 0, 1, 1], [], []>} : vector<512x3136xbf16>, vector<3136x1xbf16>, vector<512x1xf32> -> vector<512x1xf32>
    %c0_232 = arith.constant 0 : index
    %c0_233 = arith.constant 0 : index
    %247 = vector.load %arg9[%c0_232, %c0_233] : memref<512x1xf32, #tpu.memory_space<vmem>>, vector<512x1xf32>
    %248 = arith.addf %246, %247 : vector<512x1xf32>
    %cst_234 = arith.constant 0.000000e+00 : f32
    %249 = vector.broadcast %cst_234 : f32 to vector<512x1xf32>
    %250 = arith.cmpf oge, %248, %249 : vector<512x1xf32>
    %cst_235 = arith.constant 0.00999999977 : f32
    %251 = vector.broadcast %cst_235 : f32 to vector<512x1xf32>
    %252 = arith.mulf %251, %248 : vector<512x1xf32>
    %253 = arith.select %250, %248, %252 : vector<512x1xi1>, vector<512x1xf32>
    %c0_236 = arith.constant 0 : index
    %c0_237 = arith.constant 0 : index
    %254 = vector.load %arg10[%c0_236, %c0_237] : memref<128x512xbf16, #tpu.memory_space<vmem>>, vector<128x512xbf16>
    %255 = arith.truncf %253 : vector<512x1xf32> to vector<512x1xbf16>
    %cst_238 = arith.constant dense<0.000000e+00> : vector<128x1xf32>
    %256 = tpu.matmul %254, %255, %cst_238 {dimension_numbers = #tpu.dot_dimension_numbers<[1], [0], [0], [1], [0, 0, 1, 1], [], []>} : vector<128x512xbf16>, vector<512x1xbf16>, vector<128x1xf32> -> vector<128x1xf32>
    %c0_239 = arith.constant 0 : index
    %c0_240 = arith.constant 0 : index
    %257 = vector.load %arg11[%c0_239, %c0_240] : memref<128x1xf32, #tpu.memory_space<vmem>>, vector<128x1xf32>
    %258 = arith.addf %256, %257 : vector<128x1xf32>
    %c0_241 = arith.constant 0 : index
    %c0_242 = arith.constant 0 : index
    %c0_243 = arith.constant 0 : index
    %259 = vector.load %arg12[%c0_241, %c0_242, %c0_243] : memref<1x128x1xf32, #tpu.memory_space<vmem>>, vector<1x128x1xf32>
    %260 = vector.shape_cast %259 : vector<1x128x1xf32> to vector<128x1xf32>
    %261 = vector.shape_cast %258 : vector<128x1xf32> to vector<1x128x1xf32>
    tpu.vector_store %arg12[%c0_241, %c0_242, %c0_243], %261 {strides = array<i32>} : memref<1x128x1xf32, #tpu.memory_space<vmem>>, vector<1x128x1xf32>,
    return
  }
  func.func @transform_0(%arg0: i32) -> (i32, i32, i32, i32) {
    %c0_i32 = arith.constant 0 : i32
    %c0_i32_0 = arith.constant 0 : i32
    %c0_i32_1 = arith.constant 0 : i32
    %c0_i32_2 = arith.constant 0 : i32
    return %arg0, %c0_i32, %c0_i32_0, %c0_i32_1 : i32, i32, i32, i32
  }
  func.func @transform_1(%arg0: i32) -> (i32, i32) {
    %c0_i32 = arith.constant 0 : i32
    %c0_i32_0 = arith.constant 0 : i32
    %c0_i32_1 = arith.constant 0 : i32
    return %c0_i32, %c0_i32_0 : i32, i32
  }
  func.func @transform_2(%arg0: i32) -> (i32, i32) {
    %c0_i32 = arith.constant 0 : i32
    %c0_i32_0 = arith.constant 0 : i32
    %c0_i32_1 = arith.constant 0 : i32
    return %c0_i32, %c0_i32_0 : i32, i32
  }
  func.func @transform_3(%arg0: i32) -> (i32, i32) {
    %c0_i32 = arith.constant 0 : i32
    %c0_i32_0 = arith.constant 0 : i32
    %c0_i32_1 = arith.constant 0 : i32
    return %c0_i32, %c0_i32_0 : i32, i32
  }
  func.func @transform_4(%arg0: i32) -> (i32, i32) {
    %c0_i32 = arith.constant 0 : i32
    %c0_i32_0 = arith.constant 0 : i32
    %c0_i32_1 = arith.constant 0 : i32
    return %c0_i32, %c0_i32_0 : i32, i32
  }
  func.func @transform_5(%arg0: i32) -> (i32, i32) {
    %c0_i32 = arith.constant 0 : i32
    %c0_i32_0 = arith.constant 0 : i32
    %c0_i32_1 = arith.constant 0 : i32
    return %c0_i32, %c0_i32_0 : i32, i32
  }
  func.func @transform_6(%arg0: i32) -> (i32, i32) {
    %c0_i32 = arith.constant 0 : i32
    %c0_i32_0 = arith.constant 0 : i32
    %c0_i32_1 = arith.constant 0 : i32
    return %c0_i32, %c0_i32_0 : i32, i32
  }
  func.func @transform_7(%arg0: i32) -> (i32, i32) {
    %c0_i32 = arith.constant 0 : i32
    %c0_i32_0 = arith.constant 0 : i32
    %c0_i32_1 = arith.constant 0 : i32
    return %c0_i32, %c0_i32_0 : i32, i32
  }
  func.func @transform_8(%arg0: i32) -> (i32, i32) {
    %c0_i32 = arith.constant 0 : i32
    %c0_i32_0 = arith.constant 0 : i32
    %c0_i32_1 = arith.constant 0 : i32
    return %c0_i32, %c0_i32_0 : i32, i32
  }
  func.func @transform_9(%arg0: i32) -> (i32, i32) {
    %c0_i32 = arith.constant 0 : i32
    %c0_i32_0 = arith.constant 0 : i32
    %c0_i32_1 = arith.constant 0 : i32
    return %c0_i32, %c0_i32_0 : i32, i32
  }
  func.func @transform_10(%arg0: i32) -> (i32, i32) {
    %c0_i32 = arith.constant 0 : i32
    %c0_i32_0 = arith.constant 0 : i32
    %c0_i32_1 = arith.constant 0 : i32
    return %c0_i32, %c0_i32_0 : i32, i32
  }
  func.func @transform_11(%arg0: i32) -> (i32, i32, i32) {
    %c0_i32 = arith.constant 0 : i32
    %c0_i32_0 = arith.constant 0 : i32
    %c0_i32_1 = arith.constant 0 : i32
    return %arg0, %c0_i32, %c0_i32_0 : i32, i32, i32
  }
}

</mosaic_0001>

<bundles_post_ra>
// kernel: dqn_forward.1
= control target key start
LH: loop header
LB: loop body
LE: loop exit
PB: predicated region body
PF: predicated region fallthrough
CT: control target
= control target key end

     0   :  { %s18883_s17 = smov 0   ;;  %s24501_s0 = inlined_call_operand.vmem [shape: bf16[2,84,32,11], index: 0, kind: input, shape index: {}]   ;;  %s24502_s1 = inlined_call_operand.vmem [shape: bf16[32,256], index: 1, kind: input, shape index: {}]   ;;  %s24503_s2 = inlined_call_operand.vmem [shape: f32[32,1], index: 2, kind: input, shape index: {}]   ;;  %s24504_s3 = inlined_call_operand.vmem [shape: bf16[64,512], index: 3, kind: input, shape index: {}]   ;;  %s24505_s4 = inlined_call_operand.vmem [shape: f32[64,1], index: 4, kind: input, shape index: {}]   ;;  %s24506_s5 = inlined_call_operand.vmem [shape: bf16[64,576], index: 5, kind: input, shape index: {}]   ;;  %s24507_s6 = inlined_call_operand.vmem [shape: f32[64,1], index: 6, kind: input, shape index: {}]   ;;  %s24508_s7 = inlined_call_operand.vmem [shape: bf16[512,3136], index: 7, kind: input, shape index: {}]   ;;  %s24509_s8 = inlined_call_operand.vmem [shape: f32[512,1], index: 8, kind: input, shape index: {}]   ;;  %s24510_s9 = inlined_call_operand.vmem [shape: bf16[128,512], index: 9, kind: input, shape index: {}]   ;;  %s24511_s10 = inlined_call_operand.vmem [shape: f32[128,1], index: 10, kind: input, shape index: {}]   ;;  %s24512_s11 = inlined_call_operand.vmem [shape: f32[2,128,1], index: 11, kind: output, shape index: {}]  }
   0x1 LB: > { %s13604_s18 = sadd.s32 4294967295, %s18793_s17   ;;  %p13608_p0 = scmp.ge.s32.totalorder %s18793_s17, 1  ;;  %s18793_s17 = sphi %s18883_s17, %s21_s17  }
   0x2   : > { %p337_p1 = scmp.lt.s32.totalorder %s18793_s17, 3 }
   0x4   : > { %p338_p2 = pnand %p13608_p0, %p337_p1 }
   0x6   : > { %341 = sbr.rel (%p338_p2) target bundleno = 4170 (0x104a), region = 64 }
   0xd   : > { %p377_p3 = scmp.lt.s32.totalorder %s13604_s18, 1  ;;  %s18901_s27 = smov 0  }
   0xf   : > { %s24652_s18 = smov (!%p377_p3, %s13604_s18), 1 }
  0x10   : > { %s17320_s19 = smul.u32 1344, %s24652_s18  ;;  %s14714_s20 = sshll.u32 %s24652_s18, 7 }
  0x11   : > { %s18894_s23 = scalar_lea.vmem %s24512_s11, %s14714_s20 }
  0x12   : > { %s18899_s26 = scalar_lea.vmem %s24501_s0, %s17320_s19 }
  0x13 LB: >> { %v17389_v0 = vld [vmem:[%s24502_s1 + $0x4] ss:$8 sps:$4 sm:$0xff]   ;;  %v18807_v1 = vmov 0   ;;  %s14716_s30 = sshll.u32 %s18797_s27, 6  ;;  %v17392_v2 = vld [vmem:[%s24502_s1 + $0x14] ss:$8 sps:$4 sm:$0xff]   ;;  %s18797_s27 = sphi %s18901_s27, %s393_s27  }
  0x14   : >> { %17370 = vset.pattern.permute.xlu1 %v18807_v1  ;;  %17369 = vset.pattern.permute.xlu0 %v18807_v1  ;;  %v560_v3 = vld [vmem:[%s24503_s2 + $0x10] sm:$0xff]  ;;  %s18917_s16 = scalar_lea.vmem %s18899_s26, %s14716_s30  ;;  %v558_v4 = vld [vmem:[%s24503_s2] sm:$0xff]  ;;  %v561_v6 = vld [vmem:[%s24503_s2 + $0x18] sm:$0xff]  ;;  %s14724_s12 = sshll.u32 %s18797_s27, 4  ;;  %vm660_vm0 = vcmask 80896  }
  0x15   : >> { %634 = vmatprep.mubr.bf16.mxu0 %v17389_v0  ;;  %574 = vperm.xlu1 %17370, %v560_v3   ;;  %v17371_v5 = vld [vmem:[%s18917_s16 + $0x40] sm:$0xff]   ;;  %v559_v7 = vld [vmem:[%s24503_s2 + $0x8] sm:$0xff]  ;;  %v17375_v11 = vld [vmem:[%s18917_s16 + $0x50] sm:$0xff]   ;;  %s659_s13 = scalar_lea.vmem [#allocation2], %s14724_s12  ;;  %s393_s27 = sadd.s32 1, %s18797_s27  }
  0x16   : >> { %642 = vmatprep.mubr.bf16.mxu1 %v17392_v2  ;;  %564 = vperm.xlu0 %17369, %v558_v4   ;;  %v17372_v8 = vld [vmem:[%s18917_s16] sm:$0xff]   ;;  %v17373_v9 = vld [vmem:[%s18917_s16 + $0x48] sm:$0xff]   ;;  %v17376_v12 = vld [vmem:[%s18917_s16 + $0x10] sm:$0xff]   ;;  %p390_p4 = scmp.ge.s32.totalorder %s393_s27, 20  }
  0x17   : >> { %14748 = vmatprep.subr.bf16.mxu0 %v17371_v5  ;;  %15848 = vmatprep.subr.bf16.mxu1 %v17371_v5  ;;  %v17374_v10 = vld [vmem:[%s18917_s16 + $0x8] sm:$0xff]   ;;  %v17377_v13 = vld [vmem:[%s18917_s16 + $0x58] sm:$0xff]   ;;  %v17379_v15 = vld [vmem:[%s18917_s16 + $0x60] sm:$0xff]   ;;  %s18956_s14 = smov (%p390_p4), 0  }
  0x18   : >> { %14749 = vmatpush3.bf16.msra.mxu0 %v17372_v8  ;;  %15856 = vmatpush3.bf16.msra.mxu1 %v17372_v8  ;;  %v17378_v14 = vld [vmem:[%s18917_s16 + $0x18] sm:$0xff]   ;;  %v17380_v16 = vld [vmem:[%s18917_s16 + $0x20] sm:$0xff]   ;;  %v17381_v17 = vld [vmem:[%s18917_s16 + $0x68] sm:$0xff]  }
  0x19   : >> { %14750 = vmatprep.subr.bf16.mxu0 %v17373_v9  ;;  %15849 = vmatprep.subr.bf16.mxu1 %v17373_v9  ;;  %v17382_v18 = vld [vmem:[%s18917_s16 + $0x28] sm:$0xff]   ;;  %v17383_v19 = vld [vmem:[%s18917_s16 + $0x70] sm:$0xff]   ;;  %v17385_v21 = vld [vmem:[%s18917_s16 + $0x78] sm:$0xff]  }
  0x1a   : >> { %579 = vperm.xlu1 %17370, %v561_v6   ;;  %569 = vperm.xlu0 %17369, %v559_v7   ;;  %v17384_v20 = vld [vmem:[%s18917_s16 + $0x30] sm:$0xff]   ;;  %v17386_v22 = vld [vmem:[%s18917_s16 + $0x38] sm:$0xff]   ;;  %v17387_v23 = vld [vmem:[%s24502_s1] ss:$8 sps:$4 sm:$0xff]  }
  0x1b   : >> { %v17390_v24 = vld [vmem:[%s24502_s1 + $0x10] ss:$8 sps:$4 sm:$0xff]  }
  0x1c   : >> { %14751 = vmatpush3.bf16.msra.mxu0 %v17374_v10  ;;  %15857 = vmatpush3.bf16.msra.mxu1 %v17374_v10 }
  0x1d   : >> { %14752 = vmatprep.subr.bf16.mxu0 %v17375_v11  ;;  %15850 = vmatprep.subr.bf16.mxu1 %v17375_v11 }
  0x20   : >> { %14753 = vmatpush3.bf16.msra.mxu0 %v17376_v12  ;;  %15858 = vmatpush3.bf16.msra.mxu1 %v17376_v12 }
  0x21   : >> { %14754 = vmatprep.subr.bf16.mxu0 %v17377_v13  ;;  %15851 = vmatprep.subr.bf16.mxu1 %v17377_v13 }
  0x24   : >> { %14755 = vmatpush3.bf16.msra.mxu0 %v17378_v14  ;;  %15859 = vmatpush3.bf16.msra.mxu1 %v17378_v14 }
  0x25   : >> { %14756 = vmatprep.subr.bf16.mxu0 %v17379_v15  ;;  %15852 = vmatprep.subr.bf16.mxu1 %v17379_v15 }
  0x28   : >> { %14757 = vmatpush3.bf16.msra.mxu0 %v17380_v16  ;;  %15860 = vmatpush3.bf16.msra.mxu1 %v17380_v16 }
  0x29   : >> { %14758 = vmatprep.subr.bf16.mxu0 %v17381_v17  ;;  %15853 = vmatprep.subr.bf16.mxu1 %v17381_v17 }
  0x2c   : >> { %14759 = vmatpush3.bf16.msra.mxu0 %v17382_v18  ;;  %15861 = vmatpush3.bf16.msra.mxu1 %v17382_v18 }
  0x2d   : >> { %14760 = vmatprep.subr.bf16.mxu0 %v17383_v19  ;;  %15854 = vmatprep.subr.bf16.mxu1 %v17383_v19 }
  0x30   : >> { %14761 = vmatpush3.bf16.msra.mxu0 %v17384_v20  ;;  %15862 = vmatpush3.bf16.msra.mxu1 %v17384_v20 }
  0x31   : >> { %14762 = vmatprep.subr.bf16.mxu0 %v17385_v21  ;;  %15855 = vmatprep.subr.bf16.mxu1 %v17385_v21 }
  0x34   : >> { %14763 = vmatpush3.bf16.msra.mxu0 %v17386_v22  ;;  %15863 = vmatpush3.bf16.msra.mxu1 %v17386_v22 }
  0x37   : >> { %635 = vmatmul.mubr.bf16.vlgmr.msra.gmra.mrb[0].mxu0 %v17387_v23  ;;  %643 = vmatmul.mubr.bf16.vlgmr.msra.gmra.mrb[0].mxu1 %v17390_v24 }
  0x94   : >> { %v575_v25 = vpop.permute.xlu1 %574 }
  0x95   : >> { %v565_v26 = vpop.permute.xlu0 %564 }
  0x99   : >> { %v580_v41 = vpop.permute.xlu1 %579  ;;  %v570_v42 = vpop.permute.xlu0 %569 }
 0x10a   : >> { %v14764_v27 = vpop.f32.mrb[0].mxu0  ;;  %v14770_v28 = vpop.f32.mrb[0].mxu1 }
 0x10b   : >> { %v14765_v29 = vpop.f32.mrb[1].mxu0  ;;  %v14771_v30 = vpop.f32.mrb[1].mxu1 }
 0x10c   : >> { %v14766_v31 = vadd.f32 %v14765_v29, %v14764_v27  ;;  %v14772_v32 = vadd.f32 %v14771_v30, %v14770_v28  ;;  %v14767_v33 = vpop.f32.mrb[2].mxu0  ;;  %v14773_v34 = vpop.f32.mrb[2].mxu1 }
 0x10d   : >> { %v14768_v35 = vpop.f32.mrb[3].mxu0  ;;  %v14774_v36 = vpop.f32.mrb[3].mxu1 }
 0x10e   : >> { %v637_v37 = vadd.f32 %v14766_v31, %v565_v26  ;;  %v645_v38 = vadd.f32 %v14772_v32, %v575_v25  ;;  %v14769_v39 = vadd.f32 %v14768_v35, %v14767_v33  ;;  %v14775_v40 = vadd.f32 %v14774_v36, %v14773_v34 }
 0x110   : >> { %v640_v43 = vadd.f32 %v14769_v39, %v570_v42  ;;  %v648_v44 = vadd.f32 %v14775_v40, %v580_v41  ;;  %v651_v45 = vmax.f32 %v637_v37, 0.0  ;;  %v653_v46 = vmax.f32 %v645_v38, 0.0  ;;  %392 = sbr.rel (!%p390_p4) target bundleno = 19 (0x13), region = 150 }
 0x112   : >> { %v652_v47 = vmax.f32 %v640_v43, 0.0  ;;  %v654_v48 = vmax.f32 %v648_v44, 0.0 }
 0x114   : >> { %v655_v49 = vpack.c.bf16 %v652_v47, %v651_v45  ;;  %v656_v50 = vpack.c.bf16 %v654_v48, %v653_v46 }
 0x116   : >> { %661 = vst.msk [vmem:[%s659_s13] sm:$0xff] %vm660_vm0, %v655_v49  ;;  %662 = vst.msk [vmem:[%s659_s13 + $0x8] sm:$0xff] %vm660_vm0, %v656_v50 }
 0x117 LB: >> { %s14726_s15 = sshll.u32 %s18801_s14, 6  ;;  %s18808_s27 = smov 127   ;;  %v17413_v61 = vld [vmem:[%s24502_s1 + $0x4] ss:$8 sps:$4 sm:$0xff]   ;;  %v17416_v62 = vld [vmem:[%s24502_s1 + $0x14] ss:$8 sps:$4 sm:$0xff]   ;;  %s18801_s14 = sphi %s18956_s14, %s668_s14  }
 0x118   : >> { %s18963_s16 = scalar_lea.vmem %s18899_s26, %s14726_s15  ;;  %925 = vmatprep.mubr.bf16.mxu0 %v17413_v61  ;;  %933 = vmatprep.mubr.bf16.mxu1 %v17416_v62  ;;  %v850_v63 = vld [vmem:[%s24503_s2 + $0x8] sm:$0xff]  ;;  %v849_v0 = vld [vmem:[%s24503_s2] sm:$0xff]  ;;  %v18809_v1 = vmov 0   ;;  %v851_v2 = vld [vmem:[%s24503_s2 + $0x10] sm:$0xff] }
 0x119   : >> { %v17395_v51 = vld [vmem:[%s18963_s16 + $0x40] sm:$0xff]   ;;  %v17397_v53 = vld [vmem:[%s18963_s16 + $0x50] sm:$0xff]   ;;  %v17403_v57 = vld [vmem:[%s18963_s16 + $0x48] sm:$0xff]   ;;  %17394 = vset.pattern.permute.xlu1 %v18809_v1  ;;  %17393 = vset.pattern.permute.xlu0 %v18809_v1 }
 0x11a   : >> { %v17396_v52 = vld [vmem:[%s18963_s16] sm:$0xff]   ;;  %800 = vrot.lane.b32.xlu0 %v17395_v51, %s18808_s27  ;;  %814 = vrot.lane.b32.xlu1 %v17397_v53, %s18808_s27  ;;  %v17398_v54 = vld [vmem:[%s18963_s16 + $0x10] sm:$0xff]  }
 0x11b   : >> { %v17399_v55 = vld [vmem:[%s18963_s16 + $0x60] sm:$0xff]   ;;  %v17404_v58 = vld [vmem:[%s18963_s16 + $0x8] sm:$0xff]   ;;  %v17401_v59 = vld [vmem:[%s18963_s16 + $0x70] sm:$0xff]   ;;  %14776 = vmatprep.subr.bf16.mxu0 %v17403_v57  ;;  %15864 = vmatprep.subr.bf16.mxu1 %v17403_v57 }
 0x11c   : >> { %v17400_v56 = vld [vmem:[%s18963_s16 + $0x20] sm:$0xff]   ;;  %14777 = vmatpush3.bf16.msra.mxu0 %v17404_v58  ;;  %v17402_v60 = vld [vmem:[%s18963_s16 + $0x30] sm:$0xff]   ;;  %15872 = vmatpush3.bf16.msra.mxu1 %v17404_v58  ;;  %v852_v3 = vld [vmem:[%s24503_s2 + $0x18] sm:$0xff] }
 0x11d   : >> { %v17405_v5 = vld [vmem:[%s18963_s16 + $0x58] sm:$0xff]   ;;  %v17407_v10 = vld [vmem:[%s18963_s16 + $0x68] sm:$0xff]  }
 0x11e   : >> { %744 = vrot.lane.b32.xlu0 %v17396_v52, %s18808_s27  ;;  %758 = vrot.lane.b32.xlu1 %v17398_v54, %s18808_s27  ;;  %v17406_v8 = vld [vmem:[%s18963_s16 + $0x18] sm:$0xff]   ;;  %v17408_v11 = vld [vmem:[%s18963_s16 + $0x28] sm:$0xff]  }
 0x11f   : >> { %v17409_v14 = vld [vmem:[%s18963_s16 + $0x78] sm:$0xff]   ;;  %v17411_v18 = vld [vmem:[%s24502_s1] ss:$8 sps:$4 sm:$0xff]  }
 0x120   : >> { %v17410_v15 = vld [vmem:[%s18963_s16 + $0x38] sm:$0xff]   ;;  %s14734_s16 = sshll.u32 %s18801_s14, 4  ;;  %s668_s14 = sadd.s32 1, %s18801_s14  }
 0x121   : >> { %v17414_v19 = vld [vmem:[%s24502_s1 + $0x10] ss:$8 sps:$4 sm:$0xff]   ;;  %s13528_s20 = scalar_lea.vmem [#allocation2], %s14734_s16  ;;  %p665_p5 = scmp.ge.s32.totalorder %s668_s14, 20  }
 0x122   : >> { %828 = vrot.lane.b32.xlu0 %v17399_v55, %s18808_s27  ;;  %772 = vrot.lane.b32.xlu1 %v17400_v56, %s18808_s27  ;;  %s19011_s21 = smov (%p665_p5), 0  }
 0x126   : >> { %842 = vrot.lane.b32.xlu0 %v17401_v59, %s18808_s27  ;;  %786 = vrot.lane.b32.xlu1 %v17402_v60, %s18808_s27 }
 0x12a   : >> { %860 = vperm.xlu1 %17394, %v850_v63   ;;  %855 = vperm.xlu0 %17393, %v849_v0  }
 0x12e   : >> { %865 = vperm.xlu1 %17394, %v851_v2   ;;  %870 = vperm.xlu0 %17393, %v852_v3  }
 0x18c   : >> { %v801_v4 = vpop.permute.xlu0 %800  ;;  %v815_v7 = vpop.permute.xlu1 %814 }
 0x18d   : >> { %14778 = vmatprep.subr.bf16.mxu0 %v801_v4  ;;  %15865 = vmatprep.subr.bf16.mxu1 %v801_v4 }
 0x190   : >> { %v745_v6 = vpop.permute.xlu0 %744  ;;  %v759_v9 = vpop.permute.xlu1 %758 }
 0x191   : >> { %14779 = vmatpush3.bf16.msra.mxu0 %v745_v6  ;;  %15873 = vmatpush3.bf16.msra.mxu1 %v745_v6 }
 0x192   : >> { %14780 = vmatprep.subr.bf16.mxu0 %v17405_v5  ;;  %15866 = vmatprep.subr.bf16.mxu1 %v17405_v5 }
 0x194   : >> { %v829_v12 = vpop.permute.xlu0 %828  ;;  %v773_v13 = vpop.permute.xlu1 %772 }
 0x195   : >> { %14781 = vmatpush3.bf16.msra.mxu0 %v17406_v8  ;;  %15874 = vmatpush3.bf16.msra.mxu1 %v17406_v8 }
 0x196   : >> { %14782 = vmatprep.subr.bf16.mxu0 %v815_v7  ;;  %15867 = vmatprep.subr.bf16.mxu1 %v815_v7 }
 0x198   : >> { %v843_v16 = vpop.permute.xlu0 %842  ;;  %v787_v17 = vpop.permute.xlu1 %786 }
 0x199   : >> { %14783 = vmatpush3.bf16.msra.mxu0 %v759_v9  ;;  %15875 = vmatpush3.bf16.msra.mxu1 %v759_v9 }
 0x19a   : >> { %14784 = vmatprep.subr.bf16.mxu0 %v17407_v10  ;;  %15868 = vmatprep.subr.bf16.mxu1 %v17407_v10 }
 0x19d   : >> { %14785 = vmatpush3.bf16.msra.mxu0 %v17408_v11  ;;  %15876 = vmatpush3.bf16.msra.mxu1 %v17408_v11 }
 0x19e   : >> { %14786 = vmatprep.subr.bf16.mxu0 %v829_v12  ;;  %15869 = vmatprep.subr.bf16.mxu1 %v829_v12 }
 0x1a1   : >> { %14787 = vmatpush3.bf16.msra.mxu0 %v773_v13  ;;  %15877 = vmatpush3.bf16.msra.mxu1 %v773_v13 }
 0x1a2   : >> { %14788 = vmatprep.subr.bf16.mxu0 %v17409_v14  ;;  %15870 = vmatprep.subr.bf16.mxu1 %v17409_v14 }
 0x1a5   : >> { %14789 = vmatpush3.bf16.msra.mxu0 %v17410_v15  ;;  %15878 = vmatpush3.bf16.msra.mxu1 %v17410_v15 }
 0x1a6   : >> { %14790 = vmatprep.subr.bf16.mxu0 %v843_v16  ;;  %15871 = vmatprep.subr.bf16.mxu1 %v843_v16 }
 0x1a9   : >> { %14791 = vmatpush3.bf16.msra.mxu0 %v787_v17  ;;  %15879 = vmatpush3.bf16.msra.mxu1 %v787_v17  ;;  %v861_v20 = vpop.permute.xlu1 %860  ;;  %v856_v21 = vpop.permute.xlu0 %855 }
 0x1ac   : >> { %926 = vmatmul.mubr.bf16.vlgmr.msra.gmra.mrb[0].mxu0 %v17411_v18  ;;  %934 = vmatmul.mubr.bf16.vlgmr.msra.gmra.mrb[0].mxu1 %v17414_v19 }
 0x1ad   : >> { %v866_v22 = vpop.permute.xlu1 %865  ;;  %v871_v37 = vpop.permute.xlu0 %870 }
 0x27f   : >> { %v14792_v23 = vpop.f32.mrb[0].mxu0  ;;  %v14798_v24 = vpop.f32.mrb[0].mxu1 }
 0x280   : >> { %v14793_v25 = vpop.f32.mrb[1].mxu0  ;;  %v14799_v26 = vpop.f32.mrb[1].mxu1 }
 0x281   : >> { %v14794_v27 = vadd.f32 %v14793_v25, %v14792_v23  ;;  %v14800_v28 = vadd.f32 %v14799_v26, %v14798_v24  ;;  %v14795_v29 = vpop.f32.mrb[2].mxu0  ;;  %v14801_v30 = vpop.f32.mrb[2].mxu1 }
 0x282   : >> { %v14796_v31 = vpop.f32.mrb[3].mxu0  ;;  %v14802_v32 = vpop.f32.mrb[3].mxu1 }
 0x283   : >> { %v928_v33 = vadd.f32 %v14794_v27, %v856_v21  ;;  %v936_v34 = vadd.f32 %v14800_v28, %v866_v22  ;;  %v14797_v35 = vadd.f32 %v14796_v31, %v14795_v29  ;;  %v14803_v36 = vadd.f32 %v14802_v32, %v14801_v30 }
 0x285   : >> { %v931_v38 = vadd.f32 %v14797_v35, %v861_v20  ;;  %v939_v39 = vadd.f32 %v14803_v36, %v871_v37  ;;  %v942_v40 = vmax.f32 %v928_v33, 0.0  ;;  %v944_v41 = vmax.f32 %v936_v34, 0.0  ;;  %667 = sbr.rel (!%p665_p5) target bundleno = 279 (0x117), region = 161 }
 0x287   : >> { %v943_v42 = vmax.f32 %v931_v38, 0.0  ;;  %v945_v43 = vmax.f32 %v939_v39, 0.0 }
 0x289   : >> { %v946_v44 = vpack.c.bf16 %v943_v42, %v942_v40  ;;  %v947_v45 = vpack.c.bf16 %v945_v43, %v944_v41 }
 0x28b   : >> { %13746 = vst.msk [vmem:[%s13528_s20 + $0x140] sm:$0xff] %vm660_vm0, %v946_v44  ;;  %13747 = vst.msk [vmem:[%s13528_s20 + $0x148] sm:$0xff] %vm660_vm0, %v947_v45 }
 0x28c LB: >> { %s14736_s22 = sshll.u32 %s18805_s21, 5  ;;  %s18810_s26 = smov 127   ;;  %v17421_v60 = vld [vmem:[%s24504_s3 + $0x4] ss:$16 sps:$4 sm:$0xff]   ;;  %v17424_v63 = vld [vmem:[%s24504_s3 + $0xc] ss:$16 sps:$4 sm:$0xff]   ;;  %s18805_s21 = sphi %s19011_s21, %s960_s21  }
 0x28d   : >> { %s19019_s24 = scalar_lea.vmem [#allocation2], %s14736_s22  ;;  %1245 = vmatprep.mubr.bf16.mxu0 %v17421_v60  ;;  %1310 = vmatprep.mubr.bf16.mxu1 %v17424_v63  ;;  %v1085_v0 = vld [vmem:[%s24505_s4] sm:$0xff]  ;;  %v1086_v1 = vld [vmem:[%s24505_s4 + $0x8] sm:$0xff]  ;;  %v18811_v2 = vmov 0   ;;  %v1087_v3 = vld [vmem:[%s24505_s4 + $0x10] sm:$0xff]  ;;  %vm1358_vm1 = vcmask 72704  }
 0x28e   : >> { %17417 = vset.pattern.permute.xlu0 %v18811_v2  ;;  %17418 = vset.pattern.permute.xlu1 %v18811_v2  ;;  %v1088_v4 = vld [vmem:[%s24505_s4 + $0x18] sm:$0xff]  ;;  %v1089_v5 = vld [vmem:[%s24505_s4 + $0x20] sm:$0xff]  ;;  %v1090_v6 = vld [vmem:[%s24505_s4 + $0x28] sm:$0xff]  ;;  %s19127_s29 = scalar_lea.vmem [#allocation3], %s14736_s22  ;;  %s960_s21 = sadd.s32 1, %s18805_s21  }
 0x28f   : >> { %v1091_v7 = vld [vmem:[%s24505_s4 + $0x30] sm:$0xff]  ;;  %v1092_v8 = vld [vmem:[%s24505_s4 + $0x38] sm:$0xff]  ;;  %p957_p6 = scmp.ge.s32.totalorder %s960_s21, 9  }
 0x290   : >> { %v17419_v23 = vld [vmem:[%s24504_s3] ss:$16 sps:$4 sm:$0xff]   ;;  %v17425_v24 = vld [vmem:[%s24504_s3 + $0x24] ss:$16 sps:$4 sm:$0xff]   ;;  %v17422_v27 = vld [vmem:[%s24504_s3 + $0x8] ss:$16 sps:$4 sm:$0xff]  }
 0x291   : >> { %v17428_v28 = vld [vmem:[%s24504_s3 + $0x2c] ss:$16 sps:$4 sm:$0xff]   ;;  %v17427_v29 = vld [vmem:[%s24504_s3 + $0x20] ss:$16 sps:$4 sm:$0xff]   ;;  %v17431_v30 = vld [vmem:[%s24504_s3 + $0x44] ss:$16 sps:$4 sm:$0xff]  }
 0x292   : >> { %v13757_v46 = vld [vmem:[%s19019_s24 + $0x10] sm:$0xff]  ;;  %v965_v48 = vld [vmem:[%s19019_s24] sm:$0xff]  ;;  %v13758_v50 = vld [vmem:[%s19019_s24 + $0x18] sm:$0xff]  ;;  %s18812_s22 = smov (%p957_p6), 126   ;;  %s18813_s21 = smov (%p957_p6), 127   ;;  %vm1633_vm2 = vcmask (%p957_p6), 523264  }
 0x293   : >> { %v13775_v47 = vld [vmem:[%s19019_s24 + $0x30] sm:$0xff]  ;;  %1023 = vrot.lane.b32.xlu0 %v13757_v46, %s18810_s26  ;;  %v13766_v49 = vld [vmem:[%s19019_s24 + $0x20] sm:$0xff]  ;;  %14804 = vmatprep.subr.bf16.mxu0 %v13757_v46  ;;  %v13776_v51 = vld [vmem:[%s19019_s24 + $0x38] sm:$0xff]  ;;  %s18816_s14 = smov (%p957_p6), 2   ;;  %s24545_s25 = smov (%p957_p6), 1  }
 0x294   : >> { %1055 = vrot.lane.b32.xlu1 %v13775_v47, %s18810_s26  ;;  %14844 = vmatprep.subr.bf16.mxu1 %v13775_v47  ;;  %v966_v52 = vld [vmem:[%s19019_s24 + $0x8] sm:$0xff]  ;;  %v13762_v54 = vld [vmem:[%s19019_s24 + $0x150] sm:$0xff]  ;;  %v13753_v56 = vld [vmem:[%s19019_s24 + $0x140] sm:$0xff]  ;;  %s18818_s13 = smov (%p957_p6), 125   ;;  %s18819_s15 = smov (%p957_p6), 123  }
 0x295   : >> { %14805 = vmatpush3.bf16.msra.mxu0 %v965_v48  ;;  %14845 = vmatpush3.bf16.msra.mxu1 %v13766_v49  ;;  %v13767_v53 = vld [vmem:[%s19019_s24 + $0x28] sm:$0xff]  ;;  %v13780_v55 = vld [vmem:[%s19019_s24 + $0x170] sm:$0xff]  ;;  %v13771_v57 = vld [vmem:[%s19019_s24 + $0x160] sm:$0xff]  ;;  %s18820_s28 = smov (%p957_p6), 122   ;;  %s18821_s20 = smov (%p957_p6), 4  }
 0x296   : >> { %14806 = vmatprep.subr.bf16.mxu0 %v13758_v50  ;;  %14846 = vmatprep.subr.bf16.mxu1 %v13776_v51  ;;  %v13763_v58 = vld [vmem:[%s19019_s24 + $0x158] sm:$0xff]  ;;  %v13754_v61 = vld [vmem:[%s19019_s24 + $0x148] sm:$0xff]  ;;  %v17433_v33 = vld [vmem:[%s24504_s3 + $0x40] ss:$16 sps:$4 sm:$0xff]   ;;  %s18822_s19 = smov (%p957_p6), 3   ;;  %s24588_s16 = smov (%p957_p6), 1  }
 0x297   : >> { %1007 = vrot.lane.b32.xlu0 %v965_v48, %s18810_s26  ;;  %v13781_v59 = vld [vmem:[%s19019_s24 + $0x178] sm:$0xff]  ;;  %v13772_v62 = vld [vmem:[%s19019_s24 + $0x168] sm:$0xff]  ;;  %v17437_v34 = vld [vmem:[%s24504_s3 + $0x64] ss:$16 sps:$4 sm:$0xff]  }
 0x298   : >> { %1039 = vrot.lane.b32.xlu1 %v13766_v49, %s18810_s26  ;;  %v17430_v31 = vld [vmem:[%s24504_s3 + $0x28] ss:$16 sps:$4 sm:$0xff]   ;;  %v17434_v32 = vld [vmem:[%s24504_s3 + $0x4c] ss:$16 sps:$4 sm:$0xff]   ;;  %v17439_v37 = vld [vmem:[%s24504_s3 + $0x60] ss:$16 sps:$4 sm:$0xff]  }
 0x299   : >> { %14807 = vmatpush3.bf16.msra.mxu0 %v966_v52  ;;  %14847 = vmatpush3.bf16.msra.mxu1 %v13767_v53  ;;  %v17436_v35 = vld [vmem:[%s24504_s3 + $0x48] ss:$16 sps:$4 sm:$0xff]   ;;  %v17440_v36 = vld [vmem:[%s24504_s3 + $0x6c] ss:$16 sps:$4 sm:$0xff]  }
 0x29a   : >> { %14808 = vmatprep.subr.bf16.mxu0 %v13762_v54  ;;  %14848 = vmatprep.subr.bf16.mxu1 %v13780_v55  ;;  %v17442_v38 = vld [vmem:[%s24504_s3 + $0x68] ss:$16 sps:$4 sm:$0xff]  }
 0x29b   : >> { %1025 = vrot.lane.b32.xlu0 %v13758_v50, %s18810_s26 }
 0x29c   : >> { %1009 = vrot.lane.b32.xlu1 %v966_v52, %s18810_s26 }
 0x29d   : >> { %14809 = vmatpush3.bf16.msra.mxu0 %v13753_v56  ;;  %14849 = vmatpush3.bf16.msra.mxu1 %v13771_v57 }
 0x29e   : >> { %14810 = vmatprep.subr.bf16.mxu0 %v13763_v58  ;;  %14850 = vmatprep.subr.bf16.mxu1 %v13781_v59 }
 0x29f   : >> { %1057 = vrot.lane.b32.xlu0 %v13776_v51, %s18810_s26 }
 0x2a0   : >> { %1041 = vrot.lane.b32.xlu1 %v13767_v53, %s18810_s26 }
 0x2a1   : >> { %14811 = vmatpush3.bf16.msra.mxu0 %v13754_v61  ;;  %14851 = vmatpush3.bf16.msra.mxu1 %v13772_v62 }
 0x2a3   : >> { %1031 = vrot.lane.b32.xlu0 %v13762_v54, %s18810_s26 }
 0x2a4   : >> { %1015 = vrot.lane.b32.xlu1 %v13753_v56, %s18810_s26 }
 0x2a7   : >> { %1063 = vrot.lane.b32.xlu0 %v13780_v55, %s18810_s26 }
 0x2a8   : >> { %1047 = vrot.lane.b32.xlu1 %v13771_v57, %s18810_s26 }
 0x2ab   : >> { %1033 = vrot.lane.b32.xlu0 %v13763_v58, %s18810_s26 }
 0x2ac   : >> { %1017 = vrot.lane.b32.xlu1 %v13754_v61, %s18810_s26 }
 0x2af   : >> { %1065 = vrot.lane.b32.xlu0 %v13781_v59, %s18810_s26 }
 0x2b0   : >> { %1049 = vrot.lane.b32.xlu1 %v13772_v62, %s18810_s26  ;;  %s18815_s26 = smov (%p957_p6), 124  }
 0x2b3   : >> { %1095 = vperm.xlu0 %17417, %v1085_v0  }
 0x2b4   : >> { %1100 = vperm.xlu1 %17418, %v1086_v1  }
 0x2b7   : >> { %1110 = vperm.xlu0 %17417, %v1088_v4  }
 0x2b8   : >> { %1105 = vperm.xlu1 %17418, %v1087_v3  }
 0x2bb   : >> { %1120 = vperm.xlu0 %17417, %v1090_v6  }
 0x2bc   : >> { %1115 = vperm.xlu1 %17418, %v1089_v5  }
 0x2bf   : >> { %1130 = vperm.xlu0 %17417, %v1092_v8  }
 0x2c0   : >> { %1125 = vperm.xlu1 %17418, %v1091_v7  }
 0x305   : >> { %v1024_v9 = vpop.permute.xlu0 %1023 }
 0x306   : >> { %v1056_v10 = vpop.permute.xlu1 %1055  ;;  %14812 = vmatprep.subr.bf16.mxu0 %v1024_v9 }
 0x307   : >> { %14852 = vmatprep.subr.bf16.mxu1 %v1056_v10 }
 0x309   : >> { %v1008_v11 = vpop.permute.xlu0 %1007 }
 0x30a   : >> { %v1040_v12 = vpop.permute.xlu1 %1039  ;;  %14813 = vmatpush3.bf16.msra.mxu0 %v1008_v11 }
 0x30b   : >> { %14853 = vmatpush3.bf16.msra.mxu1 %v1040_v12 }
 0x30d   : >> { %v1026_v13 = vpop.permute.xlu0 %1025 }
 0x30e   : >> { %v1010_v14 = vpop.permute.xlu1 %1009  ;;  %14814 = vmatprep.subr.bf16.mxu0 %v1026_v13 }
 0x30f   : >> { %14815 = vmatpush3.bf16.msra.mxu0 %v1010_v14 }
 0x311   : >> { %v1058_v15 = vpop.permute.xlu0 %1057 }
 0x312   : >> { %v1042_v16 = vpop.permute.xlu1 %1041  ;;  %14854 = vmatprep.subr.bf16.mxu1 %v1058_v15 }
 0x313   : >> { %14855 = vmatpush3.bf16.msra.mxu1 %v1042_v16 }
 0x315   : >> { %v1032_v17 = vpop.permute.xlu0 %1031 }
 0x316   : >> { %v1016_v18 = vpop.permute.xlu1 %1015  ;;  %14816 = vmatprep.subr.bf16.mxu0 %v1032_v17 }
 0x317   : >> { %14817 = vmatpush3.bf16.msra.mxu0 %v1016_v18 }
 0x319   : >> { %v1064_v19 = vpop.permute.xlu0 %1063 }
 0x31a   : >> { %v1048_v20 = vpop.permute.xlu1 %1047  ;;  %14856 = vmatprep.subr.bf16.mxu1 %v1064_v19 }
 0x31b   : >> { %14857 = vmatpush3.bf16.msra.mxu1 %v1048_v20 }
 0x31d   : >> { %v1034_v21 = vpop.permute.xlu0 %1033 }
 0x31e   : >> { %v1018_v22 = vpop.permute.xlu1 %1017  ;;  %14818 = vmatprep.subr.bf16.mxu0 %v1034_v21 }
 0x31f   : >> { %14819 = vmatpush3.bf16.msra.mxu0 %v1018_v22 }
 0x321   : >> { %v1066_v25 = vpop.permute.xlu0 %1065 }
 0x322   : >> { %v1050_v26 = vpop.permute.xlu1 %1049  ;;  %1246 = vmatmul.mubr.bf16.vlgmr.msra.gmra.mrb[0].mxu0 %v17419_v23  ;;  %14858 = vmatprep.subr.bf16.mxu1 %v1066_v25 }
 0x323   : >> { %14859 = vmatpush3.bf16.msra.mxu1 %v1050_v26  ;;  %1253 = vmatprep.mubr.bf16.mxu0 %v17425_v24 }
 0x326   : >> { %1311 = vmatmul.mubr.bf16.vlgmr.msra.gmra.mrb[0].mxu1 %v17422_v27 }
 0x327   : >> { %1318 = vmatprep.mubr.bf16.mxu1 %v17428_v28 }
 0x32a   : >> { %1254 = vmatmul.mubr.bf16.gmra.mrb[4].mxu0 %v17427_v29 }
 0x32b   : >> { %1261 = vmatprep.mubr.bf16.mxu0 %v17431_v30 }
 0x32e   : >> { %1319 = vmatmul.mubr.bf16.gmra.mrb[4].mxu1 %v17430_v31 }
 0x32f   : >> { %1326 = vmatprep.mubr.bf16.mxu1 %v17434_v32 }
 0x332   : >> { %1262 = vmatmul.mubr.bf16.gmra.mrb[8].mxu0 %v17433_v33  ;;  %v1096_v41 = vpop.permute.xlu0 %1095 }
 0x333   : >> { %1269 = vmatprep.mubr.bf16.mxu0 %v17437_v34  ;;  %v1101_v48 = vpop.permute.xlu1 %1100 }
 0x336   : >> { %1327 = vmatmul.mubr.bf16.gmra.mrb[8].mxu1 %v17436_v35  ;;  %v1111_v8 = vpop.permute.xlu0 %1110 }
 0x337   : >> { %1334 = vmatprep.mubr.bf16.mxu1 %v17440_v36  ;;  %v1106_v58 = vpop.permute.xlu1 %1105 }
 0x33a   : >> { %1270 = vmatmul.mubr.bf16.gmra.mrb[12].mxu0 %v17439_v37  ;;  %v1121_v29 = vpop.permute.xlu0 %1120 }
 0x33b   : >> { %v1116_v23 = vpop.permute.xlu1 %1115 }
 0x33e   : >> { %1335 = vmatmul.mubr.bf16.gmra.mrb[12].mxu1 %v17442_v38 }
 0x3f5   : >> { %v14820_v39 = vpop.f32.mrb[0].mxu0 }
 0x3f6   : >> { %v14821_v40 = vpop.f32.mrb[1].mxu0 }
 0x3f7   : >> { %v14822_v42 = vadd.f32 %v14821_v40, %v14820_v39  ;;  %v14823_v43 = vpop.f32.mrb[2].mxu0 }
 0x3f8   : >> { %v14824_v44 = vpop.f32.mrb[3].mxu0 }
 0x3f9   : >> { %v14825_v45 = vadd.f32 %v14824_v44, %v14823_v43  ;;  %v14860_v46 = vpop.f32.mrb[0].mxu1  ;;  %v1248_v47 = vadd.f32 %v14822_v42, %v1096_v41  ;;  %v1126_v44 = vpop.permute.xlu1 %1125 }
 0x3fa   : >> { %v14861_v49 = vpop.f32.mrb[1].mxu1 }
 0x3fb   : >> { %v14862_v50 = vadd.f32 %v14861_v49, %v14860_v46  ;;  %v14863_v51 = vpop.f32.mrb[2].mxu1  ;;  %v1251_v53 = vadd.f32 %v14825_v45, %v1101_v48 }
 0x3fc   : >> { %v14864_v52 = vpop.f32.mrb[3].mxu1 }
 0x3fd   : >> { %v1313_v54 = vadd.f32 %v14862_v50, %v1248_v47  ;;  %v14865_v55 = vadd.f32 %v14864_v52, %v14863_v51  ;;  %v14826_v56 = vpop.f32.mrb[4].mxu0  ;;  %v1131_v50 = vpop.permute.xlu0 %1130 }
 0x3fe   : >> { %v14827_v57 = vpop.f32.mrb[5].mxu0 }
 0x3ff   : >> { %v1316_v59 = vadd.f32 %v14865_v55, %v1251_v53  ;;  %v14828_v60 = vadd.f32 %v14827_v57, %v14826_v56  ;;  %v14829_v61 = vpop.f32.mrb[6].mxu0  ;;  %v1343_v63 = vmax.f32 %v1313_v54, 0.0 }
 0x400   : >> { %v14830_v62 = vpop.f32.mrb[7].mxu0 }
 0x401   : >> { %v1344_v0 = vmax.f32 %v1316_v59, 0.0  ;;  %v1256_v1 = vadd.f32 %v14828_v60, %v1106_v58  ;;  %v14831_v2 = vadd.f32 %v14830_v62, %v14829_v61  ;;  %v14866_v3 = vpop.f32.mrb[4].mxu1 }
 0x402   : >> { %v14867_v4 = vpop.f32.mrb[5].mxu1 }
 0x403   : >> { %v1351_v5 = vpack.c.bf16 %v1344_v0, %v1343_v63  ;;  %v14868_v6 = vadd.f32 %v14867_v4, %v14866_v3  ;;  %v14869_v7 = vpop.f32.mrb[6].mxu1  ;;  %v1259_v10 = vadd.f32 %v14831_v2, %v1111_v8  ;;  %v17445_v3 = vld [vmem:[%s24506_s5 + $0x4] ss:$20 sps:$4 sm:$0xff] (%p957_p6)  }
 0x404   : >> { %v14870_v9 = vpop.f32.mrb[7].mxu1  ;;  %1678 = vmatprep.mubr.bf16.mxu0 (%p957_p6), %v17445_v3  ;;  %v19364_v3 = vld [vmem:[%s24506_s5 + $0x5c] ss:$20 sps:$4 sm:$0xff] (%p957_p6)  }
 0x405   : >> { %1359 = vst.msk [vmem:[%s19127_s29] sm:$0xff] %vm1358_vm1, %v1351_v5  ;;  %v1321_v11 = vadd.f32 %v14868_v6, %v1256_v1  ;;  %v14871_v12 = vadd.f32 %v14870_v9, %v14869_v7  ;;  %v14832_v13 = vpop.f32.mrb[8].mxu0  ;;  %v17450_v5 = vld [vmem:[%s24506_s5 + $0xc] ss:$20 sps:$4 sm:$0xff] (%p957_p6)  }
 0x406   : >> { %v14833_v14 = vpop.f32.mrb[9].mxu0  ;;  %1743 = vmatprep.mubr.bf16.mxu1 (%p957_p6), %v17450_v5 }
 0x407   : >> { %v1324_v15 = vadd.f32 %v14871_v12, %v1259_v10  ;;  %v14834_v16 = vadd.f32 %v14833_v14, %v14832_v13  ;;  %v14835_v17 = vpop.f32.mrb[10].mxu0  ;;  %v1345_v19 = vmax.f32 %v1321_v11, 0.0  ;;  %v24513_v13 = vmov (%p957_p6), 0  }
 0x408   : >> { %v14836_v18 = vpop.f32.mrb[11].mxu0  ;;  %17444 = vset.pattern.permute.xlu1 (%p957_p6), %v24513_v13  ;;  %17443 = vset.pattern.permute.xlu0 (%p957_p6), %v24513_v13 }
 0x409   : >> { %v1346_v20 = vmax.f32 %v1324_v15, 0.0  ;;  %v14837_v21 = vadd.f32 %v14836_v18, %v14835_v17  ;;  %v14872_v22 = vpop.f32.mrb[8].mxu1  ;;  %v1264_v26 = vadd.f32 %v14834_v16, %v1116_v23  ;;  %v1485_v23 = vld [vmem:[%s24507_s6] sm:$0xff] (%p957_p6) }
 0x40a   : >> { %v14873_v24 = vpop.f32.mrb[9].mxu1 }
 0x40b   : >> { %v1352_v25 = vpack.c.bf16 %v1346_v20, %v1345_v19  ;;  %v14874_v27 = vadd.f32 %v14873_v24, %v14872_v22  ;;  %v14875_v28 = vpop.f32.mrb[10].mxu1  ;;  %v1267_v31 = vadd.f32 %v14837_v21, %v1121_v29  ;;  %v1486_v22 = vld [vmem:[%s24507_s6 + $0x8] sm:$0xff] (%p957_p6)  ;;  %v1487_v24 = vld [vmem:[%s24507_s6 + $0x10] sm:$0xff] (%p957_p6)  ;;  %v1492_v29 = vld [vmem:[%s24507_s6 + $0x38] sm:$0xff] (%p957_p6) }
 0x40c   : >> { %v14876_v30 = vpop.f32.mrb[11].mxu1 }
 0x40d   : >> { %1360 = vst.msk [vmem:[%s19127_s29 + $0x8] sm:$0xff] %vm1358_vm1, %v1352_v25  ;;  %v1329_v32 = vadd.f32 %v14874_v27, %v1264_v26  ;;  %v14877_v33 = vadd.f32 %v14876_v30, %v14875_v28  ;;  %v14838_v34 = vpop.f32.mrb[12].mxu0  ;;  %v1488_v25 = vld [vmem:[%s24507_s6 + $0x18] sm:$0xff] (%p957_p6)  ;;  %v1489_v26 = vld [vmem:[%s24507_s6 + $0x20] sm:$0xff] (%p957_p6)  ;;  %v1490_v27 = vld [vmem:[%s24507_s6 + $0x28] sm:$0xff] (%p957_p6) }
 0x40e   : >> { %v14839_v35 = vpop.f32.mrb[13].mxu0  ;;  %v1491_v28 = vld [vmem:[%s24507_s6 + $0x30] sm:$0xff] (%p957_p6) }
 0x40f   : >> { %v1332_v36 = vadd.f32 %v14877_v33, %v1267_v31  ;;  %v14840_v37 = vadd.f32 %v14839_v35, %v14838_v34  ;;  %v14841_v38 = vpop.f32.mrb[14].mxu0  ;;  %v1347_v40 = vmax.f32 %v1329_v32, 0.0 }
 0x410   : >> { %v14842_v39 = vpop.f32.mrb[15].mxu0 }
 0x411   : >> { %v1348_v41 = vmax.f32 %v1332_v36, 0.0  ;;  %v14843_v42 = vadd.f32 %v14842_v39, %v14841_v38  ;;  %v14878_v43 = vpop.f32.mrb[12].mxu1  ;;  %v1272_v47 = vadd.f32 %v14840_v37, %v1126_v44 }
 0x412   : >> { %v14879_v45 = vpop.f32.mrb[13].mxu1 }
 0x413   : >> { %v1353_v46 = vpack.c.bf16 %v1348_v41, %v1347_v40  ;;  %v14880_v48 = vadd.f32 %v14879_v45, %v14878_v43  ;;  %v14881_v49 = vpop.f32.mrb[14].mxu1  ;;  %v1275_v52 = vadd.f32 %v14843_v42, %v1131_v50 }
 0x414   : >> { %v14882_v51 = vpop.f32.mrb[15].mxu1 }
 0x415   : >> { %1361 = vst.msk [vmem:[%s19127_s29 + $0x10] sm:$0xff] %vm1358_vm1, %v1353_v46  ;;  %v1337_v53 = vadd.f32 %v14880_v48, %v1272_v47  ;;  %v14883_v54 = vadd.f32 %v14882_v51, %v14881_v49  ;;  %v19297_v48 = vld [vmem:[%s24506_s5] ss:$20 sps:$4 sm:$0xff] (%p957_p6)  }
 0x416   : > { %v19304_v51 = vld [vmem:[%s24506_s5 + $0x2c] ss:$20 sps:$4 sm:$0xff] (%p957_p6)  }
 0x417   : >> { %v1340_v55 = vadd.f32 %v14883_v54, %v1275_v52  ;;  %v1349_v56 = vmax.f32 %v1337_v53, 0.0  ;;  %959 = sbr.rel (!%p957_p6) target bundleno = 652 (0x28c), region = 172  ;;  %v19315_v54 = vld [vmem:[%s24506_s5 + $0x28] ss:$20 sps:$4 sm:$0xff] (%p957_p6)  }
 0x419   : >> { %v1350_v57 = vmax.f32 %v1340_v55, 0.0  ;;  %v19320_v55 = vld [vmem:[%s24506_s5 + $0x8] ss:$20 sps:$4 sm:$0xff] (%p957_p6)  }
 0x41b   : >> { %v1354_v58 = vpack.c.bf16 %v1350_v57, %v1349_v56 }
 0x41d   : >> { %1362 = vst.msk [vmem:[%s19127_s29 + $0x18] sm:$0xff] %vm1358_vm1, %v1354_v58  ;;  %v19328_v58 = vld [vmem:[%s24506_s5 + $0x54] ss:$20 sps:$4 sm:$0xff] (%p957_p6)  }
 0x424   : > { %v19140_v59 = vld [vmem:[#allocation3] sm:$0xff]  ;;  %v19142_v60 = vld [vmem:[#allocation3 + $0x10] sm:$0xff]  ;;  %v19148_v61 = vld [vmem:[#allocation3 + $0x8] sm:$0xff] }
 0x425   : > { %1393 = vrot.lane.b32.xlu0 %v19140_v59, %s18812_s22  ;;  %1397 = vrot.lane.b32.xlu1 %v19142_v60, %s18812_s22  ;;  %v19150_v62 = vld [vmem:[#allocation3 + $0x18] sm:$0xff]  ;;  %v1373_v63 = vld [vmem:[#allocation3 + $0x40] sm:$0xff]  ;;  %v19162_v1 = vld [vmem:[#allocation3 + $0x28] sm:$0xff] }
 0x426   : > { %14924 = vmatprep.subr.bf16.mxu1 %v1373_v63  ;;  %v19156_v0 = vld [vmem:[#allocation3 + $0x20] sm:$0xff]  ;;  %v19168_v2 = vld [vmem:[#allocation3 + $0x30] sm:$0xff]  ;;  %v19177_v4 = vld [vmem:[#allocation3 + $0x38] sm:$0xff] }
 0x427   : > { %v19189_v6 = vld [vmem:[#allocation3 + $0x48] sm:$0xff]  ;;  %v19195_v7 = vld [vmem:[#allocation3 + $0x50] sm:$0xff]  ;;  %v19201_v8 = vld [vmem:[#allocation3 + $0x58] sm:$0xff] }
 0x428   : > { %v1854_v9 = vld [vmem:[#allocation3 + $0x60] sm:$0xff]  ;;  %v1855_v10 = vld [vmem:[#allocation3 + $0x68] sm:$0xff]  ;;  %v1856_v11 = vld [vmem:[#allocation3 + $0x70] sm:$0xff] }
 0x429   : > { %1395 = vrot.lane.b32.xlu0 %v19148_v61, %s18812_s22  ;;  %1399 = vrot.lane.b32.xlu1 %v19150_v62, %s18812_s22  ;;  %v1857_v12 = vld [vmem:[#allocation3 + $0x78] sm:$0xff]  ;;  %v2094_v14 = vld [vmem:[#allocation3 + $0x80] sm:$0xff]  ;;  %v2095_v15 = vld [vmem:[#allocation3 + $0x88] sm:$0xff] }
 0x42a   : > { %v2096_v16 = vld [vmem:[#allocation3 + $0x90] sm:$0xff]  ;;  %v2097_v17 = vld [vmem:[#allocation3 + $0x98] sm:$0xff]  ;;  %v2335_v18 = vld [vmem:[#allocation3 + $0xa8] sm:$0xff] }
 0x42b   : > { %v2334_v19 = vld [vmem:[#allocation3 + $0xa0] sm:$0xff]  ;;  %v2337_v20 = vld [vmem:[#allocation3 + $0xb8] sm:$0xff]  ;;  %v2336_v21 = vld [vmem:[#allocation3 + $0xb0] sm:$0xff] }
 0x42c   : > { %v2574_v30 = vld [vmem:[#allocation3 + $0xc0] sm:$0xff]  ;;  %v2575_v31 = vld [vmem:[#allocation3 + $0xc8] sm:$0xff]  ;;  %v2576_v32 = vld [vmem:[#allocation3 + $0xd0] sm:$0xff] }
 0x42d   : > { %1409 = vrot.lane.b32.xlu0 %v19156_v0, %s18813_s21  ;;  %1381 = vrot.lane.b32.xlu1 %v19140_v59, %s18813_s21  ;;  %v2577_v33 = vld [vmem:[#allocation3 + $0xd8] sm:$0xff]  ;;  %v18707_v5 = vld [vmem:[#allocation3 + $0x30] sm:$0xff] }
 0x431   : > { %1411 = vrot.lane.b32.xlu0 %v19162_v1, %s18813_s21  ;;  %1383 = vrot.lane.b32.xlu1 %v19148_v61, %s18813_s21 }
 0x435   : > { %1413 = vrot.lane.b32.xlu0 %v19168_v2, %s18813_s21  ;;  %1385 = vrot.lane.b32.xlu1 %v19142_v60, %s18813_s21 }
 0x439   : > { %1415 = vrot.lane.b32.xlu0 %v19177_v4, %s18813_s21  ;;  %1387 = vrot.lane.b32.xlu1 %v19150_v62, %s18813_s21 }
 0x43d   : > { %1437 = vrot.lane.b32.xlu0 %v1373_v63, %s18813_s21  ;;  %1421 = vrot.lane.b32.xlu1 %v19156_v0, %s18812_s22 }
 0x441   : > { %1439 = vrot.lane.b32.xlu0 %v19189_v6, %s18813_s21  ;;  %1423 = vrot.lane.b32.xlu1 %v19162_v1, %s18812_s22 }
 0x445   : > { %1441 = vrot.lane.b32.xlu0 %v19195_v7, %s18813_s21  ;;  %1425 = vrot.lane.b32.xlu1 %v19168_v2, %s18812_s22 }
 0x449   : > { %1443 = vrot.lane.b32.xlu0 %v19201_v8, %s18813_s21  ;;  %1427 = vrot.lane.b32.xlu1 %v19177_v4, %s18812_s22 }
 0x44d   : > { %1449 = vrot.lane.b32.xlu0 %v1373_v63, %s18812_s22  ;;  %1451 = vrot.lane.b32.xlu1 %v19189_v6, %s18812_s22  ;;  %v19346_v63 = vld [vmem:[%s24506_s5 + $0x50] ss:$20 sps:$4 sm:$0xff]  }
 0x451   : > { %1453 = vrot.lane.b32.xlu0 %v19195_v7, %s18812_s22  ;;  %1455 = vrot.lane.b32.xlu1 %v19201_v8, %s18812_s22 }
 0x455   : > { %1862 = vrot.lane.b32.xlu0 %v1854_v9, %s18813_s21  ;;  %1864 = vrot.lane.b32.xlu1 %v1855_v10, %s18813_s21 }
 0x459   : > { %1866 = vrot.lane.b32.xlu0 %v1856_v11, %s18813_s21  ;;  %1868 = vrot.lane.b32.xlu1 %v1857_v12, %s18813_s21 }
 0x45d   : > { %1874 = vrot.lane.b32.xlu0 %v1854_v9, %s18812_s22  ;;  %1876 = vrot.lane.b32.xlu1 %v1855_v10, %s18812_s22  ;;  %v19390_v9 = vld [vmem:[%s24506_s5 + $0x84] ss:$20 sps:$4 sm:$0xff]  }
 0x45e   : > { %v19396_v10 = vld [vmem:[%s24506_s5 + $0x10] ss:$20 sps:$4 sm:$0xff]  }
 0x461   : > { %1878 = vrot.lane.b32.xlu0 %v1856_v11, %s18812_s22  ;;  %1880 = vrot.lane.b32.xlu1 %v1857_v12, %s18812_s22  ;;  %v18708_v11 = vld [vmem:[#allocation3 + $0x38] sm:$0xff]  ;;  %v19398_v12 = vld [vmem:[#allocation3 + $0x40] sm:$0xff] }
 0x465   : > { %2102 = vrot.lane.b32.xlu0 %v2094_v14, %s18813_s21  ;;  %2104 = vrot.lane.b32.xlu1 %v2095_v15, %s18813_s21 }
 0x469   : > { %2106 = vrot.lane.b32.xlu0 %v2096_v16, %s18813_s21  ;;  %2108 = vrot.lane.b32.xlu1 %v2097_v17, %s18813_s21 }
 0x46d   : > { %2114 = vrot.lane.b32.xlu0 %v2094_v14, %s18812_s22  ;;  %2116 = vrot.lane.b32.xlu1 %v2095_v15, %s18812_s22  ;;  %v19408_v15 = vld [vmem:[#allocation3 + $0x48] sm:$0xff] }
 0x471   : > { %2118 = vrot.lane.b32.xlu0 %v2096_v16, %s18812_s22  ;;  %2120 = vrot.lane.b32.xlu1 %v2097_v17, %s18812_s22  ;;  %v19416_v16 = vld [vmem:[%s24506_s5 + $0x80] ss:$20 sps:$4 sm:$0xff]   ;;  %v19421_v17 = vld [vmem:[%s24506_s5 + $0x38] ss:$20 sps:$4 sm:$0xff]  }
 0x475   : > { %2344 = vrot.lane.b32.xlu1 %v2335_v18, %s18813_s21  ;;  %2342 = vrot.lane.b32.xlu0 %v2334_v19, %s18813_s21 }
 0x479   : > { %2348 = vrot.lane.b32.xlu1 %v2337_v20, %s18813_s21  ;;  %2346 = vrot.lane.b32.xlu0 %v2336_v21, %s18813_s21 }
 0x47d   : > { %2356 = vrot.lane.b32.xlu1 %v2335_v18, %s18812_s22  ;;  %2354 = vrot.lane.b32.xlu0 %v2334_v19, %s18812_s22  ;;  %v19423_v18 = vld [vmem:[#allocation3 + $0x60] sm:$0xff] }
 0x481   : > { %2360 = vrot.lane.b32.xlu1 %v2337_v20, %s18812_s22  ;;  %2358 = vrot.lane.b32.xlu0 %v2336_v21, %s18812_s22  ;;  %v19432_v20 = vld [vmem:[%s24506_s5 + $0x60] ss:$20 sps:$4 sm:$0xff]  }
 0x485   : > { %1500 = vperm.xlu1 %17444, %v1486_v22   ;;  %1495 = vperm.xlu0 %17443, %v1485_v23   ;;  %v19436_v22 = vld [vmem:[#allocation3 + $0x50] sm:$0xff]  ;;  %v19444_v23 = vld [vmem:[#allocation3 + $0x68] sm:$0xff] }
 0x489   : > { %1505 = vperm.xlu1 %17444, %v1487_v24   ;;  %1510 = vperm.xlu0 %17443, %v1488_v25   ;;  %v19447_v24 = vld [vmem:[#allocation3 + $0x58] sm:$0xff] }
 0x48a   : > { %v19453_v25 = vld [vmem:[%s24506_s5 + $0x88] ss:$20 sps:$4 sm:$0xff]  }
 0x48d   : > { %1515 = vperm.xlu1 %17444, %v1489_v26   ;;  %1520 = vperm.xlu0 %17443, %v1490_v27   ;;  %v19462_v27 = vld [vmem:[%s24506_s5 + $0x4] ss:$20 sps:$4 sm:$0xff]  }
 0x491   : > { %1525 = vperm.xlu1 %17444, %v1491_v28   ;;  %1530 = vperm.xlu0 %17443, %v1492_v29   ;;  %v19469_v29 = vld [vmem:[#allocation3 + $0x70] sm:$0xff] }
 0x495   : > { %2582 = vrot.lane.b32.xlu1 %v2574_v30, %s18813_s21  ;;  %2584 = vrot.lane.b32.xlu0 %v2575_v31, %s18813_s21  ;;  %v19480_v31 = vld [vmem:[#allocation3 + $0x78] sm:$0xff] }
 0x497   : > { %v1394_v34 = vpop.permute.xlu0 %1393  ;;  %v1398_v35 = vpop.permute.xlu1 %1397 }
 0x498   : > { %14884 = vmatprep.subr.bf16.mxu0 %v1394_v34 }
 0x499   : > { %14885 = vmatpush3.bf16.msra.mxu0 %v19140_v59  ;;  %2586 = vrot.lane.b32.xlu1 %v2576_v32, %s18813_s21  ;;  %v19333_v59 = vld [vmem:[%s24506_s5 + $0x34] ss:$20 sps:$4 sm:$0xff]   ;;  %v19488_v32 = vld [vmem:[%s24506_s5 + $0xc] ss:$20 sps:$4 sm:$0xff]  }
 0x49a   : > { %2588 = vrot.lane.b32.xlu0 %v2577_v33, %s18813_s21 }
 0x49b   : > { %v1396_v36 = vpop.permute.xlu0 %1395  ;;  %v1400_v37 = vpop.permute.xlu1 %1399 }
 0x49c   : > { %14886 = vmatprep.subr.bf16.mxu0 %v1396_v36  ;;  %v19532_v36 = vld [vmem:[#allocation3 + $0x88] sm:$0xff] }
 0x49d   : > { %14887 = vmatpush3.bf16.msra.mxu0 %v19148_v61  ;;  %v18705_v61 = vld [vmem:[#allocation3 + $0x20] sm:$0xff] }
 0x49e   : > { %14888 = vmatprep.subr.bf16.mxu0 %v1398_v35  ;;  %v19508_v35 = vld [vmem:[#allocation3 + $0x80] sm:$0xff] }
 0x49f   : > { %v19270_v38 = vpop.permute.xlu0 %1409  ;;  %v1382_v39 = vpop.permute.xlu1 %1381 }
 0x4a0   : > { %14925 = vmatpush3.bf16.msra.mxu1 %v19270_v38 }
 0x4a1   : > { %14889 = vmatpush3.bf16.msra.mxu0 %v19142_v60  ;;  %14926 = vmatprep.subr.bf16.mxu1 %v19189_v6 }
 0x4a2   : > { %14890 = vmatprep.subr.bf16.mxu0 %v1400_v37  ;;  %v19541_v37 = vld [vmem:[#allocation3 + $0x90] sm:$0xff] }
 0x4a3   : > { %v19275_v40 = vpop.permute.xlu0 %1411  ;;  %v1384_v41 = vpop.permute.xlu1 %1383 }
 0x4a4   : > { %14927 = vmatpush3.bf16.msra.mxu1 %v19275_v40 }
 0x4a5   : > { %14891 = vmatpush3.bf16.msra.mxu0 %v19150_v62  ;;  %14928 = vmatprep.subr.bf16.mxu1 %v19195_v7  ;;  %v19378_v7 = vld [vmem:[%s24506_s5 + $0x78] ss:$20 sps:$4 sm:$0xff]  }
 0x4a6   : > { %14892 = vmatprep.subr.bf16.mxu0 %v19156_v0  ;;  %v19351_v0 = vld [vmem:[%s24506_s5 + $0x30] ss:$20 sps:$4 sm:$0xff]  }
 0x4a7   : > { %v19281_v42 = vpop.permute.xlu0 %1413  ;;  %v1386_v43 = vpop.permute.xlu1 %1385 }
 0x4a8   : > { %14929 = vmatpush3.bf16.msra.mxu1 %v19281_v42 }
 0x4a9   : > { %14893 = vmatpush3.bf16.msra.mxu0 %v1382_v39  ;;  %14930 = vmatprep.subr.bf16.mxu1 %v19201_v8  ;;  %v19383_v8 = vld [vmem:[%s24506_s5 + $0x58] ss:$20 sps:$4 sm:$0xff]  }
 0x4aa   : > { %14894 = vmatprep.subr.bf16.mxu0 %v19162_v1  ;;  %v19359_v1 = vld [vmem:[%s24506_s5 + $0x7c] ss:$20 sps:$4 sm:$0xff]  }
 0x4ab   : > { %v19286_v44 = vpop.permute.xlu0 %1415  ;;  %v1388_v45 = vpop.permute.xlu1 %1387 }
 0x4ac   : > { %14931 = vmatpush3.bf16.msra.mxu1 %v19286_v44 }
 0x4ad   : > { %14895 = vmatpush3.bf16.msra.mxu0 %v1384_v41 }
 0x4ae   : > { %14896 = vmatprep.subr.bf16.mxu0 %v19168_v2  ;;  %v18706_v2 = vld [vmem:[#allocation3 + $0x28] sm:$0xff] }
 0x4af   : > { %v19290_v46 = vpop.permute.xlu0 %1437  ;;  %v1422_v47 = vpop.permute.xlu1 %1421 }
 0x4b0   : > { %14932 = vmatprep.subr.bf16.mxu1 %v19290_v46 }
 0x4b1   : > { %14897 = vmatpush3.bf16.msra.mxu0 %v1386_v43  ;;  %14933 = vmatpush3.bf16.msra.mxu1 %v1422_v47 }
 0x4b2   : > { %14898 = vmatprep.subr.bf16.mxu0 %v19177_v4 }
 0x4b3   : > { %v19299_v49 = vpop.permute.xlu0 %1439  ;;  %v1424_v50 = vpop.permute.xlu1 %1423 }
 0x4b4   : > { %14934 = vmatprep.subr.bf16.mxu1 %v19299_v49 }
 0x4b5   : > { %14899 = vmatpush3.bf16.msra.mxu0 %v1388_v45  ;;  %14935 = vmatpush3.bf16.msra.mxu1 %v1424_v50 }
 0x4b7   : > { %v19307_v52 = vpop.permute.xlu0 %1441  ;;  %v1426_v53 = vpop.permute.xlu1 %1425 }
 0x4b8   : > { %1679 = vmatmul.mubr.bf16.vlgmr.msra.gmra.mrb[0].mxu0 %v19297_v48  ;;  %14936 = vmatprep.subr.bf16.mxu1 %v19307_v52 }
 0x4b9   : > { %14937 = vmatpush3.bf16.msra.mxu1 %v1426_v53  ;;  %1686 = vmatprep.mubr.bf16.mxu0 %v19304_v51 }
 0x4bb   : > { %v19322_v56 = vpop.permute.xlu0 %1443  ;;  %v1428_v57 = vpop.permute.xlu1 %1427 }
 0x4bc   : > { %14938 = vmatprep.subr.bf16.mxu1 %v19322_v56 }
 0x4bd   : > { %14939 = vmatpush3.bf16.msra.mxu1 %v1428_v57 }
 0x4be   : > { %14972 = vmatprep.subr.bf16.mxu1 %v1422_v47  ;;  %v19612_v47 = vld [vmem:[#allocation3 + $0xa0] sm:$0xff] }
 0x4bf   : > { %v19335_v60 = vpop.permute.xlu0 %1449  ;;  %v19340_v62 = vpop.permute.xlu1 %1451 }
 0x4c0   : > { %1687 = vmatmul.mubr.bf16.gmra.mrb[4].mxu0 %v19315_v54  ;;  %1744 = vmatmul.mubr.bf16.vlgmr.msra.gmra.mrb[0].mxu1 %v19320_v55 }
 0x4c1   : > { %14973 = vmatpush3.bf16.msra.mxu1 %v18705_v61  ;;  %15664 = vmatprep.subr.bf16.mxu0 %v19335_v60 }
 0x4c2   : > { %14974 = vmatprep.subr.bf16.mxu1 %v1424_v50  ;;  %1694 = vmatprep.mubr.bf16.mxu0 %v19328_v58 }
 0x4c3   : > { %1751 = vmatprep.mubr.bf16.mxu1 %v19333_v59  ;;  %15665 = vmatpush3.bf16.msra.mxu0 %v19335_v60  ;;  %v19366_v4 = vpop.permute.xlu0 %1453  ;;  %v19372_v6 = vpop.permute.xlu1 %1455 }
 0x4c4   : > { %15666 = vmatprep.subr.bf16.mxu0 %v19340_v62 }
 0x4c5   : > { %14975 = vmatpush3.bf16.msra.mxu1 %v18706_v2 }
 0x4c6   : > { %14976 = vmatprep.subr.bf16.mxu1 %v1426_v53 }
 0x4c7   : > { %15667 = vmatpush3.bf16.msra.mxu0 %v19340_v62  ;;  %v19402_v14 = vpop.permute.xlu0 %1862  ;;  %v19426_v19 = vpop.permute.xlu1 %1864 }
 0x4c8   : > { %1695 = vmatmul.mubr.bf16.gmra.mrb[8].mxu0 %v19346_v63  ;;  %1752 = vmatmul.mubr.bf16.gmra.mrb[4].mxu1 %v19351_v0 }
 0x4c9   : > { %14977 = vmatpush3.bf16.msra.mxu1 %v18707_v5  ;;  %15668 = vmatprep.subr.bf16.mxu0 %v19366_v4  ;;  %v19736_v5 = vld [vmem:[%s24506_s5 + $0x78] ss:$20 sps:$4 sm:$0xff]  }
 0x4ca   : > { %14978 = vmatprep.subr.bf16.mxu1 %v1428_v57  ;;  %1702 = vmatprep.mubr.bf16.mxu0 %v19359_v1  ;;  %v19668_v57 = vld [vmem:[%s24506_s5 + $0x2c] ss:$20 sps:$4 sm:$0xff]  }
 0x4cb   : > { %1759 = vmatprep.mubr.bf16.mxu1 %v19364_v3  ;;  %15669 = vmatpush3.bf16.msra.mxu0 %v19366_v4  ;;  %v19434_v21 = vpop.permute.xlu0 %1866  ;;  %v19455_v26 = vpop.permute.xlu1 %1868 }
 0x4cc   : > { %15670 = vmatprep.subr.bf16.mxu0 %v19372_v6 }
 0x4cd   : > { %14979 = vmatpush3.bf16.msra.mxu1 %v18708_v11  ;;  %v19765_v11 = vld [vmem:[%s24506_s5 + $0x30] ss:$20 sps:$4 sm:$0xff]  }
 0x4ce   : > { %14980 = vmatprep.subr.bf16.mxu1 %v19398_v12 }
 0x4cf   : > { %15671 = vmatpush3.bf16.msra.mxu0 %v19372_v6  ;;  %v19465_v28 = vpop.permute.xlu0 %1874  ;;  %v19476_v30 = vpop.permute.xlu1 %1876 }
 0x4d0   : > { %1703 = vmatmul.mubr.bf16.gmra.mrb[12].mxu0 %v19378_v7  ;;  %1760 = vmatmul.mubr.bf16.gmra.mrb[8].mxu1 %v19383_v8 }
 0x4d1   : > { %14981 = vmatpush3.bf16.msra.mxu1 %v19270_v38  ;;  %1767 = vmatprep.mubr.bf16.mxu1 %v19390_v9  ;;  %v19550_v38 = vld [vmem:[#allocation3 + $0x98] sm:$0xff] }
 0x4d2   : > { %14982 = vmatprep.subr.bf16.mxu1 %v19408_v15  ;;  %15672 = vmatprep.mubr.msk.bf16.mxu0 %vm1633_vm2, %v19396_v10 }
 0x4d3   : > { %15012 = vmatprep.subr.bf16.mxu0 %v19423_v18  ;;  %v19491_v33 = vpop.permute.xlu0 %1878  ;;  %v19498_v34 = vpop.permute.xlu1 %1880 }
 0x4d5   : > { %14983 = vmatpush3.bf16.msra.mxu1 %v19275_v40 }
 0x4d6   : > { %14984 = vmatprep.subr.bf16.mxu1 %v19436_v22 }
 0x4d7   : > { %v19554_v39 = vpop.permute.xlu0 %2102  ;;  %v19561_v40 = vpop.permute.xlu1 %2104 }
 0x4d8   : > { %1768 = vmatmul.mubr.bf16.gmra.mrb[12].mxu1 %v19416_v16  ;;  %15673 = vmatmul.mubr.msk.bf16.vlgmr.msra.gmra.mrb[16].mxu0 %vm1633_vm2, %v19421_v17 }
 0x4d9   : > { %15013 = vmatpush3.bf16.msra.mxu0 %v19290_v46  ;;  %14985 = vmatpush3.bf16.msra.mxu1 %v19281_v42 }
 0x4da   : > { %15014 = vmatprep.subr.bf16.mxu0 %v19444_v23  ;;  %14986 = vmatprep.subr.bf16.mxu1 %v19447_v24 }
 0x4db   : > { %15676 = vmatprep.mubr.msk.bf16.mxu0 %vm1633_vm2, %v19432_v20  ;;  %1918 = vmatprep.mubr.bf16.mxu1 %v19462_v27  ;;  %v19563_v41 = vpop.permute.xlu0 %2106  ;;  %v19573_v43 = vpop.permute.xlu1 %2108 }
 0x4dd   : > { %15015 = vmatpush3.bf16.msra.mxu0 %v19299_v49  ;;  %14987 = vmatpush3.bf16.msra.mxu1 %v19286_v44 }
 0x4de   : > { %15016 = vmatprep.subr.bf16.mxu0 %v19469_v29  ;;  %15680 = vmatprep.subr.bf16.mxu1 %v19465_v28 }
 0x4df   : > { %v19571_v42 = vpop.permute.xlu0 %2114  ;;  %v19580_v44 = vpop.permute.xlu1 %2116 }
 0x4e0   : > { %15677 = vmatmul.mubr.msk.bf16.gmra.mrb[20].mxu0 %vm1633_vm2, %v19453_v25  ;;  %1919 = vmatmul.mubr.bf16.vlgmr.msra.gmra.mrb[16].mxu1 %v19297_v48 }
 0x4e1   : > { %15017 = vmatpush3.bf16.msra.mxu0 %v19307_v52  ;;  %1926 = vmatprep.mubr.bf16.mxu1 %v19304_v51 }
 0x4e2   : > { %15018 = vmatprep.subr.bf16.mxu0 %v19480_v31  ;;  %15681 = vmatpush3.bf16.msra.mxu1 %v19465_v28 }
 0x4e3   : > { %15682 = vmatprep.subr.bf16.mxu1 %v19476_v30  ;;  %1983 = vmatprep.mubr.bf16.mxu0 %v19488_v32  ;;  %v19587_v45 = vpop.permute.xlu0 %2118 }
 0x4e5   : > { %15019 = vmatpush3.bf16.msra.mxu0 %v19322_v56 }
 0x4e6   : > { %15020 = vmatprep.subr.bf16.mxu0 %v19402_v14  ;;  %15683 = vmatpush3.bf16.msra.mxu1 %v19476_v30 }
 0x4e7   : > { %15684 = vmatprep.subr.bf16.mxu1 %v19491_v33 }
 0x4e8   : > { %1927 = vmatmul.mubr.bf16.gmra.mrb[20].mxu1 %v19315_v54 }
 0x4e9   : > { %15021 = vmatpush3.bf16.msra.mxu0 %v19335_v60  ;;  %1934 = vmatprep.mubr.bf16.mxu1 %v19328_v58 }
 0x4ea   : > { %15022 = vmatprep.subr.bf16.mxu0 %v19426_v19  ;;  %15685 = vmatpush3.bf16.msra.mxu1 %v19491_v33 }
 0x4eb   : > { %15686 = vmatprep.subr.bf16.mxu1 %v19498_v34 }
 0x4ed   : > { %15023 = vmatpush3.bf16.msra.mxu0 %v19340_v62 }
 0x4ee   : > { %15024 = vmatprep.subr.bf16.mxu0 %v19434_v21  ;;  %15687 = vmatpush3.bf16.msra.mxu1 %v19498_v34 }
 0x4ef   : > { %15100 = vmatprep.subr.bf16.mxu1 %v19508_v35 }
 0x4f0   : > { %1935 = vmatmul.mubr.bf16.gmra.mrb[24].mxu1 %v19346_v63 }
 0x4f1   : > { %15025 = vmatpush3.bf16.msra.mxu0 %v19366_v4  ;;  %1942 = vmatprep.mubr.bf16.mxu1 %v19359_v1 }
 0x4f2   : > { %15026 = vmatprep.subr.bf16.mxu0 %v19455_v26 }
 0x4f5   : > { %15027 = vmatpush3.bf16.msra.mxu0 %v19372_v6 }
 0x4f6   : > { %15060 = vmatprep.subr.bf16.mxu0 %v19335_v60  ;;  %v19686_v60 = vld [vmem:[%s24506_s5 + $0x28] ss:$20 sps:$4 sm:$0xff]  }
 0x4f8   : > { %1984 = vmatmul.mubr.bf16.vlgmr.msra.gmra.mrb[24].mxu0 %v19320_v55  ;;  %1943 = vmatmul.mubr.bf16.gmra.mrb[28].mxu1 %v19378_v7 }
 0x4f9   : > { %15061 = vmatpush3.bf16.msra.mxu0 %v19398_v12  ;;  %1991 = vmatprep.mubr.bf16.mxu0 %v19333_v59  ;;  %v18739_v12 = vld [vmem:[%s24506_s5 + $0x38] ss:$20 sps:$4 sm:$0xff]  }
 0x4fa   : > { %15062 = vmatprep.subr.bf16.mxu0 %v19340_v62  ;;  %15688 = vmatprep.mubr.msk.bf16.mxu1 %vm1633_vm2, %v19396_v10  ;;  %v19695_v62 = vld [vmem:[%s24506_s5 + $0x54] ss:$20 sps:$4 sm:$0xff]  }
 0x4fd   : > { %15063 = vmatpush3.bf16.msra.mxu0 %v19408_v15  ;;  %v18741_v15 = vld [vmem:[%s24506_s5 + $0x5c] ss:$20 sps:$4 sm:$0xff]  }
 0x4fe   : > { %15064 = vmatprep.subr.bf16.mxu0 %v19366_v4  ;;  %v19730_v4 = vld [vmem:[%s24506_s5 + $0x8] ss:$20 sps:$4 sm:$0xff]  }
 0x500   : > { %1992 = vmatmul.mubr.bf16.gmra.mrb[28].mxu0 %v19351_v0  ;;  %15689 = vmatmul.mubr.msk.bf16.vlgmr.msra.gmra.mrb[32].mxu1 %vm1633_vm2, %v19421_v17 }
 0x501   : > { %15065 = vmatpush3.bf16.msra.mxu0 %v19436_v22  ;;  %15101 = vmatpush3.bf16.msra.mxu1 %v19402_v14 }
 0x502   : > { %15066 = vmatprep.subr.bf16.mxu0 %v19372_v6  ;;  %15102 = vmatprep.subr.bf16.mxu1 %v19532_v36  ;;  %v19743_v6 = vld [vmem:[%s24506_s5 + $0x34] ss:$20 sps:$4 sm:$0xff]  }
 0x503   : > { %1999 = vmatprep.mubr.bf16.mxu0 %v19364_v3  ;;  %15692 = vmatprep.mubr.msk.bf16.mxu1 %vm1633_vm2, %v19432_v20 }
 0x505   : > { %15067 = vmatpush3.bf16.msra.mxu0 %v19447_v24  ;;  %15103 = vmatpush3.bf16.msra.mxu1 %v19426_v19 }
 0x506   : > { %15068 = vmatprep.subr.bf16.mxu0 %v19423_v18  ;;  %15104 = vmatprep.subr.bf16.mxu1 %v19541_v37 }
 0x508   : > { %2000 = vmatmul.mubr.bf16.gmra.mrb[32].mxu0 %v19383_v8  ;;  %15693 = vmatmul.mubr.msk.bf16.gmra.mrb[36].mxu1 %vm1633_vm2, %v19453_v25 }
 0x509   : > { %15069 = vmatpush3.bf16.msra.mxu0 %v19290_v46  ;;  %15105 = vmatpush3.bf16.msra.mxu1 %v19434_v21  ;;  %v19597_v46 = vpop.permute.xlu1 %2120 }
 0x50a   : > { %15070 = vmatprep.subr.bf16.mxu0 %v19444_v23  ;;  %15106 = vmatprep.subr.bf16.mxu1 %v19550_v38 }
 0x50b   : > { %2007 = vmatprep.mubr.bf16.mxu0 %v19390_v9  ;;  %2223 = vmatprep.mubr.bf16.mxu1 %v19488_v32 }
 0x50d   : > { %15071 = vmatpush3.bf16.msra.mxu0 %v19299_v49  ;;  %15107 = vmatpush3.bf16.msra.mxu1 %v19455_v26  ;;  %v19626_v49 = vpop.permute.xlu1 %2344 }
 0x50e   : > { %15072 = vmatprep.subr.bf16.mxu0 %v19469_v29  ;;  %15108 = vmatprep.subr.bf16.mxu1 %v19554_v39 }
 0x510   : > { %2008 = vmatmul.mubr.bf16.gmra.mrb[36].mxu0 %v19416_v16 }
 0x511   : > { %15073 = vmatpush3.bf16.msra.mxu0 %v19307_v52  ;;  %15109 = vmatpush3.bf16.msra.mxu1 %v19465_v28  ;;  %v19641_v52 = vpop.permute.xlu1 %2348 }
 0x512   : > { %15074 = vmatprep.subr.bf16.mxu0 %v19480_v31  ;;  %15110 = vmatprep.subr.bf16.mxu1 %v19561_v40 }
 0x513   : > { %2158 = vmatprep.mubr.bf16.mxu0 %v19462_v27 }
 0x515   : > { %15075 = vmatpush3.bf16.msra.mxu0 %v19322_v56  ;;  %15111 = vmatpush3.bf16.msra.mxu1 %v19476_v30  ;;  %v19662_v56 = vpop.permute.xlu1 %2356 }
 0x516   : > { %15112 = vmatprep.subr.bf16.mxu1 %v19563_v41  ;;  %15696 = vmatprep.subr.bf16.mxu0 %v19571_v42 }
 0x518   : > { %2159 = vmatmul.mubr.bf16.vlgmr.msra.gmra.mrb[40].mxu0 %v19297_v48  ;;  %v19617_v48 = vpop.permute.xlu0 %2342 }
 0x519   : > { %15113 = vmatpush3.bf16.msra.mxu1 %v19491_v33  ;;  %2166 = vmatprep.mubr.bf16.mxu0 %v19304_v51  ;;  %v19637_v51 = vld [vmem:[#allocation3 + $0xa8] sm:$0xff]  ;;  %v19689_v61 = vpop.permute.xlu1 %2360 }
 0x51a   : > { %15114 = vmatprep.subr.bf16.mxu1 %v19573_v43  ;;  %15697 = vmatpush3.bf16.msra.mxu0 %v19571_v42 }
 0x51b   : > { %15698 = vmatprep.subr.bf16.mxu0 %v19580_v44 }
 0x51c   : > { %v19629_v50 = vpop.permute.xlu0 %2346 }
 0x51d   : > { %15115 = vmatpush3.bf16.msra.mxu1 %v19498_v34  ;;  %v19721_v2 = vpop.permute.xlu1 %1500 }
 0x51e   : > { %15148 = vmatprep.subr.bf16.mxu1 %v19465_v28  ;;  %15699 = vmatpush3.bf16.msra.mxu0 %v19580_v44  ;;  %v19827_v28 = vld [vmem:[%s24506_s5 + $0x80] ss:$20 sps:$4 sm:$0xff]  }
 0x51f   : > { %15700 = vmatprep.subr.bf16.mxu0 %v19587_v45 }
 0x520   : > { %2167 = vmatmul.mubr.bf16.gmra.mrb[44].mxu0 %v19315_v54  ;;  %2224 = vmatmul.mubr.bf16.vlgmr.msra.gmra.mrb[40].mxu1 %v19320_v55  ;;  %v19646_v53 = vpop.permute.xlu0 %2354  ;;  %v19650_v54 = vld [vmem:[#allocation3 + $0xb0] sm:$0xff] }
 0x521   : > { %15149 = vmatpush3.bf16.msra.mxu1 %v19423_v18  ;;  %2174 = vmatprep.mubr.bf16.mxu0 %v19328_v58  ;;  %v19659_v55 = vld [vmem:[%s24506_s5] ss:$20 sps:$4 sm:$0xff]   ;;  %v19671_v58 = vld [vmem:[#allocation3 + $0xb8] sm:$0xff] }
 0x522   : > { %15150 = vmatprep.subr.bf16.mxu1 %v19476_v30  ;;  %2231 = vmatprep.mubr.bf16.mxu1 %v19333_v59  ;;  %v18750_v30 = vld [vmem:[%s24506_s5 + $0x4] ss:$20 sps:$4 sm:$0xff]  }
 0x523   : > { %15701 = vmatpush3.bf16.msra.mxu0 %v19587_v45 }
 0x524   : > { %15702 = vmatprep.subr.bf16.mxu0 %v19597_v46  ;;  %v19677_v59 = vpop.permute.xlu0 %2358 }
 0x525   : > { %15151 = vmatpush3.bf16.msra.mxu1 %v19444_v23  ;;  %v19807_v23 = vld [vmem:[#allocation3 + $0xd8] sm:$0xff] }
 0x526   : > { %15152 = vmatprep.subr.bf16.mxu1 %v19491_v33 }
 0x527   : > { %15703 = vmatpush3.bf16.msra.mxu0 %v19597_v46 }
 0x528   : > { %2175 = vmatmul.mubr.bf16.gmra.mrb[48].mxu0 %v19346_v63  ;;  %2232 = vmatmul.mubr.bf16.gmra.mrb[44].mxu1 %v19351_v0  ;;  %v19704_v63 = vld [vmem:[#allocation3 + $0xc0] sm:$0xff] }
 0x529   : > { %15153 = vmatpush3.bf16.msra.mxu1 %v19469_v29  ;;  %2182 = vmatprep.mubr.bf16.mxu0 %v19359_v1  ;;  %v19710_v0 = vld [vmem:[%s24506_s5 + $0x50] ss:$20 sps:$4 sm:$0xff]  }
 0x52a   : > { %15154 = vmatprep.subr.bf16.mxu1 %v19498_v34  ;;  %2239 = vmatprep.mubr.bf16.mxu1 %v19364_v3  ;;  %v19717_v1 = vld [vmem:[%s24506_s5 + $0x7c] ss:$20 sps:$4 sm:$0xff]   ;;  %v19725_v3 = vpop.permute.xlu0 %1495 }
 0x52b   : > { %15188 = vmatprep.subr.bf16.mxu0 %v19612_v47 }
 0x52d   : > { %15155 = vmatpush3.bf16.msra.mxu1 %v19480_v31 }
 0x52e   : > { %15156 = vmatprep.subr.bf16.mxu1 %v19508_v35 }
 0x530   : > { %2183 = vmatmul.mubr.bf16.gmra.mrb[52].mxu0 %v19378_v7  ;;  %2240 = vmatmul.mubr.bf16.gmra.mrb[48].mxu1 %v19383_v8  ;;  %v19746_v7 = vpop.permute.xlu1 %1505  ;;  %v19752_v8 = vld [vmem:[%s24506_s5 + $0x10] ss:$20 sps:$4 sm:$0xff]  }
 0x531   : > { %15157 = vmatpush3.bf16.msra.mxu1 %v19402_v14  ;;  %2247 = vmatprep.mubr.bf16.mxu1 %v19390_v9  ;;  %v19757_v9 = vpop.permute.xlu0 %1510  ;;  %v19775_v14 = vld [vmem:[#allocation3 + $0xc8] sm:$0xff] }
 0x532   : > { %15158 = vmatprep.subr.bf16.mxu1 %v19532_v36  ;;  %15704 = vmatprep.mubr.msk.bf16.mxu0 %vm1633_vm2, %v19396_v10 }
 0x534   : > { %v19760_v10 = vpop.permute.xlu1 %1515 }
 0x535   : > { %15159 = vmatpush3.bf16.msra.mxu1 %v19426_v19  ;;  %v19792_v19 = vld [vmem:[#allocation3 + $0xd0] sm:$0xff] }
 0x536   : > { %15160 = vmatprep.subr.bf16.mxu1 %v19541_v37 }
 0x538   : > { %2248 = vmatmul.mubr.bf16.gmra.mrb[52].mxu1 %v19416_v16  ;;  %15705 = vmatmul.mubr.msk.bf16.vlgmr.msra.gmra.mrb[56].mxu0 %vm1633_vm2, %v19421_v17  ;;  %v18742_v16 = vld [vmem:[%s24506_s5 + $0x60] ss:$20 sps:$4 sm:$0xff]   ;;  %v19785_v17 = vpop.permute.xlu0 %1520  ;;  %v19789_v18 = vpop.permute.xlu1 %1525 }
 0x539   : > { %15189 = vmatpush3.bf16.msra.mxu0 %v19554_v39  ;;  %15161 = vmatpush3.bf16.msra.mxu1 %v19434_v21  ;;  %24547 = vst [vmem:[#allocation4_spill] sm:$0xff] %v19785_v17  ;;  %24548 = vst [vmem:[#allocation5_spill] sm:$0xff] %v19789_v18  ;;  %v18745_v21 = vld [vmem:[%s24506_s5 + $0x88] ss:$20 sps:$4 sm:$0xff]  }
 0x53a   : > { %15190 = vmatprep.subr.bf16.mxu0 %v19637_v51  ;;  %15162 = vmatprep.subr.bf16.mxu1 %v19550_v38 }
 0x53b   : > { %15708 = vmatprep.mubr.msk.bf16.mxu0 %vm1633_vm2, %v19432_v20  ;;  %2398 = vmatprep.mubr.bf16.mxu1 %v19462_v27  ;;  %v18744_v20 = vld [vmem:[%s24506_s5 + $0x58] ss:$20 sps:$4 sm:$0xff]  }
 0x53c   : > { %v19804_v22 = vpop.permute.xlu0 %1530  ;;  %v19810_v24 = vpop.permute.xlu1 %2582 }
 0x53d   : > { %15191 = vmatpush3.bf16.msra.mxu0 %v19561_v40  ;;  %15163 = vmatpush3.bf16.msra.mxu1 %v19455_v26  ;;  %24549 = vst [vmem:[#allocation6_spill] sm:$0xff] %v19804_v22  ;;  %v18748_v26 = vld [vmem:[%s24506_s5 + $0xc] ss:$20 sps:$4 sm:$0xff]  }
 0x53e   : > { %15192 = vmatprep.subr.bf16.mxu0 %v19650_v54  ;;  %15712 = vmatprep.subr.bf16.mxu1 %v19646_v53 }
 0x540   : > { %15709 = vmatmul.mubr.msk.bf16.gmra.mrb[60].mxu0 %vm1633_vm2, %v19453_v25  ;;  %2399 = vmatmul.mubr.bf16.vlgmr.msra.gmra.mrb[56].mxu1 %v19659_v55  ;;  %v18747_v25 = vld [vmem:[%s24506_s5 + $0x84] ss:$20 sps:$4 sm:$0xff]   ;;  %v19822_v27 = vpop.permute.xlu0 %2584  ;;  %v19834_v29 = vpop.permute.xlu1 %2586 }
 0x541   : > { %15193 = vmatpush3.bf16.msra.mxu0 %v19563_v41  ;;  %2406 = vmatprep.mubr.bf16.mxu1 %v19668_v57 }
 0x542   : > { %15194 = vmatprep.subr.bf16.mxu0 %v19671_v58  ;;  %15713 = vmatpush3.bf16.msra.mxu1 %v19646_v53 }
 0x543   : > { %15714 = vmatprep.subr.bf16.mxu1 %v19662_v56  ;;  %2463 = vmatprep.mubr.bf16.mxu0 %v19488_v32 }
 0x544   : > { %v19842_v31 = vpop.permute.xlu0 %2588 }
 0x545   : > { %15195 = vmatpush3.bf16.msra.mxu0 %v19573_v43 }
 0x546   : > { %15196 = vmatprep.subr.bf16.mxu0 %v19617_v48  ;;  %15715 = vmatpush3.bf16.msra.mxu1 %v19662_v56 }
 0x547   : > { %15716 = vmatprep.subr.bf16.mxu1 %v19677_v59 }
 0x548   : > { %2407 = vmatmul.mubr.bf16.gmra.mrb[60].mxu1 %v19686_v60 }
 0x549   : > { %15197 = vmatpush3.bf16.msra.mxu0 %v19571_v42  ;;  %2414 = vmatprep.mubr.bf16.mxu1 %v19695_v62 }
 0x54a   : > { %15198 = vmatprep.subr.bf16.mxu0 %v19626_v49  ;;  %15717 = vmatpush3.bf16.msra.mxu1 %v19677_v59 }
 0x54b   : > { %15718 = vmatprep.subr.bf16.mxu1 %v19689_v61 }
 0x54d   : > { %15199 = vmatpush3.bf16.msra.mxu0 %v19580_v44 }
 0x54e   : > { %15200 = vmatprep.subr.bf16.mxu0 %v19629_v50  ;;  %15719 = vmatpush3.bf16.msra.mxu1 %v19689_v61 }
 0x54f   : > { %15276 = vmatprep.subr.bf16.mxu1 %v19704_v63 }
 0x550   : > { %2415 = vmatmul.mubr.bf16.gmra.mrb[64].mxu1 %v19710_v0 }
 0x551   : > { %15201 = vmatpush3.bf16.msra.mxu0 %v19587_v45  ;;  %2422 = vmatprep.mubr.bf16.mxu1 %v19717_v1 }
 0x552   : > { %15202 = vmatprep.subr.bf16.mxu0 %v19641_v52 }
 0x555   : > { %15203 = vmatpush3.bf16.msra.mxu0 %v19597_v46 }
 0x556   : > { %15236 = vmatprep.subr.bf16.mxu0 %v19571_v42 }
 0x558   : > { %2464 = vmatmul.mubr.bf16.vlgmr.msra.gmra.mrb[64].mxu0 %v19730_v4  ;;  %2423 = vmatmul.mubr.bf16.gmra.mrb[68].mxu1 %v19736_v5 }
 0x559   : > { %15237 = vmatpush3.bf16.msra.mxu0 %v19508_v35  ;;  %2471 = vmatprep.mubr.bf16.mxu0 %v19743_v6 }
 0x55a   : > { %15238 = vmatprep.subr.bf16.mxu0 %v19580_v44  ;;  %15720 = vmatprep.mubr.msk.bf16.mxu1 %vm1633_vm2, %v19752_v8 }
 0x55d   : > { %15239 = vmatpush3.bf16.msra.mxu0 %v19532_v36 }
 0x55e   : > { %15240 = vmatprep.subr.bf16.mxu0 %v19587_v45 }
 0x560   : > { %2472 = vmatmul.mubr.bf16.gmra.mrb[68].mxu0 %v19765_v11  ;;  %15721 = vmatmul.mubr.msk.bf16.vlgmr.msra.gmra.mrb[72].mxu1 %vm1633_vm2, %v18739_v12 }
 0x561   : > { %15241 = vmatpush3.bf16.msra.mxu0 %v19541_v37  ;;  %15277 = vmatpush3.bf16.msra.mxu1 %v19617_v48 }
 0x562   : > { %15242 = vmatprep.subr.bf16.mxu0 %v19597_v46  ;;  %15278 = vmatprep.subr.bf16.mxu1 %v19775_v14 }
 0x563   : > { %2479 = vmatprep.mubr.bf16.mxu0 %v18741_v15  ;;  %15724 = vmatprep.mubr.msk.bf16.mxu1 %vm1633_vm2, %v18742_v16 }
 0x565   : > { %15243 = vmatpush3.bf16.msra.mxu0 %v19550_v38  ;;  %15279 = vmatpush3.bf16.msra.mxu1 %v19626_v49 }
 0x566   : > { %15244 = vmatprep.subr.bf16.mxu0 %v19612_v47  ;;  %15280 = vmatprep.subr.bf16.mxu1 %v19792_v19 }
 0x568   : > { %2480 = vmatmul.mubr.bf16.gmra.mrb[72].mxu0 %v18744_v20  ;;  %15725 = vmatmul.mubr.msk.bf16.gmra.mrb[76].mxu1 %vm1633_vm2, %v18745_v21 }
 0x569   : > { %15245 = vmatpush3.bf16.msra.mxu0 %v19554_v39  ;;  %15281 = vmatpush3.bf16.msra.mxu1 %v19629_v50 }
 0x56a   : > { %15246 = vmatprep.subr.bf16.mxu0 %v19637_v51  ;;  %15282 = vmatprep.subr.bf16.mxu1 %v19807_v23 }
 0x56b   : > { %2487 = vmatprep.mubr.bf16.mxu0 %v18747_v25  ;;  %2703 = vmatprep.mubr.bf16.mxu1 %v18748_v26 }
 0x56d   : > { %15247 = vmatpush3.bf16.msra.mxu0 %v19561_v40  ;;  %15283 = vmatpush3.bf16.msra.mxu1 %v19641_v52 }
 0x56e   : > { %15248 = vmatprep.subr.bf16.mxu0 %v19650_v54  ;;  %15284 = vmatprep.subr.bf16.mxu1 %v19810_v24 }
 0x570   : > { %2488 = vmatmul.mubr.bf16.gmra.mrb[76].mxu0 %v19827_v28 }
 0x571   : > { %15249 = vmatpush3.bf16.msra.mxu0 %v19563_v41  ;;  %15285 = vmatpush3.bf16.msra.mxu1 %v19646_v53 }
 0x572   : > { %15250 = vmatprep.subr.bf16.mxu0 %v19671_v58  ;;  %15286 = vmatprep.subr.bf16.mxu1 %v19822_v27 }
 0x573   : > { %2638 = vmatprep.mubr.bf16.mxu0 %v18750_v30 }
 0x575   : > { %15251 = vmatpush3.bf16.msra.mxu0 %v19573_v43  ;;  %15287 = vmatpush3.bf16.msra.mxu1 %v19662_v56 }
 0x576   : > { %15288 = vmatprep.subr.bf16.mxu1 %v19834_v29 }
 0x578   : > { %2639 = vmatmul.mubr.bf16.vlgmr.msra.gmra.mrb[80].mxu0 %v19659_v55 }
 0x579   : > { %15289 = vmatpush3.bf16.msra.mxu1 %v19677_v59  ;;  %2646 = vmatprep.mubr.bf16.mxu0 %v19668_v57 }
 0x57a   : > { %15290 = vmatprep.subr.bf16.mxu1 %v19842_v31 }
 0x57d   : > { %15291 = vmatpush3.bf16.msra.mxu1 %v19689_v61 }
 0x57e   : > { %15324 = vmatprep.subr.bf16.mxu1 %v19646_v53 }
 0x580   : > { %2647 = vmatmul.mubr.bf16.gmra.mrb[84].mxu0 %v19686_v60  ;;  %2704 = vmatmul.mubr.bf16.vlgmr.msra.gmra.mrb[80].mxu1 %v19730_v4 }
 0x581   : > { %15325 = vmatpush3.bf16.msra.mxu1 %v19612_v47  ;;  %2654 = vmatprep.mubr.bf16.mxu0 %v19695_v62 }
 0x582   : > { %15326 = vmatprep.subr.bf16.mxu1 %v19662_v56  ;;  %2711 = vmatprep.mubr.bf16.mxu1 %v19743_v6 }
 0x585   : > { %15327 = vmatpush3.bf16.msra.mxu1 %v19637_v51 }
 0x586   : > { %15328 = vmatprep.subr.bf16.mxu1 %v19677_v59 }
 0x588   : > { %2655 = vmatmul.mubr.bf16.gmra.mrb[88].mxu0 %v19710_v0  ;;  %2712 = vmatmul.mubr.bf16.gmra.mrb[84].mxu1 %v19765_v11 }
 0x589   : > { %15329 = vmatpush3.bf16.msra.mxu1 %v19650_v54  ;;  %2662 = vmatprep.mubr.bf16.mxu0 %v19717_v1 }
 0x58a   : > { %15330 = vmatprep.subr.bf16.mxu1 %v19689_v61  ;;  %2719 = vmatprep.mubr.bf16.mxu1 %v18741_v15 }
 0x58b   : > { %v14900_v32 = vpop.f32.mrb[0].mxu0 }
 0x58c   : > { %v14901_v33 = vpop.f32.mrb[1].mxu0 }
 0x58d   : > { %15331 = vmatpush3.bf16.msra.mxu1 %v19671_v58  ;;  %v14903_v34 = vpop.f32.mrb[2].mxu0  ;;  %v14902_v35 = vadd.f32 %v14901_v33, %v14900_v32 }
 0x58e   : > { %v14904_v36 = vpop.f32.mrb[3].mxu0  ;;  %15332 = vmatprep.subr.bf16.mxu1 %v19704_v63 }
 0x58f   : > { %v14905_v37 = vadd.f32 %v14904_v36, %v14903_v34  ;;  %v1681_v45 = vadd.f32 %v14902_v35, %v19725_v3 }
 0x590   : > { %2663 = vmatmul.mubr.bf16.gmra.mrb[92].mxu0 %v19736_v5  ;;  %2720 = vmatmul.mubr.bf16.gmra.mrb[88].mxu1 %v18744_v20 }
 0x591   : > { %15333 = vmatpush3.bf16.msra.mxu1 %v19617_v48  ;;  %2727 = vmatprep.mubr.bf16.mxu1 %v18747_v25  ;;  %v1684_v54 = vadd.f32 %v14905_v37, %v19721_v2 }
 0x592   : > { %15334 = vmatprep.subr.bf16.mxu1 %v19775_v14  ;;  %15736 = vmatprep.mubr.msk.bf16.mxu0 %vm1633_vm2, %v19752_v8 }
 0x593   : > { %v14906_v38 = vpop.f32.mrb[4].mxu0  ;;  %v14940_v39 = vpop.f32.mrb[0].mxu1 }
 0x594   : > { %v14907_v40 = vpop.f32.mrb[5].mxu0  ;;  %v14941_v41 = vpop.f32.mrb[1].mxu1 }
 0x595   : > { %15335 = vmatpush3.bf16.msra.mxu1 %v19626_v49  ;;  %v14909_v42 = vpop.f32.mrb[6].mxu0  ;;  %v14943_v43 = vpop.f32.mrb[2].mxu1  ;;  %v14908_v44 = vadd.f32 %v14907_v40, %v14906_v38  ;;  %v14942_v46 = vadd.f32 %v14941_v41, %v14940_v39 }
 0x596   : > { %v14910_v47 = vpop.f32.mrb[7].mxu0  ;;  %v14944_v48 = vpop.f32.mrb[3].mxu1  ;;  %15336 = vmatprep.subr.bf16.mxu1 %v19792_v19 }
 0x597   : > { %v1746_v51 = vadd.f32 %v14942_v46, %v1681_v45  ;;  %v14911_v53 = vadd.f32 %v14910_v47, %v14909_v42  ;;  %v14945_v56 = vadd.f32 %v14944_v48, %v14943_v43  ;;  %v1689_v12 = vadd.f32 %v14908_v44, %v19746_v7 }
 0x598   : > { %2728 = vmatmul.mubr.bf16.gmra.mrb[92].mxu1 %v19827_v28 }
 0x599   : > { %15337 = vmatpush3.bf16.msra.mxu1 %v19629_v50  ;;  %2878 = vmatprep.mubr.bf16.mxu1 %v18750_v30  ;;  %v1749_v49 = vadd.f32 %v14945_v56, %v1684_v54  ;;  %v1692_v20 = vadd.f32 %v14911_v53, %v19757_v9 }
 0x59a   : > { %15338 = vmatprep.subr.bf16.mxu1 %v19807_v23 }
 0x59b   : > { %v14912_v58 = vpop.f32.mrb[8].mxu0  ;;  %v14946_v59 = vpop.f32.mrb[4].mxu1 }
 0x59c   : > { %v14913_v61 = vpop.f32.mrb[9].mxu0  ;;  %v14947_v63 = vpop.f32.mrb[5].mxu1 }
 0x59d   : > { %15339 = vmatpush3.bf16.msra.mxu1 %v19641_v52  ;;  %v14915_v4 = vpop.f32.mrb[10].mxu0  ;;  %v14949_v6 = vpop.f32.mrb[6].mxu1  ;;  %v14914_v11 = vadd.f32 %v14913_v61, %v14912_v58  ;;  %v14948_v14 = vadd.f32 %v14947_v63, %v14946_v59 }
 0x59e   : > { %v14916_v15 = vpop.f32.mrb[11].mxu0  ;;  %v14950_v16 = vpop.f32.mrb[7].mxu1 }
 0x59f   : > { %v14917_v19 = vadd.f32 %v14916_v15, %v14915_v4  ;;  %v1754_v50 = vadd.f32 %v14948_v14, %v1689_v12  ;;  %v14951_v21 = vadd.f32 %v14950_v16, %v14949_v6  ;;  %v1697_v30 = vadd.f32 %v14914_v11, %v19760_v10 }
 0x5a0   : > { %2879 = vmatmul.mubr.bf16.vlgmr.msra.gmra.mrb[96].mxu1 %v19659_v55 }
 0x5a1   : > { %2886 = vmatprep.mubr.bf16.mxu1 %v19668_v57  ;;  %v1757_v23 = vadd.f32 %v14951_v21, %v1692_v20  ;;  %v1700_v39 = vadd.f32 %v14917_v19, %v19785_v17 }
 0x5a3   : > { %v14918_v25 = vpop.f32.mrb[12].mxu0  ;;  %v14952_v52 = vpop.f32.mrb[8].mxu1 }
 0x5a4   : > { %v14919_v26 = vpop.f32.mrb[13].mxu0  ;;  %v14953_v28 = vpop.f32.mrb[9].mxu1 }
 0x5a5   : > { %v14954_v32 = vadd.f32 %v14953_v28, %v14952_v52  ;;  %v14921_v33 = vpop.f32.mrb[14].mxu0  ;;  %v14955_v34 = vpop.f32.mrb[10].mxu1  ;;  %v14920_v35 = vadd.f32 %v14919_v26, %v14918_v25 }
 0x5a6   : > { %v14922_v36 = vpop.f32.mrb[15].mxu0  ;;  %v14956_v37 = vpop.f32.mrb[11].mxu1 }
 0x5a7   : > { %v1762_v38 = vadd.f32 %v14954_v32, %v1697_v30  ;;  %v14957_v40 = vadd.f32 %v14956_v37, %v14955_v34  ;;  %v14923_v55 = vadd.f32 %v14922_v36, %v14921_v33  ;;  %v1705_v46 = vadd.f32 %v14920_v35, %v19789_v18 }
 0x5a8   : > { %2887 = vmatmul.mubr.bf16.gmra.mrb[100].mxu1 %v19686_v60 }
 0x5a9   : > { %v1765_v57 = vadd.f32 %v14957_v40, %v1700_v39  ;;  %2894 = vmatprep.mubr.bf16.mxu1 %v19695_v62  ;;  %v1708_v60 = vadd.f32 %v14923_v55, %v19804_v22 }
 0x5ab   : > { %v14958_v41 = vpop.f32.mrb[12].mxu1  ;;  %v15674_v42 = vpop.f32.mrb[16].mxu0 }
 0x5ac   : > { %v1819_v43 = vadd.f32 %v15674_v42, %v1754_v50  ;;  %v14959_v44 = vpop.f32.mrb[13].mxu1  ;;  %v1810_v45 = vpop.f32.mrb[17].mxu0 }
 0x5ad   : > { %v14960_v47 = vadd.f32 %v14959_v44, %v14958_v41  ;;  %v1811_v48 = vadd.f32 %v1810_v45, %v1746_v51  ;;  %v14961_v53 = vpop.f32.mrb[14].mxu1  ;;  %v15675_v54 = vpop.f32.mrb[18].mxu0 }
 0x5ae   : > { %v1822_v56 = vadd.f32 %v15675_v54, %v1757_v23  ;;  %v14962_v58 = vpop.f32.mrb[15].mxu1  ;;  %v1813_v59 = vpop.f32.mrb[19].mxu0  ;;  %v1843_v62 = vmax.f32 %v1819_v43, 0.0 }
 0x5af   : > { %v1770_v61 = vadd.f32 %v14960_v47, %v1705_v46  ;;  %v14963_v63 = vadd.f32 %v14962_v58, %v14961_v53  ;;  %v1814_v4 = vadd.f32 %v1813_v59, %v1749_v49  ;;  %v1841_v11 = vmax.f32 %v1811_v48, 0.0 }
 0x5b0   : > { %v1844_v6 = vmax.f32 %v1822_v56, 0.0  ;;  %2895 = vmatmul.mubr.bf16.gmra.mrb[104].mxu1 %v19710_v0 }
 0x5b1   : > { %v1773_v12 = vadd.f32 %v14963_v63, %v1708_v60  ;;  %v1842_v14 = vmax.f32 %v1814_v4, 0.0  ;;  %2902 = vmatprep.mubr.bf16.mxu1 %v19717_v1 }
 0x5b2   : > { %v19890_v51 = vpack.c.bf16 %v1844_v6, %v1843_v62 }
 0x5b3   : > { %v19892_v15 = vpack.c.bf16 %v1842_v14, %v1841_v11  ;;  %v15678_v16 = vpop.f32.mrb[20].mxu0  ;;  %v14988_v19 = vpop.f32.mrb[16].mxu1 }
 0x5b4   : > { %v1835_v50 = vadd.f32 %v15678_v16, %v1770_v61  ;;  %v1826_v20 = vpop.f32.mrb[21].mxu0  ;;  %v14989_v21 = vpop.f32.mrb[17].mxu1 }
 0x5b5   : > { %v1827_v23 = vadd.f32 %v1826_v20, %v1762_v38  ;;  %v15679_v49 = vpop.f32.mrb[22].mxu0  ;;  %v14990_v25 = vadd.f32 %v14989_v21, %v14988_v19  ;;  %v14991_v52 = vpop.f32.mrb[18].mxu1 }
 0x5b6   : > { %v1838_v26 = vadd.f32 %v15679_v49, %v1773_v12  ;;  %v1829_v0 = vpop.f32.mrb[23].mxu0  ;;  %v14992_v28 = vpop.f32.mrb[19].mxu1  ;;  %v1847_v33 = vmax.f32 %v1835_v50, 0.0 }
 0x5b7   : > { %v1830_v30 = vadd.f32 %v1829_v0, %v1765_v57  ;;  %v14993_v32 = vadd.f32 %v14992_v28, %v14991_v52  ;;  %v1845_v34 = vmax.f32 %v1827_v23, 0.0  ;;  %v1921_v54 = vadd.f32 %v14990_v25, %v19725_v3 }
 0x5b8   : > { %v1848_v1 = vmax.f32 %v1838_v26, 0.0  ;;  %2903 = vmatmul.mubr.bf16.gmra.mrb[108].mxu1 %v19736_v5 }
 0x5b9   : > { %v1846_v35 = vmax.f32 %v1830_v30, 0.0  ;;  %15752 = vmatprep.mubr.msk.bf16.mxu1 %vm1633_vm2, %v19752_v8  ;;  %v1924_v4 = vadd.f32 %v14993_v32, %v19721_v2 }
 0x5ba   : > { %v19897_v36 = vpack.c.bf16 %v1848_v1, %v1847_v33 }
 0x5bb   : > { %v19899_v37 = vpack.c.bf16 %v1846_v35, %v1845_v34  ;;  %v14994_v38 = vpop.f32.mrb[20].mxu1 }
 0x5bc   : > { %v14995_v39 = vpop.f32.mrb[21].mxu1 }
 0x5bd   : > { %v14996_v40 = vadd.f32 %v14995_v39, %v14994_v38  ;;  %v14997_v55 = vpop.f32.mrb[22].mxu1 }
 0x5be   : > { %v14998_v41 = vpop.f32.mrb[23].mxu1 }
 0x5bf   : > { %v14999_v57 = vadd.f32 %v14998_v41, %v14997_v55  ;;  %v1929_v20 = vadd.f32 %v14996_v40, %v19746_v7 }
 0x5c1   : > { %v1932_v0 = vadd.f32 %v14999_v57, %v19757_v9 }
 0x5c3   : > { %v15000_v42 = vpop.f32.mrb[24].mxu1 }
 0x5c4   : > { %v15001_v43 = vpop.f32.mrb[25].mxu1 }
 0x5c5   : > { %v15002_v44 = vadd.f32 %v15001_v43, %v15000_v42  ;;  %v15003_v45 = vpop.f32.mrb[26].mxu1 }
 0x5c6   : > { %v15004_v5 = vpop.f32.mrb[27].mxu1 }
 0x5c7   : > { %v15005_v46 = vadd.f32 %v15004_v5, %v15003_v45  ;;  %v1937_v43 = vadd.f32 %v15002_v44, %v19760_v10 }
 0x5cb   : > { %v15028_v47 = vpop.f32.mrb[24].mxu0  ;;  %v15006_v48 = vpop.f32.mrb[28].mxu1 }
 0x5cc   : > { %v15029_v53 = vpop.f32.mrb[25].mxu0  ;;  %v15007_v8 = vpop.f32.mrb[29].mxu1 }
 0x5cd   : > { %v15030_v56 = vadd.f32 %v15029_v53, %v15028_v47  ;;  %v15031_v58 = vpop.f32.mrb[26].mxu0  ;;  %v15008_v59 = vadd.f32 %v15007_v8, %v15006_v48  ;;  %v15009_v61 = vpop.f32.mrb[30].mxu1 }
 0x5ce   : > { %v15032_v60 = vpop.f32.mrb[27].mxu0  ;;  %v15010_v63 = vpop.f32.mrb[31].mxu1 }
 0x5cf   : > { %v15033_v62 = vadd.f32 %v15032_v60, %v15031_v58  ;;  %v15011_v6 = vadd.f32 %v15010_v63, %v15009_v61  ;;  %v1986_v11 = vadd.f32 %v15030_v56, %v1921_v54  ;;  %v1940_v54 = vadd.f32 %v15005_v46, %v19785_v17 }
 0x5d0   : > { %v1945_v44 = vadd.f32 %v15008_v59, %v19789_v18 }
 0x5d1   : > { %v1989_v12 = vadd.f32 %v15033_v62, %v1924_v4 }
 0x5d3   : > { %v15034_v14 = vpop.f32.mrb[28].mxu0  ;;  %v15690_v16 = vpop.f32.mrb[32].mxu1 }
 0x5d4   : > { %v15035_v19 = vpop.f32.mrb[29].mxu0  ;;  %v2050_v50 = vpop.f32.mrb[33].mxu1 }
 0x5d5   : > { %v15036_v21 = vadd.f32 %v15035_v19, %v15034_v14  ;;  %v15037_v23 = vpop.f32.mrb[30].mxu0  ;;  %v2051_v49 = vadd.f32 %v2050_v50, %v1986_v11  ;;  %v15691_v25 = vpop.f32.mrb[34].mxu1 }
 0x5d6   : > { %v15038_v52 = vpop.f32.mrb[31].mxu0  ;;  %v2053_v26 = vpop.f32.mrb[35].mxu1 }
 0x5d7   : > { %v1994_v28 = vadd.f32 %v15036_v21, %v1929_v20  ;;  %v15039_v30 = vadd.f32 %v15038_v52, %v15037_v23  ;;  %v2054_v32 = vadd.f32 %v2053_v26, %v1989_v12  ;;  %v2081_v1 = vmax.f32 %v2051_v49, 0.0 }
 0x5d8   : > { %v1948_v20 = vadd.f32 %v15011_v6, %v19804_v22 }
 0x5d9   : > { %v2059_v33 = vadd.f32 %v15690_v16, %v1994_v28  ;;  %v1997_v34 = vadd.f32 %v15039_v30, %v1932_v0  ;;  %v2082_v35 = vmax.f32 %v2054_v32, 0.0 }
 0x5db   : > { %v2062_v38 = vadd.f32 %v15691_v25, %v1997_v34  ;;  %v19905_v39 = vpack.c.bf16 %v2082_v35, %v2081_v1  ;;  %v15040_v55 = vpop.f32.mrb[32].mxu0  ;;  %v15694_v40 = vpop.f32.mrb[36].mxu1  ;;  %v2083_v45 = vmax.f32 %v2059_v33, 0.0 }
 0x5dc   : > { %v15041_v41 = vpop.f32.mrb[33].mxu0  ;;  %v2066_v42 = vpop.f32.mrb[37].mxu1 }
 0x5dd   : > { %24550 = vst [vmem:[#allocation7_spill] sm:$0xff] %v19905_v39  ;;  %v2084_v5 = vmax.f32 %v2062_v38, 0.0  ;;  %v15042_v47 = vadd.f32 %v15041_v41, %v15040_v55  ;;  %v15043_v57 = vpop.f32.mrb[34].mxu0  ;;  %v15695_v48 = vpop.f32.mrb[38].mxu1  ;;  %v20197_v39 = vld [vmem:[%s24506_s5 + $0x80] ss:$20 sps:$4 sm:$0xff]  }
 0x5de   : > { %v15044_v53 = vpop.f32.mrb[35].mxu0  ;;  %v2069_v8 = vpop.f32.mrb[39].mxu1 }
 0x5df   : > { %v19909_v56 = vpack.c.bf16 %v2084_v5, %v2083_v45  ;;  %v15045_v58 = vadd.f32 %v15044_v53, %v15043_v57  ;;  %v2002_v61 = vadd.f32 %v15042_v47, %v1937_v43 }
 0x5e1   : > { %24551 = vst [vmem:[#allocation8_spill] sm:$0xff] %v19909_v56  ;;  %v2067_v60 = vadd.f32 %v2066_v42, %v2002_v61  ;;  %v2005_v63 = vadd.f32 %v15045_v58, %v1940_v54 }
 0x5e3   : > { %v2070_v4 = vadd.f32 %v2069_v8, %v2005_v63  ;;  %v15046_v62 = vpop.f32.mrb[36].mxu0  ;;  %v2085_v12 = vmax.f32 %v2067_v60, 0.0 }
 0x5e4   : > { %v15047_v11 = vpop.f32.mrb[37].mxu0 }
 0x5e5   : > { %v2086_v14 = vmax.f32 %v2070_v4, 0.0  ;;  %v15048_v16 = vadd.f32 %v15047_v11, %v15046_v62  ;;  %v15049_v19 = vpop.f32.mrb[38].mxu0 }
 0x5e6   : > { %v15050_v50 = vpop.f32.mrb[39].mxu0 }
 0x5e7   : > { %v19913_v21 = vpack.c.bf16 %v2086_v14, %v2085_v12  ;;  %v2010_v46 = vadd.f32 %v15048_v16, %v1945_v44  ;;  %v15051_v23 = vadd.f32 %v15050_v50, %v15049_v19 }
 0x5e9   : > { %24552 = vst [vmem:[#allocation9_spill] sm:$0xff] %v19913_v21  ;;  %v2075_v49 = vadd.f32 %v15694_v40, %v2010_v46  ;;  %v2013_v25 = vadd.f32 %v15051_v23, %v1948_v20 }
 0x5eb   : > { %v2078_v52 = vadd.f32 %v15695_v48, %v2013_v25  ;;  %v15076_v26 = vpop.f32.mrb[40].mxu0  ;;  %v2087_v28 = vmax.f32 %v2075_v49, 0.0 }
 0x5ec   : > { %v15077_v0 = vpop.f32.mrb[41].mxu0 }
 0x5ed   : > { %v2088_v30 = vmax.f32 %v2078_v52, 0.0  ;;  %v15078_v32 = vadd.f32 %v15077_v0, %v15076_v26  ;;  %v15079_v59 = vpop.f32.mrb[42].mxu0 }
 0x5ee   : > { %v15080_v33 = vpop.f32.mrb[43].mxu0 }
 0x5ef   : > { %v19915_v1 = vpack.c.bf16 %v2088_v30, %v2087_v28  ;;  %v15081_v34 = vadd.f32 %v15080_v33, %v15079_v59  ;;  %v2161_v42 = vadd.f32 %v15078_v32, %v19725_v3 }
 0x5f1   : > { %24553 = vst [vmem:[#allocation10_spill] sm:$0xff] %v19915_v1  ;;  %v2164_v53 = vadd.f32 %v15081_v34, %v19721_v2 }
 0x5f3   : > { %v15082_v35 = vpop.f32.mrb[44].mxu0  ;;  %v15116_v38 = vpop.f32.mrb[40].mxu1 }
 0x5f4   : > { %v15083_v6 = vpop.f32.mrb[45].mxu0  ;;  %v15117_v55 = vpop.f32.mrb[41].mxu1 }
 0x5f5   : > { %v15084_v41 = vadd.f32 %v15083_v6, %v15082_v35  ;;  %v15118_v40 = vadd.f32 %v15117_v55, %v15116_v38  ;;  %v15085_v43 = vpop.f32.mrb[46].mxu0  ;;  %v15119_v45 = vpop.f32.mrb[42].mxu1 }
 0x5f6   : > { %v15086_v5 = vpop.f32.mrb[47].mxu0  ;;  %v15120_v47 = vpop.f32.mrb[43].mxu1 }
 0x5f7   : > { %v2226_v57 = vadd.f32 %v15118_v40, %v2161_v42  ;;  %v15087_v48 = vadd.f32 %v15086_v5, %v15085_v43  ;;  %v15121_v8 = vadd.f32 %v15120_v47, %v15119_v45  ;;  %v2169_v62 = vadd.f32 %v15084_v41, %v19746_v7 }
 0x5f9   : > { %v2229_v54 = vadd.f32 %v15121_v8, %v2164_v53  ;;  %v2172_v20 = vadd.f32 %v15087_v48, %v19757_v9 }
 0x5fb   : > { %v15088_v58 = vpop.f32.mrb[48].mxu0  ;;  %v15122_v61 = vpop.f32.mrb[44].mxu1 }
 0x5fc   : > { %v15089_v60 = vpop.f32.mrb[49].mxu0  ;;  %v15123_v63 = vpop.f32.mrb[45].mxu1 }
 0x5fd   : > { %v15090_v4 = vadd.f32 %v15089_v60, %v15088_v58  ;;  %v15124_v11 = vadd.f32 %v15123_v63, %v15122_v61  ;;  %v15091_v44 = vpop.f32.mrb[50].mxu0  ;;  %v15125_v12 = vpop.f32.mrb[46].mxu1 }
 0x5fe   : > { %v15092_v14 = vpop.f32.mrb[51].mxu0  ;;  %v15126_v16 = vpop.f32.mrb[47].mxu1 }
 0x5ff   : > { %v2234_v19 = vadd.f32 %v15124_v11, %v2169_v62  ;;  %v15093_v50 = vadd.f32 %v15092_v14, %v15091_v44  ;;  %v15127_v46 = vadd.f32 %v15126_v16, %v15125_v12  ;;  %v2177_v28 = vadd.f32 %v15090_v4, %v19760_v10 }
 0x601   : > { %v2237_v23 = vadd.f32 %v15127_v46, %v2172_v20  ;;  %v2180_v6 = vadd.f32 %v15093_v50, %v19785_v17 }
 0x603   : > { %v15094_v49 = vpop.f32.mrb[52].mxu0  ;;  %v15128_v25 = vpop.f32.mrb[48].mxu1 }
 0x604   : > { %v15095_v52 = vpop.f32.mrb[53].mxu0  ;;  %v15129_v26 = vpop.f32.mrb[49].mxu1 }
 0x605   : > { %v15096_v0 = vadd.f32 %v15095_v52, %v15094_v49  ;;  %v15130_v30 = vadd.f32 %v15129_v26, %v15128_v25  ;;  %v15097_v32 = vpop.f32.mrb[54].mxu0  ;;  %v15131_v59 = vpop.f32.mrb[50].mxu1 }
 0x606   : > { %v15098_v33 = vpop.f32.mrb[55].mxu0  ;;  %v15132_v34 = vpop.f32.mrb[51].mxu1 }
 0x607   : > { %v2242_v35 = vadd.f32 %v15130_v30, %v2177_v28  ;;  %v15099_v38 = vadd.f32 %v15098_v33, %v15097_v32  ;;  %v15133_v55 = vadd.f32 %v15132_v34, %v15131_v59  ;;  %v2185_v47 = vadd.f32 %v15096_v0, %v19789_v18  ;;  %v19933_v30 = vld [vmem:[#allocation3 + $0xe0] sm:$0xff] }
 0x609   : > { %v2245_v41 = vadd.f32 %v15133_v55, %v2180_v6  ;;  %v2188_v62 = vadd.f32 %v15099_v38, %v19804_v22 }
 0x60b   : > { %v15134_v42 = vpop.f32.mrb[52].mxu1  ;;  %v15706_v40 = vpop.f32.mrb[56].mxu0 }
 0x60c   : > { %v2299_v43 = vadd.f32 %v15706_v40, %v2234_v19  ;;  %v15135_v45 = vpop.f32.mrb[53].mxu1  ;;  %v2290_v5 = vpop.f32.mrb[57].mxu0  ;;  %v19937_v40 = vld [vmem:[#allocation3 + $0xe8] sm:$0xff] }
 0x60d   : > { %v15136_v48 = vadd.f32 %v15135_v45, %v15134_v42  ;;  %v2291_v53 = vadd.f32 %v2290_v5, %v2226_v57  ;;  %v15137_v8 = vpop.f32.mrb[54].mxu1  ;;  %v15707_v58 = vpop.f32.mrb[58].mxu0 }
 0x60e   : > { %v2302_v61 = vadd.f32 %v15707_v58, %v2237_v23  ;;  %v15138_v60 = vpop.f32.mrb[55].mxu1  ;;  %v2293_v63 = vpop.f32.mrb[59].mxu0  ;;  %v2323_v12 = vmax.f32 %v2299_v43, 0.0 }
 0x60f   : > { %v2250_v4 = vadd.f32 %v15136_v48, %v2185_v47  ;;  %v15139_v11 = vadd.f32 %v15138_v60, %v15137_v8  ;;  %v2294_v44 = vadd.f32 %v2293_v63, %v2229_v54  ;;  %v2321_v16 = vmax.f32 %v2291_v53, 0.0  ;;  %v19947_v53 = vld [vmem:[#allocation3 + $0xf0] sm:$0xff] }
 0x610   : > { %v2324_v14 = vmax.f32 %v2302_v61, 0.0  ;;  %v19953_v61 = vld [vmem:[#allocation3 + $0xf8] sm:$0xff] }
 0x611   : > { %v2253_v19 = vadd.f32 %v15139_v11, %v2188_v62  ;;  %v2322_v50 = vmax.f32 %v2294_v44, 0.0 }
 0x612   : > { %v19925_v20 = vpack.c.bf16 %v2324_v14, %v2323_v12 }
 0x613   : > { %v19927_v46 = vpack.c.bf16 %v2322_v50, %v2321_v16  ;;  %v15710_v57 = vpop.f32.mrb[60].mxu0  ;;  %v15164_v49 = vpop.f32.mrb[56].mxu1 }
 0x614   : > { %24554 = vst [vmem:[#allocation11_spill] sm:$0xff] %v19925_v20  ;;  %v2315_v25 = vadd.f32 %v15710_v57, %v2250_v4  ;;  %v2306_v23 = vpop.f32.mrb[61].mxu0  ;;  %3479 = vrot.lane.b32.xlu0 %v19925_v20, %s18815_s26  ;;  %v15165_v52 = vpop.f32.mrb[57].mxu1 }
 0x615   : > { %24555 = vst [vmem:[#allocation12_spill] sm:$0xff] %v19927_v46  ;;  %v2307_v26 = vadd.f32 %v2306_v23, %v2242_v35  ;;  %v15711_v54 = vpop.f32.mrb[62].mxu0  ;;  %3477 = vrot.lane.b32.xlu1 %v19927_v46, %s18815_s26  ;;  %v15166_v0 = vadd.f32 %v15165_v52, %v15164_v49  ;;  %v15167_v28 = vpop.f32.mrb[58].mxu1 }
 0x616   : > { %v2318_v32 = vadd.f32 %v15711_v54, %v2253_v19  ;;  %v2309_v59 = vpop.f32.mrb[63].mxu0  ;;  %v15168_v33 = vpop.f32.mrb[59].mxu1  ;;  %v2327_v6 = vmax.f32 %v2315_v25, 0.0 }
 0x617   : > { %v2310_v34 = vadd.f32 %v2309_v59, %v2245_v41  ;;  %v15169_v38 = vadd.f32 %v15168_v33, %v15167_v28  ;;  %v2325_v42 = vmax.f32 %v2307_v26, 0.0  ;;  %v2401_v50 = vadd.f32 %v15166_v0, %v19725_v3 }
 0x618   : > { %v2328_v55 = vmax.f32 %v2318_v32, 0.0  ;;  %2834 = vrot.lane.b32.xlu0 %v19933_v30, %s18812_s22 }
 0x619   : > { %v2326_v35 = vmax.f32 %v2310_v34, 0.0  ;;  %v2404_v54 = vadd.f32 %v15169_v38, %v19721_v2 }
 0x61a   : > { %v19939_v43 = vpack.c.bf16 %v2328_v55, %v2327_v6 }
 0x61b   : > { %v19941_v45 = vpack.c.bf16 %v2326_v35, %v2325_v42  ;;  %v15170_v5 = vpop.f32.mrb[60].mxu1 }
 0x61c   : > { %24556 = vst [vmem:[#allocation13_spill] sm:$0xff] %v19939_v43  ;;  %v15171_v47 = vpop.f32.mrb[61].mxu1  ;;  %2836 = vrot.lane.b32.xlu0 %v19937_v40, %s18812_s22 }
 0x61d   : > { %24557 = vst [vmem:[#allocation14_spill] sm:$0xff] %v19941_v45  ;;  %3481 = vrot.lane.b32.xlu1 %v19941_v45, %s18815_s26  ;;  %v15172_v41 = vadd.f32 %v15171_v47, %v15170_v5  ;;  %v15173_v48 = vpop.f32.mrb[62].mxu1 }
 0x61e   : > { %v15174_v8 = vpop.f32.mrb[63].mxu1 }
 0x61f   : > { %v15175_v58 = vadd.f32 %v15174_v8, %v15173_v48  ;;  %v2409_v42 = vadd.f32 %v15172_v41, %v19746_v7  ;;  %v19970_v48 = vld [vmem:[#allocation3 + $0x100] sm:$0xff] }
 0x620   : > { %2838 = vrot.lane.b32.xlu0 %v19947_v53, %s18812_s22 }
 0x621   : > { %3483 = vrot.lane.b32.xlu1 %v19939_v43, %s18815_s26 }
 0x623   : > { %v15176_v60 = vpop.f32.mrb[64].mxu1 }
 0x624   : > { %v15177_v63 = vpop.f32.mrb[65].mxu1  ;;  %2840 = vrot.lane.b32.xlu0 %v19953_v61, %s18812_s22 }
 0x625   : > { %v15178_v4 = vadd.f32 %v15177_v63, %v15176_v60  ;;  %v15179_v62 = vpop.f32.mrb[66].mxu1  ;;  %v2412_v63 = vadd.f32 %v15175_v58, %v19757_v9 }
 0x626   : > { %v15180_v11 = vpop.f32.mrb[67].mxu1 }
 0x627   : > { %v15181_v44 = vadd.f32 %v15180_v11, %v15179_v62  ;;  %v2417_v58 = vadd.f32 %v15178_v4, %v19760_v10 }
 0x628   : > { %2822 = vrot.lane.b32.xlu0 %v19933_v30, %s18813_s21 }
 0x62b   : > { %v15204_v12 = vpop.f32.mrb[64].mxu0  ;;  %v15182_v14 = vpop.f32.mrb[68].mxu1 }
 0x62c   : > { %v15205_v16 = vpop.f32.mrb[65].mxu0  ;;  %v15183_v19 = vpop.f32.mrb[69].mxu1  ;;  %2824 = vrot.lane.b32.xlu0 %v19937_v40, %s18813_s21 }
 0x62d   : > { %v15206_v57 = vadd.f32 %v15205_v16, %v15204_v12  ;;  %v19962_v49 = vadd.f32 %v15183_v19, %v15182_v14  ;;  %v15207_v25 = vpop.f32.mrb[66].mxu0  ;;  %v15185_v23 = vpop.f32.mrb[70].mxu1 }
 0x62e   : > { %v15208_v52 = vpop.f32.mrb[67].mxu0  ;;  %v15186_v26 = vpop.f32.mrb[71].mxu1 }
 0x62f   : > { %v15209_v28 = vadd.f32 %v15208_v52, %v15207_v25  ;;  %v15187_v32 = vadd.f32 %v15186_v26, %v15185_v23  ;;  %v2466_v59 = vadd.f32 %v15206_v57, %v2401_v50  ;;  %v19975_v50 = vld [vmem:[#allocation3 + $0x108] sm:$0xff] }
 0x630   : > { %2826 = vrot.lane.b32.xlu0 %v19947_v53, %s18813_s21 }
 0x631   : > { %v2469_v33 = vadd.f32 %v15209_v28, %v2404_v54 }
 0x633   : > { %v15210_v34 = vpop.f32.mrb[68].mxu0  ;;  %v15722_v6 = vpop.f32.mrb[72].mxu1 }
 0x634   : > { %v15211_v55 = vpop.f32.mrb[69].mxu0  ;;  %v2530_v0 = vpop.f32.mrb[73].mxu1  ;;  %2828 = vrot.lane.b32.xlu0 %v19953_v61, %s18813_s21 }
 0x635   : > { %v15212_v35 = vadd.f32 %v15211_v55, %v15210_v34  ;;  %v15213_v5 = vpop.f32.mrb[70].mxu0  ;;  %v2531_v47 = vadd.f32 %v2530_v0, %v2466_v59  ;;  %v15723_v38 = vpop.f32.mrb[74].mxu1  ;;  %v19984_v55 = vld [vmem:[#allocation3 + $0x118] sm:$0xff] }
 0x636   : > { %v15214_v8 = vpop.f32.mrb[71].mxu0  ;;  %v2533_v60 = vpop.f32.mrb[75].mxu1 }
 0x637   : > { %v2474_v62 = vadd.f32 %v15212_v35, %v2409_v42  ;;  %v15215_v11 = vadd.f32 %v15214_v8, %v15213_v5  ;;  %v2534_v12 = vadd.f32 %v2533_v60, %v2469_v33  ;;  %v2561_v16 = vmax.f32 %v2531_v47, 0.0 }
 0x638   : > { %3062 = vrot.lane.b32.xlu0 %v19970_v48, %s18813_s21  ;;  %v2420_v35 = vadd.f32 %v15181_v44, %v19785_v17 }
 0x639   : > { %v2539_v14 = vadd.f32 %v15722_v6, %v2474_v62  ;;  %v2477_v19 = vadd.f32 %v15215_v11, %v2412_v63  ;;  %v2562_v41 = vmax.f32 %v2534_v12, 0.0  ;;  %v2425_v11 = vadd.f32 %v19962_v49, %v19789_v18 }
 0x63b   : > { %v2542_v57 = vadd.f32 %v15723_v38, %v2477_v19  ;;  %v19977_v25 = vpack.c.bf16 %v2562_v41, %v2561_v16  ;;  %v15216_v23 = vpop.f32.mrb[72].mxu0  ;;  %v15726_v52 = vpop.f32.mrb[76].mxu1  ;;  %v2563_v28 = vmax.f32 %v2539_v14, 0.0  ;;  %v2428_v41 = vadd.f32 %v15187_v32, %v19804_v22 }
 0x63c   : > { %v15217_v26 = vpop.f32.mrb[73].mxu0  ;;  %v2546_v54 = vpop.f32.mrb[77].mxu1  ;;  %3064 = vrot.lane.b32.xlu0 %v19975_v50, %s18813_s21 }
 0x63d   : > { %v2564_v59 = vmax.f32 %v2542_v57, 0.0  ;;  %v15218_v33 = vadd.f32 %v15217_v26, %v15216_v23  ;;  %v15219_v34 = vpop.f32.mrb[74].mxu0  ;;  %3489 = vrot.lane.b32.xlu1 %v19977_v25, %s18816_s14  ;;  %v15727_v6 = vpop.f32.mrb[78].mxu1 }
 0x63e   : > { %v15220_v0 = vpop.f32.mrb[75].mxu0  ;;  %v2549_v42 = vpop.f32.mrb[79].mxu1 }
 0x63f   : > { %v19987_v5 = vpack.c.bf16 %v2564_v59, %v2563_v28  ;;  %v15221_v47 = vadd.f32 %v15220_v0, %v15219_v34  ;;  %v2482_v38 = vadd.f32 %v15218_v33, %v2417_v58 }
 0x640   : > { %3068 = vrot.lane.b32.xlu0 %v19984_v55, %s18813_s21 }
 0x641   : > { %v2547_v4 = vadd.f32 %v2546_v54, %v2482_v38  ;;  %v2485_v8 = vadd.f32 %v15221_v47, %v2420_v35  ;;  %3491 = vrot.lane.b32.xlu1 %v19987_v5, %s18816_s14 }
 0x643   : > { %v2550_v60 = vadd.f32 %v2549_v42, %v2485_v8  ;;  %v15222_v63 = vpop.f32.mrb[76].mxu0  ;;  %v2565_v12 = vmax.f32 %v2547_v4, 0.0 }
 0x644   : > { %v15223_v62 = vpop.f32.mrb[77].mxu0 }
 0x645   : > { %v2566_v44 = vmax.f32 %v2550_v60, 0.0  ;;  %v15224_v14 = vadd.f32 %v15223_v62, %v15222_v63  ;;  %v15225_v16 = vpop.f32.mrb[78].mxu0 }
 0x646   : > { %v15226_v19 = vpop.f32.mrb[79].mxu0 }
 0x647   : > { %v19996_v57 = vpack.c.bf16 %v2566_v44, %v2565_v12  ;;  %v2490_v23 = vadd.f32 %v15224_v14, %v2425_v11  ;;  %v15227_v26 = vadd.f32 %v15226_v19, %v15225_v16 }
 0x649   : > { %v2555_v54 = vadd.f32 %v15726_v52, %v2490_v23  ;;  %v2493_v58 = vadd.f32 %v15227_v26, %v2428_v41  ;;  %3493 = vrot.lane.b32.xlu1 %v19996_v57, %s18816_s14 }
 0x64b   : > { %v2558_v28 = vadd.f32 %v15727_v6, %v2493_v58  ;;  %v15252_v59 = vpop.f32.mrb[80].mxu0  ;;  %v2567_v49 = vmax.f32 %v2555_v54, 0.0 }
 0x64c   : > { %v15253_v33 = vpop.f32.mrb[81].mxu0 }
 0x64d   : > { %v2568_v34 = vmax.f32 %v2558_v28, 0.0  ;;  %v15254_v0 = vadd.f32 %v15253_v33, %v15252_v59  ;;  %v15255_v42 = vpop.f32.mrb[82].mxu0 }
 0x64e   : > { %v15256_v35 = vpop.f32.mrb[83].mxu0 }
 0x64f   : > { %v20000_v47 = vpack.c.bf16 %v2568_v34, %v2567_v49  ;;  %v15257_v32 = vadd.f32 %v15256_v35, %v15255_v42  ;;  %v2641_v6 = vadd.f32 %v15254_v0, %v19725_v3 }
 0x651   : > { %3495 = vrot.lane.b32.xlu1 %v20000_v47, %s18816_s14  ;;  %v2644_v19 = vadd.f32 %v15257_v32, %v19721_v2 }
 0x653   : > { %v15258_v38 = vpop.f32.mrb[84].mxu0  ;;  %v15292_v52 = vpop.f32.mrb[80].mxu1 }
 0x654   : > { %v15259_v4 = vpop.f32.mrb[85].mxu0  ;;  %v15293_v8 = vpop.f32.mrb[81].mxu1 }
 0x655   : > { %v15260_v60 = vadd.f32 %v15259_v4, %v15258_v38  ;;  %v15294_v63 = vadd.f32 %v15293_v8, %v15292_v52  ;;  %v15261_v62 = vpop.f32.mrb[86].mxu0  ;;  %3497 = vrot.lane.b32.xlu1 %v19977_v25, %s24545_s25  ;;  %v15295_v11 = vpop.f32.mrb[82].mxu1 }
 0x656   : > { %v15262_v12 = vpop.f32.mrb[87].mxu0  ;;  %v15296_v44 = vpop.f32.mrb[83].mxu1 }
 0x657   : > { %v20007_v14 = vadd.f32 %v15294_v63, %v2641_v6  ;;  %v15263_v16 = vadd.f32 %v15262_v12, %v15261_v62  ;;  %v15297_v41 = vadd.f32 %v15296_v44, %v15295_v11  ;;  %v2649_v33 = vadd.f32 %v15260_v60, %v19746_v7  ;;  %v20024_v60 = vld [vmem:[#allocation3 + $0x110] sm:$0xff] }
 0x659   : > { %v20010_v23 = vadd.f32 %v15297_v41, %v2644_v19  ;;  %3499 = vrot.lane.b32.xlu1 %v19987_v5, %s24545_s25  ;;  %v2652_v52 = vadd.f32 %v15263_v16, %v19757_v9 }
 0x65b   : > { %v15264_v26 = vpop.f32.mrb[88].mxu0  ;;  %v15298_v54 = vpop.f32.mrb[84].mxu1 }
 0x65c   : > { %v15265_v58 = vpop.f32.mrb[89].mxu0  ;;  %v15299_v28 = vpop.f32.mrb[85].mxu1 }
 0x65d   : > { %v15266_v59 = vadd.f32 %v15265_v58, %v15264_v26  ;;  %v15300_v49 = vadd.f32 %v15299_v28, %v15298_v54  ;;  %v15267_v34 = vpop.f32.mrb[90].mxu0  ;;  %3501 = vrot.lane.b32.xlu1 %v19996_v57, %s24545_s25  ;;  %v15301_v0 = vpop.f32.mrb[86].mxu1 }
 0x65e   : > { %v15268_v42 = vpop.f32.mrb[91].mxu0  ;;  %v15302_v35 = vpop.f32.mrb[87].mxu1 }
 0x65f   : > { %v20017_v32 = vadd.f32 %v15300_v49, %v2649_v33  ;;  %v15269_v38 = vadd.f32 %v15268_v42, %v15267_v34  ;;  %v15303_v4 = vadd.f32 %v15302_v35, %v15301_v0  ;;  %v2657_v44 = vadd.f32 %v15266_v59, %v19760_v10 }
 0x661   : > { %v20020_v8 = vadd.f32 %v15303_v4, %v2652_v52  ;;  %3503 = vrot.lane.b32.xlu1 %v20000_v47, %s24545_s25  ;;  %v2660_v33 = vadd.f32 %v15269_v38, %v19785_v17 }
 0x663   : > { %v15270_v6 = vpop.f32.mrb[92].mxu0  ;;  %v15304_v63 = vpop.f32.mrb[88].mxu1 }
 0x664   : > { %v15271_v62 = vpop.f32.mrb[93].mxu0  ;;  %v15305_v11 = vpop.f32.mrb[89].mxu1 }
 0x665   : > { %v15272_v12 = vadd.f32 %v15271_v62, %v15270_v6  ;;  %v15306_v19 = vadd.f32 %v15305_v11, %v15304_v63  ;;  %v15273_v41 = vpop.f32.mrb[94].mxu0  ;;  %v15307_v26 = vpop.f32.mrb[90].mxu1  ;;  %3066 = vrot.lane.b32.xlu1 %v20024_v60, %s18813_s21 }
 0x666   : > { %v15274_v16 = vpop.f32.mrb[95].mxu0  ;;  %v15308_v54 = vpop.f32.mrb[91].mxu1 }
 0x667   : > { %v20029_v58 = vadd.f32 %v15306_v19, %v2657_v44  ;;  %v15275_v28 = vadd.f32 %v15274_v16, %v15273_v41  ;;  %v15309_v49 = vadd.f32 %v15308_v54, %v15307_v26  ;;  %v2665_v59 = vadd.f32 %v15272_v12, %v19789_v18  ;;  %v17473_v18 = vld [vmem:[%s24508_s7 + $0xb18] ss:$100 sps:$4 sm:$0xff]  }
 0x669   : > { %v20032_v34 = vadd.f32 %v15309_v49, %v2660_v33  ;;  %v2668_v63 = vadd.f32 %v15275_v28, %v19804_v22 }
 0x66b   : > { %v15310_v0 = vpop.f32.mrb[92].mxu1 }
 0x66c   : > { %v15311_v42 = vpop.f32.mrb[93].mxu1 }
 0x66d   : > { %v15312_v35 = vadd.f32 %v15311_v42, %v15310_v0  ;;  %v15313_v52 = vpop.f32.mrb[94].mxu1 }
 0x66e   : > { %v15314_v4 = vpop.f32.mrb[95].mxu1 }
 0x66f   : > { %v20035_v6 = vadd.f32 %v15312_v35, %v2665_v59  ;;  %v15315_v62 = vadd.f32 %v15314_v4, %v15313_v52 }
 0x671   : > { %v20038_v11 = vadd.f32 %v15315_v62, %v2668_v63 }
 0x673   : > { %v15340_v44 = vpop.f32.mrb[96].mxu1 }
 0x674   : > { %v15341_v19 = vpop.f32.mrb[97].mxu1 }
 0x675   : > { %v20040_v38 = vadd.f32 %v15341_v19, %v15340_v44  ;;  %v15343_v41 = vpop.f32.mrb[98].mxu1 }
 0x676   : > { %v15344_v26 = vpop.f32.mrb[99].mxu1 }
 0x677   : > { %v20042_v16 = vadd.f32 %v15344_v26, %v15343_v41 }
 0x67b   : > { %v15346_v54 = vpop.f32.mrb[100].mxu1 }
 0x67c   : > { %v15347_v12 = vpop.f32.mrb[101].mxu1 }
 0x67d   : > { %v20044_v33 = vadd.f32 %v15347_v12, %v15346_v54  ;;  %v15349_v49 = vpop.f32.mrb[102].mxu1 }
 0x67e   : > { %v15350_v0 = vpop.f32.mrb[103].mxu1 }
 0x67f   : > { %v20046_v42 = vadd.f32 %v15350_v0, %v15349_v49 }
 0x683   : > { %v15352_v28 = vpop.f32.mrb[104].mxu1 }
 0x684   : > { %v15353_v59 = vpop.f32.mrb[105].mxu1 }
 0x685   : > { %v20048_v35 = vadd.f32 %v15353_v59, %v15352_v28  ;;  %v15355_v52 = vpop.f32.mrb[106].mxu1 }
 0x686   : > { %v15356_v4 = vpop.f32.mrb[107].mxu1  ;;  %v3480_v63 = vpop.permute.xlu0 %3479 }
 0x687   : > { %v20050_v62 = vadd.f32 %v15356_v4, %v15355_v52  ;;  %v3478_v44 = vpop.permute.xlu1 %3477  ;;  %3695 = vrot.lane.b32.xlu0 %v3480_v63, %s18812_s22 }
 0x688   : > { %3693 = vrot.lane.b32.xlu1 %v3478_v44, %s18812_s22 }
 0x689   : > { %24558 = vst [vmem:[#allocation15_spill] sm:$0xff] %v20050_v62  ;;  %v17476_v62 = vld [vmem:[%s24508_s7 + $0xbe4] ss:$100 sps:$4 sm:$0xff]  }
 0x68a   : > { %v2835_v19 = vpop.permute.xlu0 %2834 }
 0x68b   : > { %v15358_v41 = vpop.f32.mrb[108].mxu1  ;;  %15744 = vmatprep.subr.bf16.mxu1 %v2835_v19 }
 0x68c   : > { %v15359_v26 = vpop.f32.mrb[109].mxu1  ;;  %15745 = vmatpush3.bf16.msra.mxu1 %v2835_v19 }
 0x68d   : > { %v20054_v54 = vadd.f32 %v15359_v26, %v15358_v41  ;;  %v15361_v12 = vpop.f32.mrb[110].mxu1  ;;  %v20066_v41 = vld [vmem:[%s24506_s5 + $0x38] ss:$20 sps:$4 sm:$0xff]   ;;  %v20074_v26 = vld [vmem:[%s24506_s5 + $0x60] ss:$20 sps:$4 sm:$0xff]  }
 0x68e   : > { %v15362_v49 = vpop.f32.mrb[111].mxu1  ;;  %v2837_v0 = vpop.permute.xlu0 %2836 }
 0x68f   : > { %24559 = vst [vmem:[#allocation16_spill] sm:$0xff] %v20054_v54  ;;  %v20056_v28 = vadd.f32 %v15362_v49, %v15361_v12  ;;  %v3482_v59 = vpop.permute.xlu1 %3481  ;;  %15746 = vmatprep.subr.bf16.mxu1 %v2837_v0 }
 0x690   : > { %3697 = vrot.lane.b32.xlu1 %v3482_v59, %s18812_s22  ;;  %15747 = vmatpush3.bf16.msra.mxu1 %v2837_v0  ;;  %v20088_v59 = vld [vmem:[%s24506_s5 + $0x88] ss:$20 sps:$4 sm:$0xff]  }
 0x691   : > { %24560 = vst [vmem:[#allocation17_spill] sm:$0xff] %v20056_v28 }
 0x692   : > { %v2839_v52 = vpop.permute.xlu0 %2838 }
 0x693   : > { %v3484_v4 = vpop.permute.xlu1 %3483  ;;  %15748 = vmatprep.subr.bf16.mxu1 %v2839_v52 }
 0x694   : > { %3699 = vrot.lane.b32.xlu0 %v3484_v4, %s18812_s22  ;;  %15749 = vmatpush3.bf16.msra.mxu1 %v2839_v52  ;;  %v20096_v4 = vld [vmem:[%s24506_s5 + $0xc] ss:$20 sps:$4 sm:$0xff]  }
 0x696   : > { %v2841_v63 = vpop.permute.xlu0 %2840 }
 0x697   : > { %15750 = vmatprep.subr.bf16.mxu1 %v2841_v63 }
 0x698   : > { %15751 = vmatpush3.bf16.msra.mxu1 %v2841_v63 }
 0x699   : > { %15452 = vmatprep.subr.bf16.mxu1 %v19970_v48 }
 0x69a   : > { %v20061_v44 = vpop.permute.xlu0 %2822 }
 0x69b   : > { %15753 = vmatmul.mubr.msk.bf16.vlgmr.msra.gmra.mrb[112].mxu1 %vm1633_vm2, %v20066_v41 }
 0x69c   : > { %15453 = vmatpush3.bf16.msra.mxu1 %v20061_v44  ;;  %15756 = vmatprep.mubr.msk.bf16.mxu1 %vm1633_vm2, %v20074_v26 }
 0x69d   : > { %15454 = vmatprep.subr.bf16.mxu1 %v19975_v50 }
 0x69e   : > { %v20079_v12 = vpop.permute.xlu0 %2824 }
 0x6a0   : > { %15455 = vmatpush3.bf16.msra.mxu1 %v20079_v12 }
 0x6a1   : > { %15456 = vmatprep.subr.bf16.mxu1 %v20024_v60 }
 0x6a2   : > { %v20083_v49 = vpop.permute.xlu0 %2826 }
 0x6a3   : > { %15757 = vmatmul.mubr.msk.bf16.gmra.mrb[116].mxu1 %vm1633_vm2, %v20088_v59 }
 0x6a4   : > { %15457 = vmatpush3.bf16.msra.mxu1 %v20083_v49  ;;  %3183 = vmatprep.mubr.bf16.mxu1 %v20096_v4 }
 0x6a5   : > { %15458 = vmatprep.subr.bf16.mxu1 %v19984_v55 }
 0x6a6   : > { %v20100_v13 = vpop.permute.xlu0 %2828 }
 0x6a8   : > { %15459 = vmatpush3.bf16.msra.mxu1 %v20100_v13 }
 0x6aa   : > { %v3063_v43 = vpop.permute.xlu0 %3062 }
 0x6ab   : > { %15460 = vmatprep.subr.bf16.mxu1 %v3063_v43 }
 0x6ac   : > { %15461 = vmatpush3.bf16.msra.mxu1 %v2835_v19 }
 0x6ae   : > { %v3065_v20 = vpop.permute.xlu0 %3064 }
 0x6af   : > { %v3490_v45 = vpop.permute.xlu1 %3489  ;;  %15462 = vmatprep.subr.bf16.mxu1 %v3065_v20 }
 0x6b0   : > { %3701 = vrot.lane.b32.xlu1 %v3490_v45, %s18812_s22  ;;  %15463 = vmatpush3.bf16.msra.mxu1 %v2837_v0  ;;  %v20110_v45 = vld [vmem:[#allocation3 + $0xc0] sm:$0xff]  ;;  %v24561_v0 = vmov 0  }
 0x6b3   : > { %v3492_v46 = vpop.permute.xlu1 %3491 }
 0x6b4   : > { %3703 = vrot.lane.b32.xlu0 %v3492_v46, %s18812_s22  ;;  %v20115_v46 = vld [vmem:[#allocation3 + $0xc8] sm:$0xff] }
 0x6bb   : > { %v3494_v1 = vpop.permute.xlu1 %3493 }
 0x6bc   : > { %3705 = vrot.lane.b32.xlu1 %v3494_v1, %s18812_s22 }
 0x6c3   : > { %v3496_v21 = vpop.permute.xlu1 %3495 }
 0x6c4   : > { %3707 = vrot.lane.b32.xlu0 %v3496_v21, %s18812_s22  ;;  %v20121_v21 = vld [vmem:[#allocation3 + $0xd0] sm:$0xff] }
 0x6c7   : > { %v3498_v56 = vpop.permute.xlu1 %3497 }
 0x6c8   : > { %3709 = vrot.lane.b32.xlu1 %v3498_v56, %s18812_s22  ;;  %v3069_v56 = vpop.permute.xlu0 %3068 }
 0x6cb   : > { %v3500_v43 = vpop.permute.xlu1 %3499 }
 0x6cc   : > { %3711 = vrot.lane.b32.xlu0 %v3500_v43, %s18812_s22  ;;  %v20128_v43 = vld [vmem:[#allocation3 + $0xd8] sm:$0xff] }
 0x6cf   : > { %v3502_v19 = vpop.permute.xlu1 %3501 }
 0x6d0   : > { %3713 = vrot.lane.b32.xlu1 %v3502_v19, %s18812_s22  ;;  %v20157_v19 = vld [vmem:[%s24506_s5 + $0x30] ss:$20 sps:$4 sm:$0xff]  }
 0x6d3   : > { %v3504_v20 = vpop.permute.xlu1 %3503 }
 0x6d4   : > { %2594 = vrot.lane.b32.xlu1 %v20110_v45, %s18812_s22  ;;  %3715 = vrot.lane.b32.xlu0 %v3504_v20, %s18812_s22  ;;  %v20163_v20 = vld [vmem:[%s24506_s5 + $0x5c] ss:$20 sps:$4 sm:$0xff]  }
 0x6d7   : > { %v3067_v1 = vpop.permute.xlu1 %3066 }
 0x6d8   : > { %2596 = vrot.lane.b32.xlu1 %v20115_v46, %s18812_s22  ;;  %3513 = vrot.lane.b32.xlu0 %v19977_v25, %s18812_s22 }
 0x6d9   : > { %15464 = vmatprep.subr.bf16.mxu1 %v3067_v1  ;;  %v20177_v1 = vld [vmem:[%s24506_s5 + $0x58] ss:$20 sps:$4 sm:$0xff]  }
 0x6da   : > { %15465 = vmatpush3.bf16.msra.mxu1 %v2839_v52  ;;  %v20137_v52 = vld [vmem:[%s24506_s5 + $0x8] ss:$20 sps:$4 sm:$0xff]  }
 0x6db   : > { %15466 = vmatprep.subr.bf16.mxu1 %v3069_v56  ;;  %v20183_v56 = vld [vmem:[%s24506_s5 + $0x84] ss:$20 sps:$4 sm:$0xff]  }
 0x6dc   : > { %2598 = vrot.lane.b32.xlu1 %v20121_v21, %s18812_s22  ;;  %3515 = vrot.lane.b32.xlu0 %v19987_v5, %s18812_s22 }
 0x6de   : > { %15467 = vmatpush3.bf16.msra.mxu1 %v2841_v63  ;;  %v20143_v63 = vld [vmem:[%s24506_s5 + $0x34] ss:$20 sps:$4 sm:$0xff]  }
 0x6df   : > { %15880 = vmatprep.subr.bf16.mxu1 %v24561_v0 }
 0x6e0   : > { %2600 = vrot.lane.b32.xlu1 %v20128_v43, %s18812_s22  ;;  %3517 = vrot.lane.b32.xlu0 %v19996_v57, %s18812_s22 }
 0x6e1   : > { %3184 = vmatmul.mubr.bf16.vlgmr.msra.gmra.mrb[120].mxu1 %v20137_v52 }
 0x6e2   : > { %3191 = vmatprep.mubr.bf16.mxu1 %v20143_v63 }
 0x6e4   : > { %3505 = vrot.lane.b32.xlu1 %v19977_v25, %s18813_s21  ;;  %3519 = vrot.lane.b32.xlu0 %v20000_v47, %s18812_s22 }
 0x6e8   : > { %3509 = vrot.lane.b32.xlu1 %v19996_v57, %s18813_s21  ;;  %3507 = vrot.lane.b32.xlu0 %v19987_v5, %s18813_s21 }
 0x6e9   : > { %3192 = vmatmul.mubr.bf16.gmra.mrb[124].mxu1 %v20157_v19 }
 0x6ea   : > { %3199 = vmatprep.mubr.bf16.mxu1 %v20163_v20 }
 0x6ec   : > { %3521 = vrot.lane.b32.xlu1 %v19977_v25, %s18818_s13  ;;  %3511 = vrot.lane.b32.xlu0 %v20000_v47, %s18813_s21 }
 0x6f0   : > { %3525 = vrot.lane.b32.xlu1 %v19996_v57, %s18818_s13  ;;  %3523 = vrot.lane.b32.xlu0 %v19987_v5, %s18818_s13 }
 0x6f1   : > { %3200 = vmatmul.mubr.bf16.gmra.mrb[128].mxu1 %v20177_v1 }
 0x6f2   : > { %3207 = vmatprep.mubr.bf16.mxu1 %v20183_v56 }
 0x6f4   : > { %3529 = vrot.lane.b32.xlu1 %v19977_v25, %s18815_s26  ;;  %3527 = vrot.lane.b32.xlu0 %v20000_v47, %s18818_s13 }
 0x6f8   : > { %3074 = vrot.lane.b32.xlu1 %v19970_v48, %s18812_s22  ;;  %3531 = vrot.lane.b32.xlu0 %v19987_v5, %s18815_s26 }
 0x6f9   : > { %3208 = vmatmul.mubr.bf16.gmra.mrb[132].mxu1 %v20197_v39  ;;  %v20208_v48 = vpop.permute.xlu0 %3695 }
 0x6fa   : > { %v20200_v28 = vpop.permute.xlu1 %3693  ;;  %24563 = vst [vmem:[#allocation19_spill] sm:$0xff] %v20208_v48 }
 0x6fb   : > { %24562 = vst [vmem:[#allocation18_spill] sm:$0xff] %v20200_v28  ;;  %15896 = vmatpush1.bf16.msra.mxu1 %v20200_v28 }
 0x6fc   : > { %3076 = vrot.lane.b32.xlu1 %v19975_v50, %s18812_s22  ;;  %3533 = vrot.lane.b32.xlu0 %v19996_v57, %s18815_s26 }
 0x6fd   : > { %15881 = vmatprep.subr.bf16.mxu1 %v24561_v0 }
 0x6ff   : > { %15897 = vmatpush1.bf16.msra.mxu1 %v20208_v48 }
 0x700   : > { %3535 = vrot.lane.b32.xlu1 %v20000_v47, %s18815_s26  ;;  %15882 = vmatprep.subr.bf16.mxu1 %v24561_v0 }
 0x702   : > { %v20214_v25 = vpop.permute.xlu1 %3697 }
 0x703   : > { %24564 = vst [vmem:[#allocation20_spill] sm:$0xff] %v20214_v25  ;;  %15898 = vmatpush1.bf16.msra.mxu1 %v20214_v25 }
 0x704   : > { %15883 = vmatprep.subr.bf16.mxu1 %v24561_v0 }
 0x706   : > { %v20218_v50 = vpop.permute.xlu0 %3699 }
 0x707   : > { %24565 = vst [vmem:[#allocation21_spill] sm:$0xff] %v20218_v50  ;;  %15899 = vmatpush1.bf16.msra.mxu1 %v20218_v50  ;;  %v17475_v50 = vld [vmem:[%s24508_s7 + $0xb1c] ss:$100 sps:$4 sm:$0xff]  }
 0x708   : > { %15884 = vmatprep.subr.bf16.mxu1 %v24561_v0  ;;  %10622 = vmatprep.mubr.bf16.mxu1 %v17475_v50 }
 0x722   : > { %v20222_v5 = vpop.permute.xlu1 %3701 }
 0x723   : > { %24566 = vst [vmem:[#allocation22_spill] sm:$0xff] %v20222_v5  ;;  %15900 = vmatpush1.bf16.msra.mxu1 %v20222_v5 }
 0x724   : > { %15885 = vmatprep.subr.bf16.mxu1 %v24561_v0 }
 0x726   : > { %v20226_v57 = vpop.permute.xlu0 %3703 }
 0x727   : > { %24567 = vst [vmem:[#allocation23_spill] sm:$0xff] %v20226_v57  ;;  %15901 = vmatpush1.bf16.msra.mxu1 %v20226_v57 }
 0x728   : > { %15886 = vmatprep.subr.bf16.mxu1 %v24561_v0 }
 0x72e   : > { %v20230_v47 = vpop.permute.xlu1 %3705 }
 0x72f   : > { %24568 = vst [vmem:[#allocation24_spill] sm:$0xff] %v20230_v47  ;;  %15902 = vmatpush1.bf16.msra.mxu1 %v20230_v47 }
 0x730   : > { %15887 = vmatprep.subr.bf16.mxu1 %v24561_v0 }
 0x736   : > { %v20237_v5 = vpop.permute.xlu0 %3707 }
 0x737   : > { %24569 = vst [vmem:[#allocation25_spill] sm:$0xff] %v20237_v5  ;;  %15903 = vmatpush1.bf16.msra.mxu1 %v20237_v5 }
 0x738   : > { %15888 = vmatprep.subr.bf16.mxu1 %v24561_v0 }
 0x73a   : > { %v20241_v57 = vpop.permute.xlu1 %3709 }
 0x73b   : > { %24570 = vst [vmem:[#allocation26_spill] sm:$0xff] %v20241_v57  ;;  %15904 = vmatpush1.bf16.msra.mxu1 %v20241_v57 }
 0x73c   : > { %15889 = vmatprep.subr.bf16.mxu1 %v24561_v0 }
 0x73e   : > { %v20245_v47 = vpop.permute.xlu0 %3711 }
 0x73f   : > { %24571 = vst [vmem:[#allocation27_spill] sm:$0xff] %v20245_v47  ;;  %15905 = vmatpush1.bf16.msra.mxu1 %v20245_v47 }
 0x740   : > { %15890 = vmatprep.subr.bf16.mxu1 %v24561_v0 }
 0x742   : > { %v20249_v25 = vpop.permute.xlu1 %3713 }
 0x743   : > { %24572 = vst [vmem:[#allocation28_spill] sm:$0xff] %v20249_v25  ;;  %15906 = vmatpush1.bf16.msra.mxu1 %v20249_v25 }
 0x744   : > { %15891 = vmatprep.subr.bf16.mxu1 %v24561_v0 }
 0x746   : > { %v20253_v50 = vpop.permute.xlu1 %2594  ;;  %v20255_v5 = vpop.permute.xlu0 %3715 }
 0x747   : > { %24573 = vst [vmem:[#allocation29_spill] sm:$0xff] %v20255_v5  ;;  %15728 = vmatprep.subr.bf16.mxu0 %v20253_v50  ;;  %15907 = vmatpush1.bf16.msra.mxu1 %v20255_v5 }
 0x748   : > { %15729 = vmatpush3.bf16.msra.mxu0 %v20253_v50  ;;  %15892 = vmatprep.subr.bf16.mxu1 %v24561_v0 }
 0x74a   : > { %v20261_v47 = vpop.permute.xlu1 %2596  ;;  %v20263_v57 = vpop.permute.xlu0 %3513 }
 0x74b   : > { %15730 = vmatprep.subr.bf16.mxu0 %v20261_v47  ;;  %15908 = vmatpush1.bf16.msra.mxu1 %v20263_v57 }
 0x74c   : > { %15731 = vmatpush3.bf16.msra.mxu0 %v20261_v47  ;;  %15893 = vmatprep.subr.bf16.mxu1 %v24561_v0 }
 0x74e   : > { %v20269_v25 = vpop.permute.xlu1 %2598  ;;  %v20271_v48 = vpop.permute.xlu0 %3515 }
 0x74f   : > { %15732 = vmatprep.subr.bf16.mxu0 %v20269_v25  ;;  %15909 = vmatpush1.bf16.msra.mxu1 %v20271_v48 }
 0x750   : > { %15733 = vmatpush3.bf16.msra.mxu0 %v20269_v25  ;;  %15894 = vmatprep.subr.bf16.mxu1 %v24561_v0 }
 0x752   : > { %v20277_v5 = vpop.permute.xlu1 %2600  ;;  %v20279_v28 = vpop.permute.xlu0 %3517 }
 0x753   : > { %15734 = vmatprep.subr.bf16.mxu0 %v20277_v5  ;;  %15910 = vmatpush1.bf16.msra.mxu1 %v20279_v28 }
 0x754   : > { %15735 = vmatpush3.bf16.msra.mxu0 %v20277_v5  ;;  %15895 = vmatprep.subr.bf16.mxu1 %v24561_v0 }
 0x755   : > { %15364 = vmatprep.subr.bf16.mxu0 %v19933_v30 }
 0x756   : > { %v3506_v22 = vpop.permute.xlu1 %3505  ;;  %v20286_v54 = vpop.permute.xlu0 %3519 }
 0x757   : > { %15737 = vmatmul.mubr.msk.bf16.vlgmr.msra.gmra.mrb[96].mxu0 %vm1633_vm2, %v20066_v41  ;;  %3717 = vrot.lane.b32.xlu0 %v3506_v22, %s18812_s22 }
 0x758   : > { %15911 = vmatpush1.bf16.msra.mxu1 %v20286_v54  ;;  %15365 = vmatpush3.bf16.msra.mxu0 %v19810_v24 }
 0x759   : > { %15366 = vmatprep.subr.bf16.mxu0 %v19937_v40  ;;  %15740 = vmatprep.mubr.msk.bf16.mxu0 %vm1633_vm2, %v20074_v26 }
 0x75a   : > { %v3508_v17 = vpop.permute.xlu0 %3507  ;;  %10767 = vmatprep.subr.bf16.mxu1 %v24561_v0  ;;  %v3510_v22 = vpop.permute.xlu1 %3509 }
 0x75b   : > { %3078 = vrot.lane.b32.xlu0 %v20024_v60, %s18812_s22  ;;  %3719 = vrot.lane.b32.xlu1 %v3508_v17, %s18812_s22  ;;  %v17478_v17 = vld [vmem:[%s24508_s7 + $0xbe0] ss:$100 sps:$4 sm:$0xff]   ;;  %v17479_v60 = vld [vmem:[%s24508_s7 + $0xcac] ss:$100 sps:$4 sm:$0xff]  }
 0x75c   : > { %15367 = vmatpush3.bf16.msra.mxu0 %v19822_v27  ;;  %10623 = vmatmul.mubr.bf16.vlgmr.msra.gmra.mrb[136].mxu1 %v17473_v18 }
 0x75d   : > { %15368 = vmatprep.subr.bf16.mxu0 %v19947_v53  ;;  %10630 = vmatprep.mubr.bf16.mxu1 %v17476_v62  ;;  %v17482_v62 = vld [vmem:[%s24508_s7 + $0xd74] ss:$100 sps:$4 sm:$0xff]  }
 0x75e   : > { %v3512_v18 = vpop.permute.xlu0 %3511 }
 0x75f   : > { %15741 = vmatmul.mubr.msk.bf16.gmra.mrb[100].mxu0 %vm1633_vm2, %v20088_v59  ;;  %3080 = vrot.lane.b32.xlu0 %v19984_v55, %s18812_s22  ;;  %v17481_v55 = vld [vmem:[%s24508_s7 + $0xca8] ss:$100 sps:$4 sm:$0xff]  }
 0x760   : > { %3721 = vrot.lane.b32.xlu1 %v3510_v22, %s18812_s22  ;;  %15369 = vmatpush3.bf16.msra.mxu0 %v19834_v29 }
 0x761   : > { %15370 = vmatprep.subr.bf16.mxu0 %v19953_v61  ;;  %2943 = vmatprep.mubr.bf16.mxu0 %v20096_v4 }
 0x762   : > { %v3524_v22 = vpop.permute.xlu0 %3523 }
 0x763   : > { %3723 = vrot.lane.b32.xlu0 %v3512_v18, %s18812_s22  ;;  %v18772_v18 = vld [vmem:[%s24506_s5 + $0x7c] ss:$20 sps:$4 sm:$0xff]  }
 0x764   : > { %3725 = vrot.lane.b32.xlu1 %v20263_v57, %s18812_s22  ;;  %15371 = vmatpush3.bf16.msra.mxu0 %v19842_v31 }
 0x765   : > { %15372 = vmatprep.subr.bf16.mxu0 %v20061_v44  ;;  %10631 = vmatmul.mubr.bf16.gmra.mrb[140].mxu1 %v17478_v17  ;;  %v3522_v44 = vpop.permute.xlu1 %3521 }
 0x766   : > { %10638 = vmatprep.mubr.bf16.mxu1 %v17479_v60  ;;  %v3528_v17 = vpop.permute.xlu0 %3527  ;;  %v17505_v60 = vld [vmem:[%s24508_s7 + $0x12e8] ss:$100 sps:$4 sm:$0xff]  }
 0x767   : > { %3727 = vrot.lane.b32.xlu0 %v20271_v48, %s18812_s22 }
 0x768   : > { %3729 = vrot.lane.b32.xlu1 %v20279_v28, %s18812_s22  ;;  %15373 = vmatpush3.bf16.msra.mxu0 %v20253_v50 }
 0x769   : > { %15374 = vmatprep.subr.bf16.mxu0 %v20079_v12  ;;  %v17484_v12 = vld [vmem:[%s24508_s7 + $0xd70] ss:$100 sps:$4 sm:$0xff]   ;;  %v3526_v4 = vpop.permute.xlu1 %3525 }
 0x76b   : > { %3731 = vrot.lane.b32.xlu0 %v20286_v54, %s18812_s22 }
 0x76c   : > { %3297 = vrot.lane.b32.xlu1 %v19892_v15, %s18813_s21  ;;  %15375 = vmatpush3.bf16.msra.mxu0 %v20261_v47 }
 0x76d   : > { %15376 = vmatprep.subr.bf16.mxu0 %v20083_v49  ;;  %10639 = vmatmul.mubr.bf16.gmra.mrb[144].mxu1 %v17481_v55  ;;  %v17485_v49 = vld [vmem:[%s24508_s7 + $0xe3c] ss:$100 sps:$4 sm:$0xff]   ;;  %v17506_v55 = vld [vmem:[%s24508_s7 + $0x13b4] ss:$100 sps:$4 sm:$0xff]  }
 0x76e   : > { %10646 = vmatprep.mubr.bf16.mxu1 %v17482_v62  ;;  %v18773_v62 = vld [vmem:[%s24506_s5 + $0x78] ss:$20 sps:$4 sm:$0xff]  }
 0x76f   : > { %3733 = vrot.lane.b32.xlu0 %v3522_v44, %s18812_s22  ;;  %v18774_v44 = vld [vmem:[%s24506_s5 + $0x10] ss:$20 sps:$4 sm:$0xff]  }
 0x770   : > { %3299 = vrot.lane.b32.xlu1 %v19890_v51, %s18813_s21  ;;  %15377 = vmatpush3.bf16.msra.mxu0 %v20269_v25 }
 0x771   : > { %15378 = vmatprep.subr.bf16.mxu0 %v20100_v13  ;;  %v3530_v13 = vpop.permute.xlu1 %3529 }
 0x773   : > { %3735 = vrot.lane.b32.xlu0 %v3524_v22, %s18812_s22  ;;  %v17511_v22 = vld [vmem:[%s24508_s7 + $0x1478] ss:$100 sps:$4 sm:$0xff]  }
 0x774   : > { %3301 = vrot.lane.b32.xlu1 %v19899_v37, %s18813_s21  ;;  %15379 = vmatpush3.bf16.msra.mxu0 %v20277_v5 }
 0x775   : > { %15412 = vmatprep.subr.bf16.mxu0 %v20253_v50  ;;  %10647 = vmatmul.mubr.bf16.gmra.mrb[148].mxu1 %v17484_v12  ;;  %v17487_v50 = vld [vmem:[%s24508_s7 + $0xe38] ss:$100 sps:$4 sm:$0xff]   ;;  %v17508_v12 = vld [vmem:[%s24508_s7 + $0x13b0] ss:$100 sps:$4 sm:$0xff]  }
 0x776   : > { %10654 = vmatprep.mubr.bf16.mxu1 %v17485_v49  ;;  %v17512_v49 = vld [vmem:[%s24508_s7 + $0x1544] ss:$100 sps:$4 sm:$0xff]  }
 0x777   : > { %2944 = vmatmul.mubr.bf16.vlgmr.msra.gmra.mrb[104].mxu0 %v20137_v52  ;;  %3737 = vrot.lane.b32.xlu0 %v3526_v4, %s18812_s22  ;;  %v17488_v52 = vld [vmem:[%s24508_s7 + $0xf04] ss:$100 sps:$4 sm:$0xff]   ;;  %v17509_v4 = vld [vmem:[%s24508_s7 + $0x147c] ss:$100 sps:$4 sm:$0xff]  }
 0x778   : > { %3303 = vrot.lane.b32.xlu1 %v19897_v36, %s18813_s21  ;;  %15413 = vmatpush3.bf16.msra.mxu0 %v20110_v45  ;;  %v3075_v45 = vpop.permute.xlu1 %3074 }
 0x779   : > { %15414 = vmatprep.subr.bf16.mxu0 %v20261_v47  ;;  %2951 = vmatprep.mubr.bf16.mxu0 %v20143_v63  ;;  %v3532_v63 = vpop.permute.xlu0 %3531  ;;  %v18771_v47 = vld [vmem:[%s24506_s5 + $0x50] ss:$20 sps:$4 sm:$0xff]  }
 0x77b   : > { %3739 = vrot.lane.b32.xlu0 %v3528_v17, %s18812_s22 }
 0x77c   : > { %3309 = vrot.lane.b32.xlu1 %v19892_v15, %s18812_s22  ;;  %15415 = vmatpush3.bf16.msra.mxu0 %v20115_v46  ;;  %v17490_v46 = vld [vmem:[%s24508_s7 + $0xf00] ss:$100 sps:$4 sm:$0xff]  }
 0x77d   : > { %15416 = vmatprep.subr.bf16.mxu0 %v20269_v25  ;;  %10655 = vmatmul.mubr.bf16.gmra.mrb[152].mxu1 %v17487_v50  ;;  %v3077_v25 = vpop.permute.xlu1 %3076 }
 0x77e   : > { %10662 = vmatprep.mubr.bf16.mxu1 %v17488_v52 }
 0x77f   : > { %2952 = vmatmul.mubr.bf16.gmra.mrb[108].mxu0 %v20157_v19  ;;  %3741 = vrot.lane.b32.xlu0 %v3530_v13, %s18812_s22  ;;  %v17491_v19 = vld [vmem:[%s24508_s7 + $0xfcc] ss:$100 sps:$4 sm:$0xff]   ;;  %v20489_v13 = vpop.f32.mrb[112].mxu1 }
 0x780   : > { %3311 = vrot.lane.b32.xlu1 %v19890_v51, %s18812_s22  ;;  %15417 = vmatpush3.bf16.msra.mxu0 %v20121_v21  ;;  %v3534_v21 = vpop.permute.xlu0 %3533  ;;  %v20491_v50 = vpop.f32.mrb[113].mxu1 }
 0x781   : > { %15418 = vmatprep.subr.bf16.mxu0 %v20277_v5  ;;  %2959 = vmatprep.mubr.bf16.mxu0 %v20163_v20  ;;  %v17494_v20 = vld [vmem:[%s24508_s7 + $0x1094] ss:$100 sps:$4 sm:$0xff]   ;;  %v17503_v5 = vld [vmem:[%s24508_s7 + $0x12ec] ss:$100 sps:$4 sm:$0xff]   ;;  %v20493_v17 = vpop.f32.mrb[114].mxu1 }
 0x782   : > { %v20495_v52 = vpop.f32.mrb[115].mxu1 }
 0x783   : > { %3743 = vrot.lane.b32.xlu0 %v3532_v63, %s18812_s22  ;;  %v17515_v63 = vld [vmem:[%s24508_s7 + $0x160c] ss:$100 sps:$4 sm:$0xff]  }
 0x784   : > { %3313 = vrot.lane.b32.xlu1 %v19899_v37, %s18812_s22  ;;  %15419 = vmatpush3.bf16.msra.mxu0 %v20128_v43  ;;  %v3536_v43 = vpop.permute.xlu1 %3535 }
 0x785   : > { %15420 = vmatprep.subr.bf16.mxu0 %v19933_v30  ;;  %10663 = vmatmul.mubr.bf16.gmra.mrb[156].mxu1 %v17490_v46  ;;  %v17493_v30 = vld [vmem:[%s24508_s7 + $0xfc8] ss:$100 sps:$4 sm:$0xff]  }
 0x786   : > { %10670 = vmatprep.mubr.bf16.mxu1 %v17491_v19  ;;  %v17517_v19 = vld [vmem:[%s24508_s7 + $0x1608] ss:$100 sps:$4 sm:$0xff]  }
 0x787   : > { %2960 = vmatmul.mubr.bf16.gmra.mrb[112].mxu0 %v20177_v1  ;;  %3745 = vrot.lane.b32.xlu0 %v3534_v21, %s18812_s22  ;;  %v18770_v1 = vld [vmem:[%s24506_s5 + $0x54] ss:$20 sps:$4 sm:$0xff]  }
 0x788   : > { %3315 = vrot.lane.b32.xlu1 %v19897_v36, %s18812_s22  ;;  %15421 = vmatpush3.bf16.msra.mxu0 %v19810_v24  ;;  %v18766_v24 = vld [vmem:[%s24506_s5 + $0x4] ss:$20 sps:$4 sm:$0xff]  }
 0x789   : > { %15422 = vmatprep.subr.bf16.mxu0 %v19937_v40  ;;  %2967 = vmatprep.mubr.bf16.mxu0 %v20183_v56  ;;  %v18768_v40 = vld [vmem:[%s24506_s5 + $0x2c] ss:$20 sps:$4 sm:$0xff]  }
 0x78a   : > { %v17502_v56 = vld [vmem:[%s24508_s7 + $0x1220] ss:$100 sps:$4 sm:$0xff]  }
 0x78b   : > { %3747 = vrot.lane.b32.xlu0 %v3536_v43, %s18812_s22 }
 0x78c   : > { %3321 = vrot.lane.b32.xlu1 %v19892_v15, %s18818_s13  ;;  %15423 = vmatpush3.bf16.msra.mxu0 %v19822_v27  ;;  %v17496_v27 = vld [vmem:[%s24508_s7 + $0x1090] ss:$100 sps:$4 sm:$0xff]  }
 0x78d   : > { %15424 = vmatprep.subr.bf16.mxu0 %v19947_v53  ;;  %10671 = vmatmul.mubr.bf16.gmra.mrb[160].mxu1 %v17493_v30  ;;  %v17499_v53 = vld [vmem:[%s24508_s7 + $0x1158] ss:$100 sps:$4 sm:$0xff]  }
 0x78e   : > { %10678 = vmatprep.mubr.bf16.mxu1 %v17494_v20  ;;  %v17520_v20 = vld [vmem:[%s24508_s7 + $0x16d0] ss:$100 sps:$4 sm:$0xff]  }
 0x78f   : > { %2968 = vmatmul.mubr.bf16.gmra.mrb[116].mxu0 %v20197_v39  ;;  %3323 = vrot.lane.b32.xlu0 %v19890_v51, %s18818_s13  ;;  %v17497_v39 = vld [vmem:[%s24508_s7 + $0x115c] ss:$100 sps:$4 sm:$0xff]  }
 0x790   : > { %3325 = vrot.lane.b32.xlu1 %v19899_v37, %s18818_s13  ;;  %15425 = vmatpush3.bf16.msra.mxu0 %v19834_v29  ;;  %v18767_v29 = vld [vmem:[%s24506_s5] ss:$20 sps:$4 sm:$0xff]  }
 0x791   : > { %15426 = vmatprep.subr.bf16.mxu0 %v19953_v61  ;;  %3118 = vmatprep.mubr.bf16.mxu0 %v18766_v24  ;;  %v18769_v61 = vld [vmem:[%s24506_s5 + $0x28] ss:$20 sps:$4 sm:$0xff]  }
 0x793   : > { %3327 = vrot.lane.b32.xlu0 %v19897_v36, %s18818_s13 }
 0x794   : > { %15427 = vmatpush3.bf16.msra.mxu0 %v19842_v31  ;;  %v17500_v31 = vld [vmem:[%s24508_s7 + $0x1224] ss:$100 sps:$4 sm:$0xff]  }
 0x795   : > { %15760 = vmatprep.subr.bf16.mxu0 %v3075_v45  ;;  %10679 = vmatmul.mubr.bf16.gmra.mrb[164].mxu1 %v17496_v27  ;;  %v17521_v27 = vld [vmem:[%s24508_s7 + $0x179c] ss:$100 sps:$4 sm:$0xff]  }
 0x796   : > { %10686 = vmatprep.mubr.bf16.mxu1 %v17497_v39  ;;  %v20517_v39 = vpop.f32.mrb[116].mxu1 }
 0x797   : > { %3119 = vmatmul.mubr.bf16.vlgmr.msra.gmra.mrb[120].mxu0 %v18767_v29  ;;  %v20521_v29 = vpop.f32.mrb[117].mxu1 }
 0x798   : > { %3126 = vmatprep.mubr.bf16.mxu0 %v18768_v40  ;;  %15761 = vmatpush3.bf16.msra.mxu0 %v3075_v45  ;;  %v17514_v45 = vld [vmem:[%s24508_s7 + $0x1540] ss:$100 sps:$4 sm:$0xff]  }
 0x799   : > { %15762 = vmatprep.subr.bf16.mxu0 %v3077_v25 }
 0x79c   : > { %15763 = vmatpush3.bf16.msra.mxu0 %v3077_v25  ;;  %v17518_v25 = vld [vmem:[%s24508_s7 + $0x16d4] ss:$100 sps:$4 sm:$0xff]  }
 0x79d   : > { %10687 = vmatmul.mubr.bf16.gmra.mrb[168].mxu1 %v17499_v53  ;;  %v20523_v53 = vpop.f32.mrb[118].mxu1 }
 0x79e   : > { %10694 = vmatprep.mubr.bf16.mxu1 %v17500_v31 }
 0x79f   : > { %3127 = vmatmul.mubr.bf16.gmra.mrb[124].mxu0 %v18769_v61  ;;  %v20527_v61 = vpop.f32.mrb[119].mxu1 }
 0x7a0   : > { %3134 = vmatprep.mubr.bf16.mxu0 %v18770_v1 }
 0x7a5   : > { %10695 = vmatmul.mubr.bf16.gmra.mrb[172].mxu1 %v17502_v56  ;;  %v17523_v56 = vld [vmem:[%s24508_s7 + $0x1798] ss:$100 sps:$4 sm:$0xff]  }
 0x7a6   : > { %10702 = vmatprep.mubr.bf16.mxu1 %v17503_v5 }
 0x7a7   : > { %3135 = vmatmul.mubr.bf16.gmra.mrb[128].mxu0 %v18771_v47 }
 0x7a8   : > { %3142 = vmatprep.mubr.bf16.mxu0 %v18772_v18 }
 0x7ad   : > { %10703 = vmatmul.mubr.bf16.gmra.mrb[176].mxu1 %v17505_v60 }
 0x7ae   : > { %10710 = vmatprep.mubr.bf16.mxu1 %v17506_v55 }
 0x7af   : > { %3143 = vmatmul.mubr.bf16.gmra.mrb[132].mxu0 %v18773_v62 }
 0x7b0   : > { %15768 = vmatprep.mubr.msk.bf16.mxu0 %vm1633_vm2, %v18774_v44 }
 0x7b4   : > { %v15468_v47 = vpop.f32.mrb[120].mxu1 }
 0x7b5   : > { %10711 = vmatmul.mubr.bf16.gmra.mrb[180].mxu1 %v17508_v12  ;;  %v15469_v18 = vpop.f32.mrb[121].mxu1 }
 0x7b6   : > { %10718 = vmatprep.mubr.bf16.mxu1 %v17509_v4  ;;  %v20546_v44 = vadd.f32 %v15469_v18, %v15468_v47 }
 0x7bd   : > { %10719 = vmatmul.mubr.bf16.gmra.mrb[184].mxu1 %v17511_v22  ;;  %v17526_v22 = vld [vmem:[%s24508_s7 + $0x1860] ss:$100 sps:$4 sm:$0xff]  }
 0x7be   : > { %10726 = vmatprep.mubr.bf16.mxu1 %v17512_v49 }
 0x7c5   : > { %10727 = vmatmul.mubr.bf16.gmra.mrb[188].mxu1 %v17514_v45  ;;  %v17535_v45 = vld [vmem:[%s24508_s7 + $0x4] ss:$100 sps:$4 sm:$0xff]  }
 0x7c6   : > { %10734 = vmatprep.mubr.bf16.mxu1 %v17515_v63 }
 0x7c9   : > { %v3718_v46 = vpop.permute.xlu0 %3717 }
 0x7ca   : > { %10768 = vmatpush1.bf16.msra.mxu1 %v3718_v46 }
 0x7cb   : > { %10769 = vmatprep.subr.bf16.mxu1 %v24561_v0 }
 0x7cd   : > { %v3720_v21 = vpop.permute.xlu1 %3719  ;;  %v3079_v30 = vpop.permute.xlu0 %3078  ;;  %10735 = vmatmul.mubr.bf16.gmra.mrb[192].mxu1 %v17517_v19 }
 0x7ce   : > { %15764 = vmatprep.subr.bf16.mxu0 %v3079_v30  ;;  %10770 = vmatpush1.bf16.msra.mxu1 %v3720_v21 }
 0x7cf   : > { %15765 = vmatpush3.bf16.msra.mxu0 %v3079_v30  ;;  %10771 = vmatprep.subr.bf16.mxu1 %v24561_v0 }
 0x7d0   : > { %10742 = vmatprep.mubr.bf16.mxu1 %v17518_v25 }
 0x7d1   : > { %v3081_v43 = vpop.permute.xlu0 %3080 }
 0x7d2   : > { %v3722_v24 = vpop.permute.xlu1 %3721  ;;  %15766 = vmatprep.subr.bf16.mxu0 %v3081_v43 }
 0x7d3   : > { %10772 = vmatpush1.bf16.msra.mxu1 %v3722_v24  ;;  %15767 = vmatpush3.bf16.msra.mxu0 %v3081_v43 }
 0x7d4   : > { %10773 = vmatprep.subr.bf16.mxu1 %v24561_v0  ;;  %9033 = vmatprep.subr.bf16.mxu0 %v24561_v0 }
 0x7d5   : > { %v3724_v40 = vpop.permute.xlu0 %3723  ;;  %10743 = vmatmul.mubr.bf16.gmra.mrb[196].mxu1 %v17520_v20 }
 0x7d6   : > { %v3726_v31 = vpop.permute.xlu1 %3725  ;;  %15769 = vmatmul.mubr.msk.bf16.vlgmr.msra.gmra.mrb[136].mxu0 %vm1633_vm2, %v20066_v41  ;;  %10750 = vmatprep.mubr.bf16.mxu1 %v17521_v27  ;;  %v17524_v41 = vld [vmem:[%s24508_s7 + $0x1864] ss:$100 sps:$4 sm:$0xff]  }
 0x7d7   : > { %10774 = vmatpush1.bf16.msra.mxu1 %v3724_v40  ;;  %9034 = vmatpush1.bf16.msra.mxu0 %v19892_v15 }
 0x7d8   : > { %10775 = vmatprep.subr.bf16.mxu1 %v24561_v0  ;;  %9035 = vmatprep.subr.bf16.mxu0 %v24561_v0 }
 0x7d9   : > { %v3728_v1 = vpop.permute.xlu0 %3727  ;;  %15772 = vmatprep.mubr.msk.bf16.mxu0 %vm1633_vm2, %v20074_v26  ;;  %v15471_v26 = vpop.f32.mrb[122].mxu1 }
 0x7da   : > { %v3730_v5 = vpop.permute.xlu1 %3729  ;;  %v15472_v62 = vpop.f32.mrb[123].mxu1 }
 0x7db   : > { %10776 = vmatpush1.bf16.msra.mxu1 %v3726_v31  ;;  %9036 = vmatpush1.bf16.msra.mxu0 %v19890_v51  ;;  %v20548_v12 = vadd.f32 %v15472_v62, %v15471_v26  ;;  %v15474_v24 = vpop.f32.mrb[124].mxu1 }
 0x7dc   : > { %10777 = vmatprep.subr.bf16.mxu1 %v24561_v0  ;;  %9037 = vmatprep.subr.bf16.mxu0 %v24561_v0  ;;  %v15475_v27 = vpop.f32.mrb[125].mxu1 }
 0x7dd   : > { %v3732_v60 = vpop.permute.xlu0 %3731  ;;  %10751 = vmatmul.mubr.bf16.gmra.mrb[200].mxu1 %v17523_v56  ;;  %v20572_v40 = vadd.f32 %v15475_v27, %v15474_v24  ;;  %v15477_v31 = vpop.f32.mrb[126].mxu1  ;;  %v17532_v27 = vld [vmem:[%s24508_s7 + $0xf8] ss:$100 sps:$4 sm:$0xff]  }
 0x7de   : > { %v3298_v55 = vpop.permute.xlu1 %3297  ;;  %15773 = vmatmul.mubr.msk.bf16.gmra.mrb[140].mxu0 %vm1633_vm2, %v20088_v59  ;;  %10758 = vmatprep.mubr.bf16.mxu1 %v17524_v41  ;;  %v17529_v59 = vld [vmem:[%s24508_s7 + $0x34] ss:$100 sps:$4 sm:$0xff]   ;;  %v15478_v56 = vpop.f32.mrb[127].mxu1 }
 0x7df   : > { %10778 = vmatpush1.bf16.msra.mxu1 %v3728_v1  ;;  %9038 = vmatpush1.bf16.msra.mxu0 %v19899_v37  ;;  %v15480_v47 = vpop.f32.mrb[128].mxu1 }
 0x7e0   : > { %10779 = vmatprep.subr.bf16.mxu1 %v24561_v0  ;;  %9039 = vmatprep.subr.bf16.mxu0 %v24561_v0 }
 0x7e1   : > { %v3734_v4 = vpop.permute.xlu0 %3733  ;;  %9065 = vmatprep.mubr.bf16.mxu0 %v17535_v45 }
 0x7e2   : > { %v3300_v49 = vpop.permute.xlu1 %3299 }
 0x7e3   : > { %10780 = vmatpush1.bf16.msra.mxu1 %v3730_v5  ;;  %9040 = vmatpush1.bf16.msra.mxu0 %v19897_v36  ;;  %v20576_v5 = vadd.f32 %v15478_v56, %v15477_v31  ;;  %v17536_v31 = vld [vmem:[%s24508_s7 + $0x1c4] ss:$100 sps:$4 sm:$0xff]  }
 0x7e4   : > { %10781 = vmatprep.subr.bf16.mxu1 %v24561_v0  ;;  %9041 = vmatprep.subr.bf16.mxu0 %v24561_v0  ;;  %v17533_v56 = vld [vmem:[%s24508_s7] ss:$100 sps:$4 sm:$0xff]  }
 0x7e5   : > { %v3736_v63 = vpop.permute.xlu0 %3735  ;;  %10759 = vmatmul.mubr.bf16.gmra.mrb[204].mxu1 %v17526_v22 }
 0x7e6   : > { %v3302_v46 = vpop.permute.xlu1 %3301  ;;  %10799 = vmatprep.mubr.bf16.mxu1 %v17529_v59 }
 0x7e7   : > { %10782 = vmatpush1.bf16.msra.mxu1 %v3732_v60  ;;  %9042 = vmatpush1.bf16.msra.mxu0 %v3298_v55  ;;  %v15481_v60 = vpop.f32.mrb[129].mxu1 }
 0x7e8   : > { %10783 = vmatprep.subr.bf16.mxu1 %v24561_v0  ;;  %9043 = vmatprep.subr.bf16.mxu0 %v24561_v0  ;;  %v20580_v26 = vadd.f32 %v15481_v60, %v15480_v47  ;;  %v15483_v55 = vpop.f32.mrb[130].mxu1  ;;  %v17538_v47 = vld [vmem:[%s24508_s7 + $0x1c0] ss:$100 sps:$4 sm:$0xff]   ;;  %v17541_v60 = vld [vmem:[%s24508_s7 + $0xc8] ss:$100 sps:$4 sm:$0xff]  }
 0x7e9   : > { %v3738_v19 = vpop.permute.xlu0 %3737 }
 0x7ea   : > { %v3304_v25 = vpop.permute.xlu1 %3303 }
 0x7eb   : > { %10784 = vmatpush1.bf16.msra.mxu1 %v3734_v4  ;;  %9044 = vmatpush1.bf16.msra.mxu0 %v3300_v49  ;;  %v15484_v4 = vpop.f32.mrb[131].mxu1 }
 0x7ec   : > { %10785 = vmatprep.subr.bf16.mxu1 %v24561_v0  ;;  %9045 = vmatprep.subr.bf16.mxu0 %v24561_v0  ;;  %v20584_v22 = vadd.f32 %v15484_v4, %v15483_v55  ;;  %v15486_v59 = vpop.f32.mrb[132].mxu1  ;;  %v17545_v55 = vld [vmem:[%s24508_s7 + $0x194] ss:$100 sps:$4 sm:$0xff]  }
 0x7ed   : > { %v3740_v21 = vpop.permute.xlu0 %3739  ;;  %v17548_v4 = vld [vmem:[%s24508_s7 + $0x354] ss:$100 sps:$4 sm:$0xff]  }
 0x7ee   : > { %v3310_v30 = vpop.permute.xlu1 %3309 }
 0x7ef   : > { %10786 = vmatpush1.bf16.msra.mxu1 %v3736_v63  ;;  %9046 = vmatpush1.bf16.msra.mxu0 %v3302_v46  ;;  %v17527_v63 = vld [vmem:[%s24508_s7 + $0x30] ss:$100 sps:$4 sm:$0xff]   ;;  %v15487_v46 = vpop.f32.mrb[133].mxu1 }
 0x7f0   : > { %10787 = vmatprep.subr.bf16.mxu1 %v24561_v0  ;;  %9047 = vmatprep.subr.bf16.mxu0 %v24561_v0 }
 0x7f1   : > { %v3742_v43 = vpop.permute.xlu0 %3741 }
 0x7f2   : > { %v3312_v20 = vpop.permute.xlu1 %3311 }
 0x7f3   : > { %10788 = vmatpush1.bf16.msra.mxu1 %v3738_v19  ;;  %9048 = vmatpush1.bf16.msra.mxu0 %v3304_v25  ;;  %v17530_v19 = vld [vmem:[%s24508_s7 + $0xfc] ss:$100 sps:$4 sm:$0xff]   ;;  %v20594_v25 = vadd.f32 %v15487_v46, %v15486_v59 }
 0x7f4   : > { %10789 = vmatprep.subr.bf16.mxu1 %v24561_v0  ;;  %9049 = vmatprep.subr.bf16.mxu0 %v24561_v0  ;;  %v17551_v59 = vld [vmem:[%s24508_s7 + $0x25c] ss:$100 sps:$4 sm:$0xff]  }
 0x7f5   : > { %v3744_v1 = vpop.permute.xlu0 %3743 }
 0x7f6   : > { %v3314_v41 = vpop.permute.xlu1 %3313 }
 0x7f7   : > { %10790 = vmatpush1.bf16.msra.mxu1 %v3740_v21  ;;  %9050 = vmatpush1.bf16.msra.mxu0 %v3310_v30  ;;  %v15489_v21 = vpop.f32.mrb[134].mxu1 }
 0x7f8   : > { %10791 = vmatprep.subr.bf16.mxu1 %v24561_v0  ;;  %9051 = vmatprep.subr.bf16.mxu0 %v24561_v0  ;;  %v15490_v30 = vpop.f32.mrb[135].mxu1 }
 0x7f9   : > { %v3746_v18 = vpop.permute.xlu0 %3745 }
 0x7fa   : > { %v3316_v62 = vpop.permute.xlu1 %3315 }
 0x7fb   : > { %10792 = vmatpush1.bf16.msra.mxu1 %v3742_v43  ;;  %9052 = vmatpush1.bf16.msra.mxu0 %v3312_v20  ;;  %v20598_v43 = vadd.f32 %v15490_v30, %v15489_v21 }
 0x7fc   : > { %10793 = vmatprep.subr.bf16.mxu1 %v24561_v0  ;;  %9053 = vmatprep.subr.bf16.mxu0 %v24561_v0 }
 0x7fd   : > { %v3748_v49 = vpop.permute.xlu0 %3747 }
 0x7fe   : > { %v3322_v45 = vpop.permute.xlu1 %3321 }
 0x7ff   : > { %10794 = vmatpush1.bf16.msra.mxu1 %v3744_v1  ;;  %9054 = vmatpush1.bf16.msra.mxu0 %v3314_v41  ;;  %v17539_v41 = vld [vmem:[%s24508_s7 + $0xcc] ss:$100 sps:$4 sm:$0xff]  }
 0x800   : > { %10795 = vmatprep.subr.bf16.mxu1 %v24561_v0  ;;  %9055 = vmatprep.subr.bf16.mxu0 %v24561_v0 }
 0x801   : > { %v3324_v20 = vpop.permute.xlu0 %3323 }
 0x802   : > { %v3326_v24 = vpop.permute.xlu1 %3325 }
 0x803   : > { %10796 = vmatpush1.bf16.msra.mxu1 %v3746_v18  ;;  %9056 = vmatpush1.bf16.msra.mxu0 %v3316_v62  ;;  %v17542_v18 = vld [vmem:[%s24508_s7 + $0x28c] ss:$100 sps:$4 sm:$0xff]  }
 0x804   : > { %10797 = vmatprep.subr.bf16.mxu1 %v24561_v0  ;;  %9057 = vmatprep.subr.bf16.mxu0 %v24561_v0  ;;  %v17544_v62 = vld [vmem:[%s24508_s7 + $0x288] ss:$100 sps:$4 sm:$0xff]  }
 0x805   : > { %v3328_v1 = vpop.permute.xlu0 %3327 }
 0x807   : > { %10798 = vmatpush1.bf16.msra.mxu1 %v3748_v49  ;;  %9058 = vmatpush1.bf16.msra.mxu0 %v3322_v45  ;;  %v17547_v49 = vld [vmem:[%s24508_s7 + $0x190] ss:$100 sps:$4 sm:$0xff]  }
 0x808   : > { %9059 = vmatprep.subr.bf16.mxu0 %v24561_v0  ;;  %11056 = vmatprep.subr.bf16.mxu1 %v24561_v0  ;;  %v17550_v45 = vld [vmem:[%s24508_s7 + $0x350] ss:$100 sps:$4 sm:$0xff]  }
 0x80a   : > { %10800 = vmatmul.mubr.bf16.vlgmr.msra.gmra.mrb[208].mxu1 %v17527_v63  ;;  %v17554_v63 = vld [vmem:[%s24508_s7 + $0x41c] ss:$100 sps:$4 sm:$0xff]  }
 0x80b   : > { %9060 = vmatpush1.bf16.msra.mxu0 %v3324_v20  ;;  %10807 = vmatprep.mubr.bf16.mxu1 %v17530_v19  ;;  %v17553_v19 = vld [vmem:[%s24508_s7 + $0x258] ss:$100 sps:$4 sm:$0xff]   ;;  %v17557_v20 = vld [vmem:[%s24508_s7 + $0x324] ss:$100 sps:$4 sm:$0xff]  }
 0x80c   : > { %9061 = vmatprep.subr.bf16.mxu0 %v24561_v0 }
 0x80f   : > { %9062 = vmatpush1.bf16.msra.mxu0 %v3326_v24 }
 0x810   : > { %9063 = vmatprep.subr.bf16.mxu0 %v24561_v0 }
 0x812   : > { %10808 = vmatmul.mubr.bf16.gmra.mrb[212].mxu1 %v17532_v27 }
 0x813   : > { %9064 = vmatpush1.bf16.msra.mxu0 %v3328_v1  ;;  %10815 = vmatprep.mubr.bf16.mxu1 %v17536_v31 }
 0x814   : > { %9322 = vmatprep.subr.bf16.mxu0 %v24561_v0 }
 0x816   : > { %9066 = vmatmul.mubr.bf16.vlgmr.msra.gmra.mrb[144].mxu0 %v17533_v56 }
 0x817   : > { %9073 = vmatprep.mubr.bf16.mxu0 %v17539_v41  ;;  %v17556_v41 = vld [vmem:[%s24508_s7 + $0x418] ss:$100 sps:$4 sm:$0xff]  }
 0x81a   : > { %10816 = vmatmul.mubr.bf16.gmra.mrb[216].mxu1 %v17538_v47 }
 0x81b   : > { %10823 = vmatprep.mubr.bf16.mxu1 %v17542_v18  ;;  %v17560_v18 = vld [vmem:[%s24508_s7 + $0x4e4] ss:$100 sps:$4 sm:$0xff]  }
 0x81e   : > { %9074 = vmatmul.mubr.bf16.gmra.mrb[148].mxu0 %v17541_v60 }
 0x81f   : > { %9081 = vmatprep.mubr.bf16.mxu0 %v17545_v55 }
 0x822   : > { %10824 = vmatmul.mubr.bf16.gmra.mrb[220].mxu1 %v17544_v62 }
 0x823   : > { %10831 = vmatprep.mubr.bf16.mxu1 %v17548_v4 }
 0x826   : > { %9082 = vmatmul.mubr.bf16.gmra.mrb[152].mxu0 %v17547_v49 }
 0x827   : > { %9089 = vmatprep.mubr.bf16.mxu0 %v17551_v59  ;;  %v17563_v59 = vld [vmem:[%s24508_s7 + $0x3ec] ss:$100 sps:$4 sm:$0xff]  }
 0x82a   : > { %v15738_v46 = vpop.f32.mrb[96].mxu0  ;;  %10832 = vmatmul.mubr.bf16.gmra.mrb[224].mxu1 %v17550_v45 }
 0x82b   : > { %v2779_v21 = vadd.f32 %v15738_v46, %v20017_v32  ;;  %v2770_v30 = vpop.f32.mrb[97].mxu0  ;;  %10839 = vmatprep.mubr.bf16.mxu1 %v17554_v63 }
 0x82c   : > { %v2771_v24 = vadd.f32 %v2770_v30, %v20007_v14  ;;  %v15739_v27 = vpop.f32.mrb[98].mxu0 }
 0x82d   : > { %v2782_v31 = vadd.f32 %v15739_v27, %v20020_v8  ;;  %v2773_v1 = vpop.f32.mrb[99].mxu0  ;;  %v2803_v32 = vmax.f32 %v2779_v21, 0.0  ;;  %v17562_v21 = vld [vmem:[%s24508_s7 + $0x4e0] ss:$100 sps:$4 sm:$0xff]  }
 0x82e   : > { %v2774_v56 = vadd.f32 %v2773_v1, %v20010_v23  ;;  %9090 = vmatmul.mubr.bf16.gmra.mrb[156].mxu0 %v17553_v19  ;;  %v2801_v60 = vmax.f32 %v2771_v24, 0.0  ;;  %v17559_v23 = vld [vmem:[%s24508_s7 + $0x320] ss:$100 sps:$4 sm:$0xff]   ;;  %v17569_v1 = vld [vmem:[%s24508_s7 + $0x4b4] ss:$100 sps:$4 sm:$0xff]  }
 0x82f   : > { %v2804_v47 = vmax.f32 %v2782_v31, 0.0  ;;  %9097 = vmatprep.mubr.bf16.mxu0 %v17557_v20 }
 0x830   : > { %v2802_v14 = vmax.f32 %v2774_v56, 0.0  ;;  %v17568_v56 = vld [vmem:[%s24508_s7 + $0x5a8] ss:$100 sps:$4 sm:$0xff]  }
 0x831   : > { %v20661_v55 = vpack.c.bf16 %v2804_v47, %v2803_v32  ;;  %v17571_v32 = vld [vmem:[%s24508_s7 + $0x4b0] ss:$100 sps:$4 sm:$0xff]   ;;  %v17575_v47 = vld [vmem:[%s24508_s7 + $0x57c] ss:$100 sps:$4 sm:$0xff]  }
 0x832   : > { %v20663_v8 = vpack.c.bf16 %v2802_v14, %v2801_v60  ;;  %v15742_v62 = vpop.f32.mrb[100].mxu0  ;;  %10840 = vmatmul.mubr.bf16.gmra.mrb[228].mxu1 %v17556_v41  ;;  %v17572_v41 = vld [vmem:[%s24508_s7 + $0x674] ss:$100 sps:$4 sm:$0xff]   ;;  %v17578_v60 = vld [vmem:[%s24508_s7 + $0x73c] ss:$100 sps:$4 sm:$0xff]  }
 0x833   : > { %v2795_v4 = vadd.f32 %v15742_v62, %v20035_v6  ;;  %v2786_v49 = vpop.f32.mrb[101].mxu0  ;;  %3543 = vrot.lane.b32.xlu0 %v20661_v55, %s18816_s14  ;;  %10847 = vmatprep.mubr.bf16.mxu1 %v17560_v18  ;;  %v17574_v18 = vld [vmem:[%s24508_s7 + $0x670] ss:$100 sps:$4 sm:$0xff]   ;;  %v17577_v62 = vld [vmem:[%s24508_s7 + $0x578] ss:$100 sps:$4 sm:$0xff]  }
 0x834   : > { %v2787_v45 = vadd.f32 %v2786_v49, %v20029_v58  ;;  %v15743_v63 = vpop.f32.mrb[102].mxu0  ;;  %3541 = vrot.lane.b32.xlu1 %v20663_v8, %s18816_s14  ;;  %v17566_v58 = vld [vmem:[%s24508_s7 + $0x5ac] ss:$100 sps:$4 sm:$0xff]   ;;  %v2881_v49 = vadd.f32 %v20040_v38, %v19725_v3  ;;  %v17584_v38 = vld [vmem:[%s24508_s7 + $0x804] ss:$100 sps:$4 sm:$0xff]  }
 0x835   : > { %v2798_v46 = vadd.f32 %v15743_v63, %v20038_v11  ;;  %v2789_v19 = vpop.f32.mrb[103].mxu0  ;;  %v2807_v30 = vmax.f32 %v2795_v4, 0.0  ;;  %v17581_v4 = vld [vmem:[%s24508_s7 + $0x644] ss:$100 sps:$4 sm:$0xff]  }
 0x836   : > { %v2790_v6 = vadd.f32 %v2789_v19, %v20032_v34  ;;  %9098 = vmatmul.mubr.bf16.gmra.mrb[160].mxu0 %v17559_v23  ;;  %v2805_v24 = vmax.f32 %v2787_v45, 0.0  ;;  %v17565_v34 = vld [vmem:[%s24508_s7 + $0x3e8] ss:$100 sps:$4 sm:$0xff]  }
 0x837   : > { %v2808_v20 = vmax.f32 %v2798_v46, 0.0  ;;  %9105 = vmatprep.mubr.bf16.mxu0 %v17563_v59  ;;  %v2884_v46 = vadd.f32 %v20042_v16, %v19721_v2 }
 0x838   : > { %v2806_v27 = vmax.f32 %v2790_v6, 0.0 }
 0x839   : > { %v20685_v31 = vpack.c.bf16 %v2808_v20, %v2807_v30 }
 0x83a   : > { %v20687_v11 = vpack.c.bf16 %v2806_v27, %v2805_v24  ;;  %10848 = vmatmul.mubr.bf16.gmra.mrb[232].mxu1 %v17562_v21  ;;  %v17580_v21 = vld [vmem:[%s24508_s7 + $0x738] ss:$100 sps:$4 sm:$0xff]   ;;  %v17583_v24 = vld [vmem:[%s24508_s7 + $0x640] ss:$100 sps:$4 sm:$0xff]  }
 0x83b   : > { %3547 = vrot.lane.b32.xlu0 %v20685_v31, %s18816_s14  ;;  %10855 = vmatprep.mubr.bf16.mxu1 %v17566_v58 }
 0x83c   : > { %3545 = vrot.lane.b32.xlu1 %v20687_v11, %s18816_s14 }
 0x83e   : > { %9106 = vmatmul.mubr.bf16.gmra.mrb[164].mxu0 %v17565_v34  ;;  %v17587_v34 = vld [vmem:[%s24508_s7 + $0x70c] ss:$100 sps:$4 sm:$0xff]  }
 0x83f   : > { %3551 = vrot.lane.b32.xlu0 %v20661_v55, %s24545_s25  ;;  %9113 = vmatprep.mubr.bf16.mxu0 %v17569_v1 }
 0x840   : > { %3549 = vrot.lane.b32.xlu1 %v20663_v8, %s24545_s25 }
 0x842   : > { %10856 = vmatmul.mubr.bf16.gmra.mrb[236].mxu1 %v17568_v56 }
 0x843   : > { %3555 = vrot.lane.b32.xlu0 %v20685_v31, %s24545_s25  ;;  %10863 = vmatprep.mubr.bf16.mxu1 %v17572_v41 }
 0x844   : > { %3553 = vrot.lane.b32.xlu1 %v20687_v11, %s24545_s25 }
 0x846   : > { %9114 = vmatmul.mubr.bf16.gmra.mrb[168].mxu0 %v17571_v32 }
 0x847   : > { %3559 = vrot.lane.b32.xlu0 %v20661_v55, %s18813_s21  ;;  %9121 = vmatprep.mubr.bf16.mxu0 %v17575_v47  ;;  %v2892_v47 = vadd.f32 %v20046_v42, %v19757_v9 }
 0x848   : > { %3557 = vrot.lane.b32.xlu1 %v20663_v8, %s18813_s21 }
 0x84a   : > { %v15380_v14 = vpop.f32.mrb[104].mxu0  ;;  %10864 = vmatmul.mubr.bf16.gmra.mrb[240].mxu1 %v17574_v18 }
 0x84b   : > { %v15381_v23 = vpop.f32.mrb[105].mxu0  ;;  %10871 = vmatprep.mubr.bf16.mxu1 %v17578_v60 }
 0x84c   : > { %v15382_v59 = vadd.f32 %v15381_v23, %v15380_v14  ;;  %v15383_v45 = vpop.f32.mrb[106].mxu0  ;;  %3561 = vrot.lane.b32.xlu1 %v20687_v11, %s18813_s21 }
 0x84d   : > { %v15384_v63 = vpop.f32.mrb[107].mxu0 }
 0x84e   : > { %v15385_v19 = vadd.f32 %v15384_v63, %v15383_v45  ;;  %v2946_v6 = vadd.f32 %v15382_v59, %v2881_v49  ;;  %9122 = vmatmul.mubr.bf16.gmra.mrb[172].mxu0 %v17577_v62  ;;  %v17586_v62 = vld [vmem:[%s24508_s7 + $0x800] ss:$100 sps:$4 sm:$0xff]   ;;  %v17589_v59 = vld [vmem:[%s24508_s7 + $0x708] ss:$100 sps:$4 sm:$0xff]   ;;  %v17593_v63 = vld [vmem:[%s24508_s7 + $0x7d4] ss:$100 sps:$4 sm:$0xff]  }
 0x84f   : > { %9129 = vmatprep.mubr.bf16.mxu0 %v17581_v4 }
 0x850   : > { %v3011_v30 = vadd.f32 %v20491_v50, %v2946_v6  ;;  %3563 = vrot.lane.b32.xlu1 %v20685_v31, %s18813_s21  ;;  %v2949_v20 = vadd.f32 %v15385_v19, %v2884_v46  ;;  %v2889_v50 = vadd.f32 %v20044_v33, %v19746_v7  ;;  %v17590_v33 = vld [vmem:[%s24508_s7 + $0x8cc] ss:$100 sps:$4 sm:$0xff]   ;;  %v2897_v46 = vadd.f32 %v20048_v35, %v19760_v10  ;;  %v17598_v35 = vld [vmem:[%s24508_s7 + $0x994] ss:$100 sps:$4 sm:$0xff]  }
 0x852   : > { %v3014_v16 = vadd.f32 %v20495_v52, %v2949_v20  ;;  %v15386_v58 = vpop.f32.mrb[108].mxu0  ;;  %10872 = vmatmul.mubr.bf16.gmra.mrb[244].mxu1 %v17580_v21  ;;  %v3041_v1 = vmax.f32 %v3011_v30, 0.0  ;;  %v24575_v30 = vld [vmem:[#allocation15_spill] sm:$0xff] }
 0x853   : > { %v15387_v27 = vpop.f32.mrb[109].mxu0  ;;  %10879 = vmatprep.mubr.bf16.mxu1 %v17584_v38  ;;  %v24574_v38 = vld [vmem:[#allocation4_spill] sm:$0xff] }
 0x854   : > { %v3042_v56 = vmax.f32 %v3014_v16, 0.0  ;;  %v15388_v41 = vadd.f32 %v15387_v27, %v15386_v58  ;;  %v15389_v32 = vpop.f32.mrb[110].mxu0  ;;  %v2900_v20 = vadd.f32 %v24575_v30, %v24574_v38  ;;  %v17592_v27 = vld [vmem:[%s24508_s7 + $0x8c8] ss:$100 sps:$4 sm:$0xff]   ;;  %v17601_v30 = vld [vmem:[%s24508_s7 + $0x898] ss:$100 sps:$4 sm:$0xff]  }
 0x855   : > { %v15390_v52 = vpop.f32.mrb[111].mxu0 }
 0x856   : > { %v20761_v18 = vpack.c.bf16 %v3042_v56, %v3041_v1  ;;  %v2954_v60 = vadd.f32 %v15388_v41, %v2889_v50  ;;  %v15391_v14 = vadd.f32 %v15390_v52, %v15389_v32  ;;  %9130 = vmatmul.mubr.bf16.gmra.mrb[176].mxu0 %v17583_v24  ;;  %v17595_v41 = vld [vmem:[%s24508_s7 + $0x7d0] ss:$100 sps:$4 sm:$0xff]   ;;  %v17599_v52 = vld [vmem:[%s24508_s7 + $0x89c] ss:$100 sps:$4 sm:$0xff]  }
 0x857   : > { %9137 = vmatprep.mubr.bf16.mxu0 %v17587_v34 }
 0x858   : > { %v3019_v23 = vadd.f32 %v20489_v13, %v2954_v60  ;;  %v2957_v4 = vadd.f32 %v15391_v14, %v2892_v47  ;;  %v24576_v47 = vld [vmem:[#allocation5_spill] sm:$0xff]  ;;  %v24577_v60 = vld [vmem:[#allocation16_spill] sm:$0xff] }
 0x859   : > { %v2905_v14 = vadd.f32 %v24577_v60, %v24576_v47 }
 0x85a   : > { %v3022_v49 = vadd.f32 %v20493_v17, %v2957_v4  ;;  %v15392_v42 = vpop.f32.mrb[112].mxu0  ;;  %10880 = vmatmul.mubr.bf16.gmra.mrb[248].mxu1 %v17586_v62  ;;  %v3043_v19 = vmax.f32 %v3019_v23, 0.0  ;;  %v24578_v4 = vld [vmem:[#allocation6_spill] sm:$0xff] }
 0x85b   : > { %v15393_v45 = vpop.f32.mrb[113].mxu0  ;;  %10887 = vmatprep.mubr.bf16.mxu1 %v17590_v33 }
 0x85c   : > { %v3044_v13 = vmax.f32 %v3022_v49, 0.0  ;;  %v15394_v6 = vadd.f32 %v15393_v45, %v15392_v42  ;;  %v15395_v21 = vpop.f32.mrb[114].mxu0  ;;  %v24579_v49 = vld [vmem:[#allocation17_spill] sm:$0xff] }
 0x85d   : > { %v15396_v17 = vpop.f32.mrb[115].mxu0  ;;  %v2908_v42 = vadd.f32 %v24579_v49, %v24578_v4  ;;  %v17614_v49 = vld [vmem:[%s24508_s7 + $0xbec] ss:$100 sps:$4 sm:$0xff]  }
 0x85e   : > { %v20781_v16 = vpack.c.bf16 %v3044_v13, %v3043_v19  ;;  %v15397_v58 = vadd.f32 %v15396_v17, %v15395_v21  ;;  %v2962_v24 = vadd.f32 %v15394_v6, %v2897_v46  ;;  %9138 = vmatmul.mubr.bf16.gmra.mrb[180].mxu0 %v17589_v59  ;;  %v17596_v46 = vld [vmem:[%s24508_s7 + $0x990] ss:$100 sps:$4 sm:$0xff]   ;;  %v17604_v19 = vld [vmem:[%s24508_s7 + $0xa5c] ss:$100 sps:$4 sm:$0xff]  }
 0x85f   : > { %9145 = vmatprep.mubr.bf16.mxu0 %v17593_v63 }
 0x860   : > { %v3027_v34 = vadd.f32 %v20521_v29, %v2962_v24  ;;  %v2965_v50 = vadd.f32 %v15397_v58, %v2900_v20  ;;  %v17605_v58 = vld [vmem:[%s24508_s7 + $0x964] ss:$100 sps:$4 sm:$0xff]  }
 0x862   : > { %v3030_v1 = vadd.f32 %v20527_v61, %v2965_v50  ;;  %v15398_v56 = vpop.f32.mrb[116].mxu0  ;;  %10888 = vmatmul.mubr.bf16.gmra.mrb[252].mxu1 %v17592_v27  ;;  %v3045_v62 = vmax.f32 %v3027_v34, 0.0 }
 0x863   : > { %v15399_v32 = vpop.f32.mrb[117].mxu0  ;;  %10895 = vmatprep.mubr.bf16.mxu1 %v17598_v35 }
 0x864   : > { %v3046_v29 = vmax.f32 %v3030_v1, 0.0  ;;  %v15400_v33 = vadd.f32 %v15399_v32, %v15398_v56  ;;  %v15401_v23 = vpop.f32.mrb[118].mxu0  ;;  %v17602_v56 = vld [vmem:[%s24508_s7 + $0xa58] ss:$100 sps:$4 sm:$0xff]  }
 0x865   : > { %v15402_v61 = vpop.f32.mrb[119].mxu0 }
 0x866   : > { %v20801_v59 = vpack.c.bf16 %v3046_v29, %v3045_v62  ;;  %v2970_v45 = vadd.f32 %v15400_v33, %v2905_v14  ;;  %v15403_v63 = vadd.f32 %v15402_v61, %v15401_v23  ;;  %9146 = vmatmul.mubr.bf16.gmra.mrb[184].mxu0 %v17595_v41  ;;  %v17608_v41 = vld [vmem:[%s24508_s7 + $0xb24] ss:$100 sps:$4 sm:$0xff]   ;;  %v17611_v29 = vld [vmem:[%s24508_s7 + $0xa2c] ss:$100 sps:$4 sm:$0xff]  }
 0x867   : > { %9153 = vmatprep.mubr.bf16.mxu0 %v17599_v52 }
 0x868   : > { %v3035_v13 = vadd.f32 %v20517_v39, %v2970_v45  ;;  %v2973_v6 = vadd.f32 %v15403_v63, %v2908_v42 }
 0x86a   : > { %v3038_v21 = vadd.f32 %v20523_v53, %v2973_v6  ;;  %v15428_v17 = vpop.f32.mrb[120].mxu0  ;;  %10896 = vmatmul.mubr.bf16.gmra.mrb[0].mxu1 %v17596_v46  ;;  %v3047_v24 = vmax.f32 %v3035_v13, 0.0  ;;  %v17617_v13 = vld [vmem:[%s24508_s7 + $0xaf4] ss:$100 sps:$4 sm:$0xff]  }
 0x86b   : > { %v15429_v20 = vpop.f32.mrb[121].mxu0  ;;  %10903 = vmatprep.mubr.bf16.mxu1 %v17604_v19 }
 0x86c   : > { %v3048_v27 = vmax.f32 %v3038_v21, 0.0  ;;  %v15430_v35 = vadd.f32 %v15429_v20, %v15428_v17  ;;  %v15431_v34 = vpop.f32.mrb[122].mxu0 }
 0x86d   : > { %v15432_v39 = vpop.f32.mrb[123].mxu0 }
 0x86e   : > { %v20817_v50 = vpack.c.bf16 %v3048_v27, %v3047_v24  ;;  %v15433_v53 = vadd.f32 %v15432_v39, %v15431_v34  ;;  %v3121_v1 = vadd.f32 %v15430_v35, %v19725_v3  ;;  %9154 = vmatmul.mubr.bf16.gmra.mrb[188].mxu0 %v17601_v30  ;;  %v17607_v3 = vld [vmem:[%s24508_s7 + $0x960] ss:$100 sps:$4 sm:$0xff]   ;;  %v17620_v30 = vld [vmem:[%s24508_s7 + $0xcb4] ss:$100 sps:$4 sm:$0xff]  }
 0x86f   : > { %9161 = vmatprep.mubr.bf16.mxu0 %v17605_v58  ;;  %v17623_v34 = vld [vmem:[%s24508_s7 + $0xbbc] ss:$100 sps:$4 sm:$0xff]  }
 0x870   : > { %v20827_v32 = vadd.f32 %v20546_v44, %v3121_v1  ;;  %v3124_v52 = vadd.f32 %v15433_v53, %v19721_v2 }
 0x872   : > { %v20831_v60 = vadd.f32 %v20548_v12, %v3124_v52  ;;  %v15434_v14 = vpop.f32.mrb[124].mxu0  ;;  %10904 = vmatmul.mubr.bf16.gmra.mrb[4].mxu1 %v17602_v56  ;;  %v17610_v12 = vld [vmem:[%s24508_s7 + $0xb20] ss:$100 sps:$4 sm:$0xff]  }
 0x873   : > { %v15435_v62 = vpop.f32.mrb[125].mxu0  ;;  %10911 = vmatprep.mubr.bf16.mxu1 %v17608_v41  ;;  %v17626_v56 = vld [vmem:[%s24508_s7 + $0xd7c] ss:$100 sps:$4 sm:$0xff]  }
 0x874   : > { %v15436_v33 = vadd.f32 %v15435_v62, %v15434_v14  ;;  %v15437_v44 = vpop.f32.mrb[126].mxu0  ;;  %v17635_v62 = vld [vmem:[%s24508_s7 + $0xd4c] ss:$100 sps:$4 sm:$0xff]  }
 0x875   : > { %v15438_v23 = vpop.f32.mrb[127].mxu0 }
 0x876   : > { %v15439_v61 = vadd.f32 %v15438_v23, %v15437_v44  ;;  %v3129_v2 = vadd.f32 %v15436_v33, %v19746_v7  ;;  %9162 = vmatmul.mubr.bf16.gmra.mrb[192].mxu0 %v17607_v3  ;;  %v17613_v7 = vld [vmem:[%s24508_s7 + $0xa28] ss:$100 sps:$4 sm:$0xff]   ;;  %v17641_v23 = vld [vmem:[%s24508_s7 + $0xe14] ss:$100 sps:$4 sm:$0xff]  }
 0x877   : > { %9169 = vmatprep.mubr.bf16.mxu0 %v17611_v29  ;;  %v17629_v3 = vld [vmem:[%s24508_s7 + $0xc84] ss:$100 sps:$4 sm:$0xff]   ;;  %v17638_v33 = vld [vmem:[%s24508_s7 + $0xf0c] ss:$100 sps:$4 sm:$0xff]  }
 0x878   : > { %v20847_v42 = vadd.f32 %v20572_v40, %v3129_v2  ;;  %v3132_v45 = vadd.f32 %v15439_v61, %v19757_v9  ;;  %v17634_v29 = vld [vmem:[%s24508_s7 + $0xe40] ss:$100 sps:$4 sm:$0xff]   ;;  %v17637_v44 = vld [vmem:[%s24508_s7 + $0xd48] ss:$100 sps:$4 sm:$0xff]   ;;  %v17644_v2 = vld [vmem:[%s24508_s7 + $0xfd4] ss:$100 sps:$4 sm:$0xff]  }
 0x879   : > { %v17640_v61 = vld [vmem:[%s24508_s7 + $0xf08] ss:$100 sps:$4 sm:$0xff]  }
 0x87a   : > { %v20851_v63 = vadd.f32 %v20576_v5, %v3132_v45  ;;  %v15440_v46 = vpop.f32.mrb[128].mxu0  ;;  %10912 = vmatmul.mubr.bf16.gmra.mrb[136].mxu1 %v17610_v12  ;;  %v17616_v5 = vld [vmem:[%s24508_s7 + $0xbe8] ss:$100 sps:$4 sm:$0xff]   ;;  %v17643_v12 = vld [vmem:[%s24508_s7 + $0xe10] ss:$100 sps:$4 sm:$0xff]  }
 0x87b   : > { %v15441_v19 = vpop.f32.mrb[129].mxu0  ;;  %10919 = vmatprep.mubr.bf16.mxu1 %v17614_v49  ;;  %v17647_v49 = vld [vmem:[%s24508_s7 + $0xedc] ss:$100 sps:$4 sm:$0xff]  }
 0x87c   : > { %v15442_v6 = vadd.f32 %v15441_v19, %v15440_v46  ;;  %v15443_v40 = vpop.f32.mrb[130].mxu0  ;;  %v17646_v46 = vld [vmem:[%s24508_s7 + $0xfd0] ss:$100 sps:$4 sm:$0xff]  }
 0x87d   : > { %v15444_v21 = vpop.f32.mrb[131].mxu0 }
 0x87e   : > { %v15445_v17 = vadd.f32 %v15444_v21, %v15443_v40  ;;  %v3137_v9 = vadd.f32 %v15442_v6, %v19760_v10  ;;  %9170 = vmatmul.mubr.bf16.gmra.mrb[196].mxu0 %v17613_v7  ;;  %v17619_v10 = vld [vmem:[%s24508_s7 + $0xaf0] ss:$100 sps:$4 sm:$0xff]   ;;  %v17650_v7 = vld [vmem:[%s24508_s7 + $0x109c] ss:$100 sps:$4 sm:$0xff]  }
 0x87f   : > { %9177 = vmatprep.mubr.bf16.mxu0 %v17617_v13  ;;  %v17649_v21 = vld [vmem:[%s24508_s7 + $0xed8] ss:$100 sps:$4 sm:$0xff]  }
 0x880   : > { %v20867_v20 = vadd.f32 %v20580_v26, %v3137_v9  ;;  %v3140_v58 = vadd.f32 %v15445_v17, %v24574_v38 }
 0x882   : > { %v20871_v24 = vadd.f32 %v20584_v22, %v3140_v58  ;;  %v15446_v27 = vpop.f32.mrb[132].mxu0  ;;  %10920 = vmatmul.mubr.bf16.gmra.mrb[140].mxu1 %v17616_v5  ;;  %v17622_v22 = vld [vmem:[%s24508_s7 + $0xcb0] ss:$100 sps:$4 sm:$0xff]   ;;  %v17653_v58 = vld [vmem:[%s24508_s7 + $0xfa4] ss:$100 sps:$4 sm:$0xff]  }
 0x883   : > { %v15447_v35 = vpop.f32.mrb[133].mxu0  ;;  %10927 = vmatprep.mubr.bf16.mxu1 %v17620_v30 }
 0x884   : > { %v15448_v39 = vadd.f32 %v15447_v35, %v15446_v27  ;;  %v15449_v26 = vpop.f32.mrb[134].mxu0 }
 0x885   : > { %v15450_v53 = vpop.f32.mrb[135].mxu0 }
 0x886   : > { %v15451_v1 = vadd.f32 %v15450_v53, %v15449_v26  ;;  %v3145_v38 = vadd.f32 %v15448_v39, %v24576_v47  ;;  %9178 = vmatmul.mubr.bf16.gmra.mrb[200].mxu0 %v17619_v10  ;;  %v17625_v47 = vld [vmem:[%s24508_s7 + $0xbb8] ss:$100 sps:$4 sm:$0xff]  }
 0x887   : > { %9185 = vmatprep.mubr.bf16.mxu0 %v17623_v34 }
 0x888   : > { %v20887_v41 = vadd.f32 %v20594_v25, %v3145_v38  ;;  %v3148_v52 = vadd.f32 %v15451_v1, %v24578_v4  ;;  %v17628_v25 = vld [vmem:[%s24508_s7 + $0xd78] ss:$100 sps:$4 sm:$0xff]   ;;  %v17631_v4 = vld [vmem:[%s24508_s7 + $0xc80] ss:$100 sps:$4 sm:$0xff]  }
 0x88a   : > { %v20891_v14 = vadd.f32 %v20598_v43, %v3148_v52  ;;  %10928 = vmatmul.mubr.bf16.gmra.mrb[144].mxu1 %v17622_v22  ;;  %v17632_v43 = vld [vmem:[%s24508_s7 + $0xe44] ss:$100 sps:$4 sm:$0xff]  }
 0x88b   : > { %10935 = vmatprep.mubr.bf16.mxu1 %v17626_v56  ;;  %v17655_v52 = vld [vmem:[%s24508_s7 + $0xfa0] ss:$100 sps:$4 sm:$0xff]  }
 0x88e   : > { %9186 = vmatmul.mubr.bf16.gmra.mrb[204].mxu0 %v17625_v47 }
 0x88f   : > { %9193 = vmatprep.mubr.bf16.mxu0 %v17629_v3 }
 0x892   : > { %10936 = vmatmul.mubr.bf16.gmra.mrb[148].mxu1 %v17628_v25 }
 0x893   : > { %10943 = vmatprep.mubr.bf16.mxu1 %v17632_v43 }
 0x896   : > { %9194 = vmatmul.mubr.bf16.gmra.mrb[208].mxu0 %v17631_v4 }
 0x897   : > { %9201 = vmatprep.mubr.bf16.mxu0 %v17635_v62 }
 0x89a   : > { %10944 = vmatmul.mubr.bf16.gmra.mrb[152].mxu1 %v17634_v29 }
 0x89b   : > { %10951 = vmatprep.mubr.bf16.mxu1 %v17638_v33 }
 0x89e   : > { %9202 = vmatmul.mubr.bf16.gmra.mrb[212].mxu0 %v17637_v44 }
 0x89f   : > { %9209 = vmatprep.mubr.bf16.mxu0 %v17641_v23 }
 0x8a2   : > { %10952 = vmatmul.mubr.bf16.gmra.mrb[156].mxu1 %v17640_v61 }
 0x8a3   : > { %10959 = vmatprep.mubr.bf16.mxu1 %v17644_v2 }
 0x8a5   : > { %v3544_v19 = vpop.permute.xlu0 %3543 }
 0x8a6   : > { %v3542_v45 = vpop.permute.xlu1 %3541  ;;  %9210 = vmatmul.mubr.bf16.gmra.mrb[216].mxu0 %v17643_v12  ;;  %v17661_v12 = vld [vmem:[%s24508_s7 + $0x1068] ss:$100 sps:$4 sm:$0xff]  }
 0x8a7   : > { %3749 = vrot.lane.b32.xlu0 %v3542_v45, %s18812_s22  ;;  %9217 = vmatprep.mubr.bf16.mxu0 %v17647_v49  ;;  %v17665_v49 = vld [vmem:[%s24508_s7 + $0x1134] ss:$100 sps:$4 sm:$0xff]  }
 0x8a9   : > { %v15770_v13 = vpop.f32.mrb[136].mxu0 }
 0x8aa   : > { %v3259_v6 = vadd.f32 %v15770_v13, %v20847_v42  ;;  %v3250_v40 = vpop.f32.mrb[137].mxu0  ;;  %10960 = vmatmul.mubr.bf16.gmra.mrb[160].mxu1 %v17646_v46  ;;  %v17664_v46 = vld [vmem:[%s24508_s7 + $0x1228] ss:$100 sps:$4 sm:$0xff]   ;;  %v17671_v13 = vld [vmem:[%s24508_s7 + $0x11fc] ss:$100 sps:$4 sm:$0xff]  }
 0x8ab   : > { %v3251_v17 = vadd.f32 %v3250_v40, %v20827_v32  ;;  %v15771_v9 = vpop.f32.mrb[138].mxu0  ;;  %3751 = vrot.lane.b32.xlu0 %v3544_v19, %s18812_s22  ;;  %10967 = vmatprep.mubr.bf16.mxu1 %v17650_v7  ;;  %v17652_v32 = vld [vmem:[%s24508_s7 + $0x1098] ss:$100 sps:$4 sm:$0xff]   ;;  %v17667_v19 = vld [vmem:[%s24508_s7 + $0x1130] ss:$100 sps:$4 sm:$0xff]  }
 0x8ac   : > { %v3262_v5 = vadd.f32 %v15771_v9, %v20851_v63  ;;  %v3253_v30 = vpop.f32.mrb[139].mxu0  ;;  %v3283_v10 = vmax.f32 %v3259_v6, 0.0  ;;  %v17668_v7 = vld [vmem:[%s24508_s7 + $0x12f4] ss:$100 sps:$4 sm:$0xff]   ;;  %v17674_v40 = vld [vmem:[%s24508_s7 + $0x13bc] ss:$100 sps:$4 sm:$0xff]  }
 0x8ad   : > { %v3254_v42 = vadd.f32 %v3253_v30, %v20831_v60  ;;  %v3548_v27 = vpop.permute.xlu0 %3547  ;;  %v3281_v39 = vmax.f32 %v3251_v17, 0.0  ;;  %v17656_v60 = vld [vmem:[%s24508_s7 + $0x1164] ss:$100 sps:$4 sm:$0xff]   ;;  %v17670_v6 = vld [vmem:[%s24508_s7 + $0x12f0] ss:$100 sps:$4 sm:$0xff]  }
 0x8ae   : > { %v3284_v35 = vmax.f32 %v3262_v5, 0.0  ;;  %v3546_v34 = vpop.permute.xlu1 %3545  ;;  %9218 = vmatmul.mubr.bf16.gmra.mrb[220].mxu0 %v17649_v21  ;;  %v17673_v21 = vld [vmem:[%s24508_s7 + $0x11f8] ss:$100 sps:$4 sm:$0xff]   ;;  %v17677_v17 = vld [vmem:[%s24508_s7 + $0x12c4] ss:$100 sps:$4 sm:$0xff]  }
 0x8af   : > { %v3282_v26 = vmax.f32 %v3254_v42, 0.0  ;;  %3753 = vrot.lane.b32.xlu1 %v3546_v34, %s18812_s22  ;;  %3755 = vrot.lane.b32.xlu0 %v3548_v27, %s18812_s22  ;;  %v17676_v9 = vld [vmem:[%s24508_s7 + $0x13b8] ss:$100 sps:$4 sm:$0xff]   ;;  %v17680_v5 = vld [vmem:[%s24508_s7 + $0x1484] ss:$100 sps:$4 sm:$0xff]  }
 0x8b0   : > { %v20958_v63 = vpack.c.bf16 %v3284_v35, %v3283_v10  ;;  %9225 = vmatprep.mubr.bf16.mxu0 %v17653_v58  ;;  %v17679_v58 = vld [vmem:[%s24508_s7 + $0x12c0] ss:$100 sps:$4 sm:$0xff]   ;;  %v17683_v42 = vld [vmem:[%s24508_s7 + $0x138c] ss:$100 sps:$4 sm:$0xff]  }
 0x8b1   : > { %v20963_v53 = vpack.c.bf16 %v3282_v26, %v3281_v39  ;;  %v15774_v1 = vpop.f32.mrb[140].mxu0  ;;  %v3552_v29 = vpop.permute.xlu0 %3551  ;;  %v17682_v10 = vld [vmem:[%s24508_s7 + $0x1480] ss:$100 sps:$4 sm:$0xff]   ;;  %v17685_v34 = vld [vmem:[%s24508_s7 + $0x1388] ss:$100 sps:$4 sm:$0xff]  }
 0x8b2   : > { %v3275_v38 = vadd.f32 %v15774_v1, %v20887_v41  ;;  %v3550_v22 = vpop.permute.xlu1 %3549  ;;  %v3266_v56 = vpop.f32.mrb[141].mxu0  ;;  %10968 = vmatmul.mubr.bf16.gmra.mrb[164].mxu1 %v17652_v32  ;;  %v17659_v41 = vld [vmem:[%s24508_s7 + $0x106c] ss:$100 sps:$4 sm:$0xff]   ;;  %v17698_v1 = vld [vmem:[%s24508_s7 + $0x16dc] ss:$100 sps:$4 sm:$0xff]  }
 0x8b3   : > { %v3267_v47 = vadd.f32 %v3266_v56, %v20867_v20  ;;  %3333 = vrot.lane.b32.xlu1 %v19892_v15, %s18815_s26  ;;  %v15775_v3 = vpop.f32.mrb[142].mxu0  ;;  %3757 = vrot.lane.b32.xlu0 %v3550_v22, %s18812_s22  ;;  %v17658_v20 = vld [vmem:[%s24508_s7 + $0x1160] ss:$100 sps:$4 sm:$0xff]   ;;  %v17688_v39 = vld [vmem:[%s24508_s7 + $0x1548] ss:$100 sps:$4 sm:$0xff]  }
 0x8b4   : > { %v3278_v25 = vadd.f32 %v15775_v3, %v20891_v14  ;;  %v3269_v43 = vpop.f32.mrb[143].mxu0  ;;  %10975 = vmatprep.mubr.bf16.mxu1 %v17656_v60  ;;  %v3287_v62 = vmax.f32 %v3275_v38, 0.0  ;;  %v17691_v26 = vld [vmem:[%s24508_s7 + $0x1450] ss:$100 sps:$4 sm:$0xff]   ;;  %v17697_v38 = vld [vmem:[%s24508_s7 + $0x1518] ss:$100 sps:$4 sm:$0xff]  }
 0x8b5   : > { %v3270_v4 = vadd.f32 %v3269_v43, %v20871_v24  ;;  %v3285_v44 = vmax.f32 %v3267_v47, 0.0  ;;  %v17662_v24 = vld [vmem:[%s24508_s7 + $0x122c] ss:$100 sps:$4 sm:$0xff]   ;;  %v3556_v45 = vpop.permute.xlu0 %3555  ;;  %v17700_v22 = vld [vmem:[%s24508_s7 + $0x16d8] ss:$100 sps:$4 sm:$0xff]   ;;  %v24581_v47 = vld [vmem:[#allocation8_spill] sm:$0xff] }
 0x8b6   : > { %v3288_v33 = vmax.f32 %v3278_v25, 0.0  ;;  %9226 = vmatmul.mubr.bf16.gmra.mrb[224].mxu0 %v17655_v52  ;;  %v3554_v2 = vpop.permute.xlu1 %3553  ;;  %v17694_v60 = vld [vmem:[%s24508_s7 + $0x1610] ss:$100 sps:$4 sm:$0xff]   ;;  %v17701_v56 = vld [vmem:[%s24508_s7 + $0x15e0] ss:$100 sps:$4 sm:$0xff]   ;;  %v24580_v52 = vld [vmem:[#allocation7_spill] sm:$0xff] }
 0x8b7   : > { %v3286_v23 = vmax.f32 %v3270_v4, 0.0  ;;  %3335 = vrot.lane.b32.xlu1 %v19890_v51, %s18815_s26  ;;  %3759 = vrot.lane.b32.xlu0 %v3552_v29, %s18812_s22  ;;  %v17710_v3 = vld [vmem:[%s24508_s7 + $0x186c] ss:$100 sps:$4 sm:$0xff]   ;;  %v17718_v29 = vld [vmem:[%s24508_s7 + $0x3c] ss:$100 sps:$4 sm:$0xff]  }
 0x8b8   : > { %v20984_v14 = vpack.c.bf16 %v3288_v33, %v3287_v62  ;;  %9233 = vmatprep.mubr.bf16.mxu0 %v17659_v41  ;;  %v17707_v25 = vld [vmem:[%s24508_s7 + $0x16a8] ss:$100 sps:$4 sm:$0xff]   ;;  %v17715_v41 = vld [vmem:[%s24508_s7 + $0x1774] ss:$100 sps:$4 sm:$0xff]  }
 0x8b9   : > { %v20989_v61 = vpack.c.bf16 %v3286_v23, %v3285_v44  ;;  %v3560_v27 = vpop.permute.xlu0 %3559  ;;  %v24582_v43 = vld [vmem:[#allocation9_spill] sm:$0xff]  ;;  %v24583_v62 = vld [vmem:[#allocation10_spill] sm:$0xff]  ;;  %v17719_v44 = vld [vmem:[%s24508_s7 + $0x1838] ss:$100 sps:$4 sm:$0xff]  }
 0x8ba   : > { %10976 = vmatmul.mubr.bf16.gmra.mrb[168].mxu1 %v17658_v20  ;;  %v3558_v30 = vpop.permute.xlu1 %3557  ;;  %v17712_v4 = vld [vmem:[%s24508_s7 + $0x1868] ss:$100 sps:$4 sm:$0xff]   ;;  %v17713_v33 = vld [vmem:[%s24508_s7 + $0x1770] ss:$100 sps:$4 sm:$0xff]   ;;  %v17721_v20 = vld [vmem:[%s24508_s7 + $0x183c] ss:$100 sps:$4 sm:$0xff]  }
 0x8bb   : > { %3337 = vrot.lane.b32.xlu1 %v19899_v37, %s18815_s26  ;;  %3761 = vrot.lane.b32.xlu0 %v3554_v2, %s18812_s22  ;;  %v17727_v23 = vld [vmem:[%s24508_s7 + $0xc] ss:$100 sps:$4 sm:$0xff]  }
 0x8bc   : > { %10983 = vmatprep.mubr.bf16.mxu1 %v17662_v24 }
 0x8be   : > { %9234 = vmatmul.mubr.bf16.gmra.mrb[228].mxu0 %v17661_v12  ;;  %v3562_v35 = vpop.permute.xlu1 %3561 }
 0x8bf   : > { %3339 = vrot.lane.b32.xlu1 %v19897_v36, %s18815_s26  ;;  %3763 = vrot.lane.b32.xlu0 %v3556_v45, %s18812_s22 }
 0x8c0   : > { %9241 = vmatprep.mubr.bf16.mxu0 %v17665_v49 }
 0x8c2   : > { %10984 = vmatmul.mubr.bf16.gmra.mrb[172].mxu1 %v17664_v46  ;;  %v3564_v32 = vpop.permute.xlu1 %3563 }
 0x8c3   : > { %3345 = vrot.lane.b32.xlu1 %v19892_v15, %s18819_s15  ;;  %3565 = vrot.lane.b32.xlu0 %v20663_v8, %s18812_s22 }
 0x8c4   : > { %10991 = vmatprep.mubr.bf16.mxu1 %v17668_v7 }
 0x8c6   : > { %9242 = vmatmul.mubr.bf16.gmra.mrb[232].mxu0 %v17667_v19 }
 0x8c7   : > { %3347 = vrot.lane.b32.xlu1 %v19890_v51, %s18819_s15  ;;  %3567 = vrot.lane.b32.xlu0 %v20661_v55, %s18812_s22 }
 0x8c8   : > { %9249 = vmatprep.mubr.bf16.mxu0 %v17671_v13 }
 0x8ca   : > { %10992 = vmatmul.mubr.bf16.gmra.mrb[176].mxu1 %v17670_v6 }
 0x8cb   : > { %3349 = vrot.lane.b32.xlu1 %v19899_v37, %s18819_s15  ;;  %3569 = vrot.lane.b32.xlu0 %v20687_v11, %s18812_s22 }
 0x8cc   : > { %10999 = vmatprep.mubr.bf16.mxu1 %v17674_v40 }
 0x8ce   : > { %9250 = vmatmul.mubr.bf16.gmra.mrb[236].mxu0 %v17673_v21 }
 0x8cf   : > { %3351 = vrot.lane.b32.xlu1 %v19897_v36, %s18819_s15  ;;  %3571 = vrot.lane.b32.xlu0 %v20685_v31, %s18812_s22 }
 0x8d0   : > { %9257 = vmatprep.mubr.bf16.mxu0 %v17677_v17 }
 0x8d2   : > { %11000 = vmatmul.mubr.bf16.gmra.mrb[180].mxu1 %v17676_v9 }
 0x8d3   : > { %3357 = vrot.lane.b32.xlu1 %v19892_v15, %s18820_s28  ;;  %3765 = vrot.lane.b32.xlu0 %v3558_v30, %s18812_s22  ;;  %v17686_v15 = vld [vmem:[%s24508_s7 + $0x154c] ss:$100 sps:$4 sm:$0xff]  }
 0x8d4   : > { %11007 = vmatprep.mubr.bf16.mxu1 %v17680_v5 }
 0x8d6   : > { %9258 = vmatmul.mubr.bf16.gmra.mrb[240].mxu0 %v17679_v58 }
 0x8d7   : > { %3359 = vrot.lane.b32.xlu1 %v19890_v51, %s18820_s28  ;;  %3767 = vrot.lane.b32.xlu0 %v3560_v27, %s18812_s22  ;;  %v17689_v51 = vld [vmem:[%s24508_s7 + $0x1454] ss:$100 sps:$4 sm:$0xff]  }
 0x8d8   : > { %9265 = vmatprep.mubr.bf16.mxu0 %v17683_v42 }
 0x8da   : > { %11008 = vmatmul.mubr.bf16.gmra.mrb[184].mxu1 %v17682_v10 }
 0x8db   : > { %3361 = vrot.lane.b32.xlu1 %v19899_v37, %s18820_s28  ;;  %3769 = vrot.lane.b32.xlu0 %v3562_v35, %s18812_s22  ;;  %v17692_v37 = vld [vmem:[%s24508_s7 + $0x1614] ss:$100 sps:$4 sm:$0xff]  }
 0x8dc   : > { %11015 = vmatprep.mubr.bf16.mxu1 %v17686_v15 }
 0x8de   : > { %9266 = vmatmul.mubr.bf16.gmra.mrb[244].mxu0 %v17685_v34 }
 0x8df   : > { %3363 = vrot.lane.b32.xlu1 %v19897_v36, %s18820_s28  ;;  %3771 = vrot.lane.b32.xlu0 %v3564_v32, %s18812_s22  ;;  %v17695_v36 = vld [vmem:[%s24508_s7 + $0x151c] ss:$100 sps:$4 sm:$0xff]  }
 0x8e0   : > { %9273 = vmatprep.mubr.bf16.mxu0 %v17689_v51 }
 0x8e2   : > { %11016 = vmatmul.mubr.bf16.gmra.mrb[188].mxu1 %v17688_v39 }
 0x8e3   : > { %3577 = vrot.lane.b32.xlu1 %v20761_v18, %s18821_s20  ;;  %3579 = vrot.lane.b32.xlu0 %v20781_v16, %s18821_s20 }
 0x8e4   : > { %11023 = vmatprep.mubr.bf16.mxu1 %v17692_v37 }
 0x8e6   : > { %9274 = vmatmul.mubr.bf16.gmra.mrb[248].mxu0 %v17691_v26 }
 0x8e7   : > { %3581 = vrot.lane.b32.xlu1 %v20801_v59, %s18821_s20  ;;  %3837 = vrot.lane.b32.xlu0 %v20663_v8, %s18815_s26  ;;  %v17703_v8 = vld [vmem:[%s24508_s7 + $0x15e4] ss:$100 sps:$4 sm:$0xff]  }
 0x8e8   : > { %9281 = vmatprep.mubr.bf16.mxu0 %v17695_v36 }
 0x8ea   : > { %11024 = vmatmul.mubr.bf16.gmra.mrb[192].mxu1 %v17694_v60 }
 0x8eb   : > { %3583 = vrot.lane.b32.xlu1 %v20817_v50, %s18821_s20  ;;  %3839 = vrot.lane.b32.xlu0 %v20661_v55, %s18815_s26  ;;  %v17704_v55 = vld [vmem:[%s24508_s7 + $0x17a4] ss:$100 sps:$4 sm:$0xff]  }
 0x8ec   : > { %11031 = vmatprep.mubr.bf16.mxu1 %v17698_v1  ;;  %v17716_v1 = vld [vmem:[%s24508_s7 + $0x38] ss:$100 sps:$4 sm:$0xff]  }
 0x8ee   : > { %9282 = vmatmul.mubr.bf16.gmra.mrb[252].mxu0 %v17697_v38 }
 0x8ef   : > { %3841 = vrot.lane.b32.xlu1 %v20687_v11, %s18815_s26  ;;  %3843 = vrot.lane.b32.xlu0 %v20685_v31, %s18815_s26  ;;  %v17709_v31 = vld [vmem:[%s24508_s7 + $0x16ac] ss:$100 sps:$4 sm:$0xff]   ;;  %v17706_v11 = vld [vmem:[%s24508_s7 + $0x17a0] ss:$100 sps:$4 sm:$0xff]  }
 0x8f0   : > { %9289 = vmatprep.mubr.bf16.mxu0 %v17703_v8 }
 0x8f2   : > { %11032 = vmatmul.mubr.bf16.gmra.mrb[196].mxu1 %v17700_v22  ;;  %v17722_v22 = vld [vmem:[%s24508_s7 + $0x104] ss:$100 sps:$4 sm:$0xff]  }
 0x8f3   : > { %3373 = vrot.lane.b32.xlu1 %v24580_v52, %s18813_s21  ;;  %3845 = vrot.lane.b32.xlu0 %v3558_v30, %s18815_s26 }
 0x8f4   : > { %11039 = vmatprep.mubr.bf16.mxu1 %v17704_v55 }
 0x8f6   : > { %9290 = vmatmul.mubr.bf16.gmra.mrb[0].mxu0 %v17701_v56 }
 0x8f7   : > { %3375 = vrot.lane.b32.xlu1 %v24581_v47, %s18813_s21  ;;  %3847 = vrot.lane.b32.xlu0 %v3560_v27, %s18815_s26 }
 0x8f8   : > { %9297 = vmatprep.mubr.bf16.mxu0 %v17709_v31  ;;  %v17724_v31 = vld [vmem:[%s24508_s7 + $0x100] ss:$100 sps:$4 sm:$0xff]  }
 0x8fa   : > { %11040 = vmatmul.mubr.bf16.gmra.mrb[200].mxu1 %v17706_v11 }
 0x8fb   : > { %3377 = vrot.lane.b32.xlu1 %v24582_v43, %s18813_s21  ;;  %3849 = vrot.lane.b32.xlu0 %v3562_v35, %s18815_s26 }
 0x8fc   : > { %11047 = vmatprep.mubr.bf16.mxu1 %v17710_v3 }
 0x8fe   : > { %9298 = vmatmul.mubr.bf16.gmra.mrb[4].mxu0 %v17707_v25  ;;  %v17725_v25 = vld [vmem:[%s24508_s7 + $0x8] ss:$100 sps:$4 sm:$0xff]  }
 0x8ff   : > { %3379 = vrot.lane.b32.xlu1 %v24583_v62, %s18813_s21  ;;  %3851 = vrot.lane.b32.xlu0 %v3564_v32, %s18815_s26 }
 0x900   : > { %9305 = vmatprep.mubr.bf16.mxu0 %v17715_v41  ;;  %v17728_v41 = vld [vmem:[%s24508_s7 + $0x1cc] ss:$100 sps:$4 sm:$0xff]  }
 0x902   : > { %11048 = vmatmul.mubr.bf16.gmra.mrb[204].mxu1 %v17712_v4  ;;  %v17731_v4 = vld [vmem:[%s24508_s7 + $0xd4] ss:$100 sps:$4 sm:$0xff]  }
 0x903   : > { %3385 = vrot.lane.b32.xlu1 %v24580_v52, %s18812_s22  ;;  %11088 = vmatprep.mubr.bf16.mxu1 %v17718_v29 }
 0x906   : > { %9306 = vmatmul.mubr.bf16.gmra.mrb[8].mxu0 %v17713_v33 }
 0x907   : > { %3387 = vrot.lane.b32.xlu1 %v24581_v47, %s18812_s22  ;;  %9313 = vmatprep.mubr.bf16.mxu0 %v17721_v20  ;;  %v17730_v20 = vld [vmem:[%s24508_s7 + $0x1c8] ss:$100 sps:$4 sm:$0xff]  }
 0x90b   : > { %3389 = vrot.lane.b32.xlu1 %v24582_v43, %s18812_s22 }
 0x90e   : > { %9314 = vmatmul.mubr.bf16.gmra.mrb[12].mxu0 %v17719_v44 }
 0x90f   : > { %3391 = vrot.lane.b32.xlu1 %v24583_v62, %s18812_s22  ;;  %9354 = vmatprep.mubr.bf16.mxu0 %v17727_v23  ;;  %v17733_v23 = vld [vmem:[%s24508_s7 + $0xd0] ss:$100 sps:$4 sm:$0xff]  }
 0x913   : > { %3397 = vrot.lane.b32.xlu1 %v24580_v52, %s18818_s13 }
 0x917   : > { %3399 = vrot.lane.b32.xlu1 %v24581_v47, %s18818_s13 }
 0x919   : > { %v3750_v24 = vpop.permute.xlu0 %3749 }
 0x91a   : > { %11057 = vmatpush1.bf16.msra.mxu1 %v3750_v24  ;;  %v17734_v24 = vld [vmem:[%s24508_s7 + $0x294] ss:$100 sps:$4 sm:$0xff]  }
 0x91b   : > { %3401 = vrot.lane.b32.xlu1 %v24582_v43, %s18818_s13  ;;  %11058 = vmatprep.subr.bf16.mxu1 %v24561_v0 }
 0x91d   : > { %v3752_v2 = vpop.permute.xlu0 %3751 }
 0x91e   : > { %11059 = vmatpush1.bf16.msra.mxu1 %v3752_v2 }
 0x91f   : > { %3403 = vrot.lane.b32.xlu1 %v24583_v62, %s18818_s13  ;;  %11060 = vmatprep.subr.bf16.mxu1 %v24561_v0 }
 0x921   : > { %v3754_v12 = vpop.permute.xlu1 %3753  ;;  %v3756_v49 = vpop.permute.xlu0 %3755 }
 0x922   : > { %11061 = vmatpush1.bf16.msra.mxu1 %v3754_v12  ;;  %v17737_v12 = vld [vmem:[%s24508_s7 + $0x19c] ss:$100 sps:$4 sm:$0xff]  }
 0x923   : > { %3409 = vrot.lane.b32.xlu1 %v24580_v52, %s18815_s26  ;;  %11062 = vmatprep.subr.bf16.mxu1 %v24561_v0 }
 0x925   : > { %v3334_v45 = vpop.permute.xlu1 %3333  ;;  %v3758_v46 = vpop.permute.xlu0 %3757 }
 0x926   : > { %9323 = vmatpush1.bf16.msra.mxu0 %v3334_v45  ;;  %11063 = vmatpush1.bf16.msra.mxu1 %v3756_v49  ;;  %v17736_v45 = vld [vmem:[%s24508_s7 + $0x290] ss:$100 sps:$4 sm:$0xff]  }
 0x927   : > { %3413 = vrot.lane.b32.xlu1 %v24582_v43, %s18815_s26  ;;  %9324 = vmatprep.subr.bf16.mxu0 %v24561_v0 }
 0x928   : > { %11064 = vmatprep.subr.bf16.mxu1 %v24561_v0 }
 0x929   : > { %v3336_v7 = vpop.permute.xlu1 %3335  ;;  %v3760_v19 = vpop.permute.xlu0 %3759 }
 0x92a   : > { %9325 = vmatpush1.bf16.msra.mxu0 %v3336_v7  ;;  %11065 = vmatpush1.bf16.msra.mxu1 %v3758_v46 }
 0x92b   : > { %3585 = vrot.lane.b32.xlu1 %v20761_v18, %s18822_s19  ;;  %9326 = vmatprep.subr.bf16.mxu0 %v24561_v0 }
 0x92c   : > { %11066 = vmatprep.subr.bf16.mxu1 %v24561_v0 }
 0x92d   : > { %v3338_v13 = vpop.permute.xlu1 %3337  ;;  %v3762_v6 = vpop.permute.xlu0 %3761 }
 0x92e   : > { %9327 = vmatpush1.bf16.msra.mxu0 %v3338_v13  ;;  %11067 = vmatpush1.bf16.msra.mxu1 %v3760_v19  ;;  %v17739_v19 = vld [vmem:[%s24508_s7 + $0x198] ss:$100 sps:$4 sm:$0xff]  }
 0x92f   : > { %3589 = vrot.lane.b32.xlu1 %v20801_v59, %s18822_s19  ;;  %9328 = vmatprep.subr.bf16.mxu0 %v24561_v0  ;;  %v17740_v13 = vld [vmem:[%s24508_s7 + $0x35c] ss:$100 sps:$4 sm:$0xff]  }
 0x930   : > { %11068 = vmatprep.subr.bf16.mxu1 %v24561_v0 }
 0x931   : > { %v3340_v40 = vpop.permute.xlu1 %3339  ;;  %v3764_v21 = vpop.permute.xlu0 %3763 }
 0x932   : > { %9329 = vmatpush1.bf16.msra.mxu0 %v3340_v40  ;;  %11069 = vmatpush1.bf16.msra.mxu1 %v3762_v6  ;;  %v17743_v6 = vld [vmem:[%s24508_s7 + $0x264] ss:$100 sps:$4 sm:$0xff]  }
 0x933   : > { %3593 = vrot.lane.b32.xlu1 %v20761_v18, %s18816_s14  ;;  %9330 = vmatprep.subr.bf16.mxu0 %v24561_v0 }
 0x934   : > { %11070 = vmatprep.subr.bf16.mxu1 %v24561_v0 }
 0x935   : > { %v3346_v17 = vpop.permute.xlu1 %3345  ;;  %v3566_v9 = vpop.permute.xlu0 %3565 }
 0x936   : > { %9331 = vmatpush1.bf16.msra.mxu0 %v3346_v17  ;;  %11071 = vmatpush1.bf16.msra.mxu1 %v3764_v21  ;;  %v17742_v17 = vld [vmem:[%s24508_s7 + $0x358] ss:$100 sps:$4 sm:$0xff]  }
 0x937   : > { %3853 = vrot.lane.b32.xlu0 %v3566_v9, %s18815_s26  ;;  %3597 = vrot.lane.b32.xlu1 %v20801_v59, %s18816_s14 }
 0x938   : > { %9332 = vmatprep.subr.bf16.mxu0 %v24561_v0  ;;  %11072 = vmatprep.subr.bf16.mxu1 %v24561_v0 }
 0x939   : > { %v3348_v5 = vpop.permute.xlu1 %3347  ;;  %v3568_v30 = vpop.permute.xlu0 %3567 }
 0x93a   : > { %9333 = vmatpush1.bf16.msra.mxu0 %v3348_v5  ;;  %11073 = vmatpush1.bf16.msra.mxu1 %v3566_v9  ;;  %v17746_v9 = vld [vmem:[%s24508_s7 + $0x424] ss:$100 sps:$4 sm:$0xff]  }
 0x93b   : > { %3855 = vrot.lane.b32.xlu0 %v3568_v30, %s18815_s26  ;;  %3601 = vrot.lane.b32.xlu1 %v20761_v18, %s24545_s25 }
 0x93c   : > { %9334 = vmatprep.subr.bf16.mxu0 %v24561_v0  ;;  %11074 = vmatprep.subr.bf16.mxu1 %v24561_v0 }
 0x93d   : > { %v3350_v58 = vpop.permute.xlu1 %3349  ;;  %v3570_v42 = vpop.permute.xlu0 %3569 }
 0x93e   : > { %9335 = vmatpush1.bf16.msra.mxu0 %v3350_v58  ;;  %11075 = vmatpush1.bf16.msra.mxu1 %v3568_v30  ;;  %v17745_v30 = vld [vmem:[%s24508_s7 + $0x260] ss:$100 sps:$4 sm:$0xff]   ;;  %v17749_v58 = vld [vmem:[%s24508_s7 + $0x32c] ss:$100 sps:$4 sm:$0xff]  }
 0x93f   : > { %3857 = vrot.lane.b32.xlu0 %v3570_v42, %s18815_s26  ;;  %3605 = vrot.lane.b32.xlu1 %v20801_v59, %s24545_s25 }
 0x940   : > { %9336 = vmatprep.subr.bf16.mxu0 %v24561_v0  ;;  %11076 = vmatprep.subr.bf16.mxu1 %v24561_v0 }
 0x941   : > { %v3352_v27 = vpop.permute.xlu1 %3351  ;;  %v3572_v10 = vpop.permute.xlu0 %3571 }
 0x942   : > { %9337 = vmatpush1.bf16.msra.mxu0 %v3352_v27  ;;  %11077 = vmatpush1.bf16.msra.mxu1 %v3570_v42  ;;  %v17748_v27 = vld [vmem:[%s24508_s7 + $0x420] ss:$100 sps:$4 sm:$0xff]  }
 0x943   : > { %3859 = vrot.lane.b32.xlu0 %v3572_v10, %s18815_s26  ;;  %9338 = vmatprep.subr.bf16.mxu0 %v24561_v0 }
 0x944   : > { %11078 = vmatprep.subr.bf16.mxu1 %v24561_v0 }
 0x945   : > { %v3358_v35 = vpop.permute.xlu1 %3357  ;;  %v3766_v15 = vpop.permute.xlu0 %3765 }
 0x946   : > { %9339 = vmatpush1.bf16.msra.mxu0 %v3358_v35  ;;  %11079 = vmatpush1.bf16.msra.mxu1 %v3572_v10  ;;  %v17752_v10 = vld [vmem:[%s24508_s7 + $0x4ec] ss:$100 sps:$4 sm:$0xff]  }
 0x947   : > { %9340 = vmatprep.subr.bf16.mxu0 %v24561_v0  ;;  %11080 = vmatprep.subr.bf16.mxu1 %v24561_v0 }
 0x949   : > { %v3360_v34 = vpop.permute.xlu1 %3359  ;;  %v3768_v51 = vpop.permute.xlu0 %3767 }
 0x94a   : > { %9341 = vmatpush1.bf16.msra.mxu0 %v3360_v34  ;;  %11081 = vmatpush1.bf16.msra.mxu1 %v3766_v15  ;;  %v17751_v15 = vld [vmem:[%s24508_s7 + $0x328] ss:$100 sps:$4 sm:$0xff]   ;;  %v17755_v34 = vld [vmem:[%s24508_s7 + $0x3f4] ss:$100 sps:$4 sm:$0xff]  }
 0x94b   : > { %9342 = vmatprep.subr.bf16.mxu0 %v24561_v0  ;;  %11082 = vmatprep.subr.bf16.mxu1 %v24561_v0 }
 0x94d   : > { %v3362_v32 = vpop.permute.xlu1 %3361  ;;  %v3770_v39 = vpop.permute.xlu0 %3769 }
 0x94e   : > { %9343 = vmatpush1.bf16.msra.mxu0 %v3362_v32  ;;  %11083 = vmatpush1.bf16.msra.mxu1 %v3768_v51  ;;  %v17754_v32 = vld [vmem:[%s24508_s7 + $0x4e8] ss:$100 sps:$4 sm:$0xff]  }
 0x94f   : > { %9344 = vmatprep.subr.bf16.mxu0 %v24561_v0  ;;  %11084 = vmatprep.subr.bf16.mxu1 %v24561_v0 }
 0x951   : > { %v3364_v37 = vpop.permute.xlu1 %3363  ;;  %v3772_v26 = vpop.permute.xlu0 %3771 }
 0x952   : > { %9345 = vmatpush1.bf16.msra.mxu0 %v3364_v37  ;;  %11085 = vmatpush1.bf16.msra.mxu1 %v3770_v39  ;;  %v17758_v39 = vld [vmem:[%s24508_s7 + $0x5b4] ss:$100 sps:$4 sm:$0xff]  }
 0x953   : > { %9346 = vmatprep.subr.bf16.mxu0 %v24561_v0  ;;  %11086 = vmatprep.subr.bf16.mxu1 %v24561_v0 }
 0x955   : > { %v3578_v36 = vpop.permute.xlu1 %3577  ;;  %v3580_v60 = vpop.permute.xlu0 %3579 }
 0x956   : > { %9347 = vmatpush1.bf16.msra.mxu0 %v24580_v52  ;;  %3861 = vrot.lane.b32.xlu0 %v3578_v36, %s18815_s26  ;;  %v17761_v36 = vld [vmem:[%s24508_s7 + $0x4bc] ss:$100 sps:$4 sm:$0xff]  }
 0x957   : > { %11087 = vmatpush1.bf16.msra.mxu1 %v3772_v26  ;;  %9348 = vmatprep.subr.bf16.mxu0 %v24561_v0  ;;  %v17757_v26 = vld [vmem:[%s24508_s7 + $0x3f0] ss:$100 sps:$4 sm:$0xff]  }
 0x958   : > { %11345 = vmatprep.subr.bf16.mxu1 %v24561_v0 }
 0x959   : > { %v3582_v38 = vpop.permute.xlu1 %3581  ;;  %v3838_v8 = vpop.permute.xlu0 %3837 }
 0x95a   : > { %11089 = vmatmul.mubr.bf16.vlgmr.msra.gmra.mrb[208].mxu1 %v17716_v1  ;;  %9349 = vmatpush1.bf16.msra.mxu0 %v24581_v47  ;;  %v17760_v1 = vld [vmem:[%s24508_s7 + $0x5b0] ss:$100 sps:$4 sm:$0xff]  }
 0x95b   : > { %3863 = vrot.lane.b32.xlu0 %v3580_v60, %s18815_s26  ;;  %11346 = vmatpush1.bf16.msra.mxu1 %v3838_v8 }
 0x95c   : > { %9350 = vmatprep.subr.bf16.mxu0 %v24561_v0  ;;  %11347 = vmatprep.subr.bf16.mxu1 %v24561_v0 }
 0x95d   : > { %v3584_v55 = vpop.permute.xlu1 %3583  ;;  %v3840_v56 = vpop.permute.xlu0 %3839  ;;  %11096 = vmatprep.mubr.bf16.mxu1 %v17722_v22  ;;  %v17763_v22 = vld [vmem:[%s24508_s7 + $0x4b8] ss:$100 sps:$4 sm:$0xff]  }
 0x95e   : > { %9351 = vmatpush1.bf16.msra.mxu0 %v24582_v43 }
 0x95f   : > { %3865 = vrot.lane.b32.xlu0 %v3582_v38, %s18815_s26  ;;  %11348 = vmatpush1.bf16.msra.mxu1 %v3840_v56  ;;  %v17764_v38 = vld [vmem:[%s24508_s7 + $0x67c] ss:$100 sps:$4 sm:$0xff]  }
 0x960   : > { %9352 = vmatprep.subr.bf16.mxu0 %v24561_v0  ;;  %11349 = vmatprep.subr.bf16.mxu1 %v24561_v0 }
 0x961   : > { %v3842_v11 = vpop.permute.xlu1 %3841  ;;  %v3844_v3 = vpop.permute.xlu0 %3843 }
 0x962   : > { %11097 = vmatmul.mubr.bf16.gmra.mrb[212].mxu1 %v17724_v31  ;;  %9353 = vmatpush1.bf16.msra.mxu0 %v24583_v62  ;;  %v17766_v31 = vld [vmem:[%s24508_s7 + $0x678] ss:$100 sps:$4 sm:$0xff]  }
 0x963   : > { %3867 = vrot.lane.b32.xlu0 %v3584_v55, %s18815_s26  ;;  %11350 = vmatpush1.bf16.msra.mxu1 %v3842_v11  ;;  %v17767_v55 = vld [vmem:[%s24508_s7 + $0x584] ss:$100 sps:$4 sm:$0xff]  }
 0x964   : > { %9611 = vmatprep.subr.bf16.mxu0 %v24561_v0  ;;  %11351 = vmatprep.subr.bf16.mxu1 %v24561_v0  ;;  %v17770_v11 = vld [vmem:[%s24508_s7 + $0x744] ss:$100 sps:$4 sm:$0xff]  }
 0x965   : > { %v3374_v29 = vpop.permute.xlu1 %3373  ;;  %9355 = vmatmul.mubr.bf16.vlgmr.msra.gmra.mrb[144].mxu0 %v17725_v25  ;;  %v3846_v33 = vpop.permute.xlu0 %3845  ;;  %11104 = vmatprep.mubr.bf16.mxu1 %v17728_v41  ;;  %v17769_v25 = vld [vmem:[%s24508_s7 + $0x580] ss:$100 sps:$4 sm:$0xff]   ;;  %v17773_v41 = vld [vmem:[%s24508_s7 + $0x64c] ss:$100 sps:$4 sm:$0xff]  }
 0x966   : > { %9612 = vmatpush1.bf16.msra.mxu0 %v3374_v29  ;;  %9362 = vmatprep.mubr.bf16.mxu0 %v17731_v4  ;;  %v17772_v29 = vld [vmem:[%s24508_s7 + $0x740] ss:$100 sps:$4 sm:$0xff]  }
 0x967   : > { %3411 = vrot.lane.b32.xlu0 %v24581_v47, %s18815_s26  ;;  %11352 = vmatpush1.bf16.msra.mxu1 %v3844_v3 }
 0x968   : > { %9613 = vmatprep.subr.bf16.mxu0 %v24561_v0  ;;  %11353 = vmatprep.subr.bf16.mxu1 %v24561_v0 }
 0x969   : > { %v3376_v44 = vpop.permute.xlu1 %3375  ;;  %v3848_v2 = vpop.permute.xlu0 %3847 }
 0x96a   : > { %11105 = vmatmul.mubr.bf16.gmra.mrb[216].mxu1 %v17730_v20  ;;  %9614 = vmatpush1.bf16.msra.mxu0 %v3376_v44  ;;  %v17775_v44 = vld [vmem:[%s24508_s7 + $0x648] ss:$100 sps:$4 sm:$0xff]  }
 0x96b   : > { %3415 = vrot.lane.b32.xlu0 %v24583_v62, %s18815_s26  ;;  %11354 = vmatpush1.bf16.msra.mxu1 %v3846_v33  ;;  %v17776_v33 = vld [vmem:[%s24508_s7 + $0x80c] ss:$100 sps:$4 sm:$0xff]  }
 0x96c   : > { %9615 = vmatprep.subr.bf16.mxu0 %v24561_v0  ;;  %11355 = vmatprep.subr.bf16.mxu1 %v24561_v0 }
 0x96d   : > { %v3378_v49 = vpop.permute.xlu1 %3377  ;;  %9363 = vmatmul.mubr.bf16.gmra.mrb[148].mxu0 %v17733_v23  ;;  %11112 = vmatprep.mubr.bf16.mxu1 %v17734_v24  ;;  %v3850_v46 = vpop.permute.xlu0 %3849  ;;  %v17779_v23 = vld [vmem:[%s24508_s7 + $0x714] ss:$100 sps:$4 sm:$0xff]   ;;  %v17778_v24 = vld [vmem:[%s24508_s7 + $0x808] ss:$100 sps:$4 sm:$0xff]  }
 0x96e   : > { %9616 = vmatpush1.bf16.msra.mxu0 %v3378_v49  ;;  %9370 = vmatprep.mubr.bf16.mxu0 %v17737_v12  ;;  %v17781_v49 = vld [vmem:[%s24508_s7 + $0x710] ss:$100 sps:$4 sm:$0xff]  }
 0x96f   : > { %3587 = vrot.lane.b32.xlu0 %v20781_v16, %s18822_s19  ;;  %11356 = vmatpush1.bf16.msra.mxu1 %v3848_v2  ;;  %v17782_v2 = vld [vmem:[%s24508_s7 + $0x8d4] ss:$100 sps:$4 sm:$0xff]  }
 0x970   : > { %9617 = vmatprep.subr.bf16.mxu0 %v24561_v0  ;;  %11357 = vmatprep.subr.bf16.mxu1 %v24561_v0 }
 0x971   : > { %v3380_v7 = vpop.permute.xlu1 %3379  ;;  %v3852_v21 = vpop.permute.xlu0 %3851 }
 0x972   : > { %11113 = vmatmul.mubr.bf16.gmra.mrb[220].mxu1 %v17736_v45  ;;  %9618 = vmatpush1.bf16.msra.mxu0 %v3380_v7  ;;  %v17785_v45 = vld [vmem:[%s24508_s7 + $0x7dc] ss:$100 sps:$4 sm:$0xff]   ;;  %v17784_v7 = vld [vmem:[%s24508_s7 + $0x8d0] ss:$100 sps:$4 sm:$0xff]  }
 0x973   : > { %3591 = vrot.lane.b32.xlu0 %v20817_v50, %s18822_s19  ;;  %11358 = vmatpush1.bf16.msra.mxu1 %v3850_v46 }
 0x974   : > { %9619 = vmatprep.subr.bf16.mxu0 %v24561_v0  ;;  %11359 = vmatprep.subr.bf16.mxu1 %v24561_v0 }
 0x975   : > { %v3386_v40 = vpop.permute.xlu1 %3385  ;;  %9371 = vmatmul.mubr.bf16.gmra.mrb[152].mxu0 %v17739_v19  ;;  %11120 = vmatprep.mubr.bf16.mxu1 %v17740_v13  ;;  %v17790_v19 = vld [vmem:[%s24508_s7 + $0x99c] ss:$100 sps:$4 sm:$0xff]  }
 0x976   : > { %9620 = vmatpush1.bf16.msra.mxu0 %v3386_v40  ;;  %9378 = vmatprep.mubr.bf16.mxu0 %v17743_v6  ;;  %v17787_v6 = vld [vmem:[%s24508_s7 + $0x7d8] ss:$100 sps:$4 sm:$0xff]   ;;  %v17791_v40 = vld [vmem:[%s24508_s7 + $0x8a4] ss:$100 sps:$4 sm:$0xff]  }
 0x977   : > { %3595 = vrot.lane.b32.xlu0 %v20781_v16, %s18816_s14  ;;  %11360 = vmatpush1.bf16.msra.mxu1 %v3852_v21 }
 0x978   : > { %9621 = vmatprep.subr.bf16.mxu0 %v24561_v0  ;;  %11361 = vmatprep.subr.bf16.mxu1 %v24561_v0 }
 0x979   : > { %v3388_v5 = vpop.permute.xlu1 %3387 }
 0x97a   : > { %11121 = vmatmul.mubr.bf16.gmra.mrb[224].mxu1 %v17742_v17  ;;  %9622 = vmatpush1.bf16.msra.mxu0 %v3388_v5  ;;  %v17788_v17 = vld [vmem:[%s24508_s7 + $0x998] ss:$100 sps:$4 sm:$0xff]   ;;  %v17793_v5 = vld [vmem:[%s24508_s7 + $0x8a0] ss:$100 sps:$4 sm:$0xff]  }
 0x97b   : > { %3599 = vrot.lane.b32.xlu0 %v20817_v50, %s18816_s14  ;;  %9623 = vmatprep.subr.bf16.mxu0 %v24561_v0 }
 0x97c   : > { %11128 = vmatprep.mubr.bf16.mxu1 %v17746_v9  ;;  %v17796_v9 = vld [vmem:[%s24508_s7 + $0xa64] ss:$100 sps:$4 sm:$0xff]  }
 0x97d   : > { %v3390_v42 = vpop.permute.xlu1 %3389  ;;  %9379 = vmatmul.mubr.bf16.gmra.mrb[156].mxu0 %v17745_v30  ;;  %v17794_v30 = vld [vmem:[%s24508_s7 + $0xa60] ss:$100 sps:$4 sm:$0xff]  }
 0x97e   : > { %9624 = vmatpush1.bf16.msra.mxu0 %v3390_v42  ;;  %9386 = vmatprep.mubr.bf16.mxu0 %v17749_v58  ;;  %v17800_v58 = vld [vmem:[%s24508_s7 + $0xb2c] ss:$100 sps:$4 sm:$0xff]  }
 0x97f   : > { %3603 = vrot.lane.b32.xlu0 %v20781_v16, %s24545_s25  ;;  %9625 = vmatprep.subr.bf16.mxu0 %v24561_v0  ;;  %v17802_v42 = vld [vmem:[%s24508_s7 + $0xb28] ss:$100 sps:$4 sm:$0xff]  }
 0x981   : > { %v3392_v35 = vpop.permute.xlu1 %3391 }
 0x982   : > { %11129 = vmatmul.mubr.bf16.gmra.mrb[228].mxu1 %v17748_v27  ;;  %9626 = vmatpush1.bf16.msra.mxu0 %v3392_v35  ;;  %v17806_v27 = vld [vmem:[%s24508_s7 + $0xbf4] ss:$100 sps:$4 sm:$0xff]   ;;  %v17809_v35 = vld [vmem:[%s24508_s7 + $0xafc] ss:$100 sps:$4 sm:$0xff]  }
 0x983   : > { %3607 = vrot.lane.b32.xlu0 %v20817_v50, %s24545_s25  ;;  %9627 = vmatprep.subr.bf16.mxu0 %v24561_v0 }
 0x984   : > { %11136 = vmatprep.mubr.bf16.mxu1 %v17752_v10 }
 0x985   : > { %v3398_v51 = vpop.permute.xlu1 %3397  ;;  %9387 = vmatmul.mubr.bf16.gmra.mrb[160].mxu0 %v17751_v15 }
 0x986   : > { %9628 = vmatpush1.bf16.msra.mxu0 %v3398_v51  ;;  %9394 = vmatprep.mubr.bf16.mxu0 %v17755_v34  ;;  %v24584_v34 = vld [vmem:[#allocation12_spill] sm:$0xff]  ;;  %v17808_v51 = vld [vmem:[%s24508_s7 + $0xbf0] ss:$100 sps:$4 sm:$0xff]  }
 0x987   : > { %9629 = vmatprep.subr.bf16.mxu0 %v24561_v0 }
 0x989   : > { %v3400_v37 = vpop.permute.xlu1 %3399 }
 0x98a   : > { %11137 = vmatmul.mubr.bf16.gmra.mrb[232].mxu1 %v17754_v32  ;;  %9630 = vmatpush1.bf16.msra.mxu0 %v3400_v37  ;;  %v17812_v32 = vld [vmem:[%s24508_s7 + $0xcbc] ss:$100 sps:$4 sm:$0xff]  }
 0x98b   : > { %9631 = vmatprep.subr.bf16.mxu0 %v24561_v0  ;;  %11144 = vmatprep.mubr.bf16.mxu1 %v17758_v39  ;;  %v17811_v37 = vld [vmem:[%s24508_s7 + $0xaf8] ss:$100 sps:$4 sm:$0xff]  }
 0x98d   : > { %v3402_v60 = vpop.permute.xlu1 %3401  ;;  %9395 = vmatmul.mubr.bf16.gmra.mrb[164].mxu0 %v17757_v26  ;;  %v24585_v26 = vld [vmem:[#allocation14_spill] sm:$0xff] }
 0x98e   : > { %9632 = vmatpush1.bf16.msra.mxu0 %v3402_v60  ;;  %9402 = vmatprep.mubr.bf16.mxu0 %v17761_v36  ;;  %v17815_v36 = vld [vmem:[%s24508_s7 + $0xbc4] ss:$100 sps:$4 sm:$0xff]  }
 0x98f   : > { %9633 = vmatprep.subr.bf16.mxu0 %v24561_v0 }
 0x991   : > { %v3404_v8 = vpop.permute.xlu1 %3403 }
 0x992   : > { %11145 = vmatmul.mubr.bf16.gmra.mrb[236].mxu1 %v17760_v1  ;;  %9634 = vmatpush1.bf16.msra.mxu0 %v3404_v8  ;;  %v17814_v1 = vld [vmem:[%s24508_s7 + $0xcb8] ss:$100 sps:$4 sm:$0xff]  }
 0x993   : > { %9635 = vmatprep.subr.bf16.mxu0 %v24561_v0  ;;  %11152 = vmatprep.mubr.bf16.mxu1 %v17764_v38  ;;  %v17818_v38 = vld [vmem:[%s24508_s7 + $0xd84] ss:$100 sps:$4 sm:$0xff]  }
 0x995   : > { %v3410_v56 = vpop.permute.xlu1 %3409  ;;  %9403 = vmatmul.mubr.bf16.gmra.mrb[168].mxu0 %v17763_v22  ;;  %v17817_v22 = vld [vmem:[%s24508_s7 + $0xbc0] ss:$100 sps:$4 sm:$0xff]  }
 0x996   : > { %9636 = vmatpush1.bf16.msra.mxu0 %v3410_v56  ;;  %9410 = vmatprep.mubr.bf16.mxu0 %v17767_v55  ;;  %v17821_v55 = vld [vmem:[%s24508_s7 + $0xc8c] ss:$100 sps:$4 sm:$0xff]  }
 0x997   : > { %9637 = vmatprep.subr.bf16.mxu0 %v24561_v0 }
 0x999   : > { %v21382_v3 = vpop.permute.xlu1 %3413 }
 0x99a   : > { %11153 = vmatmul.mubr.bf16.gmra.mrb[240].mxu1 %v17766_v31  ;;  %v17820_v31 = vld [vmem:[%s24508_s7 + $0xd80] ss:$100 sps:$4 sm:$0xff]  }
 0x99b   : > { %11160 = vmatprep.mubr.bf16.mxu1 %v17770_v11  ;;  %v17824_v11 = vld [vmem:[%s24508_s7 + $0xe4c] ss:$100 sps:$4 sm:$0xff]  }
 0x99d   : > { %v3586_v4 = vpop.permute.xlu1 %3585  ;;  %9411 = vmatmul.mubr.bf16.gmra.mrb[172].mxu0 %v17769_v25 }
 0x99e   : > { %3869 = vrot.lane.b32.xlu1 %v3586_v4, %s18815_s26  ;;  %9418 = vmatprep.mubr.bf16.mxu0 %v17773_v41  ;;  %v17823_v41 = vld [vmem:[%s24508_s7 + $0xc88] ss:$100 sps:$4 sm:$0xff]  }
 0x99f   : > { %v17826_v4 = vld [vmem:[%s24508_s7 + $0xe48] ss:$100 sps:$4 sm:$0xff]  }
 0x9a1   : > { %v3590_v20 = vpop.permute.xlu1 %3589 }
 0x9a2   : > { %11161 = vmatmul.mubr.bf16.gmra.mrb[244].mxu1 %v17772_v29  ;;  %3873 = vrot.lane.b32.xlu1 %v3590_v20, %s18815_s26  ;;  %v17830_v29 = vld [vmem:[%s24508_s7 + $0xf14] ss:$100 sps:$4 sm:$0xff]   ;;  %v17833_v20 = vld [vmem:[%s24508_s7 + $0xe1c] ss:$100 sps:$4 sm:$0xff]  }
 0x9a3   : > { %11168 = vmatprep.mubr.bf16.mxu1 %v17776_v33 }
 0x9a5   : > { %9419 = vmatmul.mubr.bf16.gmra.mrb[176].mxu0 %v17775_v44  ;;  %v3594_v33 = vpop.permute.xlu1 %3593 }
 0x9a6   : > { %3421 = vrot.lane.b32.xlu1 %v24580_v52, %s18819_s15  ;;  %9426 = vmatprep.mubr.bf16.mxu0 %v17779_v23  ;;  %v17832_v23 = vld [vmem:[%s24508_s7 + $0xf10] ss:$100 sps:$4 sm:$0xff]  }
 0x9a9   : > { %v3854_v12 = vpop.permute.xlu0 %3853 }
 0x9aa   : > { %11169 = vmatmul.mubr.bf16.gmra.mrb[248].mxu1 %v17778_v24  ;;  %3423 = vrot.lane.b32.xlu1 %v24581_v47, %s18819_s15  ;;  %v17836_v24 = vld [vmem:[%s24508_s7 + $0xfdc] ss:$100 sps:$4 sm:$0xff]  }
 0x9ab   : > { %11362 = vmatpush1.bf16.msra.mxu1 %v3854_v12  ;;  %11176 = vmatprep.mubr.bf16.mxu1 %v17782_v2  ;;  %v17835_v2 = vld [vmem:[%s24508_s7 + $0xe18] ss:$100 sps:$4 sm:$0xff]   ;;  %v3598_v12 = vpop.permute.xlu1 %3597 }
 0x9ac   : > { %11363 = vmatprep.subr.bf16.mxu1 %v24561_v0 }
 0x9ad   : > { %v3856_v46 = vpop.permute.xlu0 %3855  ;;  %9427 = vmatmul.mubr.bf16.gmra.mrb[180].mxu0 %v17781_v49  ;;  %v17839_v49 = vld [vmem:[%s24508_s7 + $0xee4] ss:$100 sps:$4 sm:$0xff]  }
 0x9ae   : > { %3425 = vrot.lane.b32.xlu1 %v24582_v43, %s18819_s15  ;;  %9434 = vmatprep.mubr.bf16.mxu0 %v17785_v45  ;;  %v24586_v45 = vld [vmem:[#allocation11_spill] sm:$0xff] }
 0x9af   : > { %11364 = vmatpush1.bf16.msra.mxu1 %v3856_v46 }
 0x9b0   : > { %11365 = vmatprep.subr.bf16.mxu1 %v24561_v0 }
 0x9b1   : > { %v3858_v13 = vpop.permute.xlu0 %3857 }
 0x9b2   : > { %11177 = vmatmul.mubr.bf16.gmra.mrb[252].mxu1 %v17784_v7  ;;  %3427 = vrot.lane.b32.xlu1 %v24583_v62, %s18819_s15  ;;  %v17838_v7 = vld [vmem:[%s24508_s7 + $0xfd8] ss:$100 sps:$4 sm:$0xff]  }
 0x9b3   : > { %11366 = vmatpush1.bf16.msra.mxu1 %v3858_v13  ;;  %11184 = vmatprep.mubr.bf16.mxu1 %v17790_v19  ;;  %v17842_v19 = vld [vmem:[%s24508_s7 + $0x10a4] ss:$100 sps:$4 sm:$0xff]  }
 0x9b4   : > { %11367 = vmatprep.subr.bf16.mxu1 %v24561_v0  ;;  %v17841_v13 = vld [vmem:[%s24508_s7 + $0xee0] ss:$100 sps:$4 sm:$0xff]  }
 0x9b5   : > { %v3860_v21 = vpop.permute.xlu0 %3859  ;;  %9435 = vmatmul.mubr.bf16.gmra.mrb[184].mxu0 %v17787_v6  ;;  %v3602_v6 = vpop.permute.xlu1 %3601 }
 0x9b6   : > { %3433 = vrot.lane.b32.xlu1 %v24580_v52, %s18820_s28  ;;  %9442 = vmatprep.mubr.bf16.mxu0 %v17791_v40  ;;  %v17797_v52 = vld [vmem:[%s24508_s7 + $0x96c] ss:$100 sps:$4 sm:$0xff]  }
 0x9b7   : > { %11368 = vmatpush1.bf16.msra.mxu1 %v3860_v21  ;;  %v17845_v40 = vld [vmem:[%s24508_s7 + $0xfac] ss:$100 sps:$4 sm:$0xff]  }
 0x9b8   : > { %11369 = vmatprep.subr.bf16.mxu1 %v24561_v0  ;;  %v24587_v21 = vld [vmem:[#allocation13_spill] sm:$0xff] }
 0x9ba   : > { %11185 = vmatmul.mubr.bf16.gmra.mrb[0].mxu1 %v17788_v17  ;;  %3435 = vrot.lane.b32.xlu1 %v24581_v47, %s18820_s28  ;;  %v17799_v47 = vld [vmem:[%s24508_s7 + $0x968] ss:$100 sps:$4 sm:$0xff]  }
 0x9bb   : > { %11192 = vmatprep.mubr.bf16.mxu1 %v17796_v9  ;;  %v17844_v9 = vld [vmem:[%s24508_s7 + $0x10a0] ss:$100 sps:$4 sm:$0xff]  }
 0x9bd   : > { %9443 = vmatmul.mubr.bf16.gmra.mrb[188].mxu0 %v17793_v5  ;;  %v17848_v5 = vld [vmem:[%s24508_s7 + $0x116c] ss:$100 sps:$4 sm:$0xff]  }
 0x9be   : > { %3437 = vrot.lane.b32.xlu1 %v24582_v43, %s18820_s28  ;;  %9450 = vmatprep.mubr.bf16.mxu0 %v17797_v52  ;;  %v17803_v43 = vld [vmem:[%s24508_s7 + $0xa34] ss:$100 sps:$4 sm:$0xff]   ;;  %v17847_v52 = vld [vmem:[%s24508_s7 + $0xfa8] ss:$100 sps:$4 sm:$0xff]  }
 0x9c2   : > { %11193 = vmatmul.mubr.bf16.gmra.mrb[4].mxu1 %v17794_v30  ;;  %3439 = vrot.lane.b32.xlu1 %v24583_v62, %s18820_s28  ;;  %v17805_v62 = vld [vmem:[%s24508_s7 + $0xa30] ss:$100 sps:$4 sm:$0xff]   ;;  %v3606_v30 = vpop.permute.xlu1 %3605 }
 0x9c3   : > { %11200 = vmatprep.mubr.bf16.mxu1 %v17800_v58  ;;  %v17851_v58 = vld [vmem:[%s24508_s7 + $0x1074] ss:$100 sps:$4 sm:$0xff]  }
 0x9c5   : > { %9451 = vmatmul.mubr.bf16.gmra.mrb[192].mxu0 %v17799_v47 }
 0x9c6   : > { %3893 = vrot.lane.b32.xlu1 %v20761_v18, %s18815_s26  ;;  %9458 = vmatprep.mubr.bf16.mxu0 %v17803_v43  ;;  %v17850_v43 = vld [vmem:[%s24508_s7 + $0x1168] ss:$100 sps:$4 sm:$0xff]  }
 0x9c8   : > { %v3862_v10 = vpop.permute.xlu0 %3861 }
 0x9c9   : > { %11370 = vmatpush1.bf16.msra.mxu1 %v3862_v10  ;;  %v17857_v10 = vld [vmem:[%s24508_s7 + $0x113c] ss:$100 sps:$4 sm:$0xff]  }
 0x9ca   : > { %11201 = vmatmul.mubr.bf16.gmra.mrb[136].mxu1 %v17802_v42  ;;  %3897 = vrot.lane.b32.xlu1 %v20801_v59, %s18815_s26  ;;  %v17854_v42 = vld [vmem:[%s24508_s7 + $0x1234] ss:$100 sps:$4 sm:$0xff]  }
 0x9cb   : > { %11371 = vmatprep.subr.bf16.mxu1 %v24561_v0  ;;  %11208 = vmatprep.mubr.bf16.mxu1 %v17806_v27  ;;  %v17853_v27 = vld [vmem:[%s24508_s7 + $0x1070] ss:$100 sps:$4 sm:$0xff]  }
 0x9cd   : > { %v3864_v15 = vpop.permute.xlu0 %3863  ;;  %9459 = vmatmul.mubr.bf16.gmra.mrb[196].mxu0 %v17805_v62  ;;  %v17856_v62 = vld [vmem:[%s24508_s7 + $0x1230] ss:$100 sps:$4 sm:$0xff]  }
 0x9ce   : > { %11372 = vmatpush1.bf16.msra.mxu1 %v3864_v15  ;;  %3449 = vrot.lane.b32.xlu1 %v24584_v34, %s18813_s21 }
 0x9cf   : > { %11373 = vmatprep.subr.bf16.mxu1 %v24561_v0  ;;  %9466 = vmatprep.mubr.bf16.mxu0 %v17809_v35  ;;  %v17860_v35 = vld [vmem:[%s24508_s7 + $0x12fc] ss:$100 sps:$4 sm:$0xff]  }
 0x9d1   : > { %v3866_v39 = vpop.permute.xlu0 %3865 }
 0x9d2   : > { %11209 = vmatmul.mubr.bf16.gmra.mrb[140].mxu1 %v17808_v51  ;;  %3453 = vrot.lane.b32.xlu1 %v24585_v26, %s18813_s21  ;;  %v17859_v51 = vld [vmem:[%s24508_s7 + $0x1138] ss:$100 sps:$4 sm:$0xff]  }
 0x9d3   : > { %11374 = vmatpush1.bf16.msra.mxu1 %v3866_v39  ;;  %11216 = vmatprep.mubr.bf16.mxu1 %v17812_v32  ;;  %v17863_v32 = vld [vmem:[%s24508_s7 + $0x1204] ss:$100 sps:$4 sm:$0xff]  }
 0x9d4   : > { %11375 = vmatprep.subr.bf16.mxu1 %v24561_v0 }
 0x9d5   : > { %v3868_v60 = vpop.permute.xlu0 %3867  ;;  %9467 = vmatmul.mubr.bf16.gmra.mrb[200].mxu0 %v17811_v37  ;;  %v17862_v37 = vld [vmem:[%s24508_s7 + $0x12f8] ss:$100 sps:$4 sm:$0xff]  }
 0x9d6   : > { %3609 = vrot.lane.b32.xlu1 %v20761_v18, %s18813_s21  ;;  %9474 = vmatprep.mubr.bf16.mxu0 %v17815_v36  ;;  %v17866_v36 = vld [vmem:[%s24508_s7 + $0x13c4] ss:$100 sps:$4 sm:$0xff]  }
 0x9d7   : > { %11376 = vmatpush1.bf16.msra.mxu1 %v3868_v60 }
 0x9d8   : > { %11634 = vmatprep.subr.bf16.mxu1 %v24561_v0 }
 0x9d9   : > { %v3412_v8 = vpop.permute.xlu0 %3411 }
 0x9da   : > { %9638 = vmatpush1.bf16.msra.mxu0 %v3412_v8  ;;  %11217 = vmatmul.mubr.bf16.gmra.mrb[144].mxu1 %v17814_v1  ;;  %v17865_v1 = vld [vmem:[%s24508_s7 + $0x1200] ss:$100 sps:$4 sm:$0xff]  }
 0x9db   : > { %3613 = vrot.lane.b32.xlu1 %v20801_v59, %s18813_s21  ;;  %9639 = vmatprep.subr.bf16.mxu0 %v24561_v0 }
 0x9dc   : > { %11224 = vmatprep.mubr.bf16.mxu1 %v17818_v38  ;;  %v17869_v38 = vld [vmem:[%s24508_s7 + $0x12cc] ss:$100 sps:$4 sm:$0xff]  }
 0x9dd   : > { %v3416_v56 = vpop.permute.xlu0 %3415  ;;  %9475 = vmatmul.mubr.bf16.gmra.mrb[204].mxu0 %v17817_v22  ;;  %v17868_v22 = vld [vmem:[%s24508_s7 + $0x13c0] ss:$100 sps:$4 sm:$0xff]  }
 0x9de   : > { %9640 = vmatpush1.bf16.msra.mxu0 %v21382_v3  ;;  %9482 = vmatprep.mubr.bf16.mxu0 %v17821_v55  ;;  %v17827_v3 = vld [vmem:[%s24508_s7 + $0xd54] ss:$100 sps:$4 sm:$0xff]   ;;  %v17872_v55 = vld [vmem:[%s24508_s7 + $0x148c] ss:$100 sps:$4 sm:$0xff]  }
 0x9df   : > { %3617 = vrot.lane.b32.xlu1 %v20761_v18, %s18812_s22  ;;  %9641 = vmatprep.subr.bf16.mxu0 %v24561_v0 }
 0x9e1   : > { %v3588_v25 = vpop.permute.xlu0 %3587 }
 0x9e2   : > { %9642 = vmatpush1.bf16.msra.mxu0 %v3416_v56  ;;  %11225 = vmatmul.mubr.bf16.gmra.mrb[148].mxu1 %v17820_v31  ;;  %v17871_v31 = vld [vmem:[%s24508_s7 + $0x12c8] ss:$100 sps:$4 sm:$0xff]  }
 0x9e3   : > { %3871 = vrot.lane.b32.xlu0 %v3588_v25, %s18815_s26  ;;  %3621 = vrot.lane.b32.xlu1 %v20801_v59, %s18812_s22  ;;  %v17829_v59 = vld [vmem:[%s24508_s7 + $0xd50] ss:$100 sps:$4 sm:$0xff]  }
 0x9e4   : > { %11232 = vmatprep.mubr.bf16.mxu1 %v17824_v11  ;;  %9900 = vmatprep.subr.bf16.mxu0 %v24561_v0  ;;  %v17875_v11 = vld [vmem:[%s24508_s7 + $0x1394] ss:$100 sps:$4 sm:$0xff]  }
 0x9e5   : > { %v3592_v18 = vpop.permute.xlu0 %3591  ;;  %9483 = vmatmul.mubr.bf16.gmra.mrb[208].mxu0 %v17823_v41  ;;  %v17874_v41 = vld [vmem:[%s24508_s7 + $0x1488] ss:$100 sps:$4 sm:$0xff]  }
 0x9e6   : > { %9490 = vmatprep.mubr.bf16.mxu0 %v17827_v3  ;;  %v17878_v3 = vld [vmem:[%s24508_s7 + $0x1554] ss:$100 sps:$4 sm:$0xff]  }
 0x9e7   : > { %3875 = vrot.lane.b32.xlu0 %v3592_v18, %s18815_s26  ;;  %3629 = vrot.lane.b32.xlu1 %v20963_v53, %s18821_s20 }
 0x9e9   : > { %v3596_v44 = vpop.permute.xlu0 %3595 }
 0x9ea   : > { %11233 = vmatmul.mubr.bf16.gmra.mrb[152].mxu1 %v17826_v4  ;;  %v17881_v4 = vld [vmem:[%s24508_s7 + $0x145c] ss:$100 sps:$4 sm:$0xff]  }
 0x9eb   : > { %3877 = vrot.lane.b32.xlu0 %v3594_v33, %s18815_s26  ;;  %3633 = vrot.lane.b32.xlu1 %v20989_v61, %s18821_s20 }
 0x9ec   : > { %11240 = vmatprep.mubr.bf16.mxu1 %v17830_v29  ;;  %v17880_v29 = vld [vmem:[%s24508_s7 + $0x1550] ss:$100 sps:$4 sm:$0xff]  }
 0x9ed   : > { %9491 = vmatmul.mubr.bf16.gmra.mrb[212].mxu0 %v17829_v59  ;;  %v3600_v46 = vpop.permute.xlu0 %3599  ;;  %v17884_v59 = vld [vmem:[%s24508_s7 + $0x161c] ss:$100 sps:$4 sm:$0xff]  }
 0x9ee   : > { %9498 = vmatprep.mubr.bf16.mxu0 %v17833_v20  ;;  %v17883_v20 = vld [vmem:[%s24508_s7 + $0x1458] ss:$100 sps:$4 sm:$0xff]  }
 0x9ef   : > { %3879 = vrot.lane.b32.xlu0 %v3596_v44, %s18815_s26  ;;  %3461 = vrot.lane.b32.xlu1 %v24584_v34, %s18812_s22  ;;  %v17887_v44 = vld [vmem:[%s24508_s7 + $0x1524] ss:$100 sps:$4 sm:$0xff]  }
 0x9f1   : > { %v3604_v17 = vpop.permute.xlu0 %3603 }
 0x9f2   : > { %11241 = vmatmul.mubr.bf16.gmra.mrb[156].mxu1 %v17832_v23 }
 0x9f3   : > { %3881 = vrot.lane.b32.xlu0 %v3598_v12, %s18815_s26  ;;  %3463 = vrot.lane.b32.xlu1 %v24586_v45, %s18812_s22 }
 0x9f4   : > { %11248 = vmatprep.mubr.bf16.mxu1 %v17836_v24  ;;  %v17886_v24 = vld [vmem:[%s24508_s7 + $0x1618] ss:$100 sps:$4 sm:$0xff]  }
 0x9f5   : > { %9499 = vmatmul.mubr.bf16.gmra.mrb[216].mxu0 %v17835_v2  ;;  %v3608_v47 = vpop.permute.xlu0 %3607  ;;  %v17890_v2 = vld [vmem:[%s24508_s7 + $0x16e4] ss:$100 sps:$4 sm:$0xff]  }
 0x9f6   : > { %9506 = vmatprep.mubr.bf16.mxu0 %v17839_v49  ;;  %v17889_v49 = vld [vmem:[%s24508_s7 + $0x1520] ss:$100 sps:$4 sm:$0xff]  }
 0x9f7   : > { %3883 = vrot.lane.b32.xlu0 %v3600_v46, %s18815_s26  ;;  %3465 = vrot.lane.b32.xlu1 %v24585_v26, %s18812_s22  ;;  %v17895_v46 = vld [vmem:[%s24508_s7 + $0x15ec] ss:$100 sps:$4 sm:$0xff]  }
 0x9fa   : > { %11249 = vmatmul.mubr.bf16.gmra.mrb[160].mxu1 %v17838_v7 }
 0x9fb   : > { %3885 = vrot.lane.b32.xlu0 %v3602_v6, %s18815_s26  ;;  %3467 = vrot.lane.b32.xlu1 %v24587_v21, %s18812_s22 }
 0x9fc   : > { %11256 = vmatprep.mubr.bf16.mxu1 %v17842_v19  ;;  %v17892_v19 = vld [vmem:[%s24508_s7 + $0x16e0] ss:$100 sps:$4 sm:$0xff]  }
 0x9fd   : > { %9507 = vmatmul.mubr.bf16.gmra.mrb[220].mxu0 %v17841_v13  ;;  %v17896_v13 = vld [vmem:[%s24508_s7 + $0x17ac] ss:$100 sps:$4 sm:$0xff]  }
 0x9fe   : > { %9514 = vmatprep.mubr.bf16.mxu0 %v17845_v40  ;;  %v17893_v40 = vld [vmem:[%s24508_s7 + $0x15e8] ss:$100 sps:$4 sm:$0xff]  }
 0x9ff   : > { %3887 = vrot.lane.b32.xlu0 %v3604_v17, %s18815_s26  ;;  %3643 = vrot.lane.b32.xlu1 %v20984_v14, %s18822_s19  ;;  %v17901_v17 = vld [vmem:[%s24508_s7 + $0x16b4] ss:$100 sps:$4 sm:$0xff]  }
 0xa02   : > { %11257 = vmatmul.mubr.bf16.gmra.mrb[164].mxu1 %v17844_v9 }
 0xa03   : > { %3889 = vrot.lane.b32.xlu0 %v3606_v30, %s18815_s26  ;;  %11264 = vmatprep.mubr.bf16.mxu1 %v17848_v5  ;;  %v17898_v5 = vld [vmem:[%s24508_s7 + $0x17a8] ss:$100 sps:$4 sm:$0xff]  }
 0xa05   : > { %9515 = vmatmul.mubr.bf16.gmra.mrb[224].mxu0 %v17847_v52  ;;  %v17902_v52 = vld [vmem:[%s24508_s7 + $0x1874] ss:$100 sps:$4 sm:$0xff]  }
 0xa06   : > { %9522 = vmatprep.mubr.bf16.mxu0 %v17851_v58  ;;  %v17899_v58 = vld [vmem:[%s24508_s7 + $0x16b0] ss:$100 sps:$4 sm:$0xff]  }
 0xa07   : > { %3891 = vrot.lane.b32.xlu0 %v3608_v47, %s18815_s26  ;;  %v17907_v47 = vld [vmem:[%s24508_s7 + $0x177c] ss:$100 sps:$4 sm:$0xff]  }
 0xa0a   : > { %11265 = vmatmul.mubr.bf16.gmra.mrb[168].mxu1 %v17850_v43  ;;  %v17904_v43 = vld [vmem:[%s24508_s7 + $0x1870] ss:$100 sps:$4 sm:$0xff]  }
 0xa0b   : > { %3895 = vrot.lane.b32.xlu0 %v20781_v16, %s18815_s26  ;;  %11272 = vmatprep.mubr.bf16.mxu1 %v17854_v42  ;;  %v17910_v42 = vld [vmem:[%s24508_s7 + $0x44] ss:$100 sps:$4 sm:$0xff]  }
 0xa0d   : > { %9523 = vmatmul.mubr.bf16.gmra.mrb[228].mxu0 %v17853_v27  ;;  %v17905_v27 = vld [vmem:[%s24508_s7 + $0x1778] ss:$100 sps:$4 sm:$0xff]  }
 0xa0e   : > { %9530 = vmatprep.mubr.bf16.mxu0 %v17857_v10  ;;  %v17913_v10 = vld [vmem:[%s24508_s7 + $0x1844] ss:$100 sps:$4 sm:$0xff]  }
 0xa0f   : > { %3899 = vrot.lane.b32.xlu0 %v20817_v50, %s18815_s26 }
 0xa10   : > { %v21638_v15 = vpop.permute.xlu1 %3869 }
 0xa12   : > { %11273 = vmatmul.mubr.bf16.gmra.mrb[172].mxu1 %v17856_v62 }
 0xa13   : > { %3451 = vrot.lane.b32.xlu0 %v24586_v45, %s18813_s21  ;;  %11280 = vmatprep.mubr.bf16.mxu1 %v17860_v35  ;;  %v17908_v35 = vld [vmem:[%s24508_s7 + $0x40] ss:$100 sps:$4 sm:$0xff]  }
 0xa14   : > { %v21648_v39 = vpop.permute.xlu1 %3873 }
 0xa15   : > { %9531 = vmatmul.mubr.bf16.gmra.mrb[232].mxu0 %v17859_v51  ;;  %v17914_v51 = vld [vmem:[%s24508_s7 + $0x10c] ss:$100 sps:$4 sm:$0xff]  }
 0xa16   : > { %9538 = vmatprep.mubr.bf16.mxu0 %v17863_v32 }
 0xa17   : > { %3455 = vrot.lane.b32.xlu0 %v24587_v21, %s18813_s21 }
 0xa18   : > { %v21658_v60 = vpop.permute.xlu1 %3421 }
 0xa1a   : > { %11281 = vmatmul.mubr.bf16.gmra.mrb[176].mxu1 %v17862_v37  ;;  %v17911_v37 = vld [vmem:[%s24508_s7 + $0x1840] ss:$100 sps:$4 sm:$0xff]  }
 0xa1b   : > { %3611 = vrot.lane.b32.xlu0 %v20781_v16, %s18813_s21  ;;  %11288 = vmatprep.mubr.bf16.mxu1 %v17866_v36  ;;  %v17919_v36 = vld [vmem:[%s24508_s7 + $0x14] ss:$100 sps:$4 sm:$0xff]  }
 0xa1c   : > { %v21668_v8 = vpop.permute.xlu1 %3423 }
 0xa1d   : > { %9539 = vmatmul.mubr.bf16.gmra.mrb[236].mxu0 %v17865_v1 }
 0xa1e   : > { %9546 = vmatprep.mubr.bf16.mxu0 %v17869_v38  ;;  %v17916_v38 = vld [vmem:[%s24508_s7 + $0x108] ss:$100 sps:$4 sm:$0xff]  }
 0xa1f   : > { %3615 = vrot.lane.b32.xlu0 %v20817_v50, %s18813_s21 }
 0xa20   : > { %v21678_v56 = vpop.permute.xlu1 %3425 }
 0xa22   : > { %11289 = vmatmul.mubr.bf16.gmra.mrb[180].mxu1 %v17868_v22  ;;  %v17920_v22 = vld [vmem:[%s24508_s7 + $0x1d4] ss:$100 sps:$4 sm:$0xff]  }
 0xa23   : > { %3619 = vrot.lane.b32.xlu0 %v20781_v16, %s18812_s22  ;;  %11296 = vmatprep.mubr.bf16.mxu1 %v17872_v55  ;;  %v17877_v16 = vld [vmem:[%s24508_s7 + $0x1390] ss:$100 sps:$4 sm:$0xff]  }
 0xa24   : > { %v21688_v25 = vpop.permute.xlu1 %3427 }
 0xa25   : > { %9547 = vmatmul.mubr.bf16.gmra.mrb[240].mxu0 %v17871_v31  ;;  %v17923_v31 = vld [vmem:[%s24508_s7 + $0xdc] ss:$100 sps:$4 sm:$0xff]  }
 0xa26   : > { %9554 = vmatprep.mubr.bf16.mxu0 %v17875_v11 }
 0xa27   : > { %3623 = vrot.lane.b32.xlu0 %v20817_v50, %s18812_s22 }
 0xa28   : > { %v21698_v18 = vpop.permute.xlu1 %3433 }
 0xa2a   : > { %11297 = vmatmul.mubr.bf16.gmra.mrb[184].mxu1 %v17874_v41  ;;  %v17922_v41 = vld [vmem:[%s24508_s7 + $0x1d0] ss:$100 sps:$4 sm:$0xff]  }
 0xa2b   : > { %3631 = vrot.lane.b32.xlu0 %v20958_v63, %s18821_s20  ;;  %11304 = vmatprep.mubr.bf16.mxu1 %v17878_v3 }
 0xa2c   : > { %v21708_v50 = vpop.permute.xlu1 %3435 }
 0xa2d   : > { %9555 = vmatmul.mubr.bf16.gmra.mrb[244].mxu0 %v17877_v16  ;;  %v17925_v16 = vld [vmem:[%s24508_s7 + $0xd8] ss:$100 sps:$4 sm:$0xff]  }
 0xa2e   : > { %9562 = vmatprep.mubr.bf16.mxu0 %v17881_v4 }
 0xa2f   : > { %3635 = vrot.lane.b32.xlu0 %v20984_v14, %s18821_s20 }
 0xa30   : > { %v21718_v33 = vpop.permute.xlu1 %3437 }
 0xa32   : > { %11305 = vmatmul.mubr.bf16.gmra.mrb[188].mxu1 %v17880_v29  ;;  %v17928_v29 = vld [vmem:[%s24508_s7 + $0x298] ss:$100 sps:$4 sm:$0xff]  }
 0xa33   : > { %3637 = vrot.lane.b32.xlu0 %v20963_v53, %s18822_s19  ;;  %11312 = vmatprep.mubr.bf16.mxu1 %v17884_v59 }
 0xa34   : > { %v21728_v23 = vpop.permute.xlu1 %3439 }
 0xa35   : > { %9563 = vmatmul.mubr.bf16.gmra.mrb[248].mxu0 %v17883_v20  ;;  %v17931_v20 = vld [vmem:[%s24508_s7 + $0x1a0] ss:$100 sps:$4 sm:$0xff]  }
 0xa36   : > { %9570 = vmatprep.mubr.bf16.mxu0 %v17887_v44 }
 0xa37   : > { %3639 = vrot.lane.b32.xlu0 %v20958_v63, %s18822_s19 }
 0xa38   : > { %v21738_v12 = vpop.permute.xlu1 %3893 }
 0xa3a   : > { %11313 = vmatmul.mubr.bf16.gmra.mrb[192].mxu1 %v17886_v24  ;;  %v17934_v24 = vld [vmem:[%s24508_s7 + $0x360] ss:$100 sps:$4 sm:$0xff]  }
 0xa3b   : > { %3641 = vrot.lane.b32.xlu0 %v20989_v61, %s18822_s19  ;;  %11320 = vmatprep.mubr.bf16.mxu1 %v17890_v2 }
 0xa3c   : > { %v21748_v7 = vpop.permute.xlu1 %3897 }
 0xa3d   : > { %9571 = vmatmul.mubr.bf16.gmra.mrb[252].mxu0 %v17889_v49  ;;  %v17937_v49 = vld [vmem:[%s24508_s7 + $0x268] ss:$100 sps:$4 sm:$0xff]  }
 0xa3e   : > { %9578 = vmatprep.mubr.bf16.mxu0 %v17895_v46 }
 0xa40   : > { %v21756_v6 = vpop.permute.xlu1 %3449 }
 0xa42   : > { %11321 = vmatmul.mubr.bf16.gmra.mrb[196].mxu1 %v17892_v19  ;;  %v17940_v19 = vld [vmem:[%s24508_s7 + $0x428] ss:$100 sps:$4 sm:$0xff]  }
 0xa43   : > { %11328 = vmatprep.mubr.bf16.mxu1 %v17896_v13 }
 0xa44   : > { %v21764_v9 = vpop.permute.xlu1 %3453 }
 0xa45   : > { %9579 = vmatmul.mubr.bf16.gmra.mrb[0].mxu0 %v17893_v40  ;;  %v17943_v40 = vld [vmem:[%s24508_s7 + $0x330] ss:$100 sps:$4 sm:$0xff]  }
 0xa46   : > { %9586 = vmatprep.mubr.bf16.mxu0 %v17901_v17 }
 0xa48   : > { %v3610_v30 = vpop.permute.xlu1 %3609 }
 0xa49   : > { %3901 = vrot.lane.b32.xlu0 %v3610_v30, %s18815_s26 }
 0xa4a   : > { %11329 = vmatmul.mubr.bf16.gmra.mrb[200].mxu1 %v17898_v5 }
 0xa4b   : > { %11336 = vmatprep.mubr.bf16.mxu1 %v17902_v52  ;;  %v17950_v52 = vld [vmem:[%s24508_s7 + $0x5bc] ss:$100 sps:$4 sm:$0xff]  }
 0xa4d   : > { %9587 = vmatmul.mubr.bf16.gmra.mrb[4].mxu0 %v17899_v58  ;;  %3469 = vrot.lane.b32.xlu0 %v24584_v34, %s18818_s13  ;;  %v3614_v17 = vpop.permute.xlu1 %3613 }
 0xa4e   : > { %9594 = vmatprep.mubr.bf16.mxu0 %v17907_v47  ;;  %v17953_v47 = vld [vmem:[%s24508_s7 + $0x4c4] ss:$100 sps:$4 sm:$0xff]  }
 0xa51   : > { %3471 = vrot.lane.b32.xlu0 %v24586_v45, %s18818_s13  ;;  %v3618_v30 = vpop.permute.xlu1 %3617 }
 0xa52   : > { %11337 = vmatmul.mubr.bf16.gmra.mrb[204].mxu1 %v17904_v43 }
 0xa53   : > { %11377 = vmatprep.mubr.bf16.mxu1 %v17910_v42 }
 0xa55   : > { %v3872_v62 = vpop.permute.xlu0 %3871  ;;  %9595 = vmatmul.mubr.bf16.gmra.mrb[8].mxu0 %v17905_v27  ;;  %3473 = vrot.lane.b32.xlu0 %v24585_v26, %s18818_s13  ;;  %v3622_v42 = vpop.permute.xlu1 %3621 }
 0xa56   : > { %9602 = vmatprep.mubr.bf16.mxu0 %v17913_v10  ;;  %v17959_v10 = vld [vmem:[%s24508_s7 + $0x58c] ss:$100 sps:$4 sm:$0xff]  }
 0xa59   : > { %v3876_v32 = vpop.permute.xlu0 %3875  ;;  %3475 = vrot.lane.b32.xlu0 %v24587_v21, %s18818_s13 }
 0xa5a   : > { %11378 = vmatmul.mubr.bf16.vlgmr.msra.gmra.mrb[208].mxu1 %v17908_v35 }
 0xa5b   : > { %11635 = vmatpush1.bf16.msra.mxu1 %v21638_v15  ;;  %11385 = vmatprep.mubr.bf16.mxu1 %v17914_v51  ;;  %v17917_v15 = vld [vmem:[%s24508_s7 + $0x10] ss:$100 sps:$4 sm:$0xff]  }
 0xa5c   : > { %11636 = vmatprep.subr.bf16.mxu1 %v24561_v0 }
 0xa5d   : > { %v3878_v1 = vpop.permute.xlu0 %3877  ;;  %9603 = vmatmul.mubr.bf16.gmra.mrb[12].mxu0 %v17911_v37 }
 0xa5e   : > { %9643 = vmatprep.mubr.bf16.mxu0 %v17919_v36  ;;  %v17965_v36 = vld [vmem:[%s24508_s7 + $0x654] ss:$100 sps:$4 sm:$0xff]  }
 0xa5f   : > { %11637 = vmatpush1.bf16.msra.mxu1 %v3872_v62  ;;  %v3630_v62 = vpop.permute.xlu1 %3629 }
 0xa60   : > { %11638 = vmatprep.subr.bf16.mxu1 %v24561_v0 }
 0xa61   : > { %v3880_v55 = vpop.permute.xlu0 %3879 }
 0xa62   : > { %11386 = vmatmul.mubr.bf16.gmra.mrb[212].mxu1 %v17916_v38  ;;  %v17964_v38 = vld [vmem:[%s24508_s7 + $0x748] ss:$100 sps:$4 sm:$0xff]  }
 0xa63   : > { %11639 = vmatpush1.bf16.msra.mxu1 %v21648_v39  ;;  %11393 = vmatprep.mubr.bf16.mxu1 %v17920_v22  ;;  %v17926_v39 = vld [vmem:[%s24508_s7 + $0x29c] ss:$100 sps:$4 sm:$0xff]   ;;  %v3634_v37 = vpop.permute.xlu1 %3633  ;;  %v17968_v22 = vld [vmem:[%s24508_s7 + $0x814] ss:$100 sps:$4 sm:$0xff]  }
 0xa64   : > { %11640 = vmatprep.subr.bf16.mxu1 %v24561_v0 }
 0xa65   : > { %v3882_v11 = vpop.permute.xlu0 %3881  ;;  %9644 = vmatmul.mubr.bf16.vlgmr.msra.gmra.mrb[144].mxu0 %v17917_v15  ;;  %v17967_v15 = vld [vmem:[%s24508_s7 + $0x650] ss:$100 sps:$4 sm:$0xff]  }
 0xa66   : > { %9901 = vmatpush1.bf16.msra.mxu0 %v21658_v60  ;;  %9651 = vmatprep.mubr.bf16.mxu0 %v17923_v31  ;;  %v17929_v60 = vld [vmem:[%s24508_s7 + $0x1a4] ss:$100 sps:$4 sm:$0xff]  }
 0xa67   : > { %11641 = vmatpush1.bf16.msra.mxu1 %v3876_v32  ;;  %9902 = vmatprep.subr.bf16.mxu0 %v24561_v0  ;;  %v17961_v32 = vld [vmem:[%s24508_s7 + $0x588] ss:$100 sps:$4 sm:$0xff]  }
 0xa68   : > { %11642 = vmatprep.subr.bf16.mxu1 %v24561_v0 }
 0xa69   : > { %v3884_v3 = vpop.permute.xlu0 %3883 }
 0xa6a   : > { %9903 = vmatpush1.bf16.msra.mxu0 %v21668_v8  ;;  %11394 = vmatmul.mubr.bf16.gmra.mrb[216].mxu1 %v17922_v41  ;;  %v17932_v8 = vld [vmem:[%s24508_s7 + $0x364] ss:$100 sps:$4 sm:$0xff]   ;;  %v17970_v41 = vld [vmem:[%s24508_s7 + $0x810] ss:$100 sps:$4 sm:$0xff]  }
 0xa6b   : > { %11643 = vmatpush1.bf16.msra.mxu1 %v3878_v1  ;;  %9904 = vmatprep.subr.bf16.mxu0 %v24561_v0 }
 0xa6c   : > { %11644 = vmatprep.subr.bf16.mxu1 %v24561_v0  ;;  %11401 = vmatprep.mubr.bf16.mxu1 %v17926_v39  ;;  %v17974_v39 = vld [vmem:[%s24508_s7 + $0x8dc] ss:$100 sps:$4 sm:$0xff]  }
 0xa6d   : > { %v3886_v4 = vpop.permute.xlu0 %3885  ;;  %9652 = vmatmul.mubr.bf16.gmra.mrb[148].mxu0 %v17925_v16  ;;  %v17973_v16 = vld [vmem:[%s24508_s7 + $0x718] ss:$100 sps:$4 sm:$0xff]  }
 0xa6e   : > { %9905 = vmatpush1.bf16.msra.mxu0 %v21678_v56  ;;  %9659 = vmatprep.mubr.bf16.mxu0 %v17929_v60  ;;  %v17935_v56 = vld [vmem:[%s24508_s7 + $0x26c] ss:$100 sps:$4 sm:$0xff]   ;;  %v17977_v60 = vld [vmem:[%s24508_s7 + $0x7e4] ss:$100 sps:$4 sm:$0xff]  }
 0xa6f   : > { %11645 = vmatpush1.bf16.msra.mxu1 %v3880_v55  ;;  %9906 = vmatprep.subr.bf16.mxu0 %v24561_v0  ;;  %v21975_v55 = vpop.permute.xlu1 %3461 }
 0xa70   : > { %11646 = vmatprep.subr.bf16.mxu1 %v24561_v0 }
 0xa71   : > { %v3888_v59 = vpop.permute.xlu0 %3887 }
 0xa72   : > { %9907 = vmatpush1.bf16.msra.mxu0 %v21688_v25  ;;  %11402 = vmatmul.mubr.bf16.gmra.mrb[220].mxu1 %v17928_v29  ;;  %v17938_v25 = vld [vmem:[%s24508_s7 + $0x42c] ss:$100 sps:$4 sm:$0xff]  }
 0xa73   : > { %11647 = vmatpush1.bf16.msra.mxu1 %v3882_v11  ;;  %9908 = vmatprep.subr.bf16.mxu0 %v24561_v0  ;;  %v17971_v11 = vld [vmem:[%s24508_s7 + $0x71c] ss:$100 sps:$4 sm:$0xff]  }
 0xa74   : > { %11648 = vmatprep.subr.bf16.mxu1 %v24561_v0  ;;  %11409 = vmatprep.mubr.bf16.mxu1 %v17932_v8  ;;  %v17982_v8 = vld [vmem:[%s24508_s7 + $0x9a4] ss:$100 sps:$4 sm:$0xff]  }
 0xa75   : > { %v3890_v44 = vpop.permute.xlu0 %3889  ;;  %9660 = vmatmul.mubr.bf16.gmra.mrb[152].mxu0 %v17931_v20 }
 0xa76   : > { %9909 = vmatpush1.bf16.msra.mxu0 %v21698_v18  ;;  %9667 = vmatprep.mubr.bf16.mxu0 %v17935_v56  ;;  %v17941_v18 = vld [vmem:[%s24508_s7 + $0x334] ss:$100 sps:$4 sm:$0xff]   ;;  %v17983_v56 = vld [vmem:[%s24508_s7 + $0x8ac] ss:$100 sps:$4 sm:$0xff]  }
 0xa77   : > { %11649 = vmatpush1.bf16.msra.mxu1 %v3884_v3  ;;  %9910 = vmatprep.subr.bf16.mxu0 %v24561_v0 }
 0xa78   : > { %11650 = vmatprep.subr.bf16.mxu1 %v24561_v0 }
 0xa79   : > { %v3892_v2 = vpop.permute.xlu0 %3891 }
 0xa7a   : > { %9911 = vmatpush1.bf16.msra.mxu0 %v21708_v50  ;;  %11410 = vmatmul.mubr.bf16.gmra.mrb[224].mxu1 %v17934_v24  ;;  %v17944_v50 = vld [vmem:[%s24508_s7 + $0x4f4] ss:$100 sps:$4 sm:$0xff]   ;;  %v17980_v24 = vld [vmem:[%s24508_s7 + $0x9a0] ss:$100 sps:$4 sm:$0xff]  }
 0xa7b   : > { %11651 = vmatpush1.bf16.msra.mxu1 %v3886_v4  ;;  %9912 = vmatprep.subr.bf16.mxu0 %v24561_v0 }
 0xa7c   : > { %11652 = vmatprep.subr.bf16.mxu1 %v24561_v0  ;;  %11417 = vmatprep.mubr.bf16.mxu1 %v17938_v25  ;;  %v17988_v25 = vld [vmem:[%s24508_s7 + $0xa6c] ss:$100 sps:$4 sm:$0xff]  }
 0xa7d   : > { %v3896_v46 = vpop.permute.xlu0 %3895  ;;  %9668 = vmatmul.mubr.bf16.gmra.mrb[156].mxu0 %v17937_v49  ;;  %v17985_v49 = vld [vmem:[%s24508_s7 + $0x8a8] ss:$100 sps:$4 sm:$0xff]  }
 0xa7e   : > { %9913 = vmatpush1.bf16.msra.mxu0 %v21718_v33  ;;  %9675 = vmatprep.mubr.bf16.mxu0 %v17941_v18  ;;  %v17947_v33 = vld [vmem:[%s24508_s7 + $0x3fc] ss:$100 sps:$4 sm:$0xff]   ;;  %v17989_v18 = vld [vmem:[%s24508_s7 + $0x974] ss:$100 sps:$4 sm:$0xff]  }
 0xa7f   : > { %11653 = vmatpush1.bf16.msra.mxu1 %v3888_v59  ;;  %9914 = vmatprep.subr.bf16.mxu0 %v24561_v0  ;;  %v17979_v59 = vld [vmem:[%s24508_s7 + $0x7e0] ss:$100 sps:$4 sm:$0xff]  }
 0xa80   : > { %11654 = vmatprep.subr.bf16.mxu1 %v24561_v0 }
 0xa81   : > { %v3900_v13 = vpop.permute.xlu0 %3899 }
 0xa82   : > { %9915 = vmatpush1.bf16.msra.mxu0 %v21728_v23  ;;  %11418 = vmatmul.mubr.bf16.gmra.mrb[228].mxu1 %v17940_v19  ;;  %v17946_v23 = vld [vmem:[%s24508_s7 + $0x4f0] ss:$100 sps:$4 sm:$0xff]  }
 0xa83   : > { %11655 = vmatpush1.bf16.msra.mxu1 %v3890_v44  ;;  %9916 = vmatprep.subr.bf16.mxu0 %v24561_v0 }
 0xa84   : > { %11656 = vmatprep.subr.bf16.mxu1 %v24561_v0  ;;  %11425 = vmatprep.mubr.bf16.mxu1 %v17944_v50  ;;  %v17986_v50 = vld [vmem:[%s24508_s7 + $0xa68] ss:$100 sps:$4 sm:$0xff]  }
 0xa85   : > { %v21900_v5 = vpop.permute.xlu0 %3451  ;;  %9676 = vmatmul.mubr.bf16.gmra.mrb[160].mxu0 %v17943_v40  ;;  %v17991_v40 = vld [vmem:[%s24508_s7 + $0x970] ss:$100 sps:$4 sm:$0xff]  }
 0xa86   : > { %9917 = vmatpush1.bf16.msra.mxu0 %v24584_v34  ;;  %9683 = vmatprep.mubr.bf16.mxu0 %v17947_v33  ;;  %v17949_v34 = vld [vmem:[%s24508_s7 + $0x3f8] ss:$100 sps:$4 sm:$0xff]  }
 0xa87   : > { %11657 = vmatpush1.bf16.msra.mxu1 %v3892_v2  ;;  %9918 = vmatprep.subr.bf16.mxu0 %v24561_v0  ;;  %v17995_v33 = vld [vmem:[%s24508_s7 + $0xa3c] ss:$100 sps:$4 sm:$0xff]  }
 0xa88   : > { %11658 = vmatprep.subr.bf16.mxu1 %v24561_v0 }
 0xa89   : > { %v21911_v58 = vpop.permute.xlu0 %3455 }
 0xa8a   : > { %9919 = vmatpush1.bf16.msra.mxu0 %v24586_v45  ;;  %11426 = vmatmul.mubr.bf16.gmra.mrb[232].mxu1 %v17946_v23  ;;  %v17952_v45 = vld [vmem:[%s24508_s7 + $0x5b8] ss:$100 sps:$4 sm:$0xff]   ;;  %v17994_v23 = vld [vmem:[%s24508_s7 + $0xb30] ss:$100 sps:$4 sm:$0xff]  }
 0xa8b   : > { %11659 = vmatpush1.bf16.msra.mxu1 %v21738_v12  ;;  %9920 = vmatprep.subr.bf16.mxu0 %v24561_v0  ;;  %v17956_v12 = vld [vmem:[%s24508_s7 + $0x684] ss:$100 sps:$4 sm:$0xff]  }
 0xa8c   : > { %11660 = vmatprep.subr.bf16.mxu1 %v24561_v0  ;;  %11433 = vmatprep.mubr.bf16.mxu1 %v17950_v52  ;;  %v17997_v52 = vld [vmem:[%s24508_s7 + $0xa38] ss:$100 sps:$4 sm:$0xff]  }
 0xa8d   : > { %v3612_v43 = vpop.permute.xlu0 %3611  ;;  %9684 = vmatmul.mubr.bf16.gmra.mrb[164].mxu0 %v17949_v34 }
 0xa8e   : > { %3903 = vrot.lane.b32.xlu1 %v3612_v43, %s18815_s26  ;;  %9921 = vmatpush1.bf16.msra.mxu0 %v24585_v26  ;;  %v17955_v26 = vld [vmem:[%s24508_s7 + $0x4c0] ss:$100 sps:$4 sm:$0xff]  }
 0xa8f   : > { %11661 = vmatpush1.bf16.msra.mxu1 %v3896_v46  ;;  %9922 = vmatprep.subr.bf16.mxu0 %v24561_v0  ;;  %v18003_v43 = vld [vmem:[%s24508_s7 + $0xb00] ss:$100 sps:$4 sm:$0xff]  }
 0xa90   : > { %11662 = vmatprep.subr.bf16.mxu1 %v24561_v0  ;;  %9691 = vmatprep.mubr.bf16.mxu0 %v17953_v47  ;;  %v18000_v47 = vld [vmem:[%s24508_s7 + $0xbf8] ss:$100 sps:$4 sm:$0xff]  }
 0xa91   : > { %v3616_v27 = vpop.permute.xlu0 %3615 }
 0xa92   : > { %3905 = vrot.lane.b32.xlu1 %v3614_v17, %s18815_s26  ;;  %9923 = vmatpush1.bf16.msra.mxu0 %v24587_v21  ;;  %v17958_v21 = vld [vmem:[%s24508_s7 + $0x680] ss:$100 sps:$4 sm:$0xff]  }
 0xa93   : > { %11434 = vmatmul.mubr.bf16.gmra.mrb[236].mxu1 %v17952_v45  ;;  %9924 = vmatprep.subr.bf16.mxu0 %v24561_v0  ;;  %v18007_v45 = vld [vmem:[%s24508_s7 + $0xbcc] ss:$100 sps:$4 sm:$0xff]  }
 0xa94   : > { %11663 = vmatpush1.bf16.msra.mxu1 %v21748_v7  ;;  %11441 = vmatprep.mubr.bf16.mxu1 %v17956_v12  ;;  %v17962_v7 = vld [vmem:[%s24508_s7 + $0x74c] ss:$100 sps:$4 sm:$0xff]   ;;  %v18006_v12 = vld [vmem:[%s24508_s7 + $0xcc0] ss:$100 sps:$4 sm:$0xff]  }
 0xa95   : > { %v3620_v35 = vpop.permute.xlu0 %3619  ;;  %11664 = vmatprep.subr.bf16.mxu1 %v24561_v0  ;;  %9692 = vmatmul.mubr.bf16.gmra.mrb[168].mxu0 %v17955_v26  ;;  %v18010_v26 = vld [vmem:[%s24508_s7 + $0xd8c] ss:$100 sps:$4 sm:$0xff]  }
 0xa96   : > { %3907 = vrot.lane.b32.xlu1 %v3616_v27, %s18815_s26  ;;  %3911 = vrot.lane.b32.xlu0 %v3620_v35, %s18815_s26  ;;  %v18009_v27 = vld [vmem:[%s24508_s7 + $0xbc8] ss:$100 sps:$4 sm:$0xff]   ;;  %v18016_v35 = vld [vmem:[%s24508_s7 + $0xe54] ss:$100 sps:$4 sm:$0xff]  }
 0xa97   : > { %9925 = vmatpush1.bf16.msra.mxu0 %v21756_v6  ;;  %9699 = vmatprep.mubr.bf16.mxu0 %v17959_v10  ;;  %v18013_v10 = vld [vmem:[%s24508_s7 + $0xc94] ss:$100 sps:$4 sm:$0xff]  }
 0xa98   : > { %11665 = vmatpush1.bf16.msra.mxu1 %v3900_v13  ;;  %9926 = vmatprep.subr.bf16.mxu0 %v24561_v0  ;;  %v17992_v13 = vld [vmem:[%s24508_s7 + $0xb34] ss:$100 sps:$4 sm:$0xff]  }
 0xa99   : > { %v3624_v51 = vpop.permute.xlu0 %3623  ;;  %11923 = vmatprep.subr.bf16.mxu1 %v24561_v0 }
 0xa9a   : > { %3909 = vrot.lane.b32.xlu1 %v3618_v30, %s18815_s26  ;;  %3915 = vrot.lane.b32.xlu0 %v3624_v51, %s18815_s26  ;;  %v17998_v30 = vld [vmem:[%s24508_s7 + $0xbfc] ss:$100 sps:$4 sm:$0xff]   ;;  %v18018_v51 = vld [vmem:[%s24508_s7 + $0xe50] ss:$100 sps:$4 sm:$0xff]  }
 0xa9b   : > { %9927 = vmatpush1.bf16.msra.mxu0 %v21900_v5  ;;  %11442 = vmatmul.mubr.bf16.gmra.mrb[240].mxu1 %v17958_v21  ;;  %v18015_v21 = vld [vmem:[%s24508_s7 + $0xc90] ss:$100 sps:$4 sm:$0xff]  }
 0xa9c   : > { %9928 = vmatprep.subr.bf16.mxu0 %v24561_v0  ;;  %11449 = vmatprep.mubr.bf16.mxu1 %v17962_v7  ;;  %v18019_v7 = vld [vmem:[%s24508_s7 + $0xd5c] ss:$100 sps:$4 sm:$0xff]  }
 0xa9d   : > { %v3632_v1 = vpop.permute.xlu0 %3631  ;;  %9700 = vmatmul.mubr.bf16.gmra.mrb[172].mxu0 %v17961_v32  ;;  %v18022_v32 = vld [vmem:[%s24508_s7 + $0xf1c] ss:$100 sps:$4 sm:$0xff]  }
 0xa9e   : > { %3913 = vrot.lane.b32.xlu1 %v3622_v42, %s18815_s26  ;;  %3917 = vrot.lane.b32.xlu0 %v3630_v62, %s18815_s26  ;;  %v18004_v42 = vld [vmem:[%s24508_s7 + $0xcc4] ss:$100 sps:$4 sm:$0xff]  }
 0xa9f   : > { %9929 = vmatpush1.bf16.msra.mxu0 %v21764_v9  ;;  %9707 = vmatprep.mubr.bf16.mxu0 %v17965_v36  ;;  %v18012_v62 = vld [vmem:[%s24508_s7 + $0xd88] ss:$100 sps:$4 sm:$0xff]  }
 0xaa0   : > { %9930 = vmatprep.subr.bf16.mxu0 %v24561_v0  ;;  %v18025_v36 = vld [vmem:[%s24508_s7 + $0xe24] ss:$100 sps:$4 sm:$0xff]  }
 0xaa1   : > { %v3636_v31 = vpop.permute.xlu0 %3635 }
 0xaa2   : > { %3669 = vrot.lane.b32.xlu1 %v21756_v6, %s18812_s22  ;;  %3919 = vrot.lane.b32.xlu0 %v3632_v1, %s18815_s26  ;;  %v21991_v6 = vpop.permute.xlu1 %3463  ;;  %v18024_v1 = vld [vmem:[%s24508_s7 + $0xf18] ss:$100 sps:$4 sm:$0xff]  }
 0xaa3   : > { %9931 = vmatpush1.bf16.msra.mxu0 %v21911_v58  ;;  %11450 = vmatmul.mubr.bf16.gmra.mrb[244].mxu1 %v17964_v38  ;;  %v18028_v38 = vld [vmem:[%s24508_s7 + $0xfe4] ss:$100 sps:$4 sm:$0xff]  }
 0xaa4   : > { %11457 = vmatprep.mubr.bf16.mxu1 %v17968_v22  ;;  %10189 = vmatprep.subr.bf16.mxu0 %v24561_v0  ;;  %v18027_v22 = vld [vmem:[%s24508_s7 + $0xe20] ss:$100 sps:$4 sm:$0xff]  }
 0xaa5   : > { %9708 = vmatmul.mubr.bf16.gmra.mrb[176].mxu0 %v17967_v15  ;;  %v3638_v3 = vpop.permute.xlu0 %3637  ;;  %v18031_v15 = vld [vmem:[%s24508_s7 + $0xeec] ss:$100 sps:$4 sm:$0xff]  }
 0xaa6   : > { %3671 = vrot.lane.b32.xlu1 %v21900_v5, %s18812_s22  ;;  %3921 = vrot.lane.b32.xlu0 %v3634_v37, %s18815_s26  ;;  %v22008_v4 = vpop.permute.xlu1 %3465  ;;  %v18021_v37 = vld [vmem:[%s24508_s7 + $0xd58] ss:$100 sps:$4 sm:$0xff]  }
 0xaa7   : > { %9715 = vmatprep.mubr.bf16.mxu0 %v17971_v11  ;;  %v18034_v11 = vld [vmem:[%s24508_s7 + $0x10ac] ss:$100 sps:$4 sm:$0xff]  }
 0xaa9   : > { %v3640_v29 = vpop.permute.xlu0 %3639 }
 0xaaa   : > { %3673 = vrot.lane.b32.xlu1 %v21764_v9, %s18812_s22  ;;  %3923 = vrot.lane.b32.xlu0 %v3636_v31, %s18815_s26  ;;  %v17976_v9 = vld [vmem:[%s24508_s7 + $0x8d8] ss:$100 sps:$4 sm:$0xff]   ;;  %v22025_v20 = vpop.permute.xlu1 %3467  ;;  %v18030_v31 = vld [vmem:[%s24508_s7 + $0xfe0] ss:$100 sps:$4 sm:$0xff]  }
 0xaab   : > { %11458 = vmatmul.mubr.bf16.gmra.mrb[248].mxu1 %v17970_v41  ;;  %v18033_v41 = vld [vmem:[%s24508_s7 + $0xee8] ss:$100 sps:$4 sm:$0xff]  }
 0xaac   : > { %11465 = vmatprep.mubr.bf16.mxu1 %v17974_v39  ;;  %v18037_v39 = vld [vmem:[%s24508_s7 + $0xfb4] ss:$100 sps:$4 sm:$0xff]  }
 0xaad   : > { %9716 = vmatmul.mubr.bf16.gmra.mrb[180].mxu0 %v17973_v16  ;;  %v3642_v44 = vpop.permute.xlu0 %3641 }
 0xaae   : > { %3675 = vrot.lane.b32.xlu1 %v21911_v58, %s18812_s22  ;;  %3925 = vrot.lane.b32.xlu0 %v3638_v3, %s18815_s26  ;;  %v3644_v2 = vpop.permute.xlu1 %3643  ;;  %v18001_v58 = vld [vmem:[%s24508_s7 + $0xb04] ss:$100 sps:$4 sm:$0xff]  }
 0xaaf   : > { %9723 = vmatprep.mubr.bf16.mxu0 %v17977_v60  ;;  %v18036_v3 = vld [vmem:[%s24508_s7 + $0x10a8] ss:$100 sps:$4 sm:$0xff]   ;;  %v18040_v60 = vld [vmem:[%s24508_s7 + $0x1174] ss:$100 sps:$4 sm:$0xff]  }
 0xab2   : > { %3677 = vrot.lane.b32.xlu1 %v21975_v55, %s18812_s22  ;;  %3927 = vrot.lane.b32.xlu0 %v3640_v29, %s18815_s26  ;;  %v18039_v29 = vld [vmem:[%s24508_s7 + $0xfb0] ss:$100 sps:$4 sm:$0xff]  }
 0xab3   : > { %11466 = vmatmul.mubr.bf16.gmra.mrb[252].mxu1 %v17976_v9  ;;  %v18043_v9 = vld [vmem:[%s24508_s7 + $0x107c] ss:$100 sps:$4 sm:$0xff]  }
 0xab4   : > { %11473 = vmatprep.mubr.bf16.mxu1 %v17982_v8 }
 0xab5   : > { %9724 = vmatmul.mubr.bf16.gmra.mrb[184].mxu0 %v17979_v59  ;;  %v18042_v59 = vld [vmem:[%s24508_s7 + $0x1170] ss:$100 sps:$4 sm:$0xff]  }
 0xab6   : > { %3679 = vrot.lane.b32.xlu1 %v21991_v6, %s18812_s22  ;;  %3929 = vrot.lane.b32.xlu0 %v3642_v44, %s18815_s26 }
 0xab7   : > { %9731 = vmatprep.mubr.bf16.mxu0 %v17983_v56 }
 0xaba   : > { %3681 = vrot.lane.b32.xlu1 %v22008_v4, %s18812_s22  ;;  %3931 = vrot.lane.b32.xlu0 %v3644_v2, %s18815_s26  ;;  %v18049_v2 = vld [vmem:[%s24508_s7 + $0x1144] ss:$100 sps:$4 sm:$0xff]  }
 0xabb   : > { %11474 = vmatmul.mubr.bf16.gmra.mrb[0].mxu1 %v17980_v24  ;;  %v22048_v46 = vpop.permute.xlu0 %3901  ;;  %v18046_v24 = vld [vmem:[%s24508_s7 + $0x123c] ss:$100 sps:$4 sm:$0xff]  }
 0xabc   : > { %11481 = vmatprep.mubr.bf16.mxu1 %v17988_v25  ;;  %v18045_v25 = vld [vmem:[%s24508_s7 + $0x1078] ss:$100 sps:$4 sm:$0xff]  }
 0xabd   : > { %9732 = vmatmul.mubr.bf16.gmra.mrb[188].mxu0 %v17985_v49 }
 0xabe   : > { %3683 = vrot.lane.b32.xlu1 %v22025_v20, %s18812_s22  ;;  %9739 = vmatprep.mubr.bf16.mxu0 %v17989_v18 }
 0xabf   : > { %v3470_v19 = vpop.permute.xlu0 %3469 }
 0xac2   : > { %3685 = vrot.lane.b32.xlu1 %v3470_v19, %s18812_s22  ;;  %v18048_v19 = vld [vmem:[%s24508_s7 + $0x1238] ss:$100 sps:$4 sm:$0xff]  }
 0xac3   : > { %11482 = vmatmul.mubr.bf16.gmra.mrb[4].mxu1 %v17986_v50  ;;  %v3472_v17 = vpop.permute.xlu0 %3471 }
 0xac4   : > { %3687 = vrot.lane.b32.xlu0 %v3472_v17, %s18812_s22  ;;  %11489 = vmatprep.mubr.bf16.mxu1 %v17992_v13  ;;  %v18055_v17 = vld [vmem:[%s24508_s7 + $0x120c] ss:$100 sps:$4 sm:$0xff]  }
 0xac5   : > { %9740 = vmatmul.mubr.bf16.gmra.mrb[192].mxu0 %v17991_v40  ;;  %v18052_v40 = vld [vmem:[%s24508_s7 + $0x1304] ss:$100 sps:$4 sm:$0xff]  }
 0xac6   : > { %9747 = vmatprep.mubr.bf16.mxu0 %v17995_v33  ;;  %v18051_v33 = vld [vmem:[%s24508_s7 + $0x1140] ss:$100 sps:$4 sm:$0xff]  }
 0xac7   : > { %v3474_v5 = vpop.permute.xlu0 %3473 }
 0xac8   : > { %3689 = vrot.lane.b32.xlu1 %v3474_v5, %s18812_s22 }
 0xacb   : > { %11490 = vmatmul.mubr.bf16.gmra.mrb[136].mxu1 %v17994_v23  ;;  %v3476_v34 = vpop.permute.xlu0 %3475 }
 0xacc   : > { %3645 = vrot.lane.b32.xlu1 %v20963_v53, %s18816_s14  ;;  %3691 = vrot.lane.b32.xlu0 %v3476_v34, %s18812_s22  ;;  %v18058_v34 = vld [vmem:[%s24508_s7 + $0x13cc] ss:$100 sps:$4 sm:$0xff]  }
 0xacd   : > { %9748 = vmatmul.mubr.bf16.gmra.mrb[196].mxu0 %v17997_v52  ;;  %11497 = vmatprep.mubr.bf16.mxu1 %v17998_v30  ;;  %v18054_v52 = vld [vmem:[%s24508_s7 + $0x1300] ss:$100 sps:$4 sm:$0xff]  }
 0xace   : > { %9755 = vmatprep.mubr.bf16.mxu0 %v18001_v58 }
 0xad0   : > { %3649 = vrot.lane.b32.xlu1 %v20989_v61, %s18816_s14  ;;  %3647 = vrot.lane.b32.xlu0 %v20958_v63, %s18816_s14 }
 0xad3   : > { %11498 = vmatmul.mubr.bf16.gmra.mrb[140].mxu1 %v18000_v47  ;;  %v18057_v47 = vld [vmem:[%s24508_s7 + $0x1208] ss:$100 sps:$4 sm:$0xff]  }
 0xad4   : > { %3653 = vrot.lane.b32.xlu1 %v20963_v53, %s24588_s16  ;;  %3651 = vrot.lane.b32.xlu0 %v20984_v14, %s18816_s14 }
 0xad5   : > { %9756 = vmatmul.mubr.bf16.gmra.mrb[200].mxu0 %v18003_v43  ;;  %11505 = vmatprep.mubr.bf16.mxu1 %v18004_v42  ;;  %v18061_v43 = vld [vmem:[%s24508_s7 + $0x12d4] ss:$100 sps:$4 sm:$0xff]  }
 0xad6   : > { %9763 = vmatprep.mubr.bf16.mxu0 %v18007_v45 }
 0xad8   : > { %3657 = vrot.lane.b32.xlu1 %v20989_v61, %s24588_s16  ;;  %3655 = vrot.lane.b32.xlu0 %v20958_v63, %s24588_s16 }
 0xadb   : > { %11506 = vmatmul.mubr.bf16.gmra.mrb[144].mxu1 %v18006_v12  ;;  %v18060_v12 = vld [vmem:[%s24508_s7 + $0x13c8] ss:$100 sps:$4 sm:$0xff]  }
 0xadc   : > { %3661 = vrot.lane.b32.xlu1 %v20963_v53, %s18813_s21  ;;  %3659 = vrot.lane.b32.xlu0 %v20984_v14, %s24588_s16 }
 0xadd   : > { %9764 = vmatmul.mubr.bf16.gmra.mrb[204].mxu0 %v18009_v27  ;;  %11513 = vmatprep.mubr.bf16.mxu1 %v18010_v26  ;;  %v18064_v26 = vld [vmem:[%s24508_s7 + $0x1494] ss:$100 sps:$4 sm:$0xff]  }
 0xade   : > { %9771 = vmatprep.mubr.bf16.mxu0 %v18013_v10  ;;  %v18063_v10 = vld [vmem:[%s24508_s7 + $0x12d0] ss:$100 sps:$4 sm:$0xff]  }
 0xae0   : > { %3665 = vrot.lane.b32.xlu1 %v20989_v61, %s18813_s21  ;;  %3663 = vrot.lane.b32.xlu0 %v20958_v63, %s18813_s21 }
 0xae3   : > { %11514 = vmatmul.mubr.bf16.gmra.mrb[148].mxu1 %v18012_v62  ;;  %v18067_v62 = vld [vmem:[%s24508_s7 + $0x139c] ss:$100 sps:$4 sm:$0xff]  }
 0xae4   : > { %3667 = vrot.lane.b32.xlu1 %v20984_v14, %s18813_s21  ;;  %11521 = vmatprep.mubr.bf16.mxu1 %v18016_v35 }
 0xae5   : > { %9772 = vmatmul.mubr.bf16.gmra.mrb[208].mxu0 %v18015_v21 }
 0xae6   : > { %9779 = vmatprep.mubr.bf16.mxu0 %v18019_v7  ;;  %v18066_v7 = vld [vmem:[%s24508_s7 + $0x1490] ss:$100 sps:$4 sm:$0xff]  }
 0xaeb   : > { %11522 = vmatmul.mubr.bf16.gmra.mrb[152].mxu1 %v18018_v51 }
 0xaec   : > { %11529 = vmatprep.mubr.bf16.mxu1 %v18022_v32  ;;  %v18070_v32 = vld [vmem:[%s24508_s7 + $0x155c] ss:$100 sps:$4 sm:$0xff]  }
 0xaed   : > { %9780 = vmatmul.mubr.bf16.gmra.mrb[212].mxu0 %v18021_v37  ;;  %v18069_v37 = vld [vmem:[%s24508_s7 + $0x1398] ss:$100 sps:$4 sm:$0xff]  }
 0xaee   : > { %9787 = vmatprep.mubr.bf16.mxu0 %v18025_v36 }
 0xaf3   : > { %11530 = vmatmul.mubr.bf16.gmra.mrb[156].mxu1 %v18024_v1  ;;  %v18073_v1 = vld [vmem:[%s24508_s7 + $0x1464] ss:$100 sps:$4 sm:$0xff]  }
 0xaf4   : > { %11537 = vmatprep.mubr.bf16.mxu1 %v18028_v38 }
 0xaf5   : > { %9788 = vmatmul.mubr.bf16.gmra.mrb[216].mxu0 %v18027_v22  ;;  %v18072_v22 = vld [vmem:[%s24508_s7 + $0x1558] ss:$100 sps:$4 sm:$0xff]  }
 0xaf6   : > { %9795 = vmatprep.mubr.bf16.mxu0 %v18031_v15 }
 0xafb   : > { %11538 = vmatmul.mubr.bf16.gmra.mrb[160].mxu1 %v18030_v31 }
 0xafc   : > { %11545 = vmatprep.mubr.bf16.mxu1 %v18034_v11  ;;  %v18076_v11 = vld [vmem:[%s24508_s7 + $0x1624] ss:$100 sps:$4 sm:$0xff]  }
 0xafd   : > { %9796 = vmatmul.mubr.bf16.gmra.mrb[220].mxu0 %v18033_v41  ;;  %v18075_v41 = vld [vmem:[%s24508_s7 + $0x1460] ss:$100 sps:$4 sm:$0xff]  }
 0xafe   : > { %9803 = vmatprep.mubr.bf16.mxu0 %v18037_v39  ;;  %v18079_v39 = vld [vmem:[%s24508_s7 + $0x152c] ss:$100 sps:$4 sm:$0xff]  }
 0xb00   : > { %v22179_v16 = vpop.permute.xlu1 %3903 }
 0xb03   : > { %11546 = vmatmul.mubr.bf16.gmra.mrb[164].mxu1 %v18036_v3 }
 0xb04   : > { %v22190_v8 = vpop.permute.xlu1 %3905  ;;  %11553 = vmatprep.mubr.bf16.mxu1 %v18040_v60 }
 0xb05   : > { %9804 = vmatmul.mubr.bf16.gmra.mrb[224].mxu0 %v18039_v29  ;;  %v18078_v29 = vld [vmem:[%s24508_s7 + $0x1620] ss:$100 sps:$4 sm:$0xff]  }
 0xb06   : > { %9811 = vmatprep.mubr.bf16.mxu0 %v18043_v9  ;;  %v18082_v9 = vld [vmem:[%s24508_s7 + $0x16ec] ss:$100 sps:$4 sm:$0xff]  }
 0xb08   : > { %v22195_v56 = vpop.permute.xlu1 %3907  ;;  %v22197_v44 = vpop.permute.xlu0 %3911 }
 0xb0b   : > { %11554 = vmatmul.mubr.bf16.gmra.mrb[168].mxu1 %v18042_v59  ;;  %v18081_v59 = vld [vmem:[%s24508_s7 + $0x1528] ss:$100 sps:$4 sm:$0xff]  }
 0xb0c   : > { %v22208_v49 = vpop.permute.xlu1 %3909  ;;  %v22210_v18 = vpop.permute.xlu0 %3915  ;;  %11561 = vmatprep.mubr.bf16.mxu1 %v18046_v24 }
 0xb0d   : > { %9812 = vmatmul.mubr.bf16.gmra.mrb[228].mxu0 %v18045_v25 }
 0xb0e   : > { %9819 = vmatprep.mubr.bf16.mxu0 %v18049_v2  ;;  %v18087_v2 = vld [vmem:[%s24508_s7 + $0x15f4] ss:$100 sps:$4 sm:$0xff]  }
 0xb10   : > { %v22215_v50 = vpop.permute.xlu1 %3913  ;;  %v22217_v13 = vpop.permute.xlu0 %3917 }
 0xb13   : > { %11562 = vmatmul.mubr.bf16.gmra.mrb[172].mxu1 %v18048_v19 }
 0xb14   : > { %v22228_v5 = vpop.permute.xlu1 %3669  ;;  %v22230_v23 = vpop.permute.xlu0 %3919  ;;  %11569 = vmatprep.mubr.bf16.mxu1 %v18052_v40 }
 0xb15   : > { %9820 = vmatmul.mubr.bf16.gmra.mrb[232].mxu0 %v18051_v33  ;;  %v18084_v33 = vld [vmem:[%s24508_s7 + $0x16e8] ss:$100 sps:$4 sm:$0xff]  }
 0xb16   : > { %9827 = vmatprep.mubr.bf16.mxu0 %v18055_v17  ;;  %v18088_v17 = vld [vmem:[%s24508_s7 + $0x17b4] ss:$100 sps:$4 sm:$0xff]  }
 0xb18   : > { %v22235_v30 = vpop.permute.xlu1 %3671  ;;  %v22237_v58 = vpop.permute.xlu0 %3921 }
 0xb1b   : > { %11570 = vmatmul.mubr.bf16.gmra.mrb[176].mxu1 %v18054_v52  ;;  %v18085_v52 = vld [vmem:[%s24508_s7 + $0x15f0] ss:$100 sps:$4 sm:$0xff]  }
 0xb1c   : > { %v22248_v42 = vpop.permute.xlu1 %3673  ;;  %11577 = vmatprep.mubr.bf16.mxu1 %v18058_v34  ;;  %v22250_v45 = vpop.permute.xlu0 %3923 }
 0xb1d   : > { %9828 = vmatmul.mubr.bf16.gmra.mrb[236].mxu0 %v18057_v47 }
 0xb1e   : > { %9835 = vmatprep.mubr.bf16.mxu0 %v18061_v43  ;;  %v18093_v43 = vld [vmem:[%s24508_s7 + $0x16bc] ss:$100 sps:$4 sm:$0xff]  }
 0xb20   : > { %v22255_v27 = vpop.permute.xlu1 %3675  ;;  %v22266_v35 = vpop.permute.xlu0 %3925 }
 0xb23   : > { %11578 = vmatmul.mubr.bf16.gmra.mrb[180].mxu1 %v18060_v12 }
 0xb24   : > { %v22268_v21 = vpop.permute.xlu1 %3677  ;;  %11585 = vmatprep.mubr.bf16.mxu1 %v18064_v26  ;;  %v22281_v36 = vpop.permute.xlu0 %3927 }
 0xb25   : > { %9836 = vmatmul.mubr.bf16.gmra.mrb[240].mxu0 %v18063_v10  ;;  %v18090_v10 = vld [vmem:[%s24508_s7 + $0x17b0] ss:$100 sps:$4 sm:$0xff]  }
 0xb26   : > { %9843 = vmatprep.mubr.bf16.mxu0 %v18067_v62  ;;  %v18094_v62 = vld [vmem:[%s24508_s7 + $0x187c] ss:$100 sps:$4 sm:$0xff]  }
 0xb28   : > { %v22273_v51 = vpop.permute.xlu1 %3679  ;;  %v22291_v15 = vpop.permute.xlu0 %3929 }
 0xb2b   : > { %11586 = vmatmul.mubr.bf16.gmra.mrb[184].mxu1 %v18066_v7  ;;  %v18091_v7 = vld [vmem:[%s24508_s7 + $0x16b8] ss:$100 sps:$4 sm:$0xff]  }
 0xb2c   : > { %v22286_v38 = vpop.permute.xlu1 %3681  ;;  %11593 = vmatprep.mubr.bf16.mxu1 %v18070_v32  ;;  %v22304_v3 = vpop.permute.xlu0 %3931 }
 0xb2d   : > { %9844 = vmatmul.mubr.bf16.gmra.mrb[244].mxu0 %v18069_v37 }
 0xb2e   : > { %9851 = vmatprep.mubr.bf16.mxu0 %v18073_v1  ;;  %v18099_v1 = vld [vmem:[%s24508_s7 + $0x1784] ss:$100 sps:$4 sm:$0xff]  }
 0xb30   : > { %v22293_v31 = vpop.permute.xlu1 %3683 }
 0xb33   : > { %11594 = vmatmul.mubr.bf16.gmra.mrb[188].mxu1 %v18072_v22 }
 0xb34   : > { %11601 = vmatprep.mubr.bf16.mxu1 %v18076_v11  ;;  %v22306_v60 = vpop.permute.xlu1 %3685  ;;  %v18096_v11 = vld [vmem:[%s24508_s7 + $0x1878] ss:$100 sps:$4 sm:$0xff]  }
 0xb35   : > { %9852 = vmatmul.mubr.bf16.gmra.mrb[248].mxu0 %v18075_v41  ;;  %v18102_v41 = vld [vmem:[%s24508_s7 + $0x4c] ss:$100 sps:$4 sm:$0xff]  }
 0xb36   : > { %9859 = vmatprep.mubr.bf16.mxu0 %v18079_v39  ;;  %v22317_v24 = vpop.permute.xlu0 %3687  ;;  %v18097_v39 = vld [vmem:[%s24508_s7 + $0x1780] ss:$100 sps:$4 sm:$0xff]  }
 0xb3a   : > { %v22319_v25 = vpop.permute.xlu1 %3689 }
 0xb3b   : > { %11602 = vmatmul.mubr.bf16.gmra.mrb[192].mxu1 %v18078_v29  ;;  %v18105_v29 = vld [vmem:[%s24508_s7 + $0x184c] ss:$100 sps:$4 sm:$0xff]  }
 0xb3c   : > { %11609 = vmatprep.mubr.bf16.mxu1 %v18082_v9 }
 0xb3d   : > { %9860 = vmatmul.mubr.bf16.gmra.mrb[252].mxu0 %v18081_v59  ;;  %v18100_v59 = vld [vmem:[%s24508_s7 + $0x48] ss:$100 sps:$4 sm:$0xff]  }
 0xb3e   : > { %v3646_v19 = vpop.permute.xlu1 %3645  ;;  %v22324_v40 = vpop.permute.xlu0 %3691  ;;  %9867 = vmatprep.mubr.bf16.mxu0 %v18087_v2 }
 0xb3f   : > { %3933 = vrot.lane.b32.xlu0 %v3646_v19, %s18815_s26  ;;  %v18103_v19 = vld [vmem:[%s24508_s7 + $0x1848] ss:$100 sps:$4 sm:$0xff]  }
 0xb42   : > { %v3650_v34 = vpop.permute.xlu1 %3649  ;;  %v3648_v47 = vpop.permute.xlu0 %3647 }
 0xb43   : > { %11610 = vmatmul.mubr.bf16.gmra.mrb[196].mxu1 %v18084_v33  ;;  %3937 = vrot.lane.b32.xlu1 %v3650_v34, %s18815_s26  ;;  %v18106_v33 = vld [vmem:[%s24508_s7 + $0x114] ss:$100 sps:$4 sm:$0xff]  }
 0xb44   : > { %3935 = vrot.lane.b32.xlu0 %v3648_v47, %s18815_s26  ;;  %11617 = vmatprep.mubr.bf16.mxu1 %v18088_v17  ;;  %v18111_v17 = vld [vmem:[%s24508_s7 + $0x1c] ss:$100 sps:$4 sm:$0xff]   ;;  %v18108_v47 = vld [vmem:[%s24508_s7 + $0x110] ss:$100 sps:$4 sm:$0xff]  }
 0xb45   : > { %9868 = vmatmul.mubr.bf16.gmra.mrb[0].mxu0 %v18085_v52 }
 0xb46   : > { %v3654_v12 = vpop.permute.xlu1 %3653  ;;  %v3652_v26 = vpop.permute.xlu0 %3651  ;;  %9875 = vmatprep.mubr.bf16.mxu0 %v18093_v43  ;;  %v18112_v43 = vld [vmem:[%s24508_s7 + $0x1dc] ss:$100 sps:$4 sm:$0xff]  }
 0xb47   : > { %3941 = vrot.lane.b32.xlu1 %v3654_v12, %s18815_s26  ;;  %v18166_v12 = vld [vmem:[%s24508_s7 + $0x8e4] ss:$100 sps:$4 sm:$0xff]  }
 0xb48   : > { %3939 = vrot.lane.b32.xlu0 %v3652_v26, %s18815_s26  ;;  %v18169_v26 = vld [vmem:[%s24508_s7 + $0x7ec] ss:$100 sps:$4 sm:$0xff]  }
 0xb4a   : > { %v3658_v32 = vpop.permute.xlu1 %3657  ;;  %v3656_v37 = vpop.permute.xlu0 %3655 }
 0xb4b   : > { %11618 = vmatmul.mubr.bf16.gmra.mrb[200].mxu1 %v18090_v10  ;;  %3945 = vrot.lane.b32.xlu1 %v3658_v32, %s18815_s26  ;;  %v18168_v10 = vld [vmem:[%s24508_s7 + $0x8e0] ss:$100 sps:$4 sm:$0xff]   ;;  %v18175_v32 = vld [vmem:[%s24508_s7 + $0x8b4] ss:$100 sps:$4 sm:$0xff]  }
 0xb4c   : > { %3943 = vrot.lane.b32.xlu0 %v3656_v37, %s18815_s26  ;;  %11625 = vmatprep.mubr.bf16.mxu1 %v18094_v62  ;;  %v18174_v62 = vld [vmem:[%s24508_s7 + $0x9ac] ss:$100 sps:$4 sm:$0xff]  }
 0xb4d   : > { %9876 = vmatmul.mubr.bf16.gmra.mrb[4].mxu0 %v18091_v7  ;;  %v18171_v7 = vld [vmem:[%s24508_s7 + $0x7e8] ss:$100 sps:$4 sm:$0xff]  }
 0xb4e   : > { %v3660_v22 = vpop.permute.xlu0 %3659  ;;  %9883 = vmatprep.mubr.bf16.mxu0 %v18099_v1  ;;  %v3662_v9 = vpop.permute.xlu1 %3661  ;;  %v18172_v37 = vld [vmem:[%s24508_s7 + $0x9a8] ss:$100 sps:$4 sm:$0xff]   ;;  %v18180_v1 = vld [vmem:[%s24508_s7 + $0xa74] ss:$100 sps:$4 sm:$0xff]  }
 0xb4f   : > { %3949 = vrot.lane.b32.xlu1 %v20963_v53, %s18815_s26 }
 0xb50   : > { %3947 = vrot.lane.b32.xlu0 %v3660_v22, %s18815_s26  ;;  %v18177_v22 = vld [vmem:[%s24508_s7 + $0x8b0] ss:$100 sps:$4 sm:$0xff]  }
 0xb52   : > { %v3666_v2 = vpop.permute.xlu1 %3665  ;;  %v3664_v52 = vpop.permute.xlu0 %3663 }
 0xb53   : > { %11626 = vmatmul.mubr.bf16.gmra.mrb[204].mxu1 %v18096_v11  ;;  %3953 = vrot.lane.b32.xlu1 %v20989_v61, %s18815_s26  ;;  %v18181_v11 = vld [vmem:[%s24508_s7 + $0x97c] ss:$100 sps:$4 sm:$0xff]  }
 0xb54   : > { %3951 = vrot.lane.b32.xlu0 %v20958_v63, %s18815_s26  ;;  %11666 = vmatprep.mubr.bf16.mxu1 %v18102_v41  ;;  %v18178_v41 = vld [vmem:[%s24508_s7 + $0xa70] ss:$100 sps:$4 sm:$0xff]  }
 0xb55   : > { %9884 = vmatmul.mubr.bf16.gmra.mrb[8].mxu0 %v18097_v39  ;;  %v18184_v39 = vld [vmem:[%s24508_s7 + $0xb3c] ss:$100 sps:$4 sm:$0xff]  }
 0xb56   : > { %9891 = vmatprep.mubr.bf16.mxu0 %v18105_v29  ;;  %v3668_v34 = vpop.permute.xlu1 %3667  ;;  %v18183_v29 = vld [vmem:[%s24508_s7 + $0x978] ss:$100 sps:$4 sm:$0xff]  }
 0xb57   : > { %3957 = vrot.lane.b32.xlu1 %v3662_v9, %s18815_s26  ;;  %v18187_v9 = vld [vmem:[%s24508_s7 + $0xa44] ss:$100 sps:$4 sm:$0xff]  }
 0xb58   : > { %3955 = vrot.lane.b32.xlu0 %v20984_v14, %s18815_s26 }
 0xb5b   : > { %11667 = vmatmul.mubr.bf16.vlgmr.msra.gmra.mrb[208].mxu1 %v18100_v59  ;;  %3961 = vrot.lane.b32.xlu1 %v3666_v2, %s18815_s26  ;;  %v18186_v59 = vld [vmem:[%s24508_s7 + $0xb38] ss:$100 sps:$4 sm:$0xff]   ;;  %v18190_v2 = vld [vmem:[%s24508_s7 + $0xc04] ss:$100 sps:$4 sm:$0xff]  }
 0xb5c   : > { %11924 = vmatpush1.bf16.msra.mxu1 %v22048_v46  ;;  %3959 = vrot.lane.b32.xlu0 %v3664_v52, %s18815_s26  ;;  %v18109_v46 = vld [vmem:[%s24508_s7 + $0x18] ss:$100 sps:$4 sm:$0xff]   ;;  %v18196_v52 = vld [vmem:[%s24508_s7 + $0xccc] ss:$100 sps:$4 sm:$0xff]  }
 0xb5d   : > { %11925 = vmatprep.subr.bf16.mxu1 %v24561_v0  ;;  %9892 = vmatmul.mubr.bf16.gmra.mrb[12].mxu0 %v18103_v19  ;;  %v18189_v19 = vld [vmem:[%s24508_s7 + $0xa40] ss:$100 sps:$4 sm:$0xff]  }
 0xb5e   : > { %11674 = vmatprep.mubr.bf16.mxu1 %v18106_v33  ;;  %9932 = vmatprep.mubr.bf16.mxu0 %v18111_v17  ;;  %v18193_v33 = vld [vmem:[%s24508_s7 + $0xb0c] ss:$100 sps:$4 sm:$0xff]   ;;  %v18192_v17 = vld [vmem:[%s24508_s7 + $0xc00] ss:$100 sps:$4 sm:$0xff]  }
 0xb5f   : > { %4029 = vrot.lane.b32.xlu1 %v20963_v53, %s18820_s28  ;;  %v18115_v53 = vld [vmem:[%s24508_s7 + $0xe4] ss:$100 sps:$4 sm:$0xff]  }
 0xb60   : > { %11926 = vmatpush1.bf16.msra.mxu1 %v22179_v16  ;;  %3963 = vrot.lane.b32.xlu0 %v3668_v34, %s18815_s26  ;;  %v18121_v16 = vld [vmem:[%s24508_s7 + $0x1ac] ss:$100 sps:$4 sm:$0xff]  }
 0xb61   : > { %11927 = vmatprep.subr.bf16.mxu1 %v24561_v0  ;;  %v18195_v34 = vld [vmem:[%s24508_s7 + $0xb08] ss:$100 sps:$4 sm:$0xff]  }
 0xb63   : > { %11675 = vmatmul.mubr.bf16.gmra.mrb[212].mxu1 %v18108_v47  ;;  %4033 = vrot.lane.b32.xlu1 %v20989_v61, %s18820_s28  ;;  %v18114_v61 = vld [vmem:[%s24508_s7 + $0x1d8] ss:$100 sps:$4 sm:$0xff]  }
 0xb64   : > { %11928 = vmatpush1.bf16.msra.mxu1 %v22190_v8  ;;  %4031 = vrot.lane.b32.xlu0 %v20958_v63, %s18820_s28  ;;  %v18118_v63 = vld [vmem:[%s24508_s7 + $0x2a4] ss:$100 sps:$4 sm:$0xff]   ;;  %v18199_v47 = vld [vmem:[%s24508_s7 + $0xbd4] ss:$100 sps:$4 sm:$0xff]  }
 0xb65   : > { %11929 = vmatprep.subr.bf16.mxu1 %v24561_v0  ;;  %9933 = vmatmul.mubr.bf16.vlgmr.msra.gmra.mrb[144].mxu0 %v18109_v46  ;;  %v18123_v8 = vld [vmem:[%s24508_s7 + $0x1a8] ss:$100 sps:$4 sm:$0xff]  }
 0xb66   : > { %10190 = vmatpush1.bf16.msra.mxu0 %v21975_v55  ;;  %11682 = vmatprep.mubr.bf16.mxu1 %v18112_v43  ;;  %v18117_v55 = vld [vmem:[%s24508_s7 + $0xe0] ss:$100 sps:$4 sm:$0xff]   ;;  %v18198_v46 = vld [vmem:[%s24508_s7 + $0xcc8] ss:$100 sps:$4 sm:$0xff]   ;;  %v18202_v43 = vld [vmem:[%s24508_s7 + $0xd94] ss:$100 sps:$4 sm:$0xff]  }
 0xb67   : > { %10191 = vmatprep.subr.bf16.mxu0 %v24561_v0  ;;  %9940 = vmatprep.mubr.bf16.mxu0 %v18115_v53  ;;  %v18201_v53 = vld [vmem:[%s24508_s7 + $0xbd0] ss:$100 sps:$4 sm:$0xff]  }
 0xb68   : > { %11930 = vmatpush1.bf16.msra.mxu1 %v22195_v56  ;;  %4035 = vrot.lane.b32.xlu0 %v20984_v14, %s18820_s28  ;;  %v18120_v14 = vld [vmem:[%s24508_s7 + $0x2a0] ss:$100 sps:$4 sm:$0xff]   ;;  %v18130_v56 = vld [vmem:[%s24508_s7 + $0x434] ss:$100 sps:$4 sm:$0xff]  }
 0xb69   : > { %11931 = vmatprep.subr.bf16.mxu1 %v24561_v0 }
 0xb6a   : > { %10192 = vmatpush1.bf16.msra.mxu0 %v21991_v6  ;;  %v18124_v6 = vld [vmem:[%s24508_s7 + $0x36c] ss:$100 sps:$4 sm:$0xff]  }
 0xb6b   : > { %11683 = vmatmul.mubr.bf16.gmra.mrb[216].mxu1 %v18114_v61  ;;  %10193 = vmatprep.subr.bf16.mxu0 %v24561_v0  ;;  %v18205_v61 = vld [vmem:[%s24508_s7 + $0xc9c] ss:$100 sps:$4 sm:$0xff]  }
 0xb6c   : > { %11932 = vmatpush1.bf16.msra.mxu1 %v22208_v49  ;;  %11690 = vmatprep.mubr.bf16.mxu1 %v18118_v63  ;;  %v18133_v49 = vld [vmem:[%s24508_s7 + $0x33c] ss:$100 sps:$4 sm:$0xff]   ;;  %v18204_v63 = vld [vmem:[%s24508_s7 + $0xd90] ss:$100 sps:$4 sm:$0xff]  }
 0xb6d   : > { %11933 = vmatprep.subr.bf16.mxu1 %v24561_v0  ;;  %9941 = vmatmul.mubr.bf16.gmra.mrb[148].mxu0 %v18117_v55  ;;  %v18208_v55 = vld [vmem:[%s24508_s7 + $0xe5c] ss:$100 sps:$4 sm:$0xff]  }
 0xb6e   : > { %10194 = vmatpush1.bf16.msra.mxu0 %v22008_v4  ;;  %9948 = vmatprep.mubr.bf16.mxu0 %v18121_v16  ;;  %v18127_v4 = vld [vmem:[%s24508_s7 + $0x274] ss:$100 sps:$4 sm:$0xff]  }
 0xb6f   : > { %10195 = vmatprep.subr.bf16.mxu0 %v24561_v0  ;;  %v18207_v16 = vld [vmem:[%s24508_s7 + $0xc98] ss:$100 sps:$4 sm:$0xff]  }
 0xb70   : > { %11934 = vmatpush1.bf16.msra.mxu1 %v22197_v44  ;;  %v18129_v44 = vld [vmem:[%s24508_s7 + $0x270] ss:$100 sps:$4 sm:$0xff]  }
 0xb71   : > { %11935 = vmatprep.subr.bf16.mxu1 %v24561_v0 }
 0xb72   : > { %10196 = vmatpush1.bf16.msra.mxu0 %v22025_v20  ;;  %v18126_v20 = vld [vmem:[%s24508_s7 + $0x368] ss:$100 sps:$4 sm:$0xff]  }
 0xb73   : > { %11691 = vmatmul.mubr.bf16.gmra.mrb[220].mxu1 %v18120_v14  ;;  %10197 = vmatprep.subr.bf16.mxu0 %v24561_v0  ;;  %v18211_v14 = vld [vmem:[%s24508_s7 + $0xd64] ss:$100 sps:$4 sm:$0xff]  }
 0xb74   : > { %11936 = vmatpush1.bf16.msra.mxu1 %v22215_v50  ;;  %11698 = vmatprep.mubr.bf16.mxu1 %v18124_v6  ;;  %v18136_v50 = vld [vmem:[%s24508_s7 + $0x4fc] ss:$100 sps:$4 sm:$0xff]  }
 0xb75   : > { %11937 = vmatprep.subr.bf16.mxu1 %v24561_v0  ;;  %9949 = vmatmul.mubr.bf16.gmra.mrb[152].mxu0 %v18123_v8  ;;  %v18210_v6 = vld [vmem:[%s24508_s7 + $0xe58] ss:$100 sps:$4 sm:$0xff]   ;;  %v18214_v8 = vld [vmem:[%s24508_s7 + $0xf24] ss:$100 sps:$4 sm:$0xff]  }
 0xb76   : > { %10198 = vmatpush1.bf16.msra.mxu0 %v22228_v5  ;;  %9956 = vmatprep.mubr.bf16.mxu0 %v18127_v4  ;;  %v18139_v5 = vld [vmem:[%s24508_s7 + $0x404] ss:$100 sps:$4 sm:$0xff]  }
 0xb77   : > { %10199 = vmatprep.subr.bf16.mxu0 %v24561_v0  ;;  %v18213_v4 = vld [vmem:[%s24508_s7 + $0xd60] ss:$100 sps:$4 sm:$0xff]  }
 0xb78   : > { %11938 = vmatpush1.bf16.msra.mxu1 %v22210_v18  ;;  %v18132_v18 = vld [vmem:[%s24508_s7 + $0x430] ss:$100 sps:$4 sm:$0xff]  }
 0xb79   : > { %11939 = vmatprep.subr.bf16.mxu1 %v24561_v0 }
 0xb7a   : > { %10200 = vmatpush1.bf16.msra.mxu0 %v22235_v30  ;;  %v18142_v30 = vld [vmem:[%s24508_s7 + $0x5c4] ss:$100 sps:$4 sm:$0xff]  }
 0xb7b   : > { %11699 = vmatmul.mubr.bf16.gmra.mrb[224].mxu1 %v18126_v20  ;;  %10201 = vmatprep.subr.bf16.mxu0 %v24561_v0  ;;  %v18217_v20 = vld [vmem:[%s24508_s7 + $0xe2c] ss:$100 sps:$4 sm:$0xff]  }
 0xb7c   : > { %11940 = vmatpush1.bf16.msra.mxu1 %v22217_v13  ;;  %11706 = vmatprep.mubr.bf16.mxu1 %v18130_v56  ;;  %v18135_v13 = vld [vmem:[%s24508_s7 + $0x338] ss:$100 sps:$4 sm:$0xff]   ;;  %v18216_v56 = vld [vmem:[%s24508_s7 + $0xf20] ss:$100 sps:$4 sm:$0xff]  }
 0xb7d   : > { %11941 = vmatprep.subr.bf16.mxu1 %v24561_v0  ;;  %9957 = vmatmul.mubr.bf16.gmra.mrb[156].mxu0 %v18129_v44  ;;  %v18220_v44 = vld [vmem:[%s24508_s7 + $0xfec] ss:$100 sps:$4 sm:$0xff]  }
 0xb7e   : > { %10202 = vmatpush1.bf16.msra.mxu0 %v22248_v42  ;;  %9964 = vmatprep.mubr.bf16.mxu0 %v18133_v49  ;;  %v18145_v42 = vld [vmem:[%s24508_s7 + $0x4cc] ss:$100 sps:$4 sm:$0xff]  }
 0xb7f   : > { %10203 = vmatprep.subr.bf16.mxu0 %v24561_v0  ;;  %v18219_v49 = vld [vmem:[%s24508_s7 + $0xe28] ss:$100 sps:$4 sm:$0xff]  }
 0xb80   : > { %11942 = vmatpush1.bf16.msra.mxu1 %v22230_v23  ;;  %v18138_v23 = vld [vmem:[%s24508_s7 + $0x4f8] ss:$100 sps:$4 sm:$0xff]  }
 0xb81   : > { %11943 = vmatprep.subr.bf16.mxu1 %v24561_v0 }
 0xb82   : > { %10204 = vmatpush1.bf16.msra.mxu0 %v22255_v27  ;;  %v18148_v27 = vld [vmem:[%s24508_s7 + $0x68c] ss:$100 sps:$4 sm:$0xff]  }
 0xb83   : > { %11707 = vmatmul.mubr.bf16.gmra.mrb[228].mxu1 %v18132_v18  ;;  %10205 = vmatprep.subr.bf16.mxu0 %v24561_v0  ;;  %v18223_v18 = vld [vmem:[%s24508_s7 + $0xef4] ss:$100 sps:$4 sm:$0xff]  }
 0xb84   : > { %11944 = vmatpush1.bf16.msra.mxu1 %v22237_v58  ;;  %11714 = vmatprep.mubr.bf16.mxu1 %v18136_v50  ;;  %v18141_v58 = vld [vmem:[%s24508_s7 + $0x400] ss:$100 sps:$4 sm:$0xff]   ;;  %v18222_v50 = vld [vmem:[%s24508_s7 + $0xfe8] ss:$100 sps:$4 sm:$0xff]  }
 0xb85   : > { %11945 = vmatprep.subr.bf16.mxu1 %v24561_v0  ;;  %9965 = vmatmul.mubr.bf16.gmra.mrb[160].mxu0 %v18135_v13  ;;  %v18226_v13 = vld [vmem:[%s24508_s7 + $0x10b4] ss:$100 sps:$4 sm:$0xff]  }
 0xb86   : > { %10206 = vmatpush1.bf16.msra.mxu0 %v22268_v21  ;;  %9972 = vmatprep.mubr.bf16.mxu0 %v18139_v5  ;;  %v18151_v21 = vld [vmem:[%s24508_s7 + $0x594] ss:$100 sps:$4 sm:$0xff]  }
 0xb87   : > { %10207 = vmatprep.subr.bf16.mxu0 %v24561_v0  ;;  %v18225_v5 = vld [vmem:[%s24508_s7 + $0xef0] ss:$100 sps:$4 sm:$0xff]  }
 0xb88   : > { %11946 = vmatpush1.bf16.msra.mxu1 %v22250_v45  ;;  %v18144_v45 = vld [vmem:[%s24508_s7 + $0x5c0] ss:$100 sps:$4 sm:$0xff]  }
 0xb89   : > { %11947 = vmatprep.subr.bf16.mxu1 %v24561_v0 }
 0xb8a   : > { %10208 = vmatpush1.bf16.msra.mxu0 %v22273_v51  ;;  %v18150_v51 = vld [vmem:[%s24508_s7 + $0x688] ss:$100 sps:$4 sm:$0xff]  }
 0xb8b   : > { %11715 = vmatmul.mubr.bf16.gmra.mrb[232].mxu1 %v18138_v23  ;;  %10209 = vmatprep.subr.bf16.mxu0 %v24561_v0  ;;  %v18229_v23 = vld [vmem:[%s24508_s7 + $0xfbc] ss:$100 sps:$4 sm:$0xff]  }
 0xb8c   : > { %11948 = vmatpush1.bf16.msra.mxu1 %v22266_v35  ;;  %11722 = vmatprep.mubr.bf16.mxu1 %v18142_v30  ;;  %v18147_v35 = vld [vmem:[%s24508_s7 + $0x4c8] ss:$100 sps:$4 sm:$0xff]   ;;  %v18228_v30 = vld [vmem:[%s24508_s7 + $0x10b0] ss:$100 sps:$4 sm:$0xff]  }
 0xb8d   : > { %11949 = vmatprep.subr.bf16.mxu1 %v24561_v0  ;;  %9973 = vmatmul.mubr.bf16.gmra.mrb[164].mxu0 %v18141_v58  ;;  %v18232_v58 = vld [vmem:[%s24508_s7 + $0x117c] ss:$100 sps:$4 sm:$0xff]  }
 0xb8e   : > { %10210 = vmatpush1.bf16.msra.mxu0 %v22286_v38  ;;  %9980 = vmatprep.mubr.bf16.mxu0 %v18145_v42  ;;  %v18153_v38 = vld [vmem:[%s24508_s7 + $0x590] ss:$100 sps:$4 sm:$0xff]   ;;  %v18231_v42 = vld [vmem:[%s24508_s7 + $0xfb8] ss:$100 sps:$4 sm:$0xff]  }
 0xb8f   : > { %10211 = vmatprep.subr.bf16.mxu0 %v24561_v0 }
 0xb90   : > { %11950 = vmatpush1.bf16.msra.mxu1 %v22281_v36  ;;  %v18154_v36 = vld [vmem:[%s24508_s7 + $0x754] ss:$100 sps:$4 sm:$0xff]  }
 0xb91   : > { %11951 = vmatprep.subr.bf16.mxu1 %v24561_v0 }
 0xb92   : > { %10212 = vmatpush1.bf16.msra.mxu0 %v22293_v31  ;;  %v18156_v31 = vld [vmem:[%s24508_s7 + $0x750] ss:$100 sps:$4 sm:$0xff]  }
 0xb93   : > { %11723 = vmatmul.mubr.bf16.gmra.mrb[236].mxu1 %v18144_v45  ;;  %10213 = vmatprep.subr.bf16.mxu0 %v24561_v0  ;;  %v18235_v45 = vld [vmem:[%s24508_s7 + $0x1084] ss:$100 sps:$4 sm:$0xff]  }
 0xb94   : > { %11952 = vmatpush1.bf16.msra.mxu1 %v22291_v15  ;;  %11730 = vmatprep.mubr.bf16.mxu1 %v18148_v27  ;;  %v18157_v15 = vld [vmem:[%s24508_s7 + $0x65c] ss:$100 sps:$4 sm:$0xff]  }
 0xb95   : > { %11953 = vmatprep.subr.bf16.mxu1 %v24561_v0  ;;  %9981 = vmatmul.mubr.bf16.gmra.mrb[168].mxu0 %v18147_v35  ;;  %v18234_v27 = vld [vmem:[%s24508_s7 + $0x1178] ss:$100 sps:$4 sm:$0xff]   ;;  %v18238_v35 = vld [vmem:[%s24508_s7 + $0x1244] ss:$100 sps:$4 sm:$0xff]  }
 0xb96   : > { %10214 = vmatpush1.bf16.msra.mxu0 %v22306_v60  ;;  %9988 = vmatprep.mubr.bf16.mxu0 %v18151_v21  ;;  %v18159_v60 = vld [vmem:[%s24508_s7 + $0x658] ss:$100 sps:$4 sm:$0xff]   ;;  %v18237_v21 = vld [vmem:[%s24508_s7 + $0x1080] ss:$100 sps:$4 sm:$0xff]  }
 0xb97   : > { %10215 = vmatprep.subr.bf16.mxu0 %v24561_v0 }
 0xb98   : > { %11954 = vmatpush1.bf16.msra.mxu1 %v22304_v3  ;;  %v18160_v3 = vld [vmem:[%s24508_s7 + $0x81c] ss:$100 sps:$4 sm:$0xff]  }
 0xb99   : > { %12212 = vmatprep.subr.bf16.mxu1 %v24561_v0 }
 0xb9a   : > { %10216 = vmatpush1.bf16.msra.mxu0 %v22317_v24  ;;  %v18163_v24 = vld [vmem:[%s24508_s7 + $0x724] ss:$100 sps:$4 sm:$0xff]  }
 0xb9b   : > { %11731 = vmatmul.mubr.bf16.gmra.mrb[240].mxu1 %v18150_v51  ;;  %10217 = vmatprep.subr.bf16.mxu0 %v24561_v0  ;;  %v18241_v51 = vld [vmem:[%s24508_s7 + $0x114c] ss:$100 sps:$4 sm:$0xff]  }
 0xb9c   : > { %11738 = vmatprep.mubr.bf16.mxu1 %v18154_v36  ;;  %v18240_v36 = vld [vmem:[%s24508_s7 + $0x1240] ss:$100 sps:$4 sm:$0xff]  }
 0xb9d   : > { %9989 = vmatmul.mubr.bf16.gmra.mrb[172].mxu0 %v18153_v38  ;;  %v18244_v38 = vld [vmem:[%s24508_s7 + $0x130c] ss:$100 sps:$4 sm:$0xff]  }
 0xb9e   : > { %10218 = vmatpush1.bf16.msra.mxu0 %v22319_v25  ;;  %9996 = vmatprep.mubr.bf16.mxu0 %v18157_v15  ;;  %v18162_v25 = vld [vmem:[%s24508_s7 + $0x818] ss:$100 sps:$4 sm:$0xff]   ;;  %v18243_v15 = vld [vmem:[%s24508_s7 + $0x1148] ss:$100 sps:$4 sm:$0xff]  }
 0xb9f   : > { %10219 = vmatprep.subr.bf16.mxu0 %v24561_v0 }
 0xba2   : > { %10220 = vmatpush1.bf16.msra.mxu0 %v22324_v40  ;;  %v18165_v40 = vld [vmem:[%s24508_s7 + $0x720] ss:$100 sps:$4 sm:$0xff]  }
 0xba3   : > { %11739 = vmatmul.mubr.bf16.gmra.mrb[244].mxu1 %v18156_v31  ;;  %10478 = vmatprep.subr.bf16.mxu0 %v24561_v0  ;;  %v18247_v31 = vld [vmem:[%s24508_s7 + $0x1214] ss:$100 sps:$4 sm:$0xff]  }
 0xba4   : > { %11746 = vmatprep.mubr.bf16.mxu1 %v18160_v3  ;;  %v18246_v3 = vld [vmem:[%s24508_s7 + $0x1308] ss:$100 sps:$4 sm:$0xff]  }
 0xba5   : > { %9997 = vmatmul.mubr.bf16.gmra.mrb[176].mxu0 %v18159_v60  ;;  %v18250_v60 = vld [vmem:[%s24508_s7 + $0x13d4] ss:$100 sps:$4 sm:$0xff]  }
 0xba6   : > { %10004 = vmatprep.mubr.bf16.mxu0 %v18163_v24  ;;  %v18249_v24 = vld [vmem:[%s24508_s7 + $0x1210] ss:$100 sps:$4 sm:$0xff]  }
 0xbab   : > { %11747 = vmatmul.mubr.bf16.gmra.mrb[248].mxu1 %v18162_v25  ;;  %v18253_v25 = vld [vmem:[%s24508_s7 + $0x12dc] ss:$100 sps:$4 sm:$0xff]  }
 0xbac   : > { %11754 = vmatprep.mubr.bf16.mxu1 %v18166_v12  ;;  %v18252_v12 = vld [vmem:[%s24508_s7 + $0x13d0] ss:$100 sps:$4 sm:$0xff]  }
 0xbad   : > { %10005 = vmatmul.mubr.bf16.gmra.mrb[180].mxu0 %v18165_v40  ;;  %v18256_v40 = vld [vmem:[%s24508_s7 + $0x149c] ss:$100 sps:$4 sm:$0xff]  }
 0xbae   : > { %10012 = vmatprep.mubr.bf16.mxu0 %v18169_v26  ;;  %v18255_v26 = vld [vmem:[%s24508_s7 + $0x12d8] ss:$100 sps:$4 sm:$0xff]  }
 0xbb3   : > { %11755 = vmatmul.mubr.bf16.gmra.mrb[252].mxu1 %v18168_v10  ;;  %v18259_v10 = vld [vmem:[%s24508_s7 + $0x13a4] ss:$100 sps:$4 sm:$0xff]  }
 0xbb4   : > { %11762 = vmatprep.mubr.bf16.mxu1 %v18174_v62  ;;  %v18258_v62 = vld [vmem:[%s24508_s7 + $0x1498] ss:$100 sps:$4 sm:$0xff]  }
 0xbb5   : > { %10013 = vmatmul.mubr.bf16.gmra.mrb[184].mxu0 %v18171_v7  ;;  %v18262_v7 = vld [vmem:[%s24508_s7 + $0x1564] ss:$100 sps:$4 sm:$0xff]  }
 0xbb6   : > { %10020 = vmatprep.mubr.bf16.mxu0 %v18175_v32  ;;  %v18261_v32 = vld [vmem:[%s24508_s7 + $0x13a0] ss:$100 sps:$4 sm:$0xff]  }
 0xbbb   : > { %11763 = vmatmul.mubr.bf16.gmra.mrb[0].mxu1 %v18172_v37  ;;  %v18265_v37 = vld [vmem:[%s24508_s7 + $0x146c] ss:$100 sps:$4 sm:$0xff]  }
 0xbbc   : > { %11770 = vmatprep.mubr.bf16.mxu1 %v18180_v1  ;;  %v18264_v1 = vld [vmem:[%s24508_s7 + $0x1560] ss:$100 sps:$4 sm:$0xff]  }
 0xbbd   : > { %10021 = vmatmul.mubr.bf16.gmra.mrb[188].mxu0 %v18177_v22  ;;  %v18268_v22 = vld [vmem:[%s24508_s7 + $0x162c] ss:$100 sps:$4 sm:$0xff]  }
 0xbbe   : > { %10028 = vmatprep.mubr.bf16.mxu0 %v18181_v11  ;;  %v18267_v11 = vld [vmem:[%s24508_s7 + $0x1468] ss:$100 sps:$4 sm:$0xff]  }
 0xbc3   : > { %11771 = vmatmul.mubr.bf16.gmra.mrb[4].mxu1 %v18178_v41  ;;  %v18271_v41 = vld [vmem:[%s24508_s7 + $0x1534] ss:$100 sps:$4 sm:$0xff]  }
 0xbc4   : > { %11778 = vmatprep.mubr.bf16.mxu1 %v18184_v39  ;;  %v18270_v39 = vld [vmem:[%s24508_s7 + $0x1628] ss:$100 sps:$4 sm:$0xff]  }
 0xbc5   : > { %10029 = vmatmul.mubr.bf16.gmra.mrb[192].mxu0 %v18183_v29  ;;  %v18274_v29 = vld [vmem:[%s24508_s7 + $0x16f4] ss:$100 sps:$4 sm:$0xff]  }
 0xbc6   : > { %10036 = vmatprep.mubr.bf16.mxu0 %v18187_v9  ;;  %v18273_v9 = vld [vmem:[%s24508_s7 + $0x1530] ss:$100 sps:$4 sm:$0xff]  }
 0xbcb   : > { %11779 = vmatmul.mubr.bf16.gmra.mrb[136].mxu1 %v18186_v59  ;;  %v18279_v59 = vld [vmem:[%s24508_s7 + $0x15fc] ss:$100 sps:$4 sm:$0xff]  }
 0xbcc   : > { %11786 = vmatprep.mubr.bf16.mxu1 %v18190_v2  ;;  %v18276_v2 = vld [vmem:[%s24508_s7 + $0x16f0] ss:$100 sps:$4 sm:$0xff]  }
 0xbcd   : > { %10037 = vmatmul.mubr.bf16.gmra.mrb[196].mxu0 %v18189_v19  ;;  %v18280_v19 = vld [vmem:[%s24508_s7 + $0x17bc] ss:$100 sps:$4 sm:$0xff]  }
 0xbce   : > { %10044 = vmatprep.mubr.bf16.mxu0 %v18193_v33  ;;  %v18277_v33 = vld [vmem:[%s24508_s7 + $0x15f8] ss:$100 sps:$4 sm:$0xff]  }
 0xbd3   : > { %11787 = vmatmul.mubr.bf16.gmra.mrb[140].mxu1 %v18192_v17  ;;  %v18285_v17 = vld [vmem:[%s24508_s7 + $0x16c4] ss:$100 sps:$4 sm:$0xff]  }
 0xbd4   : > { %11794 = vmatprep.mubr.bf16.mxu1 %v18196_v52  ;;  %v18282_v52 = vld [vmem:[%s24508_s7 + $0x17b8] ss:$100 sps:$4 sm:$0xff]  }
 0xbd5   : > { %10045 = vmatmul.mubr.bf16.gmra.mrb[200].mxu0 %v18195_v34  ;;  %v18286_v34 = vld [vmem:[%s24508_s7 + $0x1884] ss:$100 sps:$4 sm:$0xff]  }
 0xbd6   : > { %10052 = vmatprep.mubr.bf16.mxu0 %v18199_v47  ;;  %v18283_v47 = vld [vmem:[%s24508_s7 + $0x16c0] ss:$100 sps:$4 sm:$0xff]  }
 0xbdb   : > { %11795 = vmatmul.mubr.bf16.gmra.mrb[144].mxu1 %v18198_v46  ;;  %v18291_v46 = vld [vmem:[%s24508_s7 + $0x178c] ss:$100 sps:$4 sm:$0xff]  }
 0xbdc   : > { %11802 = vmatprep.mubr.bf16.mxu1 %v18202_v43  ;;  %v18288_v43 = vld [vmem:[%s24508_s7 + $0x1880] ss:$100 sps:$4 sm:$0xff]  }
 0xbdd   : > { %10053 = vmatmul.mubr.bf16.gmra.mrb[204].mxu0 %v18201_v53  ;;  %v18294_v53 = vld [vmem:[%s24508_s7 + $0x54] ss:$100 sps:$4 sm:$0xff]  }
 0xbde   : > { %10060 = vmatprep.mubr.bf16.mxu0 %v18205_v61  ;;  %v18289_v61 = vld [vmem:[%s24508_s7 + $0x1788] ss:$100 sps:$4 sm:$0xff]  }
 0xbe3   : > { %11803 = vmatmul.mubr.bf16.gmra.mrb[148].mxu1 %v18204_v63  ;;  %v18297_v63 = vld [vmem:[%s24508_s7 + $0x1854] ss:$100 sps:$4 sm:$0xff]  }
 0xbe4   : > { %11810 = vmatprep.mubr.bf16.mxu1 %v18208_v55  ;;  %v18292_v55 = vld [vmem:[%s24508_s7 + $0x50] ss:$100 sps:$4 sm:$0xff]  }
 0xbe5   : > { %10061 = vmatmul.mubr.bf16.gmra.mrb[208].mxu0 %v18207_v16  ;;  %v18298_v16 = vld [vmem:[%s24508_s7 + $0x11c] ss:$100 sps:$4 sm:$0xff]  }
 0xbe6   : > { %10068 = vmatprep.mubr.bf16.mxu0 %v18211_v14  ;;  %v3934_v14 = vpop.permute.xlu0 %3933 }
 0xbeb   : > { %11811 = vmatmul.mubr.bf16.gmra.mrb[152].mxu1 %v18210_v6  ;;  %v18295_v6 = vld [vmem:[%s24508_s7 + $0x1850] ss:$100 sps:$4 sm:$0xff]  }
 0xbec   : > { %11818 = vmatprep.mubr.bf16.mxu1 %v18214_v8  ;;  %v18303_v8 = vld [vmem:[%s24508_s7 + $0x24] ss:$100 sps:$4 sm:$0xff]  }
 0xbed   : > { %10069 = vmatmul.mubr.bf16.gmra.mrb[212].mxu0 %v18213_v4  ;;  %v3936_v4 = vpop.permute.xlu0 %3935 }
 0xbee   : > { %10076 = vmatprep.mubr.bf16.mxu0 %v18217_v20  ;;  %v18300_v20 = vld [vmem:[%s24508_s7 + $0x118] ss:$100 sps:$4 sm:$0xff]  }
 0xbf3   : > { %11819 = vmatmul.mubr.bf16.gmra.mrb[156].mxu1 %v18216_v56  ;;  %v18304_v56 = vld [vmem:[%s24508_s7 + $0x1e4] ss:$100 sps:$4 sm:$0xff]  }
 0xbf4   : > { %11826 = vmatprep.mubr.bf16.mxu1 %v18220_v44  ;;  %v18301_v44 = vld [vmem:[%s24508_s7 + $0x20] ss:$100 sps:$4 sm:$0xff]  }
 0xbf5   : > { %10077 = vmatmul.mubr.bf16.gmra.mrb[216].mxu0 %v18219_v49  ;;  %v18307_v49 = vld [vmem:[%s24508_s7 + $0xec] ss:$100 sps:$4 sm:$0xff]  }
 0xbf6   : > { %10084 = vmatprep.mubr.bf16.mxu0 %v18223_v18  ;;  %v3938_v18 = vpop.permute.xlu1 %3937 }
 0xbfb   : > { %11827 = vmatmul.mubr.bf16.gmra.mrb[160].mxu1 %v18222_v50  ;;  %v24589_v50 = vld [vmem:[#allocation18_spill] sm:$0xff] }
 0xbfc   : > { %11834 = vmatprep.mubr.bf16.mxu1 %v18226_v13  ;;  %v3940_v13 = vpop.permute.xlu0 %3939 }
 0xbfd   : > { %10085 = vmatmul.mubr.bf16.gmra.mrb[220].mxu0 %v18225_v5  ;;  %v18306_v5 = vld [vmem:[%s24508_s7 + $0x1e0] ss:$100 sps:$4 sm:$0xff]  }
 0xbfe   : > { %10092 = vmatprep.mubr.bf16.mxu0 %v18229_v23  ;;  %v18310_v23 = vld [vmem:[%s24508_s7 + $0x2ac] ss:$100 sps:$4 sm:$0xff]  }
 0xc03   : > { %11835 = vmatmul.mubr.bf16.gmra.mrb[164].mxu1 %v18228_v30  ;;  %v18309_v30 = vld [vmem:[%s24508_s7 + $0xe8] ss:$100 sps:$4 sm:$0xff]  }
 0xc04   : > { %11842 = vmatprep.mubr.bf16.mxu1 %v18232_v58  ;;  %v24590_v58 = vld [vmem:[#allocation19_spill] sm:$0xff] }
 0xc05   : > { %10093 = vmatmul.mubr.bf16.gmra.mrb[224].mxu0 %v18231_v42  ;;  %v18313_v42 = vld [vmem:[%s24508_s7 + $0x1b4] ss:$100 sps:$4 sm:$0xff]  }
 0xc06   : > { %10100 = vmatprep.mubr.bf16.mxu0 %v18235_v45  ;;  %v3942_v45 = vpop.permute.xlu1 %3941 }
 0xc0b   : > { %11843 = vmatmul.mubr.bf16.gmra.mrb[168].mxu1 %v18234_v27  ;;  %v24591_v27 = vld [vmem:[#allocation20_spill] sm:$0xff] }
 0xc0c   : > { %11850 = vmatprep.mubr.bf16.mxu1 %v18238_v35  ;;  %v3944_v35 = vpop.permute.xlu0 %3943 }
 0xc0d   : > { %10101 = vmatmul.mubr.bf16.gmra.mrb[228].mxu0 %v18237_v21  ;;  %v18312_v21 = vld [vmem:[%s24508_s7 + $0x2a8] ss:$100 sps:$4 sm:$0xff]  }
 0xc0e   : > { %10108 = vmatprep.mubr.bf16.mxu0 %v18241_v51  ;;  %v18316_v51 = vld [vmem:[%s24508_s7 + $0x374] ss:$100 sps:$4 sm:$0xff]  }
 0xc13   : > { %11851 = vmatmul.mubr.bf16.gmra.mrb[172].mxu1 %v18240_v36  ;;  %v18315_v36 = vld [vmem:[%s24508_s7 + $0x1b0] ss:$100 sps:$4 sm:$0xff]  }
 0xc14   : > { %11858 = vmatprep.mubr.bf16.mxu1 %v18244_v38  ;;  %v24592_v38 = vld [vmem:[#allocation21_spill] sm:$0xff] }
 0xc15   : > { %10109 = vmatmul.mubr.bf16.gmra.mrb[232].mxu0 %v18243_v15  ;;  %v18319_v15 = vld [vmem:[%s24508_s7 + $0x27c] ss:$100 sps:$4 sm:$0xff]  }
 0xc16   : > { %10116 = vmatprep.mubr.bf16.mxu0 %v18247_v31  ;;  %v3946_v31 = vpop.permute.xlu1 %3945 }
 0xc1b   : > { %11859 = vmatmul.mubr.bf16.gmra.mrb[176].mxu1 %v18246_v3  ;;  %v24593_v3 = vld [vmem:[#allocation22_spill] sm:$0xff] }
 0xc1c   : > { %11866 = vmatprep.mubr.bf16.mxu1 %v18250_v60  ;;  %v3948_v60 = vpop.permute.xlu0 %3947 }
 0xc1d   : > { %10117 = vmatmul.mubr.bf16.gmra.mrb[236].mxu0 %v18249_v24  ;;  %v18318_v24 = vld [vmem:[%s24508_s7 + $0x370] ss:$100 sps:$4 sm:$0xff]  }
 0xc1e   : > { %10124 = vmatprep.mubr.bf16.mxu0 %v18253_v25  ;;  %v18322_v25 = vld [vmem:[%s24508_s7 + $0x43c] ss:$100 sps:$4 sm:$0xff]  }
 0xc23   : > { %11867 = vmatmul.mubr.bf16.gmra.mrb[180].mxu1 %v18252_v12  ;;  %v18321_v12 = vld [vmem:[%s24508_s7 + $0x278] ss:$100 sps:$4 sm:$0xff]  }
 0xc24   : > { %11874 = vmatprep.mubr.bf16.mxu1 %v18256_v40  ;;  %v24594_v40 = vld [vmem:[#allocation23_spill] sm:$0xff] }
 0xc25   : > { %10125 = vmatmul.mubr.bf16.gmra.mrb[240].mxu0 %v18255_v26  ;;  %v18325_v26 = vld [vmem:[%s24508_s7 + $0x344] ss:$100 sps:$4 sm:$0xff]  }
 0xc26   : > { %10132 = vmatprep.mubr.bf16.mxu0 %v18259_v10  ;;  %v3950_v10 = vpop.permute.xlu1 %3949 }
 0xc2b   : > { %11875 = vmatmul.mubr.bf16.gmra.mrb[184].mxu1 %v18258_v62  ;;  %v24595_v62 = vld [vmem:[#allocation24_spill] sm:$0xff] }
 0xc2c   : > { %11882 = vmatprep.mubr.bf16.mxu1 %v18262_v7  ;;  %v3952_v7 = vpop.permute.xlu0 %3951 }
 0xc2d   : > { %10133 = vmatmul.mubr.bf16.gmra.mrb[244].mxu0 %v18261_v32  ;;  %v18324_v32 = vld [vmem:[%s24508_s7 + $0x438] ss:$100 sps:$4 sm:$0xff]  }
 0xc2e   : > { %10140 = vmatprep.mubr.bf16.mxu0 %v18265_v37  ;;  %v18328_v37 = vld [vmem:[%s24508_s7 + $0x504] ss:$100 sps:$4 sm:$0xff]  }
 0xc33   : > { %11883 = vmatmul.mubr.bf16.gmra.mrb[188].mxu1 %v18264_v1  ;;  %v18327_v1 = vld [vmem:[%s24508_s7 + $0x340] ss:$100 sps:$4 sm:$0xff]  }
 0xc34   : > { %11890 = vmatprep.mubr.bf16.mxu1 %v18268_v22  ;;  %v24596_v22 = vld [vmem:[#allocation25_spill] sm:$0xff] }
 0xc35   : > { %10141 = vmatmul.mubr.bf16.gmra.mrb[248].mxu0 %v18267_v11  ;;  %v18331_v11 = vld [vmem:[%s24508_s7 + $0x40c] ss:$100 sps:$4 sm:$0xff]  }
 0xc36   : > { %10148 = vmatprep.mubr.bf16.mxu0 %v18271_v41  ;;  %v3954_v41 = vpop.permute.xlu1 %3953 }
 0xc3b   : > { %11891 = vmatmul.mubr.bf16.gmra.mrb[192].mxu1 %v18270_v39  ;;  %v24597_v39 = vld [vmem:[#allocation26_spill] sm:$0xff] }
 0xc3c   : > { %11898 = vmatprep.mubr.bf16.mxu1 %v18274_v29  ;;  %v3956_v29 = vpop.permute.xlu0 %3955 }
 0xc3d   : > { %10149 = vmatmul.mubr.bf16.gmra.mrb[252].mxu0 %v18273_v9  ;;  %v18330_v9 = vld [vmem:[%s24508_s7 + $0x500] ss:$100 sps:$4 sm:$0xff]  }
 0xc3e   : > { %10156 = vmatprep.mubr.bf16.mxu0 %v18279_v59  ;;  %v18334_v59 = vld [vmem:[%s24508_s7 + $0x5cc] ss:$100 sps:$4 sm:$0xff]  }
 0xc43   : > { %11899 = vmatmul.mubr.bf16.gmra.mrb[196].mxu1 %v18276_v2  ;;  %v18333_v2 = vld [vmem:[%s24508_s7 + $0x408] ss:$100 sps:$4 sm:$0xff]  }
 0xc44   : > { %11906 = vmatprep.mubr.bf16.mxu1 %v18280_v19  ;;  %v24598_v19 = vld [vmem:[#allocation27_spill] sm:$0xff] }
 0xc45   : > { %10157 = vmatmul.mubr.bf16.gmra.mrb[0].mxu0 %v18277_v33  ;;  %v18337_v33 = vld [vmem:[%s24508_s7 + $0x4d4] ss:$100 sps:$4 sm:$0xff]  }
 0xc46   : > { %10164 = vmatprep.mubr.bf16.mxu0 %v18285_v17  ;;  %v3958_v17 = vpop.permute.xlu1 %3957 }
 0xc4b   : > { %11907 = vmatmul.mubr.bf16.gmra.mrb[200].mxu1 %v18282_v52  ;;  %v24599_v52 = vld [vmem:[#allocation28_spill] sm:$0xff] }
 0xc4c   : > { %11914 = vmatprep.mubr.bf16.mxu1 %v18286_v34  ;;  %v3960_v34 = vpop.permute.xlu0 %3959 }
 0xc4d   : > { %10165 = vmatmul.mubr.bf16.gmra.mrb[4].mxu0 %v18283_v47  ;;  %v18336_v47 = vld [vmem:[%s24508_s7 + $0x5c8] ss:$100 sps:$4 sm:$0xff]  }
 0xc4e   : > { %10172 = vmatprep.mubr.bf16.mxu0 %v18291_v46  ;;  %v18340_v46 = vld [vmem:[%s24508_s7 + $0x694] ss:$100 sps:$4 sm:$0xff]  }
 0xc53   : > { %11915 = vmatmul.mubr.bf16.gmra.mrb[204].mxu1 %v18288_v43  ;;  %v18339_v43 = vld [vmem:[%s24508_s7 + $0x4d0] ss:$100 sps:$4 sm:$0xff]  }
 0xc54   : > { %11955 = vmatprep.mubr.bf16.mxu1 %v18294_v53  ;;  %v24600_v53 = vld [vmem:[#allocation29_spill] sm:$0xff] }
 0xc55   : > { %10173 = vmatmul.mubr.bf16.gmra.mrb[8].mxu0 %v18289_v61  ;;  %v18343_v61 = vld [vmem:[%s24508_s7 + $0x59c] ss:$100 sps:$4 sm:$0xff]  }
 0xc56   : > { %10180 = vmatprep.mubr.bf16.mxu0 %v18297_v63  ;;  %v3962_v63 = vpop.permute.xlu1 %3961 }
 0xc5b   : > { %11956 = vmatmul.mubr.bf16.vlgmr.msra.gmra.mrb[208].mxu1 %v18292_v55  ;;  %v3964_v55 = vpop.permute.xlu0 %3963 }
 0xc5c   : > { %12213 = vmatpush1.bf16.msra.mxu1 %v3934_v14  ;;  %11963 = vmatprep.mubr.bf16.mxu1 %v18298_v16  ;;  %v18342_v16 = vld [vmem:[%s24508_s7 + $0x690] ss:$100 sps:$4 sm:$0xff]   ;;  %v18346_v14 = vld [vmem:[%s24508_s7 + $0x75c] ss:$100 sps:$4 sm:$0xff]  }
 0xc5d   : > { %12214 = vmatprep.subr.bf16.mxu1 %v24561_v0  ;;  %10181 = vmatmul.mubr.bf16.gmra.mrb[12].mxu0 %v18295_v6  ;;  %v18345_v6 = vld [vmem:[%s24508_s7 + $0x598] ss:$100 sps:$4 sm:$0xff]  }
 0xc5e   : > { %10221 = vmatprep.mubr.bf16.mxu0 %v18303_v8  ;;  %v18348_v8 = vld [vmem:[%s24508_s7 + $0x758] ss:$100 sps:$4 sm:$0xff]  }
 0xc60   : > { %12215 = vmatpush1.bf16.msra.mxu1 %v3936_v4  ;;  %v18351_v4 = vld [vmem:[%s24508_s7 + $0x660] ss:$100 sps:$4 sm:$0xff]  }
 0xc61   : > { %12216 = vmatprep.subr.bf16.mxu1 %v24561_v0 }
 0xc63   : > { %11964 = vmatmul.mubr.bf16.gmra.mrb[212].mxu1 %v18300_v20  ;;  %v23000_v20 = vpop.permute.xlu1 %4029 }
 0xc64   : > { %12217 = vmatpush1.bf16.msra.mxu1 %v3938_v18  ;;  %11971 = vmatprep.mubr.bf16.mxu1 %v18304_v56  ;;  %v18358_v56 = vld [vmem:[%s24508_s7 + $0x8ec] ss:$100 sps:$4 sm:$0xff]   ;;  %v18366_v18 = vld [vmem:[%s24508_s7 + $0x9b4] ss:$100 sps:$4 sm:$0xff]  }
 0xc65   : > { %12218 = vmatprep.subr.bf16.mxu1 %v24561_v0  ;;  %10222 = vmatmul.mubr.bf16.vlgmr.msra.gmra.mrb[144].mxu0 %v18301_v44  ;;  %v18361_v44 = vld [vmem:[%s24508_s7 + $0x7f4] ss:$100 sps:$4 sm:$0xff]  }
 0xc66   : > { %10479 = vmatpush1.bf16.msra.mxu0 %v24589_v50  ;;  %10229 = vmatprep.mubr.bf16.mxu0 %v18307_v49  ;;  %v18360_v49 = vld [vmem:[%s24508_s7 + $0x8e8] ss:$100 sps:$4 sm:$0xff]   ;;  %v18363_v50 = vld [vmem:[%s24508_s7 + $0x7f0] ss:$100 sps:$4 sm:$0xff]  }
 0xc67   : > { %10480 = vmatprep.subr.bf16.mxu0 %v24561_v0 }
 0xc68   : > { %12219 = vmatpush1.bf16.msra.mxu1 %v3940_v13  ;;  %v18367_v13 = vld [vmem:[%s24508_s7 + $0x8bc] ss:$100 sps:$4 sm:$0xff]  }
 0xc69   : > { %12220 = vmatprep.subr.bf16.mxu1 %v24561_v0 }
 0xc6a   : > { %10481 = vmatpush1.bf16.msra.mxu0 %v24590_v58  ;;  %v18373_v58 = vld [vmem:[%s24508_s7 + $0x984] ss:$100 sps:$4 sm:$0xff]  }
 0xc6b   : > { %11972 = vmatmul.mubr.bf16.gmra.mrb[216].mxu1 %v18306_v5  ;;  %10482 = vmatprep.subr.bf16.mxu0 %v24561_v0  ;;  %v18364_v5 = vld [vmem:[%s24508_s7 + $0x9b0] ss:$100 sps:$4 sm:$0xff]  }
 0xc6c   : > { %12221 = vmatpush1.bf16.msra.mxu1 %v3942_v45  ;;  %11979 = vmatprep.mubr.bf16.mxu1 %v18310_v23  ;;  %v18372_v23 = vld [vmem:[%s24508_s7 + $0xa7c] ss:$100 sps:$4 sm:$0xff]   ;;  %v18376_v45 = vld [vmem:[%s24508_s7 + $0xb44] ss:$100 sps:$4 sm:$0xff]  }
 0xc6d   : > { %12222 = vmatprep.subr.bf16.mxu1 %v24561_v0  ;;  %10230 = vmatmul.mubr.bf16.gmra.mrb[148].mxu0 %v18309_v30  ;;  %v18369_v30 = vld [vmem:[%s24508_s7 + $0x8b8] ss:$100 sps:$4 sm:$0xff]  }
 0xc6e   : > { %10483 = vmatpush1.bf16.msra.mxu0 %v24591_v27  ;;  %10237 = vmatprep.mubr.bf16.mxu0 %v18313_v42  ;;  %v18370_v42 = vld [vmem:[%s24508_s7 + $0xa78] ss:$100 sps:$4 sm:$0xff]   ;;  %v18375_v27 = vld [vmem:[%s24508_s7 + $0x980] ss:$100 sps:$4 sm:$0xff]  }
 0xc6f   : > { %10484 = vmatprep.subr.bf16.mxu0 %v24561_v0 }
 0xc70   : > { %12223 = vmatpush1.bf16.msra.mxu1 %v3944_v35  ;;  %v18379_v35 = vld [vmem:[%s24508_s7 + $0xa4c] ss:$100 sps:$4 sm:$0xff]  }
 0xc71   : > { %12224 = vmatprep.subr.bf16.mxu1 %v24561_v0 }
 0xc72   : > { %10485 = vmatpush1.bf16.msra.mxu0 %v24592_v38  ;;  %v18385_v38 = vld [vmem:[%s24508_s7 + $0xb14] ss:$100 sps:$4 sm:$0xff]  }
 0xc73   : > { %11980 = vmatmul.mubr.bf16.gmra.mrb[220].mxu1 %v18312_v21  ;;  %10486 = vmatprep.subr.bf16.mxu0 %v24561_v0  ;;  %v18378_v21 = vld [vmem:[%s24508_s7 + $0xb40] ss:$100 sps:$4 sm:$0xff]  }
 0xc74   : > { %12225 = vmatpush1.bf16.msra.mxu1 %v3946_v31  ;;  %11987 = vmatprep.mubr.bf16.mxu1 %v18316_v51  ;;  %v18382_v51 = vld [vmem:[%s24508_s7 + $0xc0c] ss:$100 sps:$4 sm:$0xff]   ;;  %v18388_v31 = vld [vmem:[%s24508_s7 + $0xcd4] ss:$100 sps:$4 sm:$0xff]  }
 0xc75   : > { %12226 = vmatprep.subr.bf16.mxu1 %v24561_v0  ;;  %10238 = vmatmul.mubr.bf16.gmra.mrb[152].mxu0 %v18315_v36  ;;  %v18381_v36 = vld [vmem:[%s24508_s7 + $0xa48] ss:$100 sps:$4 sm:$0xff]  }
 0xc76   : > { %10487 = vmatpush1.bf16.msra.mxu0 %v24593_v3  ;;  %10245 = vmatprep.mubr.bf16.mxu0 %v18319_v15  ;;  %v18384_v15 = vld [vmem:[%s24508_s7 + $0xc08] ss:$100 sps:$4 sm:$0xff]   ;;  %v18387_v3 = vld [vmem:[%s24508_s7 + $0xb10] ss:$100 sps:$4 sm:$0xff]  }
 0xc77   : > { %10488 = vmatprep.subr.bf16.mxu0 %v24561_v0 }
 0xc78   : > { %12227 = vmatpush1.bf16.msra.mxu1 %v3948_v60  ;;  %v18391_v60 = vld [vmem:[%s24508_s7 + $0xbdc] ss:$100 sps:$4 sm:$0xff]  }
 0xc79   : > { %12228 = vmatprep.subr.bf16.mxu1 %v24561_v0 }
 0xc7a   : > { %10489 = vmatpush1.bf16.msra.mxu0 %v24594_v40  ;;  %v18397_v40 = vld [vmem:[%s24508_s7 + $0xca4] ss:$100 sps:$4 sm:$0xff]  }
 0xc7b   : > { %11988 = vmatmul.mubr.bf16.gmra.mrb[224].mxu1 %v18318_v24  ;;  %10490 = vmatprep.subr.bf16.mxu0 %v24561_v0  ;;  %v18390_v24 = vld [vmem:[%s24508_s7 + $0xcd0] ss:$100 sps:$4 sm:$0xff]  }
 0xc7c   : > { %12229 = vmatpush1.bf16.msra.mxu1 %v3950_v10  ;;  %11995 = vmatprep.mubr.bf16.mxu1 %v18322_v25  ;;  %v18394_v25 = vld [vmem:[%s24508_s7 + $0xd9c] ss:$100 sps:$4 sm:$0xff]   ;;  %v18400_v10 = vld [vmem:[%s24508_s7 + $0xe64] ss:$100 sps:$4 sm:$0xff]  }
 0xc7d   : > { %12230 = vmatprep.subr.bf16.mxu1 %v24561_v0  ;;  %10246 = vmatmul.mubr.bf16.gmra.mrb[156].mxu0 %v18321_v12  ;;  %v18393_v12 = vld [vmem:[%s24508_s7 + $0xbd8] ss:$100 sps:$4 sm:$0xff]  }
 0xc7e   : > { %10491 = vmatpush1.bf16.msra.mxu0 %v24595_v62  ;;  %10253 = vmatprep.mubr.bf16.mxu0 %v18325_v26  ;;  %v18396_v26 = vld [vmem:[%s24508_s7 + $0xd98] ss:$100 sps:$4 sm:$0xff]   ;;  %v18399_v62 = vld [vmem:[%s24508_s7 + $0xca0] ss:$100 sps:$4 sm:$0xff]  }
 0xc7f   : > { %10492 = vmatprep.subr.bf16.mxu0 %v24561_v0 }
 0xc80   : > { %12231 = vmatpush1.bf16.msra.mxu1 %v3952_v7  ;;  %v18403_v7 = vld [vmem:[%s24508_s7 + $0xd6c] ss:$100 sps:$4 sm:$0xff]  }
 0xc81   : > { %12232 = vmatprep.subr.bf16.mxu1 %v24561_v0 }
 0xc82   : > { %10493 = vmatpush1.bf16.msra.mxu0 %v24596_v22  ;;  %v18409_v22 = vld [vmem:[%s24508_s7 + $0xe34] ss:$100 sps:$4 sm:$0xff]  }
 0xc83   : > { %11996 = vmatmul.mubr.bf16.gmra.mrb[228].mxu1 %v18324_v32  ;;  %10494 = vmatprep.subr.bf16.mxu0 %v24561_v0  ;;  %v18402_v32 = vld [vmem:[%s24508_s7 + $0xe60] ss:$100 sps:$4 sm:$0xff]  }
 0xc84   : > { %12233 = vmatpush1.bf16.msra.mxu1 %v3954_v41  ;;  %12003 = vmatprep.mubr.bf16.mxu1 %v18328_v37  ;;  %v18406_v37 = vld [vmem:[%s24508_s7 + $0xf2c] ss:$100 sps:$4 sm:$0xff]   ;;  %v18412_v41 = vld [vmem:[%s24508_s7 + $0xff4] ss:$100 sps:$4 sm:$0xff]  }
 0xc85   : > { %12234 = vmatprep.subr.bf16.mxu1 %v24561_v0  ;;  %10254 = vmatmul.mubr.bf16.gmra.mrb[160].mxu0 %v18327_v1  ;;  %v18405_v1 = vld [vmem:[%s24508_s7 + $0xd68] ss:$100 sps:$4 sm:$0xff]  }
 0xc86   : > { %10495 = vmatpush1.bf16.msra.mxu0 %v24597_v39  ;;  %10261 = vmatprep.mubr.bf16.mxu0 %v18331_v11  ;;  %v18408_v11 = vld [vmem:[%s24508_s7 + $0xf28] ss:$100 sps:$4 sm:$0xff]   ;;  %v18411_v39 = vld [vmem:[%s24508_s7 + $0xe30] ss:$100 sps:$4 sm:$0xff]  }
 0xc87   : > { %10496 = vmatprep.subr.bf16.mxu0 %v24561_v0 }
 0xc88   : > { %12235 = vmatpush1.bf16.msra.mxu1 %v3956_v29  ;;  %v18415_v29 = vld [vmem:[%s24508_s7 + $0xefc] ss:$100 sps:$4 sm:$0xff]  }
 0xc89   : > { %12236 = vmatprep.subr.bf16.mxu1 %v24561_v0 }
 0xc8a   : > { %10497 = vmatpush1.bf16.msra.mxu0 %v24598_v19  ;;  %v18421_v19 = vld [vmem:[%s24508_s7 + $0xfc4] ss:$100 sps:$4 sm:$0xff]  }
 0xc8b   : > { %12004 = vmatmul.mubr.bf16.gmra.mrb[232].mxu1 %v18330_v9  ;;  %10498 = vmatprep.subr.bf16.mxu0 %v24561_v0  ;;  %v18414_v9 = vld [vmem:[%s24508_s7 + $0xff0] ss:$100 sps:$4 sm:$0xff]  }
 0xc8c   : > { %12237 = vmatpush1.bf16.msra.mxu1 %v3958_v17  ;;  %12011 = vmatprep.mubr.bf16.mxu1 %v18334_v59  ;;  %v18418_v59 = vld [vmem:[%s24508_s7 + $0x10bc] ss:$100 sps:$4 sm:$0xff]   ;;  %v18424_v17 = vld [vmem:[%s24508_s7 + $0x1184] ss:$100 sps:$4 sm:$0xff]  }
 0xc8d   : > { %12238 = vmatprep.subr.bf16.mxu1 %v24561_v0  ;;  %10262 = vmatmul.mubr.bf16.gmra.mrb[164].mxu0 %v18333_v2  ;;  %v18417_v2 = vld [vmem:[%s24508_s7 + $0xef8] ss:$100 sps:$4 sm:$0xff]  }
 0xc8e   : > { %10499 = vmatpush1.bf16.msra.mxu0 %v24599_v52  ;;  %10269 = vmatprep.mubr.bf16.mxu0 %v18337_v33  ;;  %v18420_v33 = vld [vmem:[%s24508_s7 + $0x10b8] ss:$100 sps:$4 sm:$0xff]   ;;  %v18423_v52 = vld [vmem:[%s24508_s7 + $0xfc0] ss:$100 sps:$4 sm:$0xff]  }
 0xc8f   : > { %10500 = vmatprep.subr.bf16.mxu0 %v24561_v0 }
 0xc90   : > { %12239 = vmatpush1.bf16.msra.mxu1 %v3960_v34  ;;  %v18427_v34 = vld [vmem:[%s24508_s7 + $0x108c] ss:$100 sps:$4 sm:$0xff]  }
 0xc91   : > { %12240 = vmatprep.subr.bf16.mxu1 %v24561_v0 }
 0xc92   : > { %10501 = vmatpush1.bf16.msra.mxu0 %v24600_v53  ;;  %v18433_v53 = vld [vmem:[%s24508_s7 + $0x1154] ss:$100 sps:$4 sm:$0xff]  }
 0xc93   : > { %12012 = vmatmul.mubr.bf16.gmra.mrb[236].mxu1 %v18336_v47  ;;  %10502 = vmatprep.subr.bf16.mxu0 %v24561_v0  ;;  %v18426_v47 = vld [vmem:[%s24508_s7 + $0x1180] ss:$100 sps:$4 sm:$0xff]  }
 0xc94   : > { %12241 = vmatpush1.bf16.msra.mxu1 %v3962_v63  ;;  %12019 = vmatprep.mubr.bf16.mxu1 %v18340_v46  ;;  %v18430_v46 = vld [vmem:[%s24508_s7 + $0x124c] ss:$100 sps:$4 sm:$0xff]   ;;  %v18436_v63 = vld [vmem:[%s24508_s7 + $0x1314] ss:$100 sps:$4 sm:$0xff]  }
 0xc95   : > { %12242 = vmatprep.subr.bf16.mxu1 %v24561_v0  ;;  %10270 = vmatmul.mubr.bf16.gmra.mrb[168].mxu0 %v18339_v43  ;;  %v18429_v43 = vld [vmem:[%s24508_s7 + $0x1088] ss:$100 sps:$4 sm:$0xff]  }
 0xc96   : > { %10503 = vmatpush1.bf16.msra.mxu0 %v20263_v57  ;;  %10277 = vmatprep.mubr.bf16.mxu0 %v18343_v61  ;;  %v18349_v57 = vld [vmem:[%s24508_s7 + $0x664] ss:$100 sps:$4 sm:$0xff]  }
 0xc97   : > { %10504 = vmatprep.subr.bf16.mxu0 %v24561_v0  ;;  %v18432_v61 = vld [vmem:[%s24508_s7 + $0x1248] ss:$100 sps:$4 sm:$0xff]  }
 0xc98   : > { %12243 = vmatpush1.bf16.msra.mxu1 %v3964_v55  ;;  %v18435_v55 = vld [vmem:[%s24508_s7 + $0x1150] ss:$100 sps:$4 sm:$0xff]  }
 0xc9a   : > { %10505 = vmatpush1.bf16.msra.mxu0 %v20271_v48  ;;  %v18352_v48 = vld [vmem:[%s24508_s7 + $0x824] ss:$100 sps:$4 sm:$0xff]  }
 0xc9b   : > { %12020 = vmatmul.mubr.bf16.gmra.mrb[240].mxu1 %v18342_v16  ;;  %10506 = vmatprep.subr.bf16.mxu0 %v24561_v0  ;;  %v18439_v16 = vld [vmem:[%s24508_s7 + $0x121c] ss:$100 sps:$4 sm:$0xff]  }
 0xc9c   : > { %12027 = vmatprep.mubr.bf16.mxu1 %v18346_v14  ;;  %v18438_v14 = vld [vmem:[%s24508_s7 + $0x1310] ss:$100 sps:$4 sm:$0xff]  }
 0xc9d   : > { %10278 = vmatmul.mubr.bf16.gmra.mrb[172].mxu0 %v18345_v6  ;;  %v18442_v6 = vld [vmem:[%s24508_s7 + $0x13dc] ss:$100 sps:$4 sm:$0xff]  }
 0xc9e   : > { %10507 = vmatpush1.bf16.msra.mxu0 %v20279_v28  ;;  %10285 = vmatprep.mubr.bf16.mxu0 %v18349_v57  ;;  %v18355_v28 = vld [vmem:[%s24508_s7 + $0x72c] ss:$100 sps:$4 sm:$0xff]   ;;  %v18441_v57 = vld [vmem:[%s24508_s7 + $0x1218] ss:$100 sps:$4 sm:$0xff]  }
 0xc9f   : > { %10508 = vmatprep.subr.bf16.mxu0 %v24561_v0  ;;  %v18354_v0 = vld [vmem:[%s24508_s7 + $0x820] ss:$100 sps:$4 sm:$0xff]  }
 0xca2   : > { %10509 = vmatpush1.bf16.msra.mxu0 %v20286_v54  ;;  %v18357_v54 = vld [vmem:[%s24508_s7 + $0x728] ss:$100 sps:$4 sm:$0xff]  }
 0xca3   : > { %12028 = vmatmul.mubr.bf16.gmra.mrb[244].mxu1 %v18348_v8  ;;  %15776 = vmatprep.subr.bf16.mxu0 %v23000_v20  ;;  %v18445_v8 = vld [vmem:[%s24508_s7 + $0x12e4] ss:$100 sps:$4 sm:$0xff]  }
 0xca4   : > { %12035 = vmatprep.mubr.bf16.mxu1 %v18352_v48  ;;  %v18444_v48 = vld [vmem:[%s24508_s7 + $0x13d8] ss:$100 sps:$4 sm:$0xff]  }
 0xca5   : > { %10286 = vmatmul.mubr.bf16.gmra.mrb[176].mxu0 %v18351_v4  ;;  %v18448_v4 = vld [vmem:[%s24508_s7 + $0x14a4] ss:$100 sps:$4 sm:$0xff]  }
 0xca6   : > { %10293 = vmatprep.mubr.bf16.mxu0 %v18355_v28  ;;  %v18447_v28 = vld [vmem:[%s24508_s7 + $0x12e0] ss:$100 sps:$4 sm:$0xff]  }
 0xcab   : > { %12036 = vmatmul.mubr.bf16.gmra.mrb[248].mxu1 %v18354_v0  ;;  %v18451_v0 = vld [vmem:[%s24508_s7 + $0x13ac] ss:$100 sps:$4 sm:$0xff]  }
 0xcac   : > { %12043 = vmatprep.mubr.bf16.mxu1 %v18358_v56  ;;  %v18450_v56 = vld [vmem:[%s24508_s7 + $0x14a0] ss:$100 sps:$4 sm:$0xff]  }
 0xcad   : > { %10294 = vmatmul.mubr.bf16.gmra.mrb[180].mxu0 %v18357_v54  ;;  %v18454_v54 = vld [vmem:[%s24508_s7 + $0x156c] ss:$100 sps:$4 sm:$0xff]  }
 0xcae   : > { %10301 = vmatprep.mubr.bf16.mxu0 %v18361_v44  ;;  %v18453_v44 = vld [vmem:[%s24508_s7 + $0x13a8] ss:$100 sps:$4 sm:$0xff]  }
 0xcb3   : > { %12044 = vmatmul.mubr.bf16.gmra.mrb[252].mxu1 %v18360_v49  ;;  %v18457_v49 = vld [vmem:[%s24508_s7 + $0x1474] ss:$100 sps:$4 sm:$0xff]  }
 0xcb4   : > { %12051 = vmatprep.mubr.bf16.mxu1 %v18366_v18  ;;  %v18456_v18 = vld [vmem:[%s24508_s7 + $0x1568] ss:$100 sps:$4 sm:$0xff]  }
 0xcb5   : > { %10302 = vmatmul.mubr.bf16.gmra.mrb[184].mxu0 %v18363_v50  ;;  %v18460_v50 = vld [vmem:[%s24508_s7 + $0x1634] ss:$100 sps:$4 sm:$0xff]  }
 0xcb6   : > { %10309 = vmatprep.mubr.bf16.mxu0 %v18367_v13  ;;  %v18459_v13 = vld [vmem:[%s24508_s7 + $0x1470] ss:$100 sps:$4 sm:$0xff]  }
 0xcbb   : > { %12052 = vmatmul.mubr.bf16.gmra.mrb[0].mxu1 %v18364_v5  ;;  %v18463_v5 = vld [vmem:[%s24508_s7 + $0x153c] ss:$100 sps:$4 sm:$0xff]  }
 0xcbc   : > { %12059 = vmatprep.mubr.bf16.mxu1 %v18372_v23  ;;  %v18462_v23 = vld [vmem:[%s24508_s7 + $0x1630] ss:$100 sps:$4 sm:$0xff]  }
 0xcbd   : > { %10310 = vmatmul.mubr.bf16.gmra.mrb[188].mxu0 %v18369_v30  ;;  %v18466_v30 = vld [vmem:[%s24508_s7 + $0x16fc] ss:$100 sps:$4 sm:$0xff]  }
 0xcbe   : > { %10317 = vmatprep.mubr.bf16.mxu0 %v18373_v58  ;;  %v18465_v58 = vld [vmem:[%s24508_s7 + $0x1538] ss:$100 sps:$4 sm:$0xff]  }
 0xcc3   : > { %12060 = vmatmul.mubr.bf16.gmra.mrb[4].mxu1 %v18370_v42  ;;  %v18471_v42 = vld [vmem:[%s24508_s7 + $0x1604] ss:$100 sps:$4 sm:$0xff]  }
 0xcc4   : > { %12067 = vmatprep.mubr.bf16.mxu1 %v18376_v45  ;;  %v18468_v45 = vld [vmem:[%s24508_s7 + $0x16f8] ss:$100 sps:$4 sm:$0xff]  }
 0xcc5   : > { %10318 = vmatmul.mubr.bf16.gmra.mrb[192].mxu0 %v18375_v27  ;;  %v18472_v27 = vld [vmem:[%s24508_s7 + $0x17c4] ss:$100 sps:$4 sm:$0xff]  }
 0xcc6   : > { %10325 = vmatprep.mubr.bf16.mxu0 %v18379_v35  ;;  %v18469_v35 = vld [vmem:[%s24508_s7 + $0x1600] ss:$100 sps:$4 sm:$0xff]  }
 0xccb   : > { %12068 = vmatmul.mubr.bf16.gmra.mrb[136].mxu1 %v18378_v21  ;;  %v18477_v21 = vld [vmem:[%s24508_s7 + $0x16cc] ss:$100 sps:$4 sm:$0xff]  }
 0xccc   : > { %12075 = vmatprep.mubr.bf16.mxu1 %v18382_v51  ;;  %v18474_v51 = vld [vmem:[%s24508_s7 + $0x17c0] ss:$100 sps:$4 sm:$0xff]  }
 0xccd   : > { %10326 = vmatmul.mubr.bf16.gmra.mrb[196].mxu0 %v18381_v36  ;;  %v18478_v36 = vld [vmem:[%s24508_s7 + $0x188c] ss:$100 sps:$4 sm:$0xff]  }
 0xcce   : > { %10333 = vmatprep.mubr.bf16.mxu0 %v18385_v38  ;;  %v18475_v38 = vld [vmem:[%s24508_s7 + $0x16c8] ss:$100 sps:$4 sm:$0xff]  }
 0xcd3   : > { %12076 = vmatmul.mubr.bf16.gmra.mrb[140].mxu1 %v18384_v15  ;;  %v18483_v15 = vld [vmem:[%s24508_s7 + $0x1794] ss:$100 sps:$4 sm:$0xff]  }
 0xcd4   : > { %12083 = vmatprep.mubr.bf16.mxu1 %v18388_v31  ;;  %v18480_v31 = vld [vmem:[%s24508_s7 + $0x1888] ss:$100 sps:$4 sm:$0xff]  }
 0xcd5   : > { %10334 = vmatmul.mubr.bf16.gmra.mrb[200].mxu0 %v18387_v3  ;;  %v18486_v3 = vld [vmem:[%s24508_s7 + $0x5c] ss:$100 sps:$4 sm:$0xff]  }
 0xcd6   : > { %10341 = vmatprep.mubr.bf16.mxu0 %v18391_v60  ;;  %v18481_v60 = vld [vmem:[%s24508_s7 + $0x1790] ss:$100 sps:$4 sm:$0xff]  }
 0xcdb   : > { %12084 = vmatmul.mubr.bf16.gmra.mrb[144].mxu1 %v18390_v24  ;;  %v18489_v24 = vld [vmem:[%s24508_s7 + $0x185c] ss:$100 sps:$4 sm:$0xff]  }
 0xcdc   : > { %12091 = vmatprep.mubr.bf16.mxu1 %v18394_v25  ;;  %v18484_v25 = vld [vmem:[%s24508_s7 + $0x58] ss:$100 sps:$4 sm:$0xff]  }
 0xcdd   : > { %10342 = vmatmul.mubr.bf16.gmra.mrb[204].mxu0 %v18393_v12  ;;  %v18490_v12 = vld [vmem:[%s24508_s7 + $0x124] ss:$100 sps:$4 sm:$0xff]  }
 0xcde   : > { %10349 = vmatprep.mubr.bf16.mxu0 %v18397_v40  ;;  %v18487_v40 = vld [vmem:[%s24508_s7 + $0x1858] ss:$100 sps:$4 sm:$0xff]  }
 0xce3   : > { %12092 = vmatmul.mubr.bf16.gmra.mrb[148].mxu1 %v18396_v26  ;;  %v18495_v26 = vld [vmem:[%s24508_s7 + $0x2c] ss:$100 sps:$4 sm:$0xff]  }
 0xce4   : > { %12099 = vmatprep.mubr.bf16.mxu1 %v18400_v10  ;;  %v18492_v10 = vld [vmem:[%s24508_s7 + $0x120] ss:$100 sps:$4 sm:$0xff]  }
 0xce5   : > { %10350 = vmatmul.mubr.bf16.gmra.mrb[208].mxu0 %v18399_v62  ;;  %v18496_v62 = vld [vmem:[%s24508_s7 + $0x1ec] ss:$100 sps:$4 sm:$0xff]  }
 0xce6   : > { %10357 = vmatprep.mubr.bf16.mxu0 %v18403_v7  ;;  %v18493_v7 = vld [vmem:[%s24508_s7 + $0x28] ss:$100 sps:$4 sm:$0xff]  }
 0xceb   : > { %12100 = vmatmul.mubr.bf16.gmra.mrb[152].mxu1 %v18402_v32  ;;  %v18499_v32 = vld [vmem:[%s24508_s7 + $0xf4] ss:$100 sps:$4 sm:$0xff]  }
 0xcec   : > { %12107 = vmatprep.mubr.bf16.mxu1 %v18406_v37  ;;  %v4032_v37 = vpop.permute.xlu0 %4031 }
 0xced   : > { %10358 = vmatmul.mubr.bf16.gmra.mrb[212].mxu0 %v18405_v1  ;;  %v18498_v1 = vld [vmem:[%s24508_s7 + $0x1e8] ss:$100 sps:$4 sm:$0xff]  }
 0xcee   : > { %10365 = vmatprep.mubr.bf16.mxu0 %v18409_v22  ;;  %v18502_v22 = vld [vmem:[%s24508_s7 + $0x2b4] ss:$100 sps:$4 sm:$0xff]  }
 0xcf3   : > { %12108 = vmatmul.mubr.bf16.gmra.mrb[156].mxu1 %v18408_v11  ;;  %v18501_v11 = vld [vmem:[%s24508_s7 + $0xf0] ss:$100 sps:$4 sm:$0xff]  }
 0xcf4   : > { %12115 = vmatprep.mubr.bf16.mxu1 %v18412_v41  ;;  %v4034_v41 = vpop.permute.xlu1 %4033 }
 0xcf5   : > { %10366 = vmatmul.mubr.bf16.gmra.mrb[216].mxu0 %v18411_v39  ;;  %v4036_v39 = vpop.permute.xlu0 %4035 }
 0xcf6   : > { %10373 = vmatprep.mubr.bf16.mxu0 %v18415_v29  ;;  %v18504_v29 = vld [vmem:[%s24508_s7 + $0x2b0] ss:$100 sps:$4 sm:$0xff]  }
 0xcfb   : > { %12116 = vmatmul.mubr.bf16.gmra.mrb[160].mxu1 %v18414_v9  ;;  %v18508_v9 = vld [vmem:[%s24508_s7 + $0x37c] ss:$100 sps:$4 sm:$0xff]  }
 0xcfc   : > { %12123 = vmatprep.mubr.bf16.mxu1 %v18418_v59  ;;  %v18507_v59 = vld [vmem:[%s24508_s7 + $0x1b8] ss:$100 sps:$4 sm:$0xff]  }
 0xcfd   : > { %10374 = vmatmul.mubr.bf16.gmra.mrb[220].mxu0 %v18417_v2  ;;  %v18511_v2 = vld [vmem:[%s24508_s7 + $0x284] ss:$100 sps:$4 sm:$0xff]  }
 0xcfe   : > { %10381 = vmatprep.mubr.bf16.mxu0 %v18421_v19  ;;  %v18510_v19 = vld [vmem:[%s24508_s7 + $0x378] ss:$100 sps:$4 sm:$0xff]  }
 0xd03   : > { %12124 = vmatmul.mubr.bf16.gmra.mrb[164].mxu1 %v18420_v33  ;;  %v18514_v33 = vld [vmem:[%s24508_s7 + $0x444] ss:$100 sps:$4 sm:$0xff]  }
 0xd04   : > { %12131 = vmatprep.mubr.bf16.mxu1 %v18424_v17  ;;  %v18513_v17 = vld [vmem:[%s24508_s7 + $0x280] ss:$100 sps:$4 sm:$0xff]  }
 0xd05   : > { %10382 = vmatmul.mubr.bf16.gmra.mrb[224].mxu0 %v18423_v52  ;;  %v18517_v52 = vld [vmem:[%s24508_s7 + $0x34c] ss:$100 sps:$4 sm:$0xff]  }
 0xd06   : > { %10389 = vmatprep.mubr.bf16.mxu0 %v18427_v34  ;;  %v18516_v34 = vld [vmem:[%s24508_s7 + $0x440] ss:$100 sps:$4 sm:$0xff]  }
 0xd0b   : > { %12132 = vmatmul.mubr.bf16.gmra.mrb[168].mxu1 %v18426_v47  ;;  %v18520_v47 = vld [vmem:[%s24508_s7 + $0x50c] ss:$100 sps:$4 sm:$0xff]  }
 0xd0c   : > { %12139 = vmatprep.mubr.bf16.mxu1 %v18430_v46  ;;  %v18519_v46 = vld [vmem:[%s24508_s7 + $0x348] ss:$100 sps:$4 sm:$0xff]  }
 0xd0d   : > { %10390 = vmatmul.mubr.bf16.gmra.mrb[228].mxu0 %v18429_v43  ;;  %v18523_v43 = vld [vmem:[%s24508_s7 + $0x414] ss:$100 sps:$4 sm:$0xff]  }
 0xd0e   : > { %10397 = vmatprep.mubr.bf16.mxu0 %v18433_v53  ;;  %v18522_v53 = vld [vmem:[%s24508_s7 + $0x508] ss:$100 sps:$4 sm:$0xff]  }
 0xd13   : > { %12140 = vmatmul.mubr.bf16.gmra.mrb[172].mxu1 %v18432_v61  ;;  %v18526_v61 = vld [vmem:[%s24508_s7 + $0x5d4] ss:$100 sps:$4 sm:$0xff]  }
 0xd14   : > { %12147 = vmatprep.mubr.bf16.mxu1 %v18436_v63  ;;  %v18525_v63 = vld [vmem:[%s24508_s7 + $0x410] ss:$100 sps:$4 sm:$0xff]  }
 0xd15   : > { %10398 = vmatmul.mubr.bf16.gmra.mrb[232].mxu0 %v18435_v55  ;;  %v18529_v55 = vld [vmem:[%s24508_s7 + $0x4dc] ss:$100 sps:$4 sm:$0xff]  }
 0xd16   : > { %10405 = vmatprep.mubr.bf16.mxu0 %v18439_v16  ;;  %v18528_v16 = vld [vmem:[%s24508_s7 + $0x5d0] ss:$100 sps:$4 sm:$0xff]  }
 0xd1b   : > { %12148 = vmatmul.mubr.bf16.gmra.mrb[176].mxu1 %v18438_v14  ;;  %v18532_v14 = vld [vmem:[%s24508_s7 + $0x69c] ss:$100 sps:$4 sm:$0xff]  }
 0xd1c   : > { %12155 = vmatprep.mubr.bf16.mxu1 %v18442_v6  ;;  %v18531_v6 = vld [vmem:[%s24508_s7 + $0x4d8] ss:$100 sps:$4 sm:$0xff]  }
 0xd1d   : > { %10406 = vmatmul.mubr.bf16.gmra.mrb[236].mxu0 %v18441_v57  ;;  %v18535_v57 = vld [vmem:[%s24508_s7 + $0x5a4] ss:$100 sps:$4 sm:$0xff]  }
 0xd1e   : > { %10413 = vmatprep.mubr.bf16.mxu0 %v18445_v8  ;;  %v18534_v8 = vld [vmem:[%s24508_s7 + $0x698] ss:$100 sps:$4 sm:$0xff]  }
 0xd23   : > { %12156 = vmatmul.mubr.bf16.gmra.mrb[180].mxu1 %v18444_v48  ;;  %v18538_v48 = vld [vmem:[%s24508_s7 + $0x764] ss:$100 sps:$4 sm:$0xff]  }
 0xd24   : > { %12163 = vmatprep.mubr.bf16.mxu1 %v18448_v4  ;;  %v18537_v4 = vld [vmem:[%s24508_s7 + $0x5a0] ss:$100 sps:$4 sm:$0xff]  }
 0xd25   : > { %10414 = vmatmul.mubr.bf16.gmra.mrb[240].mxu0 %v18447_v28  ;;  %v18541_v28 = vld [vmem:[%s24508_s7 + $0x66c] ss:$100 sps:$4 sm:$0xff]  }
 0xd26   : > { %10421 = vmatprep.mubr.bf16.mxu0 %v18451_v0  ;;  %v18540_v0 = vld [vmem:[%s24508_s7 + $0x760] ss:$100 sps:$4 sm:$0xff]  }
 0xd2b   : > { %12164 = vmatmul.mubr.bf16.gmra.mrb[184].mxu1 %v18450_v56  ;;  %v18544_v56 = vld [vmem:[%s24508_s7 + $0x82c] ss:$100 sps:$4 sm:$0xff]  }
 0xd2c   : > { %12171 = vmatprep.mubr.bf16.mxu1 %v18454_v54  ;;  %v18543_v54 = vld [vmem:[%s24508_s7 + $0x668] ss:$100 sps:$4 sm:$0xff]  }
 0xd2d   : > { %10422 = vmatmul.mubr.bf16.gmra.mrb[244].mxu0 %v18453_v44  ;;  %v18547_v44 = vld [vmem:[%s24508_s7 + $0x734] ss:$100 sps:$4 sm:$0xff]  }
 0xd2e   : > { %10429 = vmatprep.mubr.bf16.mxu0 %v18457_v49  ;;  %v18546_v49 = vld [vmem:[%s24508_s7 + $0x828] ss:$100 sps:$4 sm:$0xff]  }
 0xd33   : > { %12172 = vmatmul.mubr.bf16.gmra.mrb[188].mxu1 %v18456_v18 }
 0xd34   : > { %12179 = vmatprep.mubr.bf16.mxu1 %v18460_v50  ;;  %v18550_v50 = vld [vmem:[%s24508_s7 + $0x8f4] ss:$100 sps:$4 sm:$0xff]  }
 0xd35   : > { %10430 = vmatmul.mubr.bf16.gmra.mrb[248].mxu0 %v18459_v13 }
 0xd36   : > { %10437 = vmatprep.mubr.bf16.mxu0 %v18463_v5  ;;  %v18549_v5 = vld [vmem:[%s24508_s7 + $0x730] ss:$100 sps:$4 sm:$0xff]  }
 0xd3b   : > { %12180 = vmatmul.mubr.bf16.gmra.mrb[192].mxu1 %v18462_v23 }
 0xd3c   : > { %12187 = vmatprep.mubr.bf16.mxu1 %v18466_v30  ;;  %v18553_v30 = vld [vmem:[%s24508_s7 + $0x7fc] ss:$100 sps:$4 sm:$0xff]  }
 0xd3d   : > { %10438 = vmatmul.mubr.bf16.gmra.mrb[252].mxu0 %v18465_v58 }
 0xd3e   : > { %10445 = vmatprep.mubr.bf16.mxu0 %v18471_v42  ;;  %v18552_v42 = vld [vmem:[%s24508_s7 + $0x8f0] ss:$100 sps:$4 sm:$0xff]  }
 0xd43   : > { %12188 = vmatmul.mubr.bf16.gmra.mrb[196].mxu1 %v18468_v45 }
 0xd44   : > { %12195 = vmatprep.mubr.bf16.mxu1 %v18472_v27  ;;  %v18558_v27 = vld [vmem:[%s24508_s7 + $0x9bc] ss:$100 sps:$4 sm:$0xff]  }
 0xd45   : > { %10446 = vmatmul.mubr.bf16.gmra.mrb[0].mxu0 %v18469_v35 }
 0xd46   : > { %10453 = vmatprep.mubr.bf16.mxu0 %v18477_v21  ;;  %v18555_v21 = vld [vmem:[%s24508_s7 + $0x7f8] ss:$100 sps:$4 sm:$0xff]  }
 0xd4b   : > { %12196 = vmatmul.mubr.bf16.gmra.mrb[200].mxu1 %v18474_v51 }
 0xd4c   : > { %12203 = vmatprep.mubr.bf16.mxu1 %v18478_v36  ;;  %v18559_v36 = vld [vmem:[%s24508_s7 + $0x8c4] ss:$100 sps:$4 sm:$0xff]  }
 0xd4d   : > { %10454 = vmatmul.mubr.bf16.gmra.mrb[4].mxu0 %v18475_v38 }
 0xd4e   : > { %10461 = vmatprep.mubr.bf16.mxu0 %v18483_v15  ;;  %v18556_v15 = vld [vmem:[%s24508_s7 + $0x9b8] ss:$100 sps:$4 sm:$0xff]  }
 0xd53   : > { %12204 = vmatmul.mubr.bf16.gmra.mrb[204].mxu1 %v18480_v31 }
 0xd54   : > { %12244 = vmatprep.mubr.bf16.mxu1 %v18486_v3  ;;  %v18564_v3 = vld [vmem:[%s24508_s7 + $0xa84] ss:$100 sps:$4 sm:$0xff]  }
 0xd55   : > { %10462 = vmatmul.mubr.bf16.gmra.mrb[8].mxu0 %v18481_v60 }
 0xd56   : > { %10469 = vmatprep.mubr.bf16.mxu0 %v18489_v24  ;;  %v18561_v24 = vld [vmem:[%s24508_s7 + $0x8c0] ss:$100 sps:$4 sm:$0xff]  }
 0xd5b   : > { %12245 = vmatmul.mubr.bf16.vlgmr.msra.gmra.mrb[208].mxu1 %v18484_v25 }
 0xd5c   : > { %12252 = vmatprep.mubr.bf16.mxu1 %v18490_v12  ;;  %v18565_v12 = vld [vmem:[%s24508_s7 + $0x98c] ss:$100 sps:$4 sm:$0xff]  }
 0xd5d   : > { %10470 = vmatmul.mubr.bf16.gmra.mrb[12].mxu0 %v18487_v40 }
 0xd5e   : > { %10510 = vmatprep.mubr.bf16.mxu0 %v18495_v26  ;;  %v18562_v26 = vld [vmem:[%s24508_s7 + $0xa80] ss:$100 sps:$4 sm:$0xff]  }
 0xd63   : > { %12253 = vmatmul.mubr.bf16.gmra.mrb[212].mxu1 %v18492_v10 }
 0xd64   : > { %12260 = vmatprep.mubr.bf16.mxu1 %v18496_v62  ;;  %v18568_v62 = vld [vmem:[%s24508_s7 + $0xb4c] ss:$100 sps:$4 sm:$0xff]  }
 0xd65   : > { %10511 = vmatmul.mubr.bf16.vlgmr.msra.gmra.mrb[144].mxu0 %v18493_v7 }
 0xd66   : > { %15777 = vmatpush3.bf16.msra.mxu0 %v23000_v20  ;;  %10518 = vmatprep.mubr.bf16.mxu0 %v18499_v32  ;;  %v18505_v20 = vld [vmem:[%s24508_s7 + $0x1bc] ss:$100 sps:$4 sm:$0xff]   ;;  %v18567_v32 = vld [vmem:[%s24508_s7 + $0x988] ss:$100 sps:$4 sm:$0xff]  }
 0xd67   : > { %15778 = vmatprep.subr.bf16.mxu0 %v4032_v37 }
 0xd6a   : > { %15779 = vmatpush3.bf16.msra.mxu0 %v4032_v37 }
 0xd6b   : > { %12261 = vmatmul.mubr.bf16.gmra.mrb[216].mxu1 %v18498_v1  ;;  %15780 = vmatprep.subr.bf16.mxu0 %v4034_v41  ;;  %v18571_v1 = vld [vmem:[%s24508_s7 + $0xa54] ss:$100 sps:$4 sm:$0xff]  }
 0xd6c   : > { %12268 = vmatprep.mubr.bf16.mxu1 %v18502_v22 }
 0xd6d   : > { %10519 = vmatmul.mubr.bf16.gmra.mrb[148].mxu0 %v18501_v11  ;;  %v18570_v11 = vld [vmem:[%s24508_s7 + $0xb48] ss:$100 sps:$4 sm:$0xff]  }
 0xd6e   : > { %15781 = vmatpush3.bf16.msra.mxu0 %v4034_v41  ;;  %10526 = vmatprep.mubr.bf16.mxu0 %v18505_v20  ;;  %v18574_v20 = vld [vmem:[%s24508_s7 + $0xc14] ss:$100 sps:$4 sm:$0xff]  }
 0xd6f   : > { %15782 = vmatprep.subr.bf16.mxu0 %v4036_v39 }
 0xd72   : > { %15783 = vmatpush3.bf16.msra.mxu0 %v4036_v39 }
 0xd73   : > { %12269 = vmatmul.mubr.bf16.gmra.mrb[220].mxu1 %v18504_v29  ;;  %v18573_v29 = vld [vmem:[%s24508_s7 + $0xa50] ss:$100 sps:$4 sm:$0xff]  }
 0xd74   : > { %12276 = vmatprep.mubr.bf16.mxu1 %v18508_v9 }
 0xd75   : > { %10527 = vmatmul.mubr.bf16.gmra.mrb[152].mxu0 %v18507_v59  ;;  %v18577_v59 = vld [vmem:[%s24508_s7 + $0x60] ss:$100 sps:$4 sm:$0xff]  }
 0xd76   : > { %10534 = vmatprep.mubr.bf16.mxu0 %v18511_v2 }
 0xd7b   : > { %12277 = vmatmul.mubr.bf16.gmra.mrb[224].mxu1 %v18510_v19  ;;  %v18576_v19 = vld [vmem:[%s24508_s7 + $0xc10] ss:$100 sps:$4 sm:$0xff]  }
 0xd7c   : > { %12284 = vmatprep.mubr.bf16.mxu1 %v18514_v33 }
 0xd7d   : > { %10535 = vmatmul.mubr.bf16.gmra.mrb[156].mxu0 %v18513_v17  ;;  %v18579_v17 = vld [vmem:[%s24508_s7 + $0xcdc] ss:$100 sps:$4 sm:$0xff]  }
 0xd7e   : > { %10542 = vmatprep.mubr.bf16.mxu0 %v18517_v52 }
 0xd83   : > { %12285 = vmatmul.mubr.bf16.gmra.mrb[228].mxu1 %v18516_v34  ;;  %v18578_v34 = vld [vmem:[%s24508_s7 + $0x128] ss:$100 sps:$4 sm:$0xff]  }
 0xd84   : > { %12292 = vmatprep.mubr.bf16.mxu1 %v18520_v47 }
 0xd85   : > { %10543 = vmatmul.mubr.bf16.gmra.mrb[160].mxu0 %v18519_v46  ;;  %v18582_v46 = vld [vmem:[%s24508_s7 + $0x1f0] ss:$100 sps:$4 sm:$0xff]  }
 0xd86   : > { %10550 = vmatprep.mubr.bf16.mxu0 %v18523_v43 }
 0xd8b   : > { %12293 = vmatmul.mubr.bf16.gmra.mrb[232].mxu1 %v18522_v53  ;;  %v18581_v53 = vld [vmem:[%s24508_s7 + $0xcd8] ss:$100 sps:$4 sm:$0xff]  }
 0xd8c   : > { %12300 = vmatprep.mubr.bf16.mxu1 %v18526_v61 }
 0xd8d   : > { %10551 = vmatmul.mubr.bf16.gmra.mrb[164].mxu0 %v18525_v63  ;;  %v18584_v63 = vld [vmem:[%s24508_s7 + $0xda4] ss:$100 sps:$4 sm:$0xff]  }
 0xd8e   : > { %10558 = vmatprep.mubr.bf16.mxu0 %v18529_v55 }
 0xd93   : > { %12301 = vmatmul.mubr.bf16.gmra.mrb[236].mxu1 %v18528_v16  ;;  %v18583_v16 = vld [vmem:[%s24508_s7 + $0x2b8] ss:$100 sps:$4 sm:$0xff]  }
 0xd94   : > { %12308 = vmatprep.mubr.bf16.mxu1 %v18532_v14 }
 0xd95   : > { %10559 = vmatmul.mubr.bf16.gmra.mrb[168].mxu0 %v18531_v6  ;;  %v18587_v6 = vld [vmem:[%s24508_s7 + $0x380] ss:$100 sps:$4 sm:$0xff]  }
 0xd96   : > { %10566 = vmatprep.mubr.bf16.mxu0 %v18535_v57 }
 0xd9b   : > { %12309 = vmatmul.mubr.bf16.gmra.mrb[240].mxu1 %v18534_v8  ;;  %v18586_v8 = vld [vmem:[%s24508_s7 + $0xda0] ss:$100 sps:$4 sm:$0xff]  }
 0xd9c   : > { %12316 = vmatprep.mubr.bf16.mxu1 %v18538_v48 }
 0xd9d   : > { %10567 = vmatmul.mubr.bf16.gmra.mrb[172].mxu0 %v18537_v4  ;;  %v18589_v4 = vld [vmem:[%s24508_s7 + $0xe6c] ss:$100 sps:$4 sm:$0xff]  }
 0xd9e   : > { %10574 = vmatprep.mubr.bf16.mxu0 %v18541_v28 }
 0xda3   : > { %12317 = vmatmul.mubr.bf16.gmra.mrb[244].mxu1 %v18540_v0  ;;  %v18588_v0 = vld [vmem:[%s24508_s7 + $0x448] ss:$100 sps:$4 sm:$0xff]  }
 0xda4   : > { %12324 = vmatprep.mubr.bf16.mxu1 %v18544_v56 }
 0xda5   : > { %10575 = vmatmul.mubr.bf16.gmra.mrb[176].mxu0 %v18543_v54  ;;  %v18592_v54 = vld [vmem:[%s24508_s7 + $0x510] ss:$100 sps:$4 sm:$0xff]  }
 0xda6   : > { %10582 = vmatprep.mubr.bf16.mxu0 %v18547_v44 }
 0xda8   : > { %v23395_v18 = vpop.f32.mrb[200].mxu0 }
 0xda9   : > { %v10337_v13 = vpop.f32.mrb[201].mxu0 }
 0xdaa   : > { %v23403_v23 = vpop.f32.mrb[202].mxu0  ;;  %v18594_v13 = vld [vmem:[%s24508_s7 + $0xf34] ss:$100 sps:$4 sm:$0xff]  }
 0xdab   : > { %12325 = vmatmul.mubr.bf16.gmra.mrb[248].mxu1 %v18546_v49  ;;  %v10340_v58 = vpop.f32.mrb[203].mxu0  ;;  %v18591_v49 = vld [vmem:[%s24508_s7 + $0xe68] ss:$100 sps:$4 sm:$0xff]  }
 0xdac   : > { %12332 = vmatprep.mubr.bf16.mxu1 %v18550_v50 }
 0xdad   : > { %10583 = vmatmul.mubr.bf16.gmra.mrb[180].mxu0 %v18549_v5 }
 0xdae   : > { %10590 = vmatprep.mubr.bf16.mxu0 %v18553_v30  ;;  %v18593_v30 = vld [vmem:[%s24508_s7 + $0x5d8] ss:$100 sps:$4 sm:$0xff]  }
 0xdb0   : > { %v23411_v45 = vpop.f32.mrb[204].mxu0 }
 0xdb1   : > { %v10345_v35 = vpop.f32.mrb[205].mxu0 }
 0xdb2   : > { %v23419_v51 = vpop.f32.mrb[206].mxu0  ;;  %v18596_v35 = vld [vmem:[%s24508_s7 + $0xf30] ss:$100 sps:$4 sm:$0xff]  }
 0xdb3   : > { %12333 = vmatmul.mubr.bf16.gmra.mrb[252].mxu1 %v18552_v42  ;;  %v10348_v38 = vpop.f32.mrb[207].mxu0  ;;  %v18597_v42 = vld [vmem:[%s24508_s7 + $0x6a0] ss:$100 sps:$4 sm:$0xff]  }
 0xdb4   : > { %12340 = vmatprep.mubr.bf16.mxu1 %v18558_v27 }
 0xdb5   : > { %10591 = vmatmul.mubr.bf16.gmra.mrb[184].mxu0 %v18555_v21 }
 0xdb6   : > { %10598 = vmatprep.mubr.bf16.mxu0 %v18559_v36  ;;  %v18599_v36 = vld [vmem:[%s24508_s7 + $0xffc] ss:$100 sps:$4 sm:$0xff]  }
 0xdb8   : > { %v23427_v31 = vpop.f32.mrb[208].mxu0 }
 0xdb9   : > { %v10353_v60 = vpop.f32.mrb[209].mxu0 }
 0xdba   : > { %v23435_v25 = vpop.f32.mrb[210].mxu0  ;;  %v18602_v60 = vld [vmem:[%s24508_s7 + $0x830] ss:$100 sps:$4 sm:$0xff]  }
 0xdbb   : > { %12341 = vmatmul.mubr.bf16.gmra.mrb[0].mxu1 %v18556_v15  ;;  %v10356_v40 = vpop.f32.mrb[211].mxu0  ;;  %v18598_v15 = vld [vmem:[%s24508_s7 + $0x768] ss:$100 sps:$4 sm:$0xff]  }
 0xdbc   : > { %12348 = vmatprep.mubr.bf16.mxu1 %v18564_v3 }
 0xdbd   : > { %10599 = vmatmul.mubr.bf16.gmra.mrb[188].mxu0 %v18561_v24 }
 0xdbe   : > { %10606 = vmatprep.mubr.bf16.mxu0 %v18565_v12  ;;  %v18601_v12 = vld [vmem:[%s24508_s7 + $0xff8] ss:$100 sps:$4 sm:$0xff]  }
 0xdc0   : > { %v23443_v10 = vpop.f32.mrb[212].mxu0 }
 0xdc1   : > { %v10361_v7 = vpop.f32.mrb[213].mxu0 }
 0xdc2   : > { %v23451_v37 = vpop.f32.mrb[214].mxu0  ;;  %v18603_v7 = vld [vmem:[%s24508_s7 + $0x8f8] ss:$100 sps:$4 sm:$0xff]  }
 0xdc3   : > { %12349 = vmatmul.mubr.bf16.gmra.mrb[4].mxu1 %v18562_v26  ;;  %v10364_v22 = vpop.f32.mrb[215].mxu0  ;;  %v18604_v26 = vld [vmem:[%s24508_s7 + $0x10c4] ss:$100 sps:$4 sm:$0xff]  }
 0xdc4   : > { %12356 = vmatprep.mubr.bf16.mxu1 %v18568_v62 }
 0xdc5   : > { %10607 = vmatmul.mubr.bf16.gmra.mrb[192].mxu0 %v18567_v32 }
 0xdc6   : > { %10614 = vmatprep.mubr.bf16.mxu0 %v18571_v1  ;;  %v18607_v1 = vld [vmem:[%s24508_s7 + $0x9c0] ss:$100 sps:$4 sm:$0xff]  }
 0xdc8   : > { %v23459_v41 = vpop.f32.mrb[216].mxu0 }
 0xdc9   : > { %v10369_v39 = vpop.f32.mrb[217].mxu0 }
 0xdca   : > { %v23467_v9 = vpop.f32.mrb[218].mxu0  ;;  %v18609_v39 = vld [vmem:[%s24508_s7 + $0x118c] ss:$100 sps:$4 sm:$0xff]  }
 0xdcb   : > { %12357 = vmatmul.mubr.bf16.gmra.mrb[136].mxu1 %v18570_v11  ;;  %v10372_v2 = vpop.f32.mrb[219].mxu0  ;;  %v18606_v11 = vld [vmem:[%s24508_s7 + $0x10c0] ss:$100 sps:$4 sm:$0xff]  }
 0xdcc   : > { %12364 = vmatprep.mubr.bf16.mxu1 %v18574_v20 }
 0xdcd   : > { %10615 = vmatmul.mubr.bf16.gmra.mrb[196].mxu0 %v18573_v29 }
 0xdce   : > { %15784 = vmatprep.mubr.msk.bf16.mxu0 %vm1633_vm2, %v18577_v59  ;;  %v18608_v59 = vld [vmem:[%s24508_s7 + $0xa88] ss:$100 sps:$4 sm:$0xff]  }
 0xdd0   : > { %v23476_v33 = vpop.f32.mrb[220].mxu0 }
 0xdd1   : > { %v10377_v52 = vpop.f32.mrb[221].mxu0 }
 0xdd2   : > { %v23484_v47 = vpop.f32.mrb[222].mxu0  ;;  %v18611_v52 = vld [vmem:[%s24508_s7 + $0x1188] ss:$100 sps:$4 sm:$0xff]  }
 0xdd3   : > { %12365 = vmatmul.mubr.bf16.gmra.mrb[140].mxu1 %v18576_v19  ;;  %v10380_v43 = vpop.f32.mrb[223].mxu0  ;;  %v18612_v19 = vld [vmem:[%s24508_s7 + $0xb50] ss:$100 sps:$4 sm:$0xff]  }
 0xdd4   : > { %12372 = vmatprep.mubr.bf16.mxu1 %v18579_v17 }
 0xdd5   : > { %15785 = vmatmul.mubr.msk.bf16.vlgmr.msra.gmra.mrb[16].mxu0 %vm1633_vm2, %v18578_v34 }
 0xdd6   : > { %15788 = vmatprep.mubr.msk.bf16.mxu0 %vm1633_vm2, %v18582_v46  ;;  %v18614_v46 = vld [vmem:[%s24508_s7 + $0x1254] ss:$100 sps:$4 sm:$0xff]  }
 0xdd8   : > { %v23494_v61 = vpop.f32.mrb[224].mxu0 }
 0xdd9   : > { %v10385_v55 = vpop.f32.mrb[225].mxu0 }
 0xdda   : > { %v23502_v14 = vpop.f32.mrb[226].mxu0  ;;  %v18617_v55 = vld [vmem:[%s24508_s7 + $0xce0] ss:$100 sps:$4 sm:$0xff]  }
 0xddb   : > { %12373 = vmatmul.mubr.bf16.gmra.mrb[144].mxu1 %v18581_v53  ;;  %v10388_v57 = vpop.f32.mrb[227].mxu0  ;;  %v18613_v53 = vld [vmem:[%s24508_s7 + $0xc18] ss:$100 sps:$4 sm:$0xff]  }
 0xddc   : > { %12380 = vmatprep.mubr.bf16.mxu1 %v18584_v63 }
 0xddd   : > { %15789 = vmatmul.mubr.msk.bf16.gmra.mrb[20].mxu0 %vm1633_vm2, %v18583_v16 }
 0xdde   : > { %15792 = vmatprep.mubr.msk.bf16.mxu0 %vm1633_vm2, %v18587_v6  ;;  %v18616_v6 = vld [vmem:[%s24508_s7 + $0x1250] ss:$100 sps:$4 sm:$0xff]  }
 0xde0   : > { %v23512_v48 = vpop.f32.mrb[228].mxu0 }
 0xde1   : > { %v10393_v28 = vpop.f32.mrb[229].mxu0 }
 0xde2   : > { %v23520_v56 = vpop.f32.mrb[230].mxu0  ;;  %v18618_v28 = vld [vmem:[%s24508_s7 + $0xda8] ss:$100 sps:$4 sm:$0xff]  }
 0xde3   : > { %12381 = vmatmul.mubr.bf16.gmra.mrb[148].mxu1 %v18586_v8  ;;  %v10396_v44 = vpop.f32.mrb[231].mxu0  ;;  %v18619_v8 = vld [vmem:[%s24508_s7 + $0x131c] ss:$100 sps:$4 sm:$0xff]  }
 0xde4   : > { %12388 = vmatprep.mubr.bf16.mxu1 %v18589_v4 }
 0xde5   : > { %15793 = vmatmul.mubr.msk.bf16.gmra.mrb[24].mxu0 %vm1633_vm2, %v18588_v0 }
 0xde6   : > { %15796 = vmatprep.mubr.msk.bf16.mxu0 %vm1633_vm2, %v18592_v54  ;;  %v18622_v54 = vld [vmem:[%s24508_s7 + $0xe70] ss:$100 sps:$4 sm:$0xff]  }
 0xde8   : > { %v23530_v50 = vpop.f32.mrb[232].mxu0 }
 0xde9   : > { %v10401_v5 = vpop.f32.mrb[233].mxu0 }
 0xdea   : > { %v23538_v58 = vpop.f32.mrb[234].mxu0  ;;  %v18624_v5 = vld [vmem:[%s24508_s7 + $0x13e4] ss:$100 sps:$4 sm:$0xff]  }
 0xdeb   : > { %12389 = vmatmul.mubr.bf16.gmra.mrb[152].mxu1 %v18591_v49  ;;  %v10404_v27 = vpop.f32.mrb[235].mxu0  ;;  %v18621_v49 = vld [vmem:[%s24508_s7 + $0x1318] ss:$100 sps:$4 sm:$0xff]  }
 0xdec   : > { %12396 = vmatprep.mubr.bf16.mxu1 %v18594_v13 }
 0xded   : > { %15797 = vmatmul.mubr.msk.bf16.gmra.mrb[28].mxu0 %vm1633_vm2, %v18593_v30 }
 0xdee   : > { %15800 = vmatprep.mubr.msk.bf16.mxu0 %vm1633_vm2, %v18597_v42  ;;  %v18623_v42 = vld [vmem:[%s24508_s7 + $0xf38] ss:$100 sps:$4 sm:$0xff]  }
 0xdf0   : > { %v23548_v21 = vpop.f32.mrb[236].mxu0 }
 0xdf1   : > { %v10409_v38 = vpop.f32.mrb[237].mxu0 }
 0xdf2   : > { %v23556_v3 = vpop.f32.mrb[238].mxu0  ;;  %v18626_v38 = vld [vmem:[%s24508_s7 + $0x13e0] ss:$100 sps:$4 sm:$0xff]  }
 0xdf3   : > { %24601 = vst [vmem:[#allocation4_spill] sm:$0xff] %v23556_v3  ;;  %12397 = vmatmul.mubr.bf16.gmra.mrb[156].mxu1 %v18596_v35  ;;  %v10412_v24 = vpop.f32.mrb[239].mxu0  ;;  %v18627_v35 = vld [vmem:[%s24508_s7 + $0x1000] ss:$100 sps:$4 sm:$0xff]  }
 0xdf4   : > { %12404 = vmatprep.mubr.bf16.mxu1 %v18599_v36 }
 0xdf5   : > { %15801 = vmatmul.mubr.msk.bf16.gmra.mrb[32].mxu0 %vm1633_vm2, %v18598_v15 }
 0xdf6   : > { %15804 = vmatprep.mubr.msk.bf16.mxu0 %vm1633_vm2, %v18602_v60  ;;  %v18629_v60 = vld [vmem:[%s24508_s7 + $0x14ac] ss:$100 sps:$4 sm:$0xff]  }
 0xdf8   : > { %v23566_v40 = vpop.f32.mrb[240].mxu0 }
 0xdf9   : > { %24602 = vst [vmem:[#allocation15_spill] sm:$0xff] %v23566_v40  ;;  %v10417_v62 = vpop.f32.mrb[241].mxu0 }
 0xdfa   : > { %v23574_v32 = vpop.f32.mrb[242].mxu0  ;;  %v18632_v62 = vld [vmem:[%s24508_s7 + $0x1190] ss:$100 sps:$4 sm:$0xff]  }
 0xdfb   : > { %24603 = vst [vmem:[#allocation5_spill] sm:$0xff] %v23574_v32  ;;  %12405 = vmatmul.mubr.bf16.gmra.mrb[160].mxu1 %v18601_v12  ;;  %v10420_v22 = vpop.f32.mrb[243].mxu0  ;;  %v18628_v12 = vld [vmem:[%s24508_s7 + $0x10c8] ss:$100 sps:$4 sm:$0xff]  }
 0xdfc   : > { %12412 = vmatprep.mubr.bf16.mxu1 %v18604_v26 }
 0xdfd   : > { %15805 = vmatmul.mubr.msk.bf16.gmra.mrb[36].mxu0 %vm1633_vm2, %v18603_v7 }
 0xdfe   : > { %15808 = vmatprep.mubr.msk.bf16.mxu0 %vm1633_vm2, %v18607_v1  ;;  %v18631_v1 = vld [vmem:[%s24508_s7 + $0x14a8] ss:$100 sps:$4 sm:$0xff]  }
 0xe00   : > { %v23584_v20 = vpop.f32.mrb[244].mxu0 }
 0xe01   : > { %24604 = vst [vmem:[#allocation16_spill] sm:$0xff] %v23584_v20  ;;  %v10425_v29 = vpop.f32.mrb[245].mxu0 }
 0xe02   : > { %v23592_v2 = vpop.f32.mrb[246].mxu0  ;;  %v18633_v29 = vld [vmem:[%s24508_s7 + $0x1258] ss:$100 sps:$4 sm:$0xff]  }
 0xe03   : > { %24605 = vst [vmem:[#allocation6_spill] sm:$0xff] %v23592_v2  ;;  %12413 = vmatmul.mubr.bf16.gmra.mrb[164].mxu1 %v18606_v11  ;;  %v10428_v17 = vpop.f32.mrb[247].mxu0  ;;  %v18634_v11 = vld [vmem:[%s24508_s7 + $0x1574] ss:$100 sps:$4 sm:$0xff]  }
 0xe04   : > { %12420 = vmatprep.mubr.bf16.mxu1 %v18609_v39 }
 0xe05   : > { %15809 = vmatmul.mubr.msk.bf16.gmra.mrb[40].mxu0 %vm1633_vm2, %v18608_v59 }
 0xe06   : > { %15812 = vmatprep.mubr.msk.bf16.mxu0 %vm1633_vm2, %v18612_v19  ;;  %v18637_v19 = vld [vmem:[%s24508_s7 + $0x1320] ss:$100 sps:$4 sm:$0xff]  }
 0xe08   : > { %v23602_v34 = vpop.f32.mrb[248].mxu0 }
 0xe09   : > { %24606 = vst [vmem:[#allocation17_spill] sm:$0xff] %v23602_v34  ;;  %v10433_v43 = vpop.f32.mrb[249].mxu0 }
 0xe0a   : > { %v23610_v63 = vpop.f32.mrb[250].mxu0  ;;  %v18636_v43 = vld [vmem:[%s24508_s7 + $0x1570] ss:$100 sps:$4 sm:$0xff]  }
 0xe0b   : > { %24607 = vst [vmem:[#allocation7_spill] sm:$0xff] %v23610_v63  ;;  %12421 = vmatmul.mubr.bf16.gmra.mrb[168].mxu1 %v18611_v52  ;;  %v10436_v16 = vpop.f32.mrb[251].mxu0 }
 0xe0c   : > { %12428 = vmatprep.mubr.bf16.mxu1 %v18614_v46  ;;  %v18639_v16 = vld [vmem:[%s24508_s7 + $0x163c] ss:$100 sps:$4 sm:$0xff]  }
 0xe0d   : > { %15813 = vmatmul.mubr.msk.bf16.gmra.mrb[44].mxu0 %vm1633_vm2, %v18613_v53 }
 0xe0e   : > { %15816 = vmatprep.mubr.msk.bf16.mxu0 %vm1633_vm2, %v18617_v55 }
 0xe10   : > { %v23620_v57 = vpop.f32.mrb[252].mxu0 }
 0xe11   : > { %24608 = vst [vmem:[#allocation8_spill] sm:$0xff] %v23620_v57  ;;  %v10441_v4 = vpop.f32.mrb[253].mxu0 }
 0xe12   : > { %v23628_v0 = vpop.f32.mrb[254].mxu0  ;;  %v18638_v4 = vld [vmem:[%s24508_s7 + $0x13e8] ss:$100 sps:$4 sm:$0xff]  }
 0xe13   : > { %24609 = vst [vmem:[#allocation9_spill] sm:$0xff] %v23628_v0  ;;  %12429 = vmatmul.mubr.bf16.gmra.mrb[172].mxu1 %v18616_v6  ;;  %v10444_v44 = vpop.f32.mrb[255].mxu0 }
 0xe14   : > { %12436 = vmatprep.mubr.bf16.mxu1 %v18619_v8 }
 0xe15   : > { %15817 = vmatmul.mubr.msk.bf16.gmra.mrb[48].mxu0 %vm1633_vm2, %v18618_v28 }
 0xe16   : > { %15820 = vmatprep.mubr.msk.bf16.mxu0 %vm1633_vm2, %v18622_v54  ;;  %v18642_v54 = vld [vmem:[%s24508_s7 + $0x14b0] ss:$100 sps:$4 sm:$0xff]  }
 0xe18   : > { %v23638_v13 = vpop.f32.mrb[0].mxu0 }
 0xe19   : > { %24610 = vst [vmem:[#allocation10_spill] sm:$0xff] %v23638_v13  ;;  %v10449_v30 = vpop.f32.mrb[1].mxu0 }
 0xe1a   : > { %v23646_v27 = vpop.f32.mrb[2].mxu0 }
 0xe1b   : > { %24611 = vst [vmem:[#allocation12_spill] sm:$0xff] %v23646_v27  ;;  %12437 = vmatmul.mubr.bf16.gmra.mrb[176].mxu1 %v18621_v49  ;;  %v10452_v36 = vpop.f32.mrb[3].mxu0 }
 0xe1c   : > { %12444 = vmatprep.mubr.bf16.mxu1 %v18624_v5  ;;  %v4873_v5 = vld [vmem:[%s24509_s8] sm:$0xff] }
 0xe1d   : > { %15821 = vmatmul.mubr.msk.bf16.gmra.mrb[52].mxu0 %vm1633_vm2, %v18623_v42  ;;  %v18641_v42 = vld [vmem:[%s24508_s7 + $0x1638] ss:$100 sps:$4 sm:$0xff]  }
 0xe1e   : > { %15824 = vmatprep.mubr.msk.bf16.mxu0 %vm1633_vm2, %v18627_v35 }
 0xe20   : > { %v23656_v15 = vpop.f32.mrb[4].mxu0 }
 0xe21   : > { %24612 = vst [vmem:[#allocation14_spill] sm:$0xff] %v23656_v15  ;;  %v10457_v24 = vpop.f32.mrb[5].mxu0 }
 0xe22   : > { %v23664_v26 = vpop.f32.mrb[6].mxu0 }
 0xe23   : > { %24613 = vst [vmem:[#allocation11_spill] sm:$0xff] %v23664_v26  ;;  %12445 = vmatmul.mubr.bf16.gmra.mrb[180].mxu1 %v18626_v38  ;;  %v10460_v7 = vpop.f32.mrb[7].mxu0  ;;  %v4874_v38 = vld [vmem:[%s24509_s8 + $0x8] sm:$0xff] }
 0xe24   : > { %12452 = vmatprep.mubr.bf16.mxu1 %v18629_v60  ;;  %v18644_v60 = vld [vmem:[%s24508_s7 + $0x1704] ss:$100 sps:$4 sm:$0xff]   ;;  %v18643_v7 = vld [vmem:[%s24508_s7 + $0x1578] ss:$100 sps:$4 sm:$0xff]  }
 0xe25   : > { %15825 = vmatmul.mubr.msk.bf16.gmra.mrb[56].mxu0 %vm1633_vm2, %v18628_v12 }
 0xe26   : > { %15828 = vmatprep.mubr.msk.bf16.mxu0 %vm1633_vm2, %v18632_v62 }
 0xe28   : > { %v23674_v22 = vpop.f32.mrb[8].mxu0 }
 0xe29   : > { %24614 = vst [vmem:[#allocation13_spill] sm:$0xff] %v23674_v22  ;;  %v10465_v39 = vpop.f32.mrb[9].mxu0 }
 0xe2a   : > { %v23682_v59 = vpop.f32.mrb[10].mxu0 }
 0xe2b   : > { %24615 = vst [vmem:[#allocation18_spill] sm:$0xff] %v23682_v59  ;;  %12453 = vmatmul.mubr.bf16.gmra.mrb[184].mxu1 %v18631_v1  ;;  %v10468_v17 = vpop.f32.mrb[11].mxu0 }
 0xe2c   : > { %12460 = vmatprep.mubr.bf16.mxu1 %v18634_v11  ;;  %v18647_v11 = vld [vmem:[%s24508_s7 + $0x1640] ss:$100 sps:$4 sm:$0xff]  }
 0xe2d   : > { %15829 = vmatmul.mubr.msk.bf16.gmra.mrb[60].mxu0 %vm1633_vm2, %v18633_v29 }
 0xe2e   : > { %v12246_v52 = vpop.f32.mrb[208].mxu1  ;;  %15832 = vmatprep.mubr.msk.bf16.mxu0 %vm1633_vm2, %v18637_v19 }
 0xe2f   : > { %v12248_v46 = vpop.f32.mrb[209].mxu1 }
 0xe30   : > { %v12249_v53 = vpop.f32.mrb[210].mxu1  ;;  %v23692_v55 = vpop.f32.mrb[12].mxu0 }
 0xe31   : > { %24616 = vst [vmem:[#allocation19_spill] sm:$0xff] %v23692_v55  ;;  %v12251_v6 = vpop.f32.mrb[211].mxu1  ;;  %v10473_v8 = vpop.f32.mrb[13].mxu0 }
 0xe32   : > { %v23700_v28 = vpop.f32.mrb[14].mxu0  ;;  %v18646_v6 = vld [vmem:[%s24508_s7 + $0x1700] ss:$100 sps:$4 sm:$0xff]  }
 0xe33   : > { %24617 = vst [vmem:[#allocation20_spill] sm:$0xff] %v23700_v28  ;;  %12461 = vmatmul.mubr.bf16.gmra.mrb[188].mxu1 %v18636_v43  ;;  %v10476_v44 = vpop.f32.mrb[15].mxu0  ;;  %v4875_v43 = vld [vmem:[%s24509_s8 + $0x10] sm:$0xff] }
 0xe34   : > { %12468 = vmatprep.mubr.bf16.mxu1 %v18639_v16 }
 0xe35   : > { %15833 = vmatmul.mubr.msk.bf16.gmra.mrb[64].mxu0 %vm1633_vm2, %v18638_v4  ;;  %v4876_v4 = vld [vmem:[%s24509_s8 + $0x18] sm:$0xff] }
 0xe36   : > { %v12254_v49 = vpop.f32.mrb[212].mxu1  ;;  %15836 = vmatprep.mubr.msk.bf16.mxu0 %vm1633_vm2, %v18642_v54 }
 0xe37   : > { %v12256_v30 = vpop.f32.mrb[213].mxu1 }
 0xe38   : > { %v12257_v35 = vpop.f32.mrb[214].mxu1  ;;  %v10512_v36 = vpop.f32.mrb[144].mxu0  ;;  %v18648_v30 = vld [vmem:[%s24508_s7 + $0x1708] ss:$100 sps:$4 sm:$0xff]  }
 0xe39   : > { %v12259_v24 = vpop.f32.mrb[215].mxu1  ;;  %v15912_v12 = vadd.f32 %v10512_v36, %v4873_v5  ;;  %v10514_v62 = vpop.f32.mrb[145].mxu0  ;;  %v18652_v36 = vld [vmem:[%s24508_s7 + $0x17d0] ss:$100 sps:$4 sm:$0xff]  }
 0xe3a   : > { %v10515_v1 = vpop.f32.mrb[146].mxu0 }
 0xe3b   : > { %12469 = vmatmul.mubr.bf16.gmra.mrb[192].mxu1 %v18641_v42  ;;  %v15914_v39 = vadd.f32 %v10515_v1, %v4874_v38  ;;  %v10517_v29 = vpop.f32.mrb[147].mxu0  ;;  %v23725_v19 = vadd.f32 %v15912_v12, %v12246_v52 }
 0xe3c   : > { %12476 = vmatprep.mubr.bf16.mxu1 %v18644_v60  ;;  %v4878_v29 = vld [vmem:[%s24509_s8 + $0x28] sm:$0xff] }
 0xe3d   : > { %15837 = vmatmul.mubr.msk.bf16.gmra.mrb[68].mxu0 %vm1633_vm2, %v18643_v7  ;;  %v23728_v17 = vadd.f32 %v15914_v39, %v12249_v53  ;;  %v18649_v53 = vld [vmem:[%s24508_s7 + $0x17cc] ss:$100 sps:$4 sm:$0xff]   ;;  %v4877_v7 = vld [vmem:[%s24509_s8 + $0x20] sm:$0xff] }
 0xe3e   : > { %v12262_v46 = vpop.f32.mrb[216].mxu1  ;;  %15840 = vmatprep.mubr.msk.bf16.mxu0 %vm1633_vm2, %v18647_v11  ;;  %v18651_v11 = vld [vmem:[%s24508_s7 + $0x17c8] ss:$100 sps:$4 sm:$0xff]  }
 0xe3f   : > { %v12264_v16 = vpop.f32.mrb[217].mxu1 }
 0xe40   : > { %v12265_v8 = vpop.f32.mrb[218].mxu1  ;;  %v10520_v52 = vpop.f32.mrb[148].mxu0 }
 0xe41   : > { %v12267_v54 = vpop.f32.mrb[219].mxu1  ;;  %v15916_v44 = vadd.f32 %v10520_v52, %v4875_v43  ;;  %v10522_v5 = vpop.f32.mrb[149].mxu0  ;;  %v18653_v52 = vld [vmem:[%s24508_s7 + $0x1898] ss:$100 sps:$4 sm:$0xff]  }
 0xe42   : > { %v10523_v42 = vpop.f32.mrb[150].mxu0 }
 0xe43   : > { %12477 = vmatmul.mubr.bf16.gmra.mrb[196].mxu1 %v18646_v6  ;;  %v15918_v38 = vadd.f32 %v10523_v42, %v4876_v4  ;;  %v10525_v60 = vpop.f32.mrb[151].mxu0  ;;  %v23749_v24 = vadd.f32 %v15916_v44, %v12254_v49  ;;  %v4879_v42 = vld [vmem:[%s24509_s8 + $0x30] sm:$0xff] }
 0xe44   : > { %12484 = vmatprep.mubr.bf16.mxu1 %v18649_v53 }
 0xe45   : > { %15841 = vmatmul.mubr.msk.bf16.gmra.mrb[72].mxu0 %vm1633_vm2, %v18648_v30  ;;  %v23752_v12 = vadd.f32 %v15918_v38, %v12257_v35  ;;  %v18654_v35 = vld [vmem:[%s24508_s7 + $0x1894] ss:$100 sps:$4 sm:$0xff]  }
 0xe46   : > { %v12270_v62 = vpop.f32.mrb[220].mxu1  ;;  %15844 = vmatprep.mubr.msk.bf16.mxu0 %vm1633_vm2, %v18652_v36  ;;  %v18656_v38 = vld [vmem:[%s24508_s7 + $0x1890] ss:$100 sps:$4 sm:$0xff]  }
 0xe47   : > { %v12272_v1 = vpop.f32.mrb[221].mxu1 }
 0xe48   : > { %v12273_v39 = vpop.f32.mrb[222].mxu1  ;;  %v10528_v49 = vpop.f32.mrb[152].mxu0 }
 0xe49   : > { %v12275_v43 = vpop.f32.mrb[223].mxu1  ;;  %v15920_v16 = vadd.f32 %v10528_v49, %v4877_v7  ;;  %v10530_v6 = vpop.f32.mrb[153].mxu0 }
 0xe4a   : > { %v10531_v4 = vpop.f32.mrb[154].mxu0 }
 0xe4b   : > { %12485 = vmatmul.mubr.bf16.gmra.mrb[200].mxu1 %v18651_v11  ;;  %v15922_v53 = vadd.f32 %v10531_v4, %v4878_v29  ;;  %v10533_v54 = vpop.f32.mrb[155].mxu0  ;;  %v23770_v44 = vadd.f32 %v15920_v16, %v12262_v46  ;;  %v4880_v46 = vld [vmem:[%s24509_s8 + $0x38] sm:$0xff] }
 0xe4c   : > { %12492 = vmatprep.mubr.bf16.mxu1 %v18654_v35 }
 0xe4d   : > { %15845 = vmatmul.mubr.msk.bf16.gmra.mrb[76].mxu0 %vm1633_vm2, %v18653_v52  ;;  %v23773_v5 = vadd.f32 %v15922_v53, %v12265_v8  ;;  %v4881_v52 = vld [vmem:[%s24509_s8 + $0x40] sm:$0xff] }
 0xe4e   : > { %v12278_v30 = vpop.f32.mrb[224].mxu1 }
 0xe4f   : > { %v12280_v36 = vpop.f32.mrb[225].mxu1 }
 0xe50   : > { %v12281_v60 = vpop.f32.mrb[226].mxu1  ;;  %v10536_v7 = vpop.f32.mrb[156].mxu0 }
 0xe51   : > { %v12283_v1 = vpop.f32.mrb[227].mxu1  ;;  %v15924_v11 = vadd.f32 %v10536_v7, %v4879_v42  ;;  %v10538_v8 = vpop.f32.mrb[157].mxu0  ;;  %v4882_v42 = vld [vmem:[%s24509_s8 + $0x48] sm:$0xff] }
 0xe52   : > { %v10539_v49 = vpop.f32.mrb[158].mxu0 }
 0xe53   : > { %12493 = vmatmul.mubr.bf16.gmra.mrb[204].mxu1 %v18656_v38  ;;  %v15926_v29 = vadd.f32 %v10539_v49, %v4880_v46  ;;  %v10541_v35 = vpop.f32.mrb[159].mxu0  ;;  %v23784_v43 = vadd.f32 %v15924_v11, %v12270_v62  ;;  %v4883_v49 = vld [vmem:[%s24509_s8 + $0x50] sm:$0xff] }
 0xe55   : > { %v23786_v16 = vadd.f32 %v15926_v29, %v12273_v39 }
 0xe56   : > { %v12286_v6 = vpop.f32.mrb[228].mxu1 }
 0xe57   : > { %v12288_v4 = vpop.f32.mrb[229].mxu1 }
 0xe58   : > { %v12289_v53 = vpop.f32.mrb[230].mxu1  ;;  %v10544_v54 = vpop.f32.mrb[160].mxu0 }
 0xe59   : > { %v12291_v36 = vpop.f32.mrb[231].mxu1  ;;  %v15928_v38 = vadd.f32 %v10544_v54, %v4881_v52  ;;  %v10546_v7 = vpop.f32.mrb[161].mxu0  ;;  %v4884_v52 = vld [vmem:[%s24509_s8 + $0x58] sm:$0xff] }
 0xe5a   : > { %v10547_v46 = vpop.f32.mrb[162].mxu0 }
 0xe5b   : > { %v15930_v62 = vadd.f32 %v10547_v46, %v4882_v42  ;;  %v10549_v1 = vpop.f32.mrb[163].mxu0  ;;  %v23794_v39 = vadd.f32 %v15928_v38, %v12278_v30 }
 0xe5c   : > { %v4885_v1 = vld [vmem:[%s24509_s8 + $0x60] sm:$0xff] }
 0xe5d   : > { %v23796_v11 = vadd.f32 %v15930_v62, %v12281_v60 }
 0xe5e   : > { %v12294_v8 = vpop.f32.mrb[232].mxu1 }
 0xe5f   : > { %v12296_v29 = vpop.f32.mrb[233].mxu1 }
 0xe60   : > { %v12297_v35 = vpop.f32.mrb[234].mxu1  ;;  %v10552_v4 = vpop.f32.mrb[164].mxu0 }
 0xe61   : > { %v12299_v54 = vpop.f32.mrb[235].mxu1  ;;  %v15932_v36 = vadd.f32 %v10552_v4, %v4883_v49  ;;  %v10554_v42 = vpop.f32.mrb[165].mxu0  ;;  %v4886_v49 = vld [vmem:[%s24509_s8 + $0x68] sm:$0xff] }
 0xe62   : > { %v10555_v7 = vpop.f32.mrb[166].mxu0 }
 0xe63   : > { %v15934_v30 = vadd.f32 %v10555_v7, %v4884_v52  ;;  %v10557_v38 = vpop.f32.mrb[167].mxu0  ;;  %v23804_v60 = vadd.f32 %v15932_v36, %v12286_v6 }
 0xe64   : > { %v4887_v38 = vld [vmem:[%s24509_s8 + $0x70] sm:$0xff] }
 0xe65   : > { %v23806_v46 = vadd.f32 %v15934_v30, %v12289_v53 }
 0xe66   : > { %v12302_v62 = vpop.f32.mrb[236].mxu1 }
 0xe67   : > { %v12304_v29 = vpop.f32.mrb[237].mxu1 }
 0xe68   : > { %v12305_v28 = vpop.f32.mrb[238].mxu1  ;;  %v10560_v55 = vpop.f32.mrb[168].mxu0 }
 0xe69   : > { %v12307_v4 = vpop.f32.mrb[239].mxu1  ;;  %v15936_v54 = vadd.f32 %v10560_v55, %v4885_v1  ;;  %v10562_v52 = vpop.f32.mrb[169].mxu0  ;;  %v4888_v55 = vld [vmem:[%s24509_s8 + $0x78] sm:$0xff] }
 0xe6a   : > { %v10563_v42 = vpop.f32.mrb[170].mxu0 }
 0xe6b   : > { %v15938_v6 = vadd.f32 %v10563_v42, %v4886_v49  ;;  %v10565_v36 = vpop.f32.mrb[171].mxu0  ;;  %v23814_v53 = vadd.f32 %v15936_v54, %v12294_v8  ;;  %v18659_v42 = vld [vmem:[%s24510_s9 + $0x4] ss:$16 sps:$4 sm:$0xff]  }
 0xe6c   : > { %13254 = vmatprep.mubr.bf16.mxu0 %v18659_v42 }
 0xe6d   : > { %v23816_v7 = vadd.f32 %v15938_v6, %v12297_v35 }
 0xe6e   : > { %v12310_v30 = vpop.f32.mrb[240].mxu1 }
 0xe6f   : > { %v12312_v29 = vpop.f32.mrb[241].mxu1 }
 0xe70   : > { %v12313_v59 = vpop.f32.mrb[242].mxu1  ;;  %v10568_v22 = vpop.f32.mrb[172].mxu0  ;;  %v4889_v29 = vld [vmem:[%s24509_s8 + $0x80] sm:$0xff] }
 0xe71   : > { %v12315_v1 = vpop.f32.mrb[243].mxu1  ;;  %v15940_v4 = vadd.f32 %v10568_v22, %v4887_v38  ;;  %v10570_v49 = vpop.f32.mrb[173].mxu0 }
 0xe72   : > { %v10571_v52 = vpop.f32.mrb[174].mxu0 }
 0xe73   : > { %v15942_v8 = vadd.f32 %v10571_v52, %v4888_v55  ;;  %v10573_v54 = vpop.f32.mrb[175].mxu0  ;;  %v23824_v35 = vadd.f32 %v15940_v4, %v12302_v62  ;;  %v4890_v62 = vld [vmem:[%s24509_s8 + $0x88] sm:$0xff] }
 0xe75   : > { %v23829_v6 = vadd.f32 %v15942_v8, %v12305_v28 }
 0xe76   : > { %v12318_v36 = vpop.f32.mrb[244].mxu1 }
 0xe77   : > { %v12320_v1 = vpop.f32.mrb[245].mxu1 }
 0xe78   : > { %v12321_v22 = vpop.f32.mrb[246].mxu1  ;;  %v10576_v38 = vpop.f32.mrb[176].mxu0  ;;  %v4891_v1 = vld [vmem:[%s24509_s8 + $0x90] sm:$0xff] }
 0xe79   : > { %v12323_v55 = vpop.f32.mrb[247].mxu1  ;;  %v15944_v4 = vadd.f32 %v10576_v38, %v4889_v29  ;;  %v10578_v49 = vpop.f32.mrb[177].mxu0  ;;  %v4892_v29 = vld [vmem:[%s24509_s8 + $0x98] sm:$0xff] }
 0xe7a   : > { %v10579_v52 = vpop.f32.mrb[178].mxu0 }
 0xe7b   : > { %v15946_v54 = vadd.f32 %v10579_v52, %v4890_v62  ;;  %v10581_v28 = vpop.f32.mrb[179].mxu0  ;;  %v23837_v8 = vadd.f32 %v15944_v4, %v12310_v30 }
 0xe7d   : > { %v23839_v42 = vadd.f32 %v15946_v54, %v12313_v59 }
 0xe7e   : > { %v12326_v26 = vpop.f32.mrb[248].mxu1 }
 0xe7f   : > { %v12328_v15 = vpop.f32.mrb[249].mxu1 }
 0xe80   : > { %v12329_v27 = vpop.f32.mrb[250].mxu1  ;;  %v10584_v13 = vpop.f32.mrb[180].mxu0  ;;  %v4893_v15 = vld [vmem:[%s24509_s8 + $0xa0] sm:$0xff] }
 0xe81   : > { %v12331_v38 = vpop.f32.mrb[251].mxu1  ;;  %v15948_v55 = vadd.f32 %v10584_v13, %v4891_v1  ;;  %v10586_v62 = vpop.f32.mrb[181].mxu0  ;;  %v4894_v13 = vld [vmem:[%s24509_s8 + $0xa8] sm:$0xff] }
 0xe82   : > { %v10587_v49 = vpop.f32.mrb[182].mxu0 }
 0xe83   : > { %v15950_v30 = vadd.f32 %v10587_v49, %v4892_v29  ;;  %v10589_v4 = vpop.f32.mrb[183].mxu0  ;;  %v23847_v59 = vadd.f32 %v15948_v55, %v12318_v36 }
 0xe84   : > { %v4895_v4 = vld [vmem:[%s24509_s8 + $0xb0] sm:$0xff] }
 0xe85   : > { %v23849_v52 = vadd.f32 %v15950_v30, %v12321_v22 }
 0xe86   : > { %v12334_v54 = vpop.f32.mrb[252].mxu1 }
 0xe87   : > { %v12336_v28 = vpop.f32.mrb[253].mxu1 }
 0xe88   : > { %v12337_v0 = vpop.f32.mrb[254].mxu1  ;;  %v10592_v57 = vpop.f32.mrb[184].mxu0 }
 0xe89   : > { %v12339_v1 = vpop.f32.mrb[255].mxu1  ;;  %v15952_v38 = vadd.f32 %v10592_v57, %v4893_v15  ;;  %v10594_v29 = vpop.f32.mrb[185].mxu0  ;;  %v4896_v57 = vld [vmem:[%s24509_s8 + $0xb8] sm:$0xff] }
 0xe8a   : > { %v10595_v62 = vpop.f32.mrb[186].mxu0 }
 0xe8b   : > { %v15954_v36 = vadd.f32 %v10595_v62, %v4894_v13  ;;  %v10597_v55 = vpop.f32.mrb[187].mxu0  ;;  %v23857_v22 = vadd.f32 %v15952_v38, %v12326_v26 }
 0xe8c   : > { %v4897_v55 = vld [vmem:[%s24509_s8 + $0xc0] sm:$0xff] }
 0xe8d   : > { %v23859_v49 = vadd.f32 %v15954_v36, %v12329_v27 }
 0xe8e   : > { %v12342_v30 = vpop.f32.mrb[0].mxu1 }
 0xe8f   : > { %v12344_v28 = vpop.f32.mrb[1].mxu1 }
 0xe90   : > { %v12345_v63 = vpop.f32.mrb[2].mxu1  ;;  %v10600_v34 = vpop.f32.mrb[188].mxu0 }
 0xe91   : > { %v12347_v15 = vpop.f32.mrb[3].mxu1  ;;  %v15956_v1 = vadd.f32 %v10600_v34, %v4895_v4  ;;  %v10602_v13 = vpop.f32.mrb[189].mxu0  ;;  %v4898_v34 = vld [vmem:[%s24509_s8 + $0xc8] sm:$0xff] }
 0xe92   : > { %v10603_v29 = vpop.f32.mrb[190].mxu0 }
 0xe93   : > { %v15958_v26 = vadd.f32 %v10603_v29, %v4896_v57  ;;  %v10605_v38 = vpop.f32.mrb[191].mxu0  ;;  %v23867_v27 = vadd.f32 %v15956_v1, %v12334_v54 }
 0xe95   : > { %v23869_v62 = vadd.f32 %v15958_v26, %v12337_v0  ;;  %v4901_v0 = vld [vmem:[%s24509_s8 + $0xe0] sm:$0xff]  ;;  %v4902_v26 = vld [vmem:[%s24509_s8 + $0xe8] sm:$0xff] }
 0xe96   : > { %v12350_v36 = vpop.f32.mrb[4].mxu1  ;;  %v15968_v38 = vadd.f32 %v23395_v18, %v4901_v0 }
 0xe97   : > { %v12352_v28 = vpop.f32.mrb[5].mxu1 }
 0xe98   : > { %v12353_v2 = vpop.f32.mrb[6].mxu1  ;;  %v10608_v20 = vpop.f32.mrb[192].mxu0 }
 0xe99   : > { %v12355_v4 = vpop.f32.mrb[7].mxu1  ;;  %v15960_v15 = vadd.f32 %v10608_v20, %v4897_v55  ;;  %v10610_v57 = vpop.f32.mrb[193].mxu0  ;;  %v4899_v20 = vld [vmem:[%s24509_s8 + $0xd0] sm:$0xff]  ;;  %v15970_v55 = vadd.f32 %v23403_v23, %v4902_v26 }
 0xe9a   : > { %v10611_v54 = vpop.f32.mrb[194].mxu0 }
 0xe9b   : > { %v15962_v1 = vadd.f32 %v10611_v54, %v4898_v34  ;;  %v10613_v13 = vpop.f32.mrb[195].mxu0  ;;  %v23880_v29 = vadd.f32 %v15960_v15, %v12342_v30  ;;  %v4900_v54 = vld [vmem:[%s24509_s8 + $0xd8] sm:$0xff] }
 0xe9d   : > { %v23886_v28 = vadd.f32 %v15962_v1, %v12345_v63  ;;  %v4903_v1 = vld [vmem:[%s24509_s8 + $0xf0] sm:$0xff] }
 0xe9e   : > { %v12358_v4 = vpop.f32.mrb[136].mxu1 }
 0xe9f   : > { %v23892_v57 = vadd.f32 %v15968_v38, %v12358_v4  ;;  %v12360_v34 = vpop.f32.mrb[137].mxu1  ;;  %v4904_v4 = vld [vmem:[%s24509_s8 + $0xf8] sm:$0xff] }
 0xea0   : > { %v12361_v30 = vpop.f32.mrb[138].mxu1  ;;  %v10616_v15 = vpop.f32.mrb[196].mxu0  ;;  %v15972_v34 = vadd.f32 %v23411_v45, %v4903_v1  ;;  %v4905_v45 = vld [vmem:[%s24509_s8 + $0x100] sm:$0xff] }
 0xea1   : > { %v23897_v13 = vadd.f32 %v15970_v55, %v12361_v30  ;;  %v12363_v18 = vpop.f32.mrb[139].mxu1  ;;  %v15964_v63 = vadd.f32 %v10616_v15, %v4899_v20  ;;  %v10618_v0 = vpop.f32.mrb[197].mxu0  ;;  %v15974_v20 = vadd.f32 %v23419_v51, %v4904_v4  ;;  %v4906_v4 = vld [vmem:[%s24509_s8 + $0x108] sm:$0xff] }
 0xea2   : > { %v10619_v32 = vpop.f32.mrb[198].mxu0 }
 0xea3   : > { %v15966_v23 = vadd.f32 %v10619_v32, %v4900_v54  ;;  %v10621_v26 = vpop.f32.mrb[199].mxu0  ;;  %v23902_v38 = vadd.f32 %v15964_v63, %v12350_v36 }
 0xea5   : > { %v23908_v55 = vadd.f32 %v15966_v23, %v12353_v2 }
 0xea6   : > { %v12366_v30 = vpop.f32.mrb[140].mxu1 }
 0xea7   : > { %v23911_v15 = vadd.f32 %v15972_v34, %v12366_v30  ;;  %v12368_v18 = vpop.f32.mrb[141].mxu1 }
 0xea8   : > { %v12369_v0 = vpop.f32.mrb[142].mxu1  ;;  %v15786_v40 = vpop.f32.mrb[16].mxu0  ;;  %v15978_v18 = vadd.f32 %v23435_v25, %v4906_v4 }
 0xea9   : > { %v23913_v32 = vadd.f32 %v15974_v20, %v12369_v0  ;;  %v12371_v36 = vpop.f32.mrb[143].mxu1  ;;  %v12544_v54 = vadd.f32 %v23749_v24, %v15786_v40  ;;  %v12535_v63 = vpop.f32.mrb[17].mxu0  ;;  %v15976_v24 = vadd.f32 %v23427_v31, %v4905_v45 }
 0xeaa   : > { %v12536_v2 = vadd.f32 %v23725_v19, %v12535_v63  ;;  %v15787_v1 = vpop.f32.mrb[18].mxu0 }
 0xeab   : > { %v12856_v23 = vmul.f32 0.01, %v12544_v54  ;;  %v12547_v51 = vadd.f32 %v23752_v12, %v15787_v1  ;;  %v12538_v26 = vpop.f32.mrb[19].mxu0  ;;  %vm12792_vm3 = vcmp.ge.f32.partialorder %v12544_v54, 0.0 }
 0xeac   : > { %v12854_v34 = vmul.f32 0.01, %v12536_v2  ;;  %v12539_v40 = vadd.f32 %v23728_v17, %v12538_v26  ;;  %vm12790_vm4 = vcmp.ge.f32.partialorder %v12536_v2, 0.0 }
 0xead   : > { %vm12793_vm5 = vcmp.ge.f32.partialorder %v12547_v51, 0.0  ;;  %v12857_v30 = vmul.f32 0.01, %v12547_v51  ;;  %v23927_v12 = vsel %vm12792_vm3, %v12544_v54, %v12856_v23 }
 0xeae   : > { %vm12791_vm6 = vcmp.ge.f32.partialorder %v12539_v40, 0.0  ;;  %v12855_v19 = vmul.f32 0.01, %v12539_v40  ;;  %v12374_v20 = vpop.f32.mrb[144].mxu1  ;;  %v23933_v1 = vsel %vm12790_vm4, %v12536_v2, %v12854_v34  ;;  %v4907_v2 = vld [vmem:[%s24509_s8 + $0x110] sm:$0xff] }
 0xeaf   : > { %v23929_v0 = vsel %vm12793_vm5, %v12547_v51, %v12857_v30  ;;  %v23931_v36 = vadd.f32 %v15976_v24, %v12374_v20  ;;  %v12376_v63 = vpop.f32.mrb[145].mxu1 }
 0xeb0   : > { %v23937_v17 = vsel %vm12791_vm6, %v12539_v40, %v12855_v19  ;;  %v12377_v45 = vpop.f32.mrb[146].mxu1  ;;  %v15790_v26 = vpop.f32.mrb[20].mxu0  ;;  %v4908_v19 = vld [vmem:[%s24509_s8 + $0x118] sm:$0xff] }
 0xeb1   : > { %v23941_v25 = vadd.f32 %v15978_v18, %v12377_v45  ;;  %v12379_v54 = vpop.f32.mrb[147].mxu1  ;;  %v12560_v23 = vadd.f32 %v23784_v43, %v15790_v26  ;;  %v12551_v51 = vpop.f32.mrb[21].mxu0  ;;  %v15980_v18 = vadd.f32 %v23443_v10, %v4907_v2  ;;  %v15982_v26 = vadd.f32 %v23451_v37, %v4908_v19 }
 0xeb2   : > { %v12552_v4 = vadd.f32 %v23770_v44, %v12551_v51  ;;  %v15791_v34 = vpop.f32.mrb[22].mxu0 }
 0xeb3   : > { %v12860_v40 = vmul.f32 0.01, %v12560_v23  ;;  %v12563_v24 = vadd.f32 %v23786_v16, %v15791_v34  ;;  %v12554_v30 = vpop.f32.mrb[23].mxu0  ;;  %vm12796_vm7 = vcmp.ge.f32.partialorder %v12560_v23, 0.0 }
 0xeb4   : > { %v12858_v20 = vmul.f32 0.01, %v12552_v4  ;;  %v12555_v43 = vadd.f32 %v23773_v5, %v12554_v30  ;;  %vm12794_vm8 = vcmp.ge.f32.partialorder %v12552_v4, 0.0 }
 0xeb5   : > { %vm12797_vm9 = vcmp.ge.f32.partialorder %v12563_v24, 0.0  ;;  %v12861_v63 = vmul.f32 0.01, %v12563_v24  ;;  %v23955_v16 = vsel %vm12796_vm7, %v12560_v23, %v12860_v40 }
 0xeb6   : > { %vm12795_vm10 = vcmp.ge.f32.partialorder %v12555_v43, 0.0  ;;  %v12859_v44 = vmul.f32 0.01, %v12555_v43  ;;  %v12382_v45 = vpop.f32.mrb[148].mxu1  ;;  %v23961_v31 = vsel %vm12794_vm8, %v12552_v4, %v12858_v20  ;;  %v4909_v4 = vld [vmem:[%s24509_s8 + $0x120] sm:$0xff] }
 0xeb7   : > { %v23957_v54 = vsel %vm12797_vm9, %v12563_v24, %v12861_v63  ;;  %v23959_v51 = vadd.f32 %v15980_v18, %v12382_v45  ;;  %v12384_v34 = vpop.f32.mrb[149].mxu1 }
 0xeb8   : > { %v23965_v5 = vsel %vm12795_vm10, %v12555_v43, %v12859_v44  ;;  %v12385_v2 = vpop.f32.mrb[150].mxu1  ;;  %v15794_v30 = vpop.f32.mrb[24].mxu0  ;;  %v4910_v44 = vld [vmem:[%s24509_s8 + $0x128] sm:$0xff] }
 0xeb9   : > { %v23969_v37 = vadd.f32 %v15982_v26, %v12385_v2  ;;  %v12387_v23 = vpop.f32.mrb[151].mxu1  ;;  %v12576_v40 = vadd.f32 %v23804_v60, %v15794_v30  ;;  %v12567_v24 = vpop.f32.mrb[25].mxu0  ;;  %v15984_v26 = vadd.f32 %v23459_v41, %v4909_v4  ;;  %v15986_v30 = vadd.f32 %v23467_v9, %v4910_v44 }
 0xeba   : > { %v12568_v19 = vadd.f32 %v23794_v39, %v12567_v24  ;;  %v15795_v20 = vpop.f32.mrb[26].mxu0 }
 0xebb   : > { %v12864_v43 = vmul.f32 0.01, %v12576_v40  ;;  %v12579_v18 = vadd.f32 %v23806_v46, %v15795_v20  ;;  %v12570_v63 = vpop.f32.mrb[27].mxu0  ;;  %vm12800_vm11 = vcmp.ge.f32.partialorder %v12576_v40, 0.0 }
 0xebc   : > { %v12862_v45 = vmul.f32 0.01, %v12568_v19  ;;  %v12571_v60 = vadd.f32 %v23796_v11, %v12570_v63  ;;  %vm12798_vm12 = vcmp.ge.f32.partialorder %v12568_v19, 0.0 }
 0xebd   : > { %vm12801_vm13 = vcmp.ge.f32.partialorder %v12579_v18, 0.0  ;;  %v12865_v34 = vmul.f32 0.01, %v12579_v18  ;;  %v23983_v46 = vsel %vm12800_vm11, %v12576_v40, %v12864_v43 }
 0xebe   : > { %vm12799_vm14 = vcmp.ge.f32.partialorder %v12571_v60, 0.0  ;;  %v12863_v39 = vmul.f32 0.01, %v12571_v60  ;;  %v12390_v2 = vpop.f32.mrb[152].mxu1  ;;  %v23989_v10 = vsel %vm12798_vm12, %v12568_v19, %v12862_v45  ;;  %v4911_v19 = vld [vmem:[%s24509_s8 + $0x130] sm:$0xff] }
 0xebf   : > { %v23985_v23 = vsel %vm12801_vm13, %v12579_v18, %v12865_v34  ;;  %v23987_v24 = vadd.f32 %v15984_v26, %v12390_v2  ;;  %v12392_v20 = vpop.f32.mrb[153].mxu1 }
 0xec0   : > { %v23993_v11 = vsel %vm12799_vm14, %v12571_v60, %v12863_v39  ;;  %v12393_v4 = vpop.f32.mrb[154].mxu1  ;;  %v15798_v63 = vpop.f32.mrb[28].mxu0  ;;  %v4912_v39 = vld [vmem:[%s24509_s8 + $0x138] sm:$0xff] }
 0xec1   : > { %24618 = vst [vmem:[#allocation21_spill] sm:$0xff] %v23987_v24  ;;  %v23997_v9 = vadd.f32 %v15986_v30, %v12393_v4  ;;  %v12395_v40 = vpop.f32.mrb[155].mxu1  ;;  %v12592_v43 = vadd.f32 %v23824_v35, %v15798_v63  ;;  %v12583_v18 = vpop.f32.mrb[29].mxu0  ;;  %v15988_v30 = vadd.f32 %v23476_v33, %v4911_v19  ;;  %v15990_v63 = vadd.f32 %v23484_v47, %v4912_v39 }
 0xec2   : > { %v12584_v44 = vadd.f32 %v23814_v53, %v12583_v18  ;;  %v15799_v45 = vpop.f32.mrb[30].mxu0 }
 0xec3   : > { %24619 = vst [vmem:[#allocation22_spill] sm:$0xff] %v23997_v9  ;;  %v12868_v60 = vmul.f32 0.01, %v12592_v43  ;;  %v12595_v26 = vadd.f32 %v23829_v6, %v15799_v45  ;;  %v12586_v34 = vpop.f32.mrb[31].mxu0  ;;  %vm12804_vm15 = vcmp.ge.f32.partialorder %v12592_v43, 0.0 }
 0xec4   : > { %v12866_v2 = vmul.f32 0.01, %v12584_v44  ;;  %v12587_v35 = vadd.f32 %v23816_v7, %v12586_v34  ;;  %vm12802_vm0 = vcmp.ge.f32.partialorder %v12584_v44, 0.0 }
 0xec5   : > { %vm12805_vm1 = vcmp.ge.f32.partialorder %v12595_v26, 0.0  ;;  %v12869_v20 = vmul.f32 0.01, %v12595_v26  ;;  %v24011_v6 = vsel %vm12804_vm15, %v12592_v43, %v12868_v60 }
 0xec6   : > { %vm12803_vm2 = vcmp.ge.f32.partialorder %v12587_v35, 0.0  ;;  %v12867_v53 = vmul.f32 0.01, %v12587_v35  ;;  %v12398_v4 = vpop.f32.mrb[156].mxu1  ;;  %v24017_v41 = vsel %vm12802_vm0, %v12584_v44, %v12866_v2  ;;  %v4913_v44 = vld [vmem:[%s24509_s8 + $0x140] sm:$0xff] }
 0xec7   : > { %v24013_v40 = vsel %vm12805_vm1, %v12595_v26, %v12869_v20  ;;  %v24015_v18 = vadd.f32 %v15988_v30, %v12398_v4  ;;  %v12400_v45 = vpop.f32.mrb[157].mxu1 }
 0xec8   : > { %v24021_v7 = vsel %vm12803_vm2, %v12587_v35, %v12867_v53  ;;  %v12401_v19 = vpop.f32.mrb[158].mxu1  ;;  %v15802_v34 = vpop.f32.mrb[32].mxu0  ;;  %v4914_v53 = vld [vmem:[%s24509_s8 + $0x148] sm:$0xff] }
 0xec9   : > { %24620 = vst [vmem:[#allocation23_spill] sm:$0xff] %v24015_v18  ;;  %v24025_v47 = vadd.f32 %v15990_v63, %v12401_v19  ;;  %v12403_v43 = vpop.f32.mrb[159].mxu1  ;;  %v12608_v60 = vadd.f32 %v23847_v59, %v15802_v34  ;;  %v12599_v26 = vpop.f32.mrb[33].mxu0  ;;  %v15992_v63 = vadd.f32 %v23494_v61, %v4913_v44  ;;  %v15994_v34 = vadd.f32 %v23502_v14, %v4914_v53  ;;  %v4915_v14 = vld [vmem:[%s24509_s8 + $0x150] sm:$0xff] }
 0xeca   : > { %v12600_v39 = vadd.f32 %v23837_v8, %v12599_v26  ;;  %v15803_v2 = vpop.f32.mrb[34].mxu0 }
 0xecb   : > { %24621 = vst [vmem:[#allocation24_spill] sm:$0xff] %v24025_v47  ;;  %v12872_v35 = vmul.f32 0.01, %v12608_v60  ;;  %v12611_v30 = vadd.f32 %v23849_v52, %v15803_v2  ;;  %v12602_v20 = vpop.f32.mrb[35].mxu0  ;;  %vm12808_vm3 = vcmp.ge.f32.partialorder %v12608_v60, 0.0 }
 0xecc   : > { %v12870_v4 = vmul.f32 0.01, %v12600_v39  ;;  %v12603_v59 = vadd.f32 %v23839_v42, %v12602_v20  ;;  %vm12806_vm4 = vcmp.ge.f32.partialorder %v12600_v39, 0.0 }
 0xecd   : > { %vm12809_vm5 = vcmp.ge.f32.partialorder %v12611_v30, 0.0  ;;  %v12873_v45 = vmul.f32 0.01, %v12611_v30  ;;  %v12936_v26 = vsel %vm12808_vm3, %v12608_v60, %v12872_v35 }
 0xece   : > { %vm12807_vm6 = vcmp.ge.f32.partialorder %v12603_v59, 0.0  ;;  %v12871_v8 = vmul.f32 0.01, %v12603_v59  ;;  %v12406_v19 = vpop.f32.mrb[160].mxu1  ;;  %v12934_v9 = vsel %vm12806_vm4, %v12600_v39, %v12870_v4 }
 0xecf   : > { %v24039_v52 = vadd.f32 %v15992_v63, %v12406_v19  ;;  %v12408_v43 = vpop.f32.mrb[161].mxu1  ;;  %v12937_v2 = vsel %vm12809_vm5, %v12611_v30, %v12873_v45 }
 0xed0   : > { %v12409_v33 = vpop.f32.mrb[162].mxu1  ;;  %v15806_v3 = vpop.f32.mrb[36].mxu0  ;;  %v12935_v47 = vsel %vm12807_vm6, %v12603_v59, %v12871_v8  ;;  %v13023_v42 = vpack.c.bf16 %v12937_v2, %v12936_v26 }
 0xed1   : > { %v24041_v20 = vadd.f32 %v15994_v34, %v12409_v33  ;;  %v12411_v61 = vpop.f32.mrb[163].mxu1  ;;  %v12624_v44 = vadd.f32 %v23867_v27, %v15806_v3  ;;  %v12615_v24 = vpop.f32.mrb[37].mxu0  ;;  %v13022_v18 = vpack.c.bf16 %v12935_v47, %v12934_v9  ;;  %v4916_v33 = vld [vmem:[%s24509_s8 + $0x158] sm:$0xff]  ;;  %v24622_v9 = vpack.c.bf16 %v23937_v17, %v23933_v1 }
 0xed2   : > { %v12616_v53 = vadd.f32 %v23857_v22, %v12615_v24  ;;  %v15807_v60 = vpop.f32.mrb[38].mxu0  ;;  %v15996_v22 = vadd.f32 %v23512_v48, %v4915_v14  ;;  %v15998_v47 = vadd.f32 %v23520_v56, %v4916_v33  ;;  %v24623_v1 = vpack.c.bf16 %v23929_v0, %v23927_v12 }
 0xed3   : > { %v12876_v35 = vmul.f32 0.01, %v12624_v44  ;;  %v12627_v30 = vadd.f32 %v23869_v62, %v15807_v60  ;;  %v12618_v39 = vpop.f32.mrb[39].mxu0  ;;  %15536 = vmatprep.subr.bf16.mxu0 %v13022_v18  ;;  %vm12812_vm7 = vcmp.ge.f32.partialorder %v12624_v44, 0.0 }
 0xed4   : > { %v12874_v3 = vmul.f32 0.01, %v12616_v53  ;;  %v12619_v27 = vadd.f32 %v23859_v49, %v12618_v39  ;;  %15537 = vmatpush3.bf16.msra.mxu0 %v24622_v9  ;;  %vm12810_vm8 = vcmp.ge.f32.partialorder %v12616_v53, 0.0 }
 0xed5   : > { %vm12813_vm9 = vcmp.ge.f32.partialorder %v12627_v30, 0.0  ;;  %v12877_v24 = vmul.f32 0.01, %v12627_v30  ;;  %15538 = vmatprep.subr.bf16.mxu0 %v13023_v42  ;;  %v12940_v63 = vsel %vm12812_vm7, %v12624_v44, %v12876_v35  ;;  %v4917_v42 = vld [vmem:[%s24509_s8 + $0x160] sm:$0xff]  ;;  %v24624_v35 = vpack.c.bf16 %v23965_v5, %v23961_v31 }
 0xed6   : > { %vm12811_vm10 = vcmp.ge.f32.partialorder %v12619_v27, 0.0  ;;  %v12875_v62 = vmul.f32 0.01, %v12619_v27  ;;  %v12414_v18 = vpop.f32.mrb[164].mxu1  ;;  %v12938_v48 = vsel %vm12810_vm8, %v12616_v53, %v12874_v3  ;;  %v4918_v53 = vld [vmem:[%s24509_s8 + $0x168] sm:$0xff]  ;;  %v24625_v31 = vpack.c.bf16 %v23957_v54, %v23955_v16 }
 0xed7   : > { %v24058_v4 = vadd.f32 %v15996_v22, %v12414_v18  ;;  %v12416_v59 = vpop.f32.mrb[165].mxu1  ;;  %v12941_v49 = vsel %vm12813_vm9, %v12627_v30, %v12877_v24  ;;  %v16002_v33 = vadd.f32 %v23538_v58, %v4918_v53 }
 0xed8   : > { %v12417_v45 = vpop.f32.mrb[166].mxu1  ;;  %v15810_v8 = vpop.f32.mrb[40].mxu0  ;;  %15539 = vmatpush3.bf16.msra.mxu0 %v24623_v1  ;;  %v12939_v17 = vsel %vm12811_vm10, %v12619_v27, %v12875_v62  ;;  %v13025_v19 = vpack.c.bf16 %v12941_v49, %v12940_v63  ;;  %v4919_v49 = vld [vmem:[%s24509_s8 + $0x170] sm:$0xff] }
 0xed9   : > { %v24063_v34 = vadd.f32 %v15998_v47, %v12417_v45  ;;  %v12419_v43 = vpop.f32.mrb[167].mxu1  ;;  %v12640_v26 = vadd.f32 %v23902_v38, %v15810_v8  ;;  %v12631_v56 = vpop.f32.mrb[41].mxu0  ;;  %v13024_v2 = vpack.c.bf16 %v12939_v17, %v12938_v48  ;;  %v4920_v48 = vld [vmem:[%s24509_s8 + $0x178] sm:$0xff] }
 0xeda   : > { %v12632_v61 = vadd.f32 %v23880_v29, %v12631_v56  ;;  %v15811_v44 = vpop.f32.mrb[42].mxu0  ;;  %v16000_v29 = vadd.f32 %v23530_v50, %v4917_v42  ;;  %v24627_v56 = vld [vmem:[#allocation4_spill] sm:$0xff] }
 0xedb   : > { %v12880_v14 = vmul.f32 0.01, %v12640_v26  ;;  %v12643_v12 = vadd.f32 %v23908_v55, %v15811_v44  ;;  %v12634_v0 = vpop.f32.mrb[43].mxu0  ;;  %15540 = vmatprep.subr.bf16.mxu0 %v13024_v2  ;;  %vm12816_vm11 = vcmp.ge.f32.partialorder %v12640_v26, 0.0  ;;  %v16006_v2 = vadd.f32 %v24627_v56, %v4920_v48 }
 0xedc   : > { %v12878_v38 = vmul.f32 0.01, %v12632_v61  ;;  %v12635_v60 = vadd.f32 %v23886_v28, %v12634_v0  ;;  %15541 = vmatpush3.bf16.msra.mxu0 %v24624_v35  ;;  %vm12814_vm12 = vcmp.ge.f32.partialorder %v12632_v61, 0.0 }
 0xedd   : > { %vm12817_vm13 = vcmp.ge.f32.partialorder %v12643_v12, 0.0  ;;  %v12881_v30 = vmul.f32 0.01, %v12643_v12  ;;  %15542 = vmatprep.subr.bf16.mxu0 %v13025_v19  ;;  %v12944_v9 = vsel %vm12816_vm11, %v12640_v26, %v12880_v14  ;;  %v24626_v19 = vpack.c.bf16 %v23993_v11, %v23989_v10 }
 0xede   : > { %vm12815_vm14 = vcmp.ge.f32.partialorder %v12635_v60, 0.0  ;;  %v12879_v55 = vmul.f32 0.01, %v12635_v60  ;;  %v12422_v39 = vpop.f32.mrb[168].mxu1  ;;  %v12942_v50 = vsel %vm12814_vm12, %v12632_v61, %v12878_v38  ;;  %v24628_v10 = vpack.c.bf16 %v23985_v23, %v23983_v46 }
 0xedf   : > { %v24080_v3 = vadd.f32 %v16000_v29, %v12422_v39  ;;  %v12424_v27 = vpop.f32.mrb[169].mxu1  ;;  %v12945_v28 = vsel %vm12817_vm13, %v12643_v12, %v12881_v30  ;;  %v4921_v30 = vld [vmem:[%s24509_s8 + $0x180] sm:$0xff] }
 0xee0   : > { %v12425_v22 = vpop.f32.mrb[170].mxu1  ;;  %v15814_v24 = vpop.f32.mrb[44].mxu0  ;;  %15543 = vmatpush3.bf16.msra.mxu0 %v24625_v31  ;;  %v12943_v5 = vsel %vm12815_vm14, %v12635_v60, %v12879_v55  ;;  %v13027_v62 = vpack.c.bf16 %v12945_v28, %v12944_v9  ;;  %v4922_v27 = vld [vmem:[%s24509_s8 + $0x188] sm:$0xff]  ;;  %v24629_v28 = vpack.c.bf16 %v24021_v7, %v24017_v41  ;;  %v18657_v41 = vld [vmem:[%s24510_s9] ss:$16 sps:$4 sm:$0xff]  }
 0xee1   : > { %v24085_v18 = vadd.f32 %v16002_v33, %v12425_v22  ;;  %v12427_v47 = vpop.f32.mrb[171].mxu1  ;;  %v12656_v59 = vadd.f32 %v23911_v15, %v15814_v24  ;;  %v12647_v58 = vpop.f32.mrb[45].mxu0  ;;  %v13026_v63 = vpack.c.bf16 %v12943_v5, %v12942_v50  ;;  %v24630_v22 = vld [vmem:[#allocation15_spill] sm:$0xff]  ;;  %v24631_v50 = vld [vmem:[#allocation5_spill] sm:$0xff] }
 0xee2   : > { %v12648_v45 = vadd.f32 %v23892_v57, %v12647_v58  ;;  %v15815_v8 = vpop.f32.mrb[46].mxu0  ;;  %v16004_v57 = vadd.f32 %v23548_v21, %v4919_v49  ;;  %v16010_v5 = vadd.f32 %v24631_v50, %v4922_v27 }
 0xee3   : > { %v12884_v1 = vmul.f32 0.01, %v12656_v59  ;;  %v12659_v16 = vadd.f32 %v23913_v32, %v15815_v8  ;;  %v12650_v54 = vpop.f32.mrb[47].mxu0  ;;  %15544 = vmatprep.subr.bf16.mxu0 %v13026_v63  ;;  %vm12820_vm15 = vcmp.ge.f32.partialorder %v12656_v59, 0.0  ;;  %v24632_v8 = vpack.c.bf16 %v24013_v40, %v24011_v6 }
 0xee4   : > { %v12882_v15 = vmul.f32 0.01, %v12648_v45  ;;  %v12651_v17 = vadd.f32 %v23897_v13, %v12650_v54  ;;  %15545 = vmatpush3.bf16.msra.mxu0 %v24626_v19  ;;  %vm12818_vm0 = vcmp.ge.f32.partialorder %v12648_v45, 0.0 }
 0xee5   : > { %vm12821_vm1 = vcmp.ge.f32.partialorder %v12659_v16, 0.0  ;;  %v12885_v43 = vmul.f32 0.01, %v12659_v16  ;;  %15546 = vmatprep.subr.bf16.mxu0 %v13027_v62  ;;  %v12948_v44 = vsel %vm12820_vm15, %v12656_v59, %v12884_v1  ;;  %v18662_v1 = vld [vmem:[%s24510_s9 + $0x24] ss:$16 sps:$4 sm:$0xff]  }
 0xee6   : > { %vm12819_vm2 = vcmp.ge.f32.partialorder %v12651_v17, 0.0  ;;  %v12883_v32 = vmul.f32 0.01, %v12651_v17  ;;  %v12430_v26 = vpop.f32.mrb[172].mxu1  ;;  %v12946_v21 = vsel %vm12818_vm0, %v12648_v45, %v12882_v15  ;;  %v24633_v15 = vld [vmem:[#allocation23_spill] sm:$0xff] }
 0xee7   : > { %v24102_v42 = vadd.f32 %v16004_v57, %v12430_v26  ;;  %v12432_v61 = vpop.f32.mrb[173].mxu1  ;;  %v12949_v13 = vsel %vm12821_vm1, %v12659_v16, %v12885_v43  ;;  %v4923_v57 = vld [vmem:[%s24509_s8 + $0x190] sm:$0xff]  ;;  %v24634_v43 = vld [vmem:[#allocation21_spill] sm:$0xff]  ;;  %v24635_v26 = vld [vmem:[#allocation24_spill] sm:$0xff] }
 0xee8   : > { %v12433_v14 = vpop.f32.mrb[174].mxu1  ;;  %v15818_v12 = vpop.f32.mrb[48].mxu0  ;;  %15547 = vmatpush3.bf16.msra.mxu0 %v24628_v10  ;;  %v12947_v11 = vsel %vm12819_vm2, %v12651_v17, %v12883_v32  ;;  %v13029_v0 = vpack.c.bf16 %v12949_v13, %v12948_v44  ;;  %v4924_v61 = vld [vmem:[%s24509_s8 + $0x198] sm:$0xff]  ;;  %v24636_v13 = vld [vmem:[#allocation22_spill] sm:$0xff] }
 0xee9   : > { %v24107_v53 = vadd.f32 %v16006_v2, %v12433_v14  ;;  %v12435_v38 = vpop.f32.mrb[175].mxu1  ;;  %v12672_v60 = vadd.f32 %v23959_v51, %v15818_v12  ;;  %v12663_v35 = vpop.f32.mrb[49].mxu0  ;;  %v13028_v29 = vpack.c.bf16 %v12947_v11, %v12946_v21  ;;  %v24637_v12 = vld [vmem:[#allocation16_spill] sm:$0xff] }
 0xeea   : > { %v12664_v55 = vadd.f32 %v23931_v36, %v12663_v35  ;;  %v15819_v39 = vpop.f32.mrb[50].mxu0  ;;  %v16008_v36 = vadd.f32 %v24630_v22, %v4921_v30  ;;  %v16012_v10 = vadd.f32 %v24637_v12, %v4923_v57  ;;  %v24638_v38 = vld [vmem:[#allocation6_spill] sm:$0xff] }
 0xeeb   : > { %v12888_v33 = vmul.f32 0.01, %v12672_v60  ;;  %v12675_v46 = vadd.f32 %v23969_v37, %v15819_v39  ;;  %v12666_v23 = vpop.f32.mrb[51].mxu0  ;;  %15548 = vmatprep.subr.bf16.mxu0 %v13028_v29  ;;  %vm12824_vm3 = vcmp.ge.f32.partialorder %v12672_v60, 0.0  ;;  %v18660_v39 = vld [vmem:[%s24510_s9 + $0x20] ss:$16 sps:$4 sm:$0xff]  }
 0xeec   : > { %v12886_v51 = vmul.f32 0.01, %v12664_v55  ;;  %v12667_v9 = vadd.f32 %v23941_v25, %v12666_v23  ;;  %15549 = vmatpush3.bf16.msra.mxu0 %v24629_v28  ;;  %vm12822_vm4 = vcmp.ge.f32.partialorder %v12664_v55, 0.0 }
 0xeed   : > { %vm12825_vm5 = vcmp.ge.f32.partialorder %v12675_v46, 0.0  ;;  %v12889_v24 = vmul.f32 0.01, %v12675_v46  ;;  %15550 = vmatprep.subr.bf16.mxu0 %v13029_v0  ;;  %v24124_v62 = vsel %vm12824_vm3, %v12672_v60, %v12888_v33  ;;  %v16014_v60 = vadd.f32 %v24638_v38, %v4924_v61 }
 0xeee   : > { %vm12823_vm6 = vcmp.ge.f32.partialorder %v12667_v9, 0.0  ;;  %v12887_v37 = vmul.f32 0.01, %v12667_v9  ;;  %v12438_v31 = vpop.f32.mrb[176].mxu1  ;;  %v24133_v7 = vsel %vm12822_vm4, %v12664_v55, %v12886_v51 }
 0xeef   : > { %v24126_v47 = vsel %vm12825_vm5, %v12675_v46, %v12889_v24  ;;  %v24128_v25 = vadd.f32 %v16008_v36, %v12438_v31  ;;  %v12440_v59 = vpop.f32.mrb[177].mxu1  ;;  %v4925_v31 = vld [vmem:[%s24509_s8 + $0x1a0] sm:$0xff] }
 0xef0   : > { %v13031_v58 = vpack.c.bf16 %v24126_v47, %v24124_v62  ;;  %v24137_v63 = vsel %vm12823_vm6, %v12667_v9, %v12887_v37  ;;  %v12441_v49 = vpop.f32.mrb[178].mxu1  ;;  %v15822_v45 = vpop.f32.mrb[52].mxu0  ;;  %15551 = vmatpush3.bf16.msra.mxu0 %v24632_v8  ;;  %v18665_v9 = vld [vmem:[%s24510_s9 + $0x44] ss:$16 sps:$4 sm:$0xff]  }
 0xef1   : > { %v13030_v16 = vpack.c.bf16 %v24137_v63, %v24133_v7  ;;  %v24147_v54 = vadd.f32 %v16010_v5, %v12441_v49  ;;  %v12443_v48 = vpop.f32.mrb[179].mxu1  ;;  %v12688_v17 = vadd.f32 %v24633_v15, %v15822_v45  ;;  %v12679_v19 = vpop.f32.mrb[53].mxu0  ;;  %v4926_v45 = vld [vmem:[%s24509_s8 + $0x1a8] sm:$0xff]  ;;  %v18672_v7 = vld [vmem:[%s24510_s9 + $0xa0] ss:$16 sps:$4 sm:$0xff]  }
 0xef2   : > { %v12680_v6 = vadd.f32 %v24634_v43, %v12679_v19  ;;  %v15823_v40 = vpop.f32.mrb[54].mxu0 }
 0xef3   : > { %v12892_v32 = vmul.f32 0.01, %v12688_v17  ;;  %v12691_v56 = vadd.f32 %v24635_v26, %v15823_v40  ;;  %v12682_v2 = vpop.f32.mrb[55].mxu0  ;;  %13255 = vmatmul.mubr.bf16.vlgmr.msra.gmra.mrb[80].mxu0 %v18657_v41  ;;  %vm12828_vm7 = vcmp.ge.f32.partialorder %v12688_v17, 0.0 }
 0xef4   : > { %v12890_v44 = vmul.f32 0.01, %v12680_v6  ;;  %v12683_v14 = vadd.f32 %v24636_v13, %v12682_v2  ;;  %13262 = vmatprep.mubr.bf16.mxu0 %v18662_v1  ;;  %vm12826_vm8 = vcmp.ge.f32.partialorder %v12680_v6, 0.0  ;;  %v24639_v1 = vld [vmem:[#allocation17_spill] sm:$0xff] }
 0xef5   : > { %vm12829_vm9 = vcmp.ge.f32.partialorder %v12691_v56, 0.0  ;;  %v12893_v21 = vmul.f32 0.01, %v12691_v56  ;;  %v24161_v35 = vsel %vm12828_vm7, %v12688_v17, %v12892_v32  ;;  %v16016_v48 = vadd.f32 %v24639_v1, %v4925_v31 }
 0xef6   : > { %vm12827_vm10 = vcmp.ge.f32.partialorder %v12683_v14, 0.0  ;;  %v12891_v11 = vmul.f32 0.01, %v12683_v14  ;;  %v12446_v0 = vpop.f32.mrb[180].mxu1  ;;  %v24170_v33 = vsel %vm12826_vm8, %v12680_v6, %v12890_v44  ;;  %v18668_v44 = vld [vmem:[%s24510_s9 + $0x64] ss:$16 sps:$4 sm:$0xff]  }
 0xef7   : > { %v24163_v29 = vsel %vm12829_vm9, %v12691_v56, %v12893_v21  ;;  %v24165_v30 = vadd.f32 %v16012_v10, %v12446_v0  ;;  %v12448_v55 = vpop.f32.mrb[181].mxu1 }
 0xef8   : > { %v13033_v46 = vpack.c.bf16 %v24163_v29, %v24161_v35  ;;  %v24174_v23 = vsel %vm12827_vm10, %v12683_v14, %v12891_v11  ;;  %v12449_v27 = vpop.f32.mrb[182].mxu1  ;;  %v15826_v51 = vpop.f32.mrb[56].mxu0  ;;  %v4927_v11 = vld [vmem:[%s24509_s8 + $0x1b0] sm:$0xff]  ;;  %v4936_v29 = vld [vmem:[%s24509_s8 + $0x1f8] sm:$0xff] }
 0xef9   : > { %v13032_v28 = vpack.c.bf16 %v24174_v23, %v24170_v33  ;;  %v24181_v22 = vadd.f32 %v16014_v60, %v12449_v27  ;;  %v12451_v36 = vpop.f32.mrb[183].mxu1  ;;  %v12704_v24 = vadd.f32 %v24058_v4, %v15826_v51  ;;  %v12695_v37 = vpop.f32.mrb[57].mxu0  ;;  %v4928_v27 = vld [vmem:[%s24509_s8 + $0x1b8] sm:$0xff]  ;;  %v18675_v33 = vld [vmem:[%s24510_s9 + $0xc0] ss:$16 sps:$4 sm:$0xff]  }
 0xefa   : > { %v12696_v50 = vadd.f32 %v24039_v52, %v12695_v37  ;;  %v15827_v5 = vpop.f32.mrb[58].mxu0 }
 0xefb   : > { %v12896_v59 = vmul.f32 0.01, %v12704_v24  ;;  %v12707_v41 = vadd.f32 %v24063_v34, %v15827_v5  ;;  %v12698_v49 = vpop.f32.mrb[59].mxu0  ;;  %13263 = vmatmul.mubr.bf16.gmra.mrb[84].mxu0 %v18660_v39  ;;  %vm12832_vm11 = vcmp.ge.f32.partialorder %v12704_v24, 0.0  ;;  %v24640_v34 = vld [vmem:[#allocation7_spill] sm:$0xff] }
 0xefc   : > { %v12894_v8 = vmul.f32 0.01, %v12696_v50  ;;  %v12699_v4 = vadd.f32 %v24041_v20, %v12698_v49  ;;  %13270 = vmatprep.mubr.bf16.mxu0 %v18665_v9  ;;  %vm12830_vm12 = vcmp.ge.f32.partialorder %v12696_v50, 0.0  ;;  %v16018_v19 = vadd.f32 %v24640_v34, %v4926_v45  ;;  %v18663_v20 = vld [vmem:[%s24510_s9 + $0x40] ss:$16 sps:$4 sm:$0xff]  }
 0xefd   : > { %vm12833_vm13 = vcmp.ge.f32.partialorder %v12707_v41, 0.0  ;;  %v12897_v52 = vmul.f32 0.01, %v12707_v41  ;;  %v24195_v57 = vsel %vm12832_vm11, %v12704_v24, %v12896_v59  ;;  %v24641_v9 = vld [vmem:[#allocation8_spill] sm:$0xff] }
 0xefe   : > { %vm12831_vm14 = vcmp.ge.f32.partialorder %v12699_v4, 0.0  ;;  %v12895_v15 = vmul.f32 0.01, %v12699_v4  ;;  %v12454_v17 = vpop.f32.mrb[184].mxu1  ;;  %v24204_v32 = vsel %vm12830_vm12, %v12696_v50, %v12894_v8  ;;  %v16020_v36 = vadd.f32 %v24641_v9, %v4927_v11  ;;  %v24643_v11 = vld [vmem:[#allocation10_spill] sm:$0xff] }
 0xeff   : > { %v24197_v43 = vsel %vm12833_vm13, %v12707_v41, %v12897_v52  ;;  %v24199_v6 = vadd.f32 %v16016_v48, %v12454_v17  ;;  %v12456_v40 = vpop.f32.mrb[185].mxu1  ;;  %v18671_v48 = vld [vmem:[%s24510_s9 + $0x84] ss:$16 sps:$4 sm:$0xff]   ;;  %v18669_v9 = vld [vmem:[%s24510_s9 + $0x80] ss:$16 sps:$4 sm:$0xff]  }
 0xf00   : > { %v13035_v26 = vpack.c.bf16 %v24197_v43, %v24195_v57  ;;  %v24208_v56 = vsel %vm12831_vm14, %v12699_v4, %v12895_v15  ;;  %v12457_v2 = vpop.f32.mrb[186].mxu1  ;;  %v15830_v61 = vpop.f32.mrb[60].mxu0  ;;  %v4929_v40 = vld [vmem:[%s24509_s8 + $0x1c0] sm:$0xff] }
 0xf01   : > { %v13034_v13 = vpack.c.bf16 %v24208_v56, %v24204_v32  ;;  %v24215_v14 = vadd.f32 %v16018_v19, %v12457_v2  ;;  %v12459_v12 = vpop.f32.mrb[187].mxu1  ;;  %v12720_v10 = vadd.f32 %v24102_v42, %v15830_v61  ;;  %v12711_v21 = vpop.f32.mrb[61].mxu0 }
 0xf02   : > { %v12712_v0 = vadd.f32 %v24080_v3, %v12711_v21  ;;  %v15831_v38 = vpop.f32.mrb[62].mxu0 }
 0xf03   : > { %v12900_v60 = vmul.f32 0.01, %v12720_v10  ;;  %v12723_v55 = vadd.f32 %v24107_v53, %v15831_v38  ;;  %v12714_v39 = vpop.f32.mrb[63].mxu0  ;;  %13271 = vmatmul.mubr.bf16.gmra.mrb[88].mxu0 %v18663_v20  ;;  %vm12836_vm15 = vcmp.ge.f32.partialorder %v12720_v10, 0.0  ;;  %v24642_v53 = vld [vmem:[#allocation9_spill] sm:$0xff] }
 0xf04   : > { %v12898_v51 = vmul.f32 0.01, %v12712_v0  ;;  %v12715_v42 = vadd.f32 %v24085_v18, %v12714_v39  ;;  %13278 = vmatprep.mubr.bf16.mxu0 %v18668_v44  ;;  %vm12834_vm0 = vcmp.ge.f32.partialorder %v12712_v0, 0.0  ;;  %v16022_v31 = vadd.f32 %v24642_v53, %v4928_v27  ;;  %v18666_v18 = vld [vmem:[%s24510_s9 + $0x60] ss:$16 sps:$4 sm:$0xff]  }
 0xf05   : > { %vm12837_vm1 = vcmp.ge.f32.partialorder %v12723_v55, 0.0  ;;  %v12901_v3 = vmul.f32 0.01, %v12723_v55  ;;  %v24229_v50 = vsel %vm12836_vm15, %v12720_v10, %v12900_v60  ;;  %v4930_v10 = vld [vmem:[%s24509_s8 + $0x1c8] sm:$0xff]  ;;  %v18674_v53 = vld [vmem:[%s24510_s9 + $0xa4] ss:$16 sps:$4 sm:$0xff]  }
 0xf06   : > { %vm12835_vm2 = vcmp.ge.f32.partialorder %v12715_v42, 0.0  ;;  %v12899_v24 = vmul.f32 0.01, %v12715_v42  ;;  %v12462_v37 = vpop.f32.mrb[188].mxu1  ;;  %v24236_v49 = vsel %vm12834_vm0, %v12712_v0, %v12898_v51  ;;  %v16024_v0 = vadd.f32 %v24643_v11, %v4929_v40 }
 0xf07   : > { %v24231_v5 = vsel %vm12837_vm1, %v12723_v55, %v12901_v3  ;;  %v16021_v59 = vadd.f32 %v16020_v36, %v12462_v37  ;;  %v12464_v41 = vpop.f32.mrb[189].mxu1 }
 0xf08   : > { %v13037_v45 = vpack.c.bf16 %v24231_v5, %v24229_v50  ;;  %v24240_v8 = vsel %vm12835_vm2, %v12715_v42, %v12899_v24  ;;  %v12465_v4 = vpop.f32.mrb[190].mxu1  ;;  %v15834_v1 = vpop.f32.mrb[64].mxu0  ;;  %v18687_v50 = vld [vmem:[%s24510_s9 + $0x48] ss:$16 sps:$4 sm:$0xff]   ;;  %v18692_v5 = vld [vmem:[%s24510_s9 + $0x6c] ss:$16 sps:$4 sm:$0xff]  }
 0xf09   : > { %v13036_v52 = vpack.c.bf16 %v24240_v8, %v24236_v49  ;;  %v16023_v15 = vadd.f32 %v16022_v31, %v12465_v4  ;;  %v12467_v17 = vpop.f32.mrb[191].mxu1  ;;  %v12736_v34 = vadd.f32 %v24165_v30, %v15834_v1  ;;  %v12727_v19 = vpop.f32.mrb[65].mxu0  ;;  %v18686_v49 = vld [vmem:[%s24510_s9 + $0x2c] ss:$16 sps:$4 sm:$0xff]   ;;  %v18684_v8 = vld [vmem:[%s24510_s9 + $0x28] ss:$16 sps:$4 sm:$0xff]  }
 0xf0a   : > { %v12728_v20 = vadd.f32 %v24128_v25, %v12727_v19  ;;  %v15835_v2 = vpop.f32.mrb[66].mxu0 }
 0xf0b   : > { %v12904_v61 = vmul.f32 0.01, %v12736_v34  ;;  %v12739_v44 = vadd.f32 %v24181_v22, %v15835_v2  ;;  %v12730_v12 = vpop.f32.mrb[67].mxu0  ;;  %13279 = vmatmul.mubr.bf16.gmra.mrb[92].mxu0 %v18666_v18  ;;  %vm12840_vm3 = vcmp.ge.f32.partialorder %v12736_v34, 0.0  ;;  %v24644_v22 = vld [vmem:[#allocation12_spill] sm:$0xff]  ;;  %v4932_v2 = vld [vmem:[%s24509_s8 + $0x1d8] sm:$0xff] }
 0xf0c   : > { %v12902_v21 = vmul.f32 0.01, %v12728_v20  ;;  %v12731_v30 = vadd.f32 %v24147_v54, %v12730_v12  ;;  %13286 = vmatprep.mubr.bf16.mxu0 %v18671_v48  ;;  %vm12838_vm4 = vcmp.ge.f32.partialorder %v12728_v20, 0.0  ;;  %v16026_v55 = vadd.f32 %v24644_v22, %v4930_v10  ;;  %v4931_v48 = vld [vmem:[%s24509_s8 + $0x1d0] sm:$0xff] }
 0xf0d   : > { %vm12841_vm5 = vcmp.ge.f32.partialorder %v12739_v44, 0.0  ;;  %v12905_v25 = vmul.f32 0.01, %v12739_v44  ;;  %v12968_v51 = vsel %vm12840_vm3, %v12736_v34, %v12904_v61  ;;  %vm13416_vm3 = vcmask 7168  }
 0xf0e   : > { %vm12839_vm6 = vcmp.ge.f32.partialorder %v12731_v30, 0.0  ;;  %v12903_v38 = vmul.f32 0.01, %v12731_v30  ;;  %v12470_v60 = vpop.f32.mrb[192].mxu1  ;;  %v12966_v3 = vsel %vm12838_vm4, %v12728_v20, %v12902_v21  ;;  %v24646_v21 = vld [vmem:[#allocation11_spill] sm:$0xff] }
 0xf0f   : > { %v16025_v39 = vadd.f32 %v16024_v0, %v12470_v60  ;;  %v12472_v27 = vpop.f32.mrb[193].mxu1  ;;  %v12969_v42 = vsel %vm12841_vm5, %v12739_v44, %v12905_v25 }
 0xf10   : > { %v12473_v54 = vpop.f32.mrb[194].mxu1  ;;  %v15838_v36 = vpop.f32.mrb[68].mxu0  ;;  %v12967_v24 = vsel %vm12839_vm6, %v12731_v30, %v12903_v38  ;;  %v13039_v37 = vpack.c.bf16 %v12969_v42, %v12968_v51  ;;  %v16030_v30 = vadd.f32 %v24646_v21, %v4932_v2  ;;  %v4935_v21 = vld [vmem:[%s24509_s8 + $0x1f0] sm:$0xff] }
 0xf11   : > { %v16027_v31 = vadd.f32 %v16026_v55, %v12473_v54  ;;  %v12475_v41 = vpop.f32.mrb[195].mxu1  ;;  %v12752_v18 = vadd.f32 %v16021_v59, %v15838_v36  ;;  %v12743_v4 = vpop.f32.mrb[69].mxu0  ;;  %v13038_v1 = vpack.c.bf16 %v12967_v24, %v12966_v3  ;;  %v18677_v55 = vld [vmem:[%s24510_s9 + $0xc4] ss:$16 sps:$4 sm:$0xff]  }
 0xf12   : > { %v12744_v17 = vadd.f32 %v24199_v6, %v12743_v4  ;;  %v15839_v34 = vpop.f32.mrb[70].mxu0  ;;  %v24645_v6 = vld [vmem:[#allocation14_spill] sm:$0xff]  ;;  %v4933_v36 = vld [vmem:[%s24509_s8 + $0x1e0] sm:$0xff] }
 0xf13   : > { %v12908_v19 = vmul.f32 0.01, %v12752_v18  ;;  %v12755_v40 = vadd.f32 %v16023_v15, %v15839_v34  ;;  %v12746_v20 = vpop.f32.mrb[71].mxu0  ;;  %15600 = vmatprep.subr.bf16.mxu0 %v13038_v1  ;;  %13287 = vmatmul.mubr.bf16.gmra.mrb[96].mxu0 %v18669_v9  ;;  %vm12844_vm7 = vcmp.ge.f32.partialorder %v12752_v18, 0.0  ;;  %v16028_v44 = vadd.f32 %v24645_v6, %v4931_v48  ;;  %v18680_v6 = vld [vmem:[%s24510_s9 + $0xe4] ss:$16 sps:$4 sm:$0xff]  }
 0xf14   : > { %v12906_v59 = vmul.f32 0.01, %v12744_v17  ;;  %v12747_v61 = vadd.f32 %v24215_v14, %v12746_v20  ;;  %15601 = vmatpush3.bf16.msra.mxu0 %v13030_v16  ;;  %13294 = vmatprep.mubr.bf16.mxu0 %v18674_v53  ;;  %vm12842_vm8 = vcmp.ge.f32.partialorder %v12744_v17, 0.0 }
 0xf15   : > { %vm12845_vm9 = vcmp.ge.f32.partialorder %v12755_v40, 0.0  ;;  %v12909_v15 = vmul.f32 0.01, %v12755_v40  ;;  %15602 = vmatprep.subr.bf16.mxu0 %v13039_v37  ;;  %v12972_v14 = vsel %vm12844_vm7, %v12752_v18, %v12908_v19  ;;  %v4934_v37 = vld [vmem:[%s24509_s8 + $0x1e8] sm:$0xff] }
 0xf16   : > { %vm12843_vm10 = vcmp.ge.f32.partialorder %v12747_v61, 0.0  ;;  %v12907_v12 = vmul.f32 0.01, %v12747_v61  ;;  %v12478_v10 = vpop.f32.mrb[196].mxu1  ;;  %v12970_v38 = vsel %vm12842_vm8, %v12744_v17, %v12906_v59  ;;  %v24647_v18 = vld [vmem:[#allocation13_spill] sm:$0xff]  ;;  %v24648_v17 = vld [vmem:[#allocation18_spill] sm:$0xff] }
 0xf17   : > { %v16029_v11 = vadd.f32 %v16028_v44, %v12478_v10  ;;  %v12480_v0 = vpop.f32.mrb[197].mxu1  ;;  %v12973_v25 = vsel %vm12845_vm9, %v12755_v40, %v12909_v15  ;;  %v16034_v34 = vadd.f32 %v24648_v17, %v4934_v37  ;;  %v18698_v37 = vld [vmem:[%s24510_s9 + $0xac] ss:$16 sps:$4 sm:$0xff]  }
 0xf18   : > { %v12481_v63 = vpop.f32.mrb[198].mxu1  ;;  %v15842_v16 = vpop.f32.mrb[72].mxu0  ;;  %15603 = vmatpush3.bf16.msra.mxu0 %v13031_v58  ;;  %v12971_v60 = vsel %vm12843_vm10, %v12747_v61, %v12907_v12  ;;  %v13041_v22 = vpack.c.bf16 %v12973_v25, %v12972_v14  ;;  %v24649_v14 = vld [vmem:[#allocation19_spill] sm:$0xff] }
 0xf19   : > { %v16031_v27 = vadd.f32 %v16030_v30, %v12481_v63  ;;  %v12483_v51 = vpop.f32.mrb[199].mxu1  ;;  %v12768_v42 = vadd.f32 %v16029_v11, %v15842_v16  ;;  %v12759_v9 = vpop.f32.mrb[73].mxu0  ;;  %v13040_v54 = vpack.c.bf16 %v12971_v60, %v12970_v38  ;;  %v16036_v25 = vadd.f32 %v24649_v14, %v4935_v21  ;;  %v24650_v16 = vld [vmem:[#allocation20_spill] sm:$0xff] }
 0xf1a   : > { %v12760_v3 = vadd.f32 %v16025_v39, %v12759_v9  ;;  %v15843_v62 = vpop.f32.mrb[74].mxu0  ;;  %v16032_v39 = vadd.f32 %v24647_v18, %v4933_v36  ;;  %v16038_v38 = vadd.f32 %v24650_v16, %v4936_v29  ;;  %v18699_v18 = vld [vmem:[%s24510_s9 + $0xc8] ss:$16 sps:$4 sm:$0xff]  }
 0xf1b   : > { %v12912_v47 = vmul.f32 0.01, %v12768_v42  ;;  %v12771_v58 = vadd.f32 %v16031_v27, %v15843_v62  ;;  %v12762_v24 = vpop.f32.mrb[75].mxu0  ;;  %15604 = vmatprep.subr.bf16.mxu0 %v13040_v54  ;;  %13295 = vmatmul.mubr.bf16.gmra.mrb[100].mxu0 %v18672_v7  ;;  %vm12848_vm11 = vcmp.ge.f32.partialorder %v12768_v42, 0.0 }
 0xf1c   : > { %v12910_v53 = vmul.f32 0.01, %v12760_v3  ;;  %v12763_v41 = vadd.f32 %v16027_v31, %v12762_v24  ;;  %15605 = vmatpush3.bf16.msra.mxu0 %v13032_v28  ;;  %13302 = vmatprep.mubr.bf16.mxu0 %v18677_v55  ;;  %vm12846_vm12 = vcmp.ge.f32.partialorder %v12760_v3, 0.0  ;;  %v18678_v55 = vld [vmem:[%s24510_s9 + $0xe0] ss:$16 sps:$4 sm:$0xff]  }
 0xf1d   : > { %vm12849_vm13 = vcmp.ge.f32.partialorder %v12771_v58, 0.0  ;;  %v12913_v4 = vmul.f32 0.01, %v12771_v58  ;;  %15606 = vmatprep.subr.bf16.mxu0 %v13041_v22  ;;  %v12976_v31 = vsel %vm12848_vm11, %v12768_v42, %v12912_v47  ;;  %v18681_v47 = vld [vmem:[%s24510_s9 + $0x8] ss:$16 sps:$4 sm:$0xff]  }
 0xf1e   : > { %vm12847_vm14 = vcmp.ge.f32.partialorder %v12763_v41, 0.0  ;;  %v12911_v1 = vmul.f32 0.01, %v12763_v41  ;;  %v12486_v48 = vpop.f32.mrb[200].mxu1  ;;  %v12974_v2 = vsel %vm12846_vm12, %v12760_v3, %v12910_v53  ;;  %v18693_v24 = vld [vmem:[%s24510_s9 + $0x88] ss:$16 sps:$4 sm:$0xff]  }
 0xf1f   : > { %v16033_v19 = vadd.f32 %v16032_v39, %v12486_v48  ;;  %v12488_v40 = vpop.f32.mrb[201].mxu1  ;;  %v12977_v20 = vsel %vm12849_vm13, %v12771_v58, %v12913_v4  ;;  %v18695_v58 = vld [vmem:[%s24510_s9 + $0x8c] ss:$16 sps:$4 sm:$0xff]   ;;  %v18696_v53 = vld [vmem:[%s24510_s9 + $0xa8] ss:$16 sps:$4 sm:$0xff]  }
 0xf20   : > { %v12489_v23 = vpop.f32.mrb[202].mxu1  ;;  %v15846_v28 = vpop.f32.mrb[76].mxu0  ;;  %15607 = vmatpush3.bf16.msra.mxu0 %v13033_v46  ;;  %v12975_v59 = vsel %vm12847_vm14, %v12763_v41, %v12911_v1  ;;  %v13043_v61 = vpack.c.bf16 %v12977_v20, %v12976_v31  ;;  %v18701_v41 = vld [vmem:[%s24510_s9 + $0xcc] ss:$16 sps:$4 sm:$0xff]   ;;  %v18702_v4 = vld [vmem:[%s24510_s9 + $0xe8] ss:$16 sps:$4 sm:$0xff]  }
 0xf21   : > { %v16035_v44 = vadd.f32 %v16034_v34, %v12489_v23  ;;  %v12491_v15 = vpop.f32.mrb[203].mxu1  ;;  %v12775_v12 = vpop.f32.mrb[77].mxu0  ;;  %v13042_v10 = vpack.c.bf16 %v12975_v59, %v12974_v2  ;;  %v18704_v39 = vld [vmem:[%s24510_s9 + $0xec] ss:$16 sps:$4 sm:$0xff]  }
 0xf22   : > { %v12776_v30 = vadd.f32 %v16033_v19, %v12775_v12  ;;  %v15847_v11 = vpop.f32.mrb[78].mxu0 }
 0xf23   : > { %v12778_v35 = vpop.f32.mrb[79].mxu0  ;;  %15608 = vmatprep.subr.bf16.mxu0 %v13042_v10  ;;  %13303 = vmatmul.mubr.bf16.gmra.mrb[104].mxu0 %v18675_v33 }
 0xf24   : > { %v12914_v46 = vmul.f32 0.01, %v12776_v30  ;;  %v12779_v0 = vadd.f32 %v16035_v44, %v12778_v35  ;;  %15609 = vmatpush3.bf16.msra.mxu0 %v13034_v13  ;;  %13310 = vmatprep.mubr.bf16.mxu0 %v18680_v6  ;;  %vm12850_vm15 = vcmp.ge.f32.partialorder %v12776_v30, 0.0  ;;  %v18683_v13 = vld [vmem:[%s24510_s9 + $0xc] ss:$16 sps:$4 sm:$0xff]  }
 0xf25   : > { %15610 = vmatprep.subr.bf16.mxu0 %v13043_v61 }
 0xf26   : > { %vm12851_vm0 = vcmp.ge.f32.partialorder %v12779_v0, 0.0  ;;  %v12915_v7 = vmul.f32 0.01, %v12779_v0  ;;  %v12494_v63 = vpop.f32.mrb[204].mxu1  ;;  %v12978_v32 = vsel %vm12850_vm15, %v12776_v30, %v12914_v46 }
 0xf27   : > { %v16037_v60 = vadd.f32 %v16036_v25, %v12494_v63  ;;  %v12496_v22 = vpop.f32.mrb[205].mxu1 }
 0xf28   : > { %v12497_v27 = vpop.f32.mrb[206].mxu1  ;;  %15611 = vmatpush3.bf16.msra.mxu0 %v13035_v26  ;;  %v12979_v56 = vsel %vm12851_vm0, %v12779_v0, %v12915_v7 }
 0xf29   : > { %v12784_v51 = vadd.f32 %v16037_v60, %v15846_v28  ;;  %v16039_v42 = vadd.f32 %v16038_v38, %v12497_v27  ;;  %v12499_v9 = vpop.f32.mrb[207].mxu1  ;;  %v13044_v54 = vpack.c.bf16 %v12979_v56, %v12978_v32 }
 0xf2b   : > { %v12916_v36 = vmul.f32 0.01, %v12784_v51  ;;  %v12787_v3 = vadd.f32 %v16039_v42, %v15847_v11  ;;  %15612 = vmatprep.subr.bf16.mxu0 %v13044_v54  ;;  %13311 = vmatmul.mubr.bf16.gmra.mrb[108].mxu0 %v18678_v55  ;;  %vm12852_vm1 = vcmp.ge.f32.partialorder %v12784_v51, 0.0 }
 0xf2c   : > { %15613 = vmatpush3.bf16.msra.mxu0 %v13036_v52  ;;  %13351 = vmatprep.mubr.bf16.mxu0 %v18683_v13  ;;  %v18689_v52 = vld [vmem:[%s24510_s9 + $0x4c] ss:$16 sps:$4 sm:$0xff]  }
 0xf2d   : > { %vm12853_vm2 = vcmp.ge.f32.partialorder %v12787_v3, 0.0  ;;  %v12917_v57 = vmul.f32 0.01, %v12787_v3  ;;  %v12980_v43 = vsel %vm12852_vm1, %v12784_v51, %v12916_v36 }
 0xf2f   : > { %v12981_v26 = vsel %vm12853_vm2, %v12787_v3, %v12917_v57 }
 0xf30   : > { %v13045_v62 = vpack.c.bf16 %v12981_v26, %v12980_v43 }
 0xf32   : > { %15614 = vmatprep.subr.bf16.mxu0 %v13045_v62  ;;  %v13046_v62 = vld [vmem:[%s24511_s10] sm:$0xff] }
 0xf33   : > { %15615 = vmatpush3.bf16.msra.mxu0 %v13037_v45  ;;  %v18690_v45 = vld [vmem:[%s24510_s9 + $0x68] ss:$16 sps:$4 sm:$0xff]  }
 0xf36   : > { %13352 = vmatmul.mubr.bf16.vlgmr.msra.gmra.mrb[112].mxu0 %v18681_v47 }
 0xf37   : > { %13359 = vmatprep.mubr.bf16.mxu0 %v18686_v49  ;;  %v13047_v49 = vld [vmem:[%s24511_s10 + $0x8] sm:$0xff] }
 0xf3e   : > { %13360 = vmatmul.mubr.bf16.gmra.mrb[116].mxu0 %v18684_v8 }
 0xf3f   : > { %13367 = vmatprep.mubr.bf16.mxu0 %v18689_v52 }
 0xf46   : > { %13368 = vmatmul.mubr.bf16.gmra.mrb[120].mxu0 %v18687_v50 }
 0xf47   : > { %13375 = vmatprep.mubr.bf16.mxu0 %v18692_v5 }
 0xf4e   : > { %13376 = vmatmul.mubr.bf16.gmra.mrb[124].mxu0 %v18690_v45 }
 0xf4f   : > { %13383 = vmatprep.mubr.bf16.mxu0 %v18695_v58 }
 0xf56   : > { %13384 = vmatmul.mubr.bf16.gmra.mrb[128].mxu0 %v18693_v24 }
 0xf57   : > { %13391 = vmatprep.mubr.bf16.mxu0 %v18698_v37 }
 0xf5e   : > { %13392 = vmatmul.mubr.bf16.gmra.mrb[132].mxu0 %v18696_v53 }
 0xf5f   : > { %13399 = vmatprep.mubr.bf16.mxu0 %v18701_v41  ;;  %v13048_v41 = vld [vmem:[%s24511_s10 + $0x10] sm:$0xff] }
 0xf66   : > { %13400 = vmatmul.mubr.bf16.gmra.mrb[136].mxu0 %v18699_v18 }
 0xf67   : > { %13407 = vmatprep.mubr.bf16.mxu0 %v18704_v39  ;;  %v13049_v39 = vld [vmem:[%s24511_s10 + $0x18] sm:$0xff] }
 0xf6e   : > { %13408 = vmatmul.mubr.bf16.gmra.mrb[140].mxu0 %v18702_v4 }
 0xfc6   : > { %v15552_v1 = vpop.f32.mrb[80].mxu0 }
 0xfc7   : > { %v15553_v48 = vpop.f32.mrb[81].mxu0 }
 0xfc8   : > { %v15554_v17 = vadd.f32 %v15553_v48, %v15552_v1  ;;  %v15555_v34 = vpop.f32.mrb[82].mxu0 }
 0xfc9   : > { %v15556_v19 = vpop.f32.mrb[83].mxu0 }
 0xfca   : > { %v15557_v40 = vadd.f32 %v15556_v19, %v15555_v34  ;;  %v13257_v52 = vadd.f32 %v15554_v17, %v13046_v62 }
 0xfcc   : > { %v13260_v58 = vadd.f32 %v15557_v40, %v13047_v49 }
 0xfce   : > { %v15558_v31 = vpop.f32.mrb[84].mxu0 }
 0xfcf   : > { %v15559_v20 = vpop.f32.mrb[85].mxu0 }
 0xfd0   : > { %v15560_v33 = vadd.f32 %v15559_v20, %v15558_v31  ;;  %v15561_v23 = vpop.f32.mrb[86].mxu0 }
 0xfd1   : > { %v15562_v28 = vpop.f32.mrb[87].mxu0 }
 0xfd2   : > { %v15563_v2 = vadd.f32 %v15562_v28, %v15561_v23  ;;  %v13265_v1 = vadd.f32 %v15560_v33, %v13048_v41  ;;  %v13050_v23 = vld [vmem:[%s24511_s10 + $0x20] sm:$0xff]  ;;  %v13051_v33 = vld [vmem:[%s24511_s10 + $0x28] sm:$0xff] }
 0xfd4   : > { %v13268_v19 = vadd.f32 %v15563_v2, %v13049_v39  ;;  %v13058_v39 = vld [vmem:[%s24511_s10 + $0x60] sm:$0xff] }
 0xfd6   : > { %v15564_v59 = vpop.f32.mrb[88].mxu0 }
 0xfd7   : > { %v15565_v61 = vpop.f32.mrb[89].mxu0 }
 0xfd8   : > { %v24382_v6 = vadd.f32 %v15565_v61, %v15564_v59  ;;  %v15567_v44 = vpop.f32.mrb[90].mxu0 }
 0xfd9   : > { %v15568_v15 = vpop.f32.mrb[91].mxu0 }
 0xfda   : > { %v24384_v12 = vadd.f32 %v15568_v15, %v15567_v44  ;;  %v13273_v2 = vadd.f32 %v24382_v6, %v13050_v23  ;;  %v13053_v6 = vld [vmem:[%s24511_s10 + $0x38] sm:$0xff]  ;;  %v13060_v23 = vld [vmem:[%s24511_s10 + $0x70] sm:$0xff] }
 0xfde   : > { %v15570_v10 = vpop.f32.mrb[92].mxu0 }
 0xfdf   : > { %v15571_v21 = vpop.f32.mrb[93].mxu0 }
 0xfe0   : > { %v24386_v30 = vadd.f32 %v15571_v21, %v15570_v10  ;;  %v15573_v11 = vpop.f32.mrb[94].mxu0  ;;  %v13276_v10 = vadd.f32 %v24384_v12, %v13051_v33 }
 0xfe1   : > { %v15574_v35 = vpop.f32.mrb[95].mxu0 }
 0xfe2   : > { %v24388_v29 = vadd.f32 %v15574_v35, %v15573_v11 }
 0xfe6   : > { %v15576_v46 = vpop.f32.mrb[96].mxu0 }
 0xfe7   : > { %v15577_v0 = vpop.f32.mrb[97].mxu0 }
 0xfe8   : > { %v24390_v14 = vadd.f32 %v15577_v0, %v15576_v46  ;;  %v15579_v25 = vpop.f32.mrb[98].mxu0  ;;  %v13052_v46 = vld [vmem:[%s24511_s10 + $0x30] sm:$0xff] }
 0xfe9   : > { %v15580_v7 = vpop.f32.mrb[99].mxu0  ;;  %v13281_v12 = vadd.f32 %v24386_v30, %v13052_v46  ;;  %v13055_v30 = vld [vmem:[%s24511_s10 + $0x48] sm:$0xff] }
 0xfea   : > { %v24392_v63 = vadd.f32 %v15580_v7, %v15579_v25 }
 0xfec   : > { %v13292_v62 = vadd.f32 %v24392_v63, %v13055_v30 }
 0xfee   : > { %v15582_v16 = vpop.f32.mrb[100].mxu0 }
 0xfef   : > { %v15583_v38 = vpop.f32.mrb[101].mxu0 }
 0xff0   : > { %v24394_v60 = vadd.f32 %v15583_v38, %v15582_v16  ;;  %v15585_v22 = vpop.f32.mrb[102].mxu0 }
 0xff1   : > { %v15586_v55 = vpop.f32.mrb[103].mxu0 }
 0xff2   : > { %v24396_v27 = vadd.f32 %v15586_v55, %v15585_v22  ;;  %v13284_v22 = vadd.f32 %v24388_v29, %v13053_v6 }
 0xff6   : > { %v15588_v32 = vpop.f32.mrb[104].mxu0 }
 0xff7   : > { %v15589_v56 = vpop.f32.mrb[105].mxu0 }
 0xff8   : > { %v24398_v13 = vadd.f32 %v15589_v56, %v15588_v32  ;;  %v15591_v51 = vpop.f32.mrb[106].mxu0 }
 0xff9   : > { %v15592_v42 = vpop.f32.mrb[107].mxu0 }
 0xffa   : > { %v24400_v9 = vadd.f32 %v15592_v42, %v15591_v51  ;;  %v13054_v51 = vld [vmem:[%s24511_s10 + $0x40] sm:$0xff] }
 0xffb   : > { %v13289_v29 = vadd.f32 %v24390_v14, %v13054_v51  ;;  %v13057_v14 = vld [vmem:[%s24511_s10 + $0x58] sm:$0xff] }
 0xffe   : > { %v15594_v54 = vpop.f32.mrb[108].mxu0 }
 0xfff   : > { %v15595_v36 = vpop.f32.mrb[109].mxu0 }
0x1000   : > { %v24402_v3 = vadd.f32 %v15595_v36, %v15594_v54  ;;  %v15597_v57 = vpop.f32.mrb[110].mxu0 }
0x1001   : > { %v15598_v43 = vpop.f32.mrb[111].mxu0 }
0x1002   : > { %v24404_v26 = vadd.f32 %v15598_v43, %v15597_v57 }
0x1009   : > { %v15616_v47 = vpop.f32.mrb[112].mxu0 }
0x100a   : > { %v15617_v8 = vpop.f32.mrb[113].mxu0 }
0x100b   : > { %v15618_v50 = vadd.f32 %v15617_v8, %v15616_v47  ;;  %v15619_v5 = vpop.f32.mrb[114].mxu0 }
0x100c   : > { %v15620_v45 = vpop.f32.mrb[115].mxu0 }
0x100d   : > { %v13354_v24 = vadd.f32 %v15618_v50, %v13257_v52  ;;  %v15621_v37 = vadd.f32 %v15620_v45, %v15619_v5  ;;  %v13056_v52 = vld [vmem:[%s24511_s10 + $0x50] sm:$0xff] }
0x100e   : > { %v13297_v63 = vadd.f32 %v24394_v60, %v13056_v52  ;;  %v13059_v60 = vld [vmem:[%s24511_s10 + $0x68] sm:$0xff] }
0x100f   : > { %13417 = vst.msk [vmem:[%s18894_s23] sm:$0xff] %vm13416_vm3, %v13354_v24  ;;  %v13357_v53 = vadd.f32 %v15621_v37, %v13260_v58  ;;  %v13300_v37 = vadd.f32 %v24396_v27, %v13057_v14  ;;  %v13305_v27 = vadd.f32 %v24398_v13, %v13058_v39  ;;  %v13061_v13 = vld [vmem:[%s24511_s10 + $0x78] sm:$0xff] }
0x1011   : > { %13418 = vst.msk [vmem:[%s18894_s23 + $0x8] sm:$0xff] %vm13416_vm3, %v13357_v53  ;;  %v15622_v18 = vpop.f32.mrb[116].mxu0 }
0x1012   : > { %v15623_v4 = vpop.f32.mrb[117].mxu0 }
0x1013   : > { %v15624_v48 = vadd.f32 %v15623_v4, %v15622_v18  ;;  %v15625_v17 = vpop.f32.mrb[118].mxu0 }
0x1014   : > { %v15626_v34 = vpop.f32.mrb[119].mxu0 }
0x1015   : > { %v13362_v40 = vadd.f32 %v15624_v48, %v13265_v1  ;;  %v15627_v31 = vadd.f32 %v15626_v34, %v15625_v17 }
0x1017   : > { %13419 = vst.msk [vmem:[%s18894_s23 + $0x10] sm:$0xff] %vm13416_vm3, %v13362_v40  ;;  %v13365_v20 = vadd.f32 %v15627_v31, %v13268_v19  ;;  %v13308_v19 = vadd.f32 %v24400_v9, %v13059_v60  ;;  %v13313_v9 = vadd.f32 %v24402_v3, %v13060_v23 }
0x1019   : > { %13420 = vst.msk [vmem:[%s18894_s23 + $0x18] sm:$0xff] %vm13416_vm3, %v13365_v20  ;;  %v15628_v28 = vpop.f32.mrb[120].mxu0 }
0x101a   : > { %v15629_v59 = vpop.f32.mrb[121].mxu0 }
0x101b   : > { %v15630_v61 = vadd.f32 %v15629_v59, %v15628_v28  ;;  %v15631_v44 = vpop.f32.mrb[122].mxu0 }
0x101c   : > { %v15632_v15 = vpop.f32.mrb[123].mxu0 }
0x101d   : > { %v13370_v21 = vadd.f32 %v15630_v61, %v13273_v2  ;;  %v15633_v11 = vadd.f32 %v15632_v15, %v15631_v44  ;;  %v13316_v44 = vadd.f32 %v24404_v26, %v13061_v13 }
0x101f   : > { %13421 = vst.msk [vmem:[%s18894_s23 + $0x20] sm:$0xff] %vm13416_vm3, %v13370_v21  ;;  %v13373_v35 = vadd.f32 %v15633_v11, %v13276_v10 }
0x1021   : > { %13422 = vst.msk [vmem:[%s18894_s23 + $0x28] sm:$0xff] %vm13416_vm3, %v13373_v35  ;;  %v15634_v0 = vpop.f32.mrb[124].mxu0 }
0x1022   : > { %v15635_v25 = vpop.f32.mrb[125].mxu0 }
0x1023   : > { %v15636_v7 = vadd.f32 %v15635_v25, %v15634_v0  ;;  %v15637_v16 = vpop.f32.mrb[126].mxu0 }
0x1024   : > { %v15638_v38 = vpop.f32.mrb[127].mxu0 }
0x1025   : > { %v13378_v55 = vadd.f32 %v15636_v7, %v13281_v12  ;;  %v15639_v32 = vadd.f32 %v15638_v38, %v15637_v16 }
0x1027   : > { %13423 = vst.msk [vmem:[%s18894_s23 + $0x30] sm:$0xff] %vm13416_vm3, %v13378_v55  ;;  %v13381_v56 = vadd.f32 %v15639_v32, %v13284_v22 }
0x1029   : > { %13424 = vst.msk [vmem:[%s18894_s23 + $0x38] sm:$0xff] %vm13416_vm3, %v13381_v56  ;;  %v15640_v42 = vpop.f32.mrb[128].mxu0 }
0x102a   : > { %v15641_v54 = vpop.f32.mrb[129].mxu0 }
0x102b   : > { %v15642_v36 = vadd.f32 %v15641_v54, %v15640_v42  ;;  %v15643_v57 = vpop.f32.mrb[130].mxu0 }
0x102c   : > { %v15644_v43 = vpop.f32.mrb[131].mxu0 }
0x102d   : > { %v13386_v47 = vadd.f32 %v15642_v36, %v13289_v29  ;;  %v15645_v49 = vadd.f32 %v15644_v43, %v15643_v57 }
0x102f   : > { %13425 = vst.msk [vmem:[%s18894_s23 + $0x40] sm:$0xff] %vm13416_vm3, %v13386_v47  ;;  %v13389_v8 = vadd.f32 %v15645_v49, %v13292_v62 }
0x1031   : > { %13426 = vst.msk [vmem:[%s18894_s23 + $0x48] sm:$0xff] %vm13416_vm3, %v13389_v8  ;;  %v15646_v50 = vpop.f32.mrb[132].mxu0 }
0x1032   : > { %v15647_v5 = vpop.f32.mrb[133].mxu0 }
0x1033   : > { %v15648_v45 = vadd.f32 %v15647_v5, %v15646_v50  ;;  %v15649_v58 = vpop.f32.mrb[134].mxu0 }
0x1034   : > { %v15650_v24 = vpop.f32.mrb[135].mxu0 }
0x1035   : > { %v13394_v53 = vadd.f32 %v15648_v45, %v13297_v63  ;;  %v15651_v41 = vadd.f32 %v15650_v24, %v15649_v58 }
0x1037   : > { %13427 = vst.msk [vmem:[%s18894_s23 + $0x50] sm:$0xff] %vm13416_vm3, %v13394_v53  ;;  %v13397_v18 = vadd.f32 %v15651_v41, %v13300_v37 }
0x1039   : > { %13428 = vst.msk [vmem:[%s18894_s23 + $0x58] sm:$0xff] %vm13416_vm3, %v13397_v18  ;;  %v15652_v4 = vpop.f32.mrb[136].mxu0 }
0x103a   : > { %v15653_v1 = vpop.f32.mrb[137].mxu0 }
0x103b   : > { %v15654_v48 = vadd.f32 %v15653_v1, %v15652_v4  ;;  %v15655_v17 = vpop.f32.mrb[138].mxu0 }
0x103c   : > { %v15656_v34 = vpop.f32.mrb[139].mxu0 }
0x103d   : > { %v13402_v40 = vadd.f32 %v15654_v48, %v13305_v27  ;;  %v15657_v31 = vadd.f32 %v15656_v34, %v15655_v17 }
0x103f   : > { %13429 = vst.msk [vmem:[%s18894_s23 + $0x60] sm:$0xff] %vm13416_vm3, %v13402_v40  ;;  %v13405_v20 = vadd.f32 %v15657_v31, %v13308_v19 }
0x1041   : > { %13430 = vst.msk [vmem:[%s18894_s23 + $0x68] sm:$0xff] %vm13416_vm3, %v13405_v20  ;;  %v15658_v28 = vpop.f32.mrb[140].mxu0 }
0x1042   : > { %v15659_v33 = vpop.f32.mrb[141].mxu0 }
0x1043   : > { %v15660_v59 = vadd.f32 %v15659_v33, %v15658_v28  ;;  %v15661_v2 = vpop.f32.mrb[142].mxu0 }
0x1044   : > { %v15662_v61 = vpop.f32.mrb[143].mxu0 }
0x1045   : > { %v13410_v15 = vadd.f32 %v15660_v59, %v13313_v9  ;;  %v15663_v10 = vadd.f32 %v15662_v61, %v15661_v2 }
0x1047   : > { %13431 = vst.msk [vmem:[%s18894_s23 + $0x70] sm:$0xff] %vm13416_vm3, %v13410_v15  ;;  %v13413_v21 = vadd.f32 %v15663_v10, %v13316_v44 }
0x1049   : > { %13432 = vst.msk [vmem:[%s18894_s23 + $0x78] sm:$0xff] %vm13416_vm3, %v13413_v21 }
0x104a PF: > { %s21_s17 = sadd.s32 1, %s18793_s17  }
0x104b   : > { %p18_p7 = scmp.ge.s32.totalorder %s21_s17, 4  }
0x104d   :  { %20 = sbr.rel (!%p18_p7) target bundleno = 1 (0x1), region = 183 }

</bundles_post_ra>
